<compile_context>
chip_gen: v5e
topology: v5e:2x2
jax: 0.10.0
libtpu: 0.0.40
codegen_flags: <defaults>
</compile_context>

<pallas_src>
import jax
import jax.numpy as jnp
import numpy as np
from jax import lax
from jax.experimental import pallas as pl
from jax.experimental.pallas import tpu as pltpu


# Older/newer jax compatibility for the Mosaic compiler-params class name.
_CompilerParams = getattr(pltpu, "CompilerParams", None) or getattr(pltpu, "TPUCompilerParams")


def upsample_gemm_kernel(x_ref, w_ref, shift_ref, o_ref):
    # x_ref     : (TM, Kp)   bf16 -- lane-dense im2col rows (8*Cin zero-padded to Kp)
    # w_ref     : (Kp, Co8)  bf16 -- polyphase weight with BN scale folded in
    # shift_ref : (1,  Co8)  f32  -- fused conv-bias + BN shift (class-major tiling)
    # o_ref     : (TM, Co8)  bf16
    acc = jnp.dot(x_ref[...], w_ref[...], preferred_element_type=jnp.float32)
    o_ref[...] = jnp.maximum(acc + shift_ref[...], 0.0).astype(o_ref.dtype)


def _round_up(x, m):
    return ((x + m - 1) // m) * m


def _vmem_capacity_bytes():
    try:
        return int(pltpu.get_tpu_info().vmem_capacity_bytes)
    except Exception:
        return 64 * 1024 * 1024  # conservative default (v7x per-core VMEM)


def _select_tile_m(m_rows, k_pad, co8, vmem_cap):
    """Largest M tile whose double-buffered working set fits ~55% of physical VMEM."""
    budget = int(vmem_cap * 0.55)
    const_bytes = 2 * k_pad * co8 * 2 + 2 * 2 * co8 * 4       # weight + shift (allow 2 bufs)
    per_row = (2 * k_pad * 2          # input block, bf16, double-buffered
               + 2 * co8 * 2          # output block, bf16, double-buffered
               + 2 * co8 * 4)         # f32 accumulator + epilogue temporary
    tm = (budget - const_bytes) // max(per_row, 1)
    tm = int(max(16, min(tm, 2048, _round_up(m_rows, 16))))
    tm -= tm % 16                     # bf16 sublane packing: keep tiles (16,128)-friendly
    tm = max(tm, 16)
    # Megacore (v7x): keep at least 2 grid steps when the problem is big enough.
    if m_rows > 32 and pl.cdiv(m_rows, tm) < 2:
        tm = max(16, _round_up(pl.cdiv(m_rows, 2), 16))
    return tm


def _vmem_limit_bytes(tm, k_pad, co8, vmem_cap):
    need = (2 * tm * k_pad * 2        # input blocks (double-buffered, bf16)
            + 2 * tm * co8 * 2        # output blocks (double-buffered, bf16)
            + 2 * k_pad * co8 * 2     # weight (budget 2 bufs in case single-buffering is unsupported)
            + 2 * 2 * co8 * 4         # shift
            + 2 * tm * co8 * 4)       # f32 accumulator / epilogue temporaries
    need = int(need * 1.25) + (2 << 20)
    return int(max(16 << 20, min(need, int(vmem_cap * 0.9))))


def upsample_forward(x_ncdhw, w_t, bias, gamma, beta, run_mean, run_var,
                     eps=1e-5, compute_dtype=jnp.bfloat16):
    """Forward of Upsample: ConvTranspose3d(k=3,s=2,p=1,op=1) + BatchNorm3d(eval) + ReLU."""
    N, Cin, D, H, W = x_ncdhw.shape
    Cout = w_t.shape[1]
    OD, OH, OW = 2 * D, 2 * H, 2 * W

    # Lane-dense sizes: Co8 = 8*Cout_p is a multiple of 256; K padded to a multiple of 128.
    Cout_p = _round_up(Cout, 32)
    Co8 = 8 * Cout_p
    K = 8 * Cin
    Kp = _round_up(K, 128)

    # ---- glue (plain JAX, layout plumbing only) ------------------------------------
    # NDHWC + end-padding by 1 per spatial dim (covers the d=1 polyphase taps).
    x = jnp.transpose(x_ncdhw, (0, 2, 3, 4, 1))
    xpad = jnp.pad(x, ((0, 0), (0, 1), (0, 1), (0, 1), (0, 0))).astype(compute_dtype)

    # Pre-formed im2col patch, K order (dd, dh, dw, ci).  One XLA pass; keeps the kernel
    # a pure GEMM (no in-kernel relayout) with a lane-dense minor dimension.
    parts = []
    for dd in range(2):
        for dh in range(2):
            for dw in range(2):
                parts.append(xpad[:, dd:dd + D, dh:dh + H, dw:dw + W, :])
    patch = jnp.concatenate(parts, axis=-1).reshape(N * D * H * W, K)
    if Kp > K:
        patch = jnp.pad(patch, ((0, 0), (0, Kp - K)))

    # Polyphase weight with BN scale folded in.  For output parity r and input offset d
    # (per axis) the contributing ConvTranspose tap is k = r - 2*d + 1 (valid if 0<=k<3).
    scale = (gamma / jnp.sqrt(run_var + eps)).astype(jnp.float32)            # (Cout,)
    shift = ((bias - run_mean) * scale + beta).astype(jnp.float32)           # (Cout,)
    w32 = w_t.astype(jnp.float32) * scale[None, :, None, None, None]         # (Cin,Cout,3,3,3)

    wcat = jnp.zeros((2, 2, 2, Cin, 2, 2, 2, Cout_p), jnp.float32)
    for dd in range(2):
        for dh in range(2):
            for dw in range(2):
                for rd in range(2):
                    for rh in range(2):
                        for rw in range(2):
                            kd, kh, kw = rd - 2 * dd + 1, rh - 2 * dh + 1, rw - 2 * dw + 1
                            if 0 <= kd < 3 and 0 <= kh < 3 and 0 <= kw < 3:
                                wcat = wcat.at[dd, dh, dw, :, rd, rh, rw, :Cout].set(
                                    w32[:, :, kd, kh, kw])
    wmat = wcat.reshape(K, Co8)
    if Kp > K:
        wmat = jnp.pad(wmat, ((0, Kp - K), (0, 0)))
    wmat = wmat.astype(compute_dtype)

    shift_p = jnp.zeros((Cout_p,), jnp.float32).at[:Cout].set(shift)
    shift8 = jnp.tile(shift_p, 8).reshape(1, Co8)                            # class-major

    # ---- generation-aware M tiling + VMEM budget -----------------------------------
    M = N * D * H * W
    vmem_cap = _vmem_capacity_bytes()
    TM = _select_tile_m(M, Kp, Co8, vmem_cap)
    Mp = _round_up(M, TM)
    if Mp > M:
        patch = jnp.pad(patch, ((0, Mp - M), (0, 0)))
    vmem_limit = _vmem_limit_bytes(TM, Kp, Co8, vmem_cap)

    def build_call(single_buffer_consts):
        const_kw = {}
        if single_buffer_consts and hasattr(pl, "Buffered"):
            # Constant operands never change across grid steps -> single-buffer them.
            const_kw = dict(pipeline_mode=pl.Buffered(1))
        return pl.pallas_call(
            upsample_gemm_kernel,
            out_shape=jax.ShapeDtypeStruct((Mp, Co8), compute_dtype),
            grid=(Mp // TM,),
            in_specs=[
                pl.BlockSpec((TM, Kp), lambda m: (m, 0)),
                pl.BlockSpec((Kp, Co8), lambda m: (0, 0), **const_kw),
                pl.BlockSpec((1, Co8), lambda m: (0, 0), **const_kw),
            ],
            out_specs=pl.BlockSpec((TM, Co8), lambda m: (m, 0)),
            compiler_params=_CompilerParams(
                dimension_semantics=("parallel",),
                vmem_limit_bytes=vmem_limit),
        )

    try:
        y = build_call(True)(patch, wmat, shift8)
        y = jax.block_until_ready(y)
    except Exception:
        # Graceful fallback for jax versions without single-buffered pipeline_mode.
        y = build_call(False)(patch, wmat, shift8)

    # ---- depth-to-space + channel un-pad (bf16 layout plumbing), cast f32 last ------
    y = y[:M].reshape(N, D, H, W, 2, 2, 2, Cout_p)
    y = jnp.transpose(y, (0, 1, 4, 2, 5, 3, 6, 7)).reshape(N, OD, OH, OW, Cout_p)
    y = y[..., :Cout]
    return jnp.transpose(y, (0, 4, 1, 2, 3)).astype(jnp.float32)             # NCDHW


def upsample_reference(x, w_t, bias, gamma, beta, run_mean, run_var, eps=1e-5):
    """Pure-JAX reference (matches PyTorch ConvTranspose3d + BN(eval) + ReLU)."""
    w_eff = jnp.transpose(jnp.flip(w_t, axis=(2, 3, 4)), (1, 0, 2, 3, 4))    # OIDHW
    conv = lax.conv_general_dilated(
        x, w_eff, window_strides=(1, 1, 1),
        padding=[(1, 2), (1, 2), (1, 2)],
        lhs_dilation=(2, 2, 2),
        dimension_numbers=('NCDHW', 'OIDHW', 'NCDHW'))
    conv = conv + bias[None, :, None, None, None]
    scale = gamma / jnp.sqrt(run_var + eps)
    y = (conv - run_mean[None, :, None, None, None]) * scale[None, :, None, None, None] \
        + beta[None, :, None, None, None]
    return jnp.maximum(y, 0.0)


if __name__ == "__main__":
    key = jax.random.PRNGKey(0)
    k1, k2, k3, k4, k5, k6, k7 = jax.random.split(key, 7)

    N, Cin, Cout = 2, 4, 8
    D = H = W = 16

    x = jax.random.normal(k1, (N, Cin, D, H, W), dtype=jnp.float32)
    # nn.ConvTranspose3d weight shape: (in_channels, out_channels, 3, 3, 3)
    w_t = 0.1 * jax.random.normal(k2, (Cin, Cout, 3, 3, 3), dtype=jnp.float32)
    bias = 0.1 * jax.random.normal(k3, (Cout,), dtype=jnp.float32)
    gamma = 1.0 + 0.1 * jax.random.normal(k4, (Cout,), dtype=jnp.float32)
    beta = 0.1 * jax.random.normal(k5, (Cout,), dtype=jnp.float32)
    run_mean = 0.1 * jax.random.normal(k6, (Cout,), dtype=jnp.float32)
    run_var = 1.0 + 0.1 * jax.random.uniform(k7, (Cout,), dtype=jnp.float32)

    out = upsample_forward(x, w_t, bias, gamma, beta, run_mean, run_var)
    out = jax.block_until_ready(out)

    ref = upsample_reference(x, w_t, bias, gamma, beta, run_mean, run_var)
    # Kernel uses bf16 inputs/weights with f32 MXU accumulation vs. a pure-f32 reference.
    np.testing.assert_allclose(np.asarray(out), np.asarray(ref), rtol=5e-2, atol=5e-2)
    print("KERNEL_OK")
</pallas_src>

<mosaic_0001>
module attributes {stable_mosaic.version = 11 : i64} {
  func.func @upsample_gemm_kernel(%arg0: i32, %arg1: memref<2048x128xbf16, #tpu.memory_space<vmem>>, %arg2: memref<128x256xbf16, #tpu.memory_space<vmem>>, %arg3: memref<1x256xf32, #tpu.memory_space<vmem>>, %arg4: memref<2048x256xbf16, #tpu.memory_space<vmem>>) attributes {dimension_semantics = [#tpu.dimension_semantics<parallel>], iteration_bounds = array<i64: 4>, scalar_prefetch = 0 : i64, scratch_operands = 0 : i64, tpu.core_type = #tpu.core_type<tc>, window_params = [{transform_indices = @transform_0, window_bounds = array<i64: 2048, 128>}, {pipeline_mode = #tpu.pipeline_mode<synchronous>, transform_indices = @transform_1, window_bounds = array<i64: 128, 256>}, {pipeline_mode = #tpu.pipeline_mode<synchronous>, transform_indices = @transform_2, window_bounds = array<i64: 1, 256>}, {transform_indices = @transform_3, window_bounds = array<i64: 2048, 256>}]} {
    %c0 = arith.constant 0 : index
    %c0_0 = arith.constant 0 : index
    %0 = vector.load %arg1[%c0, %c0_0] : memref<2048x128xbf16, #tpu.memory_space<vmem>>, vector<2048x128xbf16>
    %c0_1 = arith.constant 0 : index
    %c0_2 = arith.constant 0 : index
    %1 = vector.load %arg2[%c0_1, %c0_2] : memref<128x256xbf16, #tpu.memory_space<vmem>>, vector<128x256xbf16>
    %cst = arith.constant dense<0.000000e+00> : vector<2048x256xf32>
    %2 = tpu.matmul %0, %1, %cst {dimension_numbers = #tpu.dot_dimension_numbers<[1], [0], [0], [1], [0, 0, 1, 1], [], []>} : vector<2048x128xbf16>, vector<128x256xbf16>, vector<2048x256xf32> -> vector<2048x256xf32>
    %c0_3 = arith.constant 0 : index
    %c0_4 = arith.constant 0 : index
    %3 = vector.load %arg3[%c0_3, %c0_4] : memref<1x256xf32, #tpu.memory_space<vmem>>, vector<1x256xf32>
    %4 = vector.broadcast %3 : vector<1x256xf32> to vector<2048x256xf32>
    %5 = arith.addf %2, %4 : vector<2048x256xf32>
    %cst_5 = arith.constant 0.000000e+00 : f32
    %6 = vector.broadcast %cst_5 : f32 to vector<2048x256xf32>
    %7 = arith.maximumf %5, %6 : vector<2048x256xf32>
    %8 = arith.truncf %7 : vector<2048x256xf32> to vector<2048x256xbf16>
    %c0_6 = arith.constant 0 : index
    %c0_7 = arith.constant 0 : index
    %9 = vector.load %arg4[%c0_6, %c0_7] : memref<2048x256xbf16, #tpu.memory_space<vmem>>, vector<2048x256xbf16>
    tpu.vector_store %arg4[%c0_6, %c0_7], %8 {strides = array<i32>} : memref<2048x256xbf16, #tpu.memory_space<vmem>>, vector<2048x256xbf16>,
    return
  }
  func.func @transform_0(%arg0: i32) -> (i32, i32) {
    %c0_i32 = arith.constant 0 : i32
    %c0_i32_0 = arith.constant 0 : i32
    return %arg0, %c0_i32 : i32, i32
  }
  func.func @transform_1(%arg0: i32) -> (i32, i32) {
    %c0_i32 = arith.constant 0 : i32
    %c0_i32_0 = arith.constant 0 : i32
    %c0_i32_1 = arith.constant 0 : i32
    return %c0_i32, %c0_i32_0 : i32, i32
  }
  func.func @transform_2(%arg0: i32) -> (i32, i32) {
    %c0_i32 = arith.constant 0 : i32
    %c0_i32_0 = arith.constant 0 : i32
    %c0_i32_1 = arith.constant 0 : i32
    return %c0_i32, %c0_i32_0 : i32, i32
  }
  func.func @transform_3(%arg0: i32) -> (i32, i32) {
    %c0_i32 = arith.constant 0 : i32
    %c0_i32_0 = arith.constant 0 : i32
    return %arg0, %c0_i32 : i32, i32
  }
}

module attributes {stable_mosaic.version = 11 : i64} {
  func.func @upsample_gemm_kernel(%arg0: i32, %arg1: memref<2048x128xbf16, #tpu.memory_space<vmem>>, %arg2: memref<128x256xbf16, #tpu.memory_space<vmem>>, %arg3: memref<1x256xf32, #tpu.memory_space<vmem>>, %arg4: memref<2048x256xbf16, #tpu.memory_space<vmem>>) attributes {dimension_semantics = [#tpu.dimension_semantics<parallel>], iteration_bounds = array<i64: 4>, scalar_prefetch = 0 : i64, scratch_operands = 0 : i64, tpu.core_type = #tpu.core_type<tc>, window_params = [{transform_indices = @transform_0, window_bounds = array<i64: 2048, 128>}, {pipeline_mode = #tpu.pipeline_mode<synchronous>, transform_indices = @transform_1, window_bounds = array<i64: 128, 256>}, {pipeline_mode = #tpu.pipeline_mode<synchronous>, transform_indices = @transform_2, window_bounds = array<i64: 1, 256>}, {transform_indices = @transform_3, window_bounds = array<i64: 2048, 256>}]} {
    %c0 = arith.constant 0 : index
    %c0_0 = arith.constant 0 : index
    %0 = vector.load %arg1[%c0, %c0_0] : memref<2048x128xbf16, #tpu.memory_space<vmem>>, vector<2048x128xbf16>
    %c0_1 = arith.constant 0 : index
    %c0_2 = arith.constant 0 : index
    %1 = vector.load %arg2[%c0_1, %c0_2] : memref<128x256xbf16, #tpu.memory_space<vmem>>, vector<128x256xbf16>
    %cst = arith.constant dense<0.000000e+00> : vector<2048x256xf32>
    %2 = tpu.matmul %0, %1, %cst {dimension_numbers = #tpu.dot_dimension_numbers<[1], [0], [0], [1], [0, 0, 1, 1], [], []>} : vector<2048x128xbf16>, vector<128x256xbf16>, vector<2048x256xf32> -> vector<2048x256xf32>
    %c0_3 = arith.constant 0 : index
    %c0_4 = arith.constant 0 : index
    %3 = vector.load %arg3[%c0_3, %c0_4] : memref<1x256xf32, #tpu.memory_space<vmem>>, vector<1x256xf32>
    %4 = vector.broadcast %3 : vector<1x256xf32> to vector<2048x256xf32>
    %5 = arith.addf %2, %4 : vector<2048x256xf32>
    %cst_5 = arith.constant 0.000000e+00 : f32
    %6 = vector.broadcast %cst_5 : f32 to vector<2048x256xf32>
    %7 = arith.maximumf %5, %6 : vector<2048x256xf32>
    %8 = arith.truncf %7 : vector<2048x256xf32> to vector<2048x256xbf16>
    %c0_6 = arith.constant 0 : index
    %c0_7 = arith.constant 0 : index
    %9 = vector.load %arg4[%c0_6, %c0_7] : memref<2048x256xbf16, #tpu.memory_space<vmem>>, vector<2048x256xbf16>
    tpu.vector_store %arg4[%c0_6, %c0_7], %8 {strides = array<i32>} : memref<2048x256xbf16, #tpu.memory_space<vmem>>, vector<2048x256xbf16>,
    return
  }
  func.func @transform_0(%arg0: i32) -> (i32, i32) {
    %c0_i32 = arith.constant 0 : i32
    %c0_i32_0 = arith.constant 0 : i32
    return %arg0, %c0_i32 : i32, i32
  }
  func.func @transform_1(%arg0: i32) -> (i32, i32) {
    %c0_i32 = arith.constant 0 : i32
    %c0_i32_0 = arith.constant 0 : i32
    %c0_i32_1 = arith.constant 0 : i32
    return %c0_i32, %c0_i32_0 : i32, i32
  }
  func.func @transform_2(%arg0: i32) -> (i32, i32) {
    %c0_i32 = arith.constant 0 : i32
    %c0_i32_0 = arith.constant 0 : i32
    %c0_i32_1 = arith.constant 0 : i32
    return %c0_i32, %c0_i32_0 : i32, i32
  }
  func.func @transform_3(%arg0: i32) -> (i32, i32) {
    %c0_i32 = arith.constant 0 : i32
    %c0_i32_0 = arith.constant 0 : i32
    return %arg0, %c0_i32 : i32, i32
  }
}

</mosaic_0001>

<bundles_post_ra>
// kernel: tpu_custom_call.1
= control target key start
LH: loop header
LB: loop body
LE: loop exit
PB: predicated region body
PF: predicated region fallthrough
CT: control target
= control target key end

     0   :  { %8 = vsyncpa [#allocation3], 0  ;;  %s5847_s0 = inlined_call_operand.hbm [shape: bf16[8192,128], index: 0, kind: input, shape index: {}]   ;;  %s5848_s1 = inlined_call_operand.hbm [shape: bf16[128,256], index: 1, kind: input, shape index: {}]   ;;  %s5849_s2 = inlined_call_operand.hbm [shape: f32[1,256], index: 2, kind: input, shape index: {}]   ;;  %s5850_s3 = inlined_call_operand.hbm [shape: bf16[8192,256], index: 3, kind: output, shape index: {}]  }
   0x1   :  { %10 = vsyncpa [#allocation3 + $0x1], 0 }
   0x2   :  { %11 = vsyncpa [#allocation6], 0 }
   0x3   :  { %12 = vsyncpa [#allocation4], 0 }
   0x4   :  { %14 = vsyncpa [#allocation4 + $0x1], 0  ;;  %s4802_s12 = smov 0   ;;  %s4804_s13 = smov 0  }
   0x5   :  { %s4806_s14 = smov 0   ;;  %s4808_s15 = smov 0  }
   0x6 LB: > { %s4823_s16 = sadd.s32 4294967295, %s4772_s15   ;;  %s3781_s17 = sadd.s32 4294967294, %s4772_s15   ;;  %s4772_s15 = sphi %s4808_s15, %s5859_s15   ;;  %s4768_s14 = sphi %s4806_s14, %s5858_s14   ;;  %s4764_s13 = sphi %s4804_s13, %s5857_s13   ;;  %s4760_s12 = sphi %s4802_s12, %s5856_s12  }
   0x7   : > { %p40_p0 = scmp.ne.s32.totalorder %s4764_s13, %s4760_s12  ;;  %p41_p1 = scmp.eq.s32.totalorder %s4823_s16, 0 }
   0x8   : > { %p106_p2 = scmp.eq.s32.totalorder %s4823_s16, 3  ;;  %p112_p3 = scmp.eq.s32.totalorder %s3781_s17, 3 }
   0x9   : > { %p4832_p4 = por %p41_p1, %p40_p0  ;;  %p3782_p5 = scmp.ge.s32.totalorder %s4772_s15, 1 }
   0xa   : > { %p4837_p6 = por %p112_p3, %p40_p0  ;;  %p119_p7 = scmp.lt.s32.totalorder %s4772_s15, 5 }
   0xb   : > { %s130_s22 = sshll.u32 %s5848_s1, 4  ;;  %s4774_s24 = smov [#allocation5]   ;;  %s131_s22 = int_to_ptr.hbm [resolvable:$true] %s130_s22 }
   0xc   : > { %p4845_p8 = pnand %p3782_p5, %p119_p7  ;;  %s132_s25 = sshll.u32 %s4774_s24, 4  ;;  %s133_s25 = int_to_ptr.vmem [resolvable:$true] %s132_s25 }
   0xd   : > { %s145_s28 = sshll.u32 %s5849_s2, 4  ;;  %s4775_s29 = smov 128   ;;  %s146_s28 = int_to_ptr.hbm [resolvable:$true] %s145_s28 }
   0xe   : > { %p4551_p9 = pneg %p4845_p8  ;;  %s4776_s30 = smov 8  }
   0xf   : > { %s4777_s4 = smov [#allocation7]   ;;  %s4857_s6 = sadd.s32 1, %s4772_s15  }
  0x10   : > { %p4552_p10 = pnand %p4551_p9, %p41_p1  ;;  %s147_s5 = sshll.u32 %s4777_s4, 4  ;;  %s148_s5 = int_to_ptr.vmem [resolvable:$true] %s147_s5 }
  0x11   : > { %s27_s7 = sadd.s32 1, %s4768_s14  ;;  %s24_s8 = ssub.s32 %s4772_s15, %s4857_s6 }
  0x12   : > { %4554 = dma.hbm_to_vmem [thread:$0]  (!%p4552_p10), %s131_s22, 2048, %s133_s25, [#allocation6], %s4775_s29, %s4775_s29, %s4776_s30  }
  0x13   : > { %4557 = dma.hbm_to_vmem [thread:$0]  (!%p4552_p10), %s146_s28, 32, %s148_s5, [#allocation6]  }
  0x14   : > { %p34_p11 = scmp.ne.s32.totalorder %s4768_s14, %s4764_s13  ;;  %p25_p12 = scmp.eq.s32.totalorder %s24_s8, 0 }
  0x15   : > { %p35_p13 = scmp.eq.s32.totalorder %s4772_s15, 0  ;;  %p4568_p3 = scmp.lt.s32.totalorder %s4772_s15, 4 }
  0x16   : > { %p4867_p0 = por %p106_p2, %p34_p11  ;;  %s158_s11 = sand.u32 1, %s4768_s14  }
  0x17   : > { %s4873_s10 = scalar_select %p25_p12, %s4768_s14, %s27_s7  }
  0x18   : > { %p36_p5 = por %p35_p13, %p34_p11  ;;  %s3786_s17 = sshll.u32 %s158_s11, 10 }
  0x19   : > { %s4376_s20 = sshll.u32 %s4772_s15, 10  ;;  %s162_s25 = scalar_lea.vmem [#allocation2], %s3786_s17 }
  0x1a   : > { %s167_s24 = scalar_lea.hbm %s5847_s0, %s4376_s20  ;;  %s170_s26 = sshll.u32 %s162_s25, 4  ;;  %s171_s26 = int_to_ptr.vmem [resolvable:$true] %s170_s26 }
  0x1b   : > { %s168_s27 = sshll.u32 %s167_s24, 4  ;;  %p4880_p2 = pnand %p4568_p3, %p36_p5  ;;  %s169_s27 = int_to_ptr.hbm [resolvable:$true] %s168_s27 }
  0x1c   : > { %s159_s29 = scalar_lea.sflag [#allocation3], %s158_s11  ;;  %s4672_s30 = sshra.s32 %s169_s27, 4  ;;  %s4673_s30 = int_to_ptr.hbm [resolvable:$true] %s4672_s30 }
  0x1d   : > { %s4674_s4 = scalar_lea.hbm %s4673_s30, 1024  ;;  %p4676_p9 = pneg %p4880_p2 }
  0x1e   : > { %p4675_p7 = scmp.ne.s32.totalorder %s4673_s30, %s4674_s4  ;;  %s4679_s8 = scalar_lea.hbm %s5847_s0, 4096 }
  0x1f   : > { %p4680_p12 = scmp.lt.s32.totalorder %s4673_s30, %s5847_s0  ;;  %p4681_p13 = scmp.lt.s32.totalorder %s4679_s8, %s4674_s4 }
  0x20   : > { %p4677_p10 = pnand %p4676_p9, %p4675_p7 }
  0x21   : > { %p4682_p3 = por %p4681_p13, %p4680_p12 }
  0x22   : > { %p4678_p11 = pneg %p4677_p10 }
  0x24   : > { %p4683_p5 = pnand %p4682_p3, %p4678_p11 }
  0x26   : > { %4686 = shalt.err (!%p4683_p5)
}
  0x27   : > { %s4778_s11 = smov 64   ;;  %s4779_s21 = smov 4  }
  0x28   : > { %4561 = dma.hbm_to_vmem [thread:$0]  (!%p4880_p2), %s169_s27, 16384, %s171_s26, %s159_s29, %s4778_s11, %s4778_s11, %s4779_s21  }
  0x29   : > { %182 = sbr.rel (%p4845_p8) target bundleno = 1242 (0x4da), region = 32  ;;  %s4897_s22 = sand.u32 (!%p4845_p8), 1, %s4764_s13  }
  0x2a   : > { %s3790_s24 = sshll.u32 (!%p4845_p8), %s4897_s22, 10  ;;  %s185_s25 = scalar_lea.sflag (!%p4845_p8), [#allocation3], %s4897_s22 }
  0x2b   : > { %s4901_s30 = scalar_lea.vmem (!%p4845_p8), [#allocation2], %s3790_s24 }
  0x2e   : > { %4747 = dma.done.wait (%p4832_p4), %s185_s25, 16384  }
  0x2f   : > { %4749 = vsyncadd (%p4832_p4), %s185_s25, 4294950912 }
  0x30   : > { %4751 = dma.done.wait (%p41_p1), [#allocation6], 2080  }
  0x31   : > { %4753 = vsyncadd (%p41_p1), [#allocation6], 4294965216  ;;  %v4364_v0 = vld [vmem:[#allocation5 + $0x70] sm:$0xf]  ;;  %v4520_v1 = vld [vmem:[#allocation5 + $0x74] sm:$0xf0] }
  0x32   : > { %v4519_v2 = vld [vmem:[#allocation5 + $0x74] sm:$0xf]  ;;  %v4365_v3 = vor.u32 %v4520_v1, %v4364_v0  ;;  %v4366_v4 = vld [vmem:[#allocation5 + $0x78] sm:$0xf0]  ;;  %v4356_v5 = vld [vmem:[#allocation5 + $0x60] sm:$0xf] }
  0x33   : > { %v4518_v6 = vld [vmem:[#allocation5 + $0x64] sm:$0xf0]  ;;  %v4369_v7 = vor.u32 %v4519_v2, %v4366_v4  ;;  %v4517_v8 = vld [vmem:[#allocation5 + $0x64] sm:$0xf]  ;;  %v4358_v9 = vld [vmem:[#allocation5 + $0x68] sm:$0xf0] }
  0x34   : > { %1350 = vmatpush.bf16.msra.mxu0 %v4365_v3  ;;  %4523 = vmatpush.bf16.msra.mxu2 %v4365_v3  ;;  %v4357_v10 = vor.u32 %v4518_v6, %v4356_v5  ;;  %v4361_v11 = vor.u32 %v4517_v8, %v4358_v9  ;;  %v4348_v12 = vld [vmem:[#allocation5 + $0x50] sm:$0xf]  ;;  %v4516_v13 = vld [vmem:[#allocation5 + $0x54] sm:$0xf0]  ;;  %v4515_v14 = vld [vmem:[#allocation5 + $0x54] sm:$0xf] }
  0x35   : > { %1999 = vmatpush.bf16.msra.mxu1 %v4369_v7  ;;  %4531 = vmatpush.bf16.msra.mxu3 %v4369_v7  ;;  %v4350_v15 = vld [vmem:[#allocation5 + $0x58] sm:$0xf0]  ;;  %v4349_v16 = vor.u32 %v4516_v13, %v4348_v12  ;;  %v4340_v18 = vld [vmem:[#allocation5 + $0x40] sm:$0xf]  ;;  %v4514_v19 = vld [vmem:[#allocation5 + $0x44] sm:$0xf0] }
  0x36   : > { %v4353_v17 = vor.u32 %v4515_v14, %v4350_v15  ;;  %v4513_v20 = vld [vmem:[#allocation5 + $0x44] sm:$0xf]  ;;  %v4342_v21 = vld [vmem:[#allocation5 + $0x48] sm:$0xf0]  ;;  %v4341_v22 = vor.u32 %v4514_v19, %v4340_v18  ;;  %v4332_v24 = vld [vmem:[#allocation5 + $0x30] sm:$0xf] }
  0x37   : > { %v4345_v23 = vor.u32 %v4513_v20, %v4342_v21  ;;  %v4512_v25 = vld [vmem:[#allocation5 + $0x34] sm:$0xf0]  ;;  %v4511_v26 = vld [vmem:[#allocation5 + $0x34] sm:$0xf]  ;;  %v4334_v27 = vld [vmem:[#allocation5 + $0x38] sm:$0xf0] }
  0x38   : > { %1351 = vmatpush.bf16.msra.mxu0 %v4357_v10  ;;  %4524 = vmatpush.bf16.msra.mxu2 %v4357_v10  ;;  %v4333_v28 = vor.u32 %v4512_v25, %v4332_v24  ;;  %v4337_v29 = vor.u32 %v4511_v26, %v4334_v27  ;;  %v4324_v30 = vld [vmem:[#allocation5 + $0x20] sm:$0xf]  ;;  %v4510_v31 = vld [vmem:[#allocation5 + $0x24] sm:$0xf0]  ;;  %v4509_v32 = vld [vmem:[#allocation5 + $0x24] sm:$0xf] }
  0x39   : > { %2000 = vmatpush.bf16.msra.mxu1 %v4361_v11  ;;  %4532 = vmatpush.bf16.msra.mxu3 %v4361_v11  ;;  %v4326_v33 = vld [vmem:[#allocation5 + $0x28] sm:$0xf0]  ;;  %v4325_v34 = vor.u32 %v4510_v31, %v4324_v30  ;;  %v4316_v36 = vld [vmem:[#allocation5 + $0x10] sm:$0xf]  ;;  %v4508_v37 = vld [vmem:[#allocation5 + $0x14] sm:$0xf0] }
  0x3a   : > { %v4329_v35 = vor.u32 %v4509_v32, %v4326_v33  ;;  %v4507_v38 = vld [vmem:[#allocation5 + $0x14] sm:$0xf]  ;;  %v4318_v39 = vld [vmem:[#allocation5 + $0x18] sm:$0xf0]  ;;  %v4317_v40 = vor.u32 %v4508_v37, %v4316_v36  ;;  %v4308_v42 = vld [vmem:[#allocation5] sm:$0xf] }
  0x3b   : > { %v4321_v41 = vor.u32 %v4507_v38, %v4318_v39  ;;  %v4506_v43 = vld [vmem:[#allocation5 + $0x4] sm:$0xf0]  ;;  %v4505_v44 = vld [vmem:[#allocation5 + $0x4] sm:$0xf]  ;;  %v4310_v45 = vld [vmem:[#allocation5 + $0x8] sm:$0xf0] }
  0x3c   : > { %1352 = vmatpush.bf16.msra.mxu0 %v4349_v16  ;;  %4525 = vmatpush.bf16.msra.mxu2 %v4349_v16  ;;  %v4309_v46 = vor.u32 %v4506_v43, %v4308_v42  ;;  %v4313_v47 = vor.u32 %v4505_v44, %v4310_v45  ;;  %v4377_v48 = vld [vmem:[%s4901_s30] sm:$0xff]  ;;  %v4378_v50 = vld [vmem:[%s4901_s30 + $0x8] sm:$0xff]  ;;  %v4379_v52 = vld [vmem:[%s4901_s30 + $0x10] sm:$0xff]  ;;  %s3793_s18 = sshll.u32 %s4897_s22, 11  ;;  %s4522_s26 = sshll.u32 %s4823_s16, 11 }
  0x3d   : > { %2001 = vmatpush.bf16.msra.mxu1 %v4353_v17  ;;  %4533 = vmatpush.bf16.msra.mxu3 %v4353_v17  ;;  %v4441_v49 = vld [vmem:[%s4901_s30 + $0x200] sm:$0xff]  ;;  %v4442_v51 = vld [vmem:[%s4901_s30 + $0x208] sm:$0xff]  ;;  %v4443_v53 = vld [vmem:[%s4901_s30 + $0x210] sm:$0xff]  ;;  %s4937_s23 = scalar_lea.vmem [#allocation8], %s3793_s18  ;;  %s3685_s29 = scalar_lea.hbm %s5850_s3, %s4522_s26 }
  0x3e   : > { %v4380_v54 = vld [vmem:[%s4901_s30 + $0x18] sm:$0xff]  ;;  %v4381_v56 = vld [vmem:[%s4901_s30 + $0x20] sm:$0xff]  ;;  %v4382_v58 = vld [vmem:[%s4901_s30 + $0x28] sm:$0xff]  ;;  %s3686_s16 = sshll.u32 %s4937_s23, 4  ;;  %s3688_s4 = sshll.u32 %s3685_s29, 4  ;;  %s3687_s16 = int_to_ptr.vmem [resolvable:$true] %s3686_s16  ;;  %s3689_s4 = int_to_ptr.hbm [resolvable:$true] %s3688_s4 }
  0x3f   : > { %v4444_v55 = vld [vmem:[%s4901_s30 + $0x218] sm:$0xff]  ;;  %v4445_v57 = vld [vmem:[%s4901_s30 + $0x220] sm:$0xff]  ;;  %v4446_v59 = vld [vmem:[%s4901_s30 + $0x228] sm:$0xff]  ;;  %s3673_s5 = scalar_lea.sflag [#allocation4], %s4897_s22  ;;  %s4716_s7 = sshra.s32 %s3689_s4, 4  ;;  %s4717_s7 = int_to_ptr.hbm [resolvable:$true] %s4716_s7 }
  0x40   : > { %1353 = vmatpush.bf16.msra.mxu0 %v4341_v22  ;;  %4526 = vmatpush.bf16.msra.mxu2 %v4341_v22  ;;  %v4383_v60 = vld [vmem:[%s4901_s30 + $0x30] sm:$0xff]  ;;  %v4384_v62 = vld [vmem:[%s4901_s30 + $0x38] sm:$0xff]  ;;  %v496_v0 = vld [vmem:[#allocation7] sm:$0x3]  ;;  %s4718_s8 = scalar_lea.hbm %s4717_s7, 2048  ;;  %s4722_s11 = scalar_lea.hbm %s5850_s3, 8192 }
  0x41   : > { %2002 = vmatpush.bf16.msra.mxu1 %v4345_v23  ;;  %4534 = vmatpush.bf16.msra.mxu3 %v4345_v23  ;;  %v4447_v61 = vld [vmem:[%s4901_s30 + $0x230] sm:$0xff]  ;;  %v4448_v63 = vld [vmem:[%s4901_s30 + $0x238] sm:$0xff]  ;;  %v4927_v1 = vperm.slane %v496_v0, 0  ;;  %v4929_v2 = vperm.slane %v496_v0, 1  ;;  %v4385_v3 = vld [vmem:[%s4901_s30 + $0x40] sm:$0xff]  ;;  %p4719_p1 = scmp.ne.s32.totalorder %s4717_s7, %s4718_s8  ;;  %p4723_p2 = scmp.lt.s32.totalorder %s4717_s7, %s5850_s3 }
  0x42   : > { %v4449_v4 = vld [vmem:[%s4901_s30 + $0x240] sm:$0xff]  ;;  %v4450_v30 = vld [vmem:[%s4901_s30 + $0x248] sm:$0xff]  ;;  %p4724_p7 = scmp.lt.s32.totalorder %s4722_s11, %s4718_s8 }
  0x43   : > { %p4720_p4 = pnand %p4719_p1, %p4867_p0 }
  0x44   : > { %1354 = vmatpush.bf16.msra.mxu0 %v4333_v28  ;;  %4527 = vmatpush.bf16.msra.mxu2 %v4333_v28  ;;  %p4725_p9 = por %p4724_p7, %p4723_p2 }
  0x45   : > { %2003 = vmatpush.bf16.msra.mxu1 %v4337_v29  ;;  %4535 = vmatpush.bf16.msra.mxu3 %v4337_v29  ;;  %v4386_v29 = vld [vmem:[%s4901_s30 + $0x48] sm:$0xff]  ;;  %p4721_p8 = pneg %p4720_p4 }
  0x47   : > { %p4726_p10 = pnand %p4725_p9, %p4721_p8 }
  0x48   : > { %1355 = vmatpush.bf16.msra.mxu0 %v4325_v34  ;;  %4528 = vmatpush.bf16.msra.mxu2 %v4325_v34 }
  0x49   : > { %2004 = vmatpush.bf16.msra.mxu1 %v4329_v35  ;;  %4536 = vmatpush.bf16.msra.mxu3 %v4329_v35 }
  0x4c   : > { %1356 = vmatpush.bf16.msra.mxu0 %v4317_v40  ;;  %4529 = vmatpush.bf16.msra.mxu2 %v4317_v40 }
  0x4d   : > { %2005 = vmatpush.bf16.msra.mxu1 %v4321_v41  ;;  %4537 = vmatpush.bf16.msra.mxu3 %v4321_v41 }
  0x50   : > { %1357 = vmatpush.bf16.msra.mxu0 %v4309_v46  ;;  %4530 = vmatpush.bf16.msra.mxu2 %v4309_v46 }
  0x51   : > { %2006 = vmatpush.bf16.msra.mxu1 %v4313_v47  ;;  %4538 = vmatpush.bf16.msra.mxu3 %v4313_v47 }
  0x53   : > { %1358 = vmatmul.bf16.vlgmr.msra.gmra.mxu0 %v4377_v48  ;;  %1678 = vmatmul.bf16.vlgmr.msra.gmra.mxu2 %v4441_v49 }
  0x54   : > { %2007 = vmatmul.bf16.vlgmr.msra.gmra.mxu1 %v4377_v48  ;;  %2327 = vmatmul.bf16.vlgmr.msra.gmra.mxu3 %v4441_v49 }
  0x63   : > { %1363 = vmatmul.bf16.gmra.mxu0 %v4378_v50  ;;  %1683 = vmatmul.bf16.gmra.mxu2 %v4442_v51 }
  0x64   : > { %2012 = vmatmul.bf16.gmra.mxu1 %v4378_v50  ;;  %2332 = vmatmul.bf16.gmra.mxu3 %v4442_v51 }
  0x73   : > { %1368 = vmatmul.bf16.gmra.mxu0 %v4379_v52  ;;  %1688 = vmatmul.bf16.gmra.mxu2 %v4443_v53 }
  0x74   : > { %2017 = vmatmul.bf16.gmra.mxu1 %v4379_v52  ;;  %2337 = vmatmul.bf16.gmra.mxu3 %v4443_v53 }
  0x83   : > { %1373 = vmatmul.bf16.gmra.mxu0 %v4380_v54  ;;  %1693 = vmatmul.bf16.gmra.mxu2 %v4444_v55 }
  0x84   : > { %2022 = vmatmul.bf16.gmra.mxu1 %v4380_v54  ;;  %2342 = vmatmul.bf16.gmra.mxu3 %v4444_v55 }
  0x93   : > { %1378 = vmatmul.bf16.gmra.mxu0 %v4381_v56  ;;  %1698 = vmatmul.bf16.gmra.mxu2 %v4445_v57 }
  0x94   : > { %2027 = vmatmul.bf16.gmra.mxu1 %v4381_v56  ;;  %2347 = vmatmul.bf16.gmra.mxu3 %v4445_v57 }
  0xa3   : > { %1383 = vmatmul.bf16.gmra.mxu0 %v4382_v58  ;;  %1703 = vmatmul.bf16.gmra.mxu2 %v4446_v59 }
  0xa4   : > { %2032 = vmatmul.bf16.gmra.mxu1 %v4382_v58  ;;  %2352 = vmatmul.bf16.gmra.mxu3 %v4446_v59  ;;  %v4387_v59 = vld [vmem:[%s4901_s30 + $0x50] sm:$0xff] }
  0xb3   : > { %1388 = vmatmul.bf16.gmra.mxu0 %v4383_v60  ;;  %1708 = vmatmul.bf16.gmra.mxu2 %v4447_v61 }
  0xb4   : > { %2037 = vmatmul.bf16.gmra.mxu1 %v4383_v60  ;;  %2357 = vmatmul.bf16.gmra.mxu3 %v4447_v61  ;;  %v4451_v60 = vld [vmem:[%s4901_s30 + $0x250] sm:$0xff] }
  0xc3   : > { %1393 = vmatmul.bf16.gmra.mxu0 %v4384_v62  ;;  %1713 = vmatmul.bf16.gmra.mxu2 %v4448_v63 }
  0xc4   : > { %2042 = vmatmul.bf16.gmra.mxu1 %v4384_v62  ;;  %2362 = vmatmul.bf16.gmra.mxu3 %v4448_v63 }
  0xd0   : > { %v1359_v5 = vpop.f32.mrf.mxu0 }
  0xd1   : > { %v1360_v6 = vadd.f32 %v1359_v5, %v4927_v1  ;;  %v2008_v7 = vpop.f32.mrf.mxu1 }
  0xd2   : > { %v2009_v8 = vadd.f32 %v2008_v7, %v4929_v2 }
  0xd3   : > { %v2648_v9 = vmax.f32 %v1360_v6, 0.0  ;;  %1398 = vmatmul.bf16.gmra.mxu0 %v4385_v3  ;;  %1718 = vmatmul.bf16.gmra.mxu2 %v4449_v4 }
  0xd4   : > { %v2649_v10 = vmax.f32 %v2009_v8, 0.0  ;;  %2047 = vmatmul.bf16.gmra.mxu1 %v4385_v3  ;;  %2367 = vmatmul.bf16.gmra.mxu3 %v4449_v4 }
  0xd6   : > { %v3160_v11 = vpack.c.bf16 %v2649_v10, %v2648_v9  ;;  %v1679_v12 = vpop.f32.mrf.mxu2 }
  0xd7   : > { %v1680_v13 = vadd.f32 %v1679_v12, %v4927_v1  ;;  %v2328_v14 = vpop.f32.mrf.mxu3 }
  0xd8   : > { %3416 = vst [vmem:[%s4937_s23] sm:$0xff] %v3160_v11  ;;  %v2329_v15 = vadd.f32 %v2328_v14, %v4929_v2  ;;  %v1361_v16 = vpop.f32.mrf.mxu0 }
  0xd9   : > { %v2904_v17 = vmax.f32 %v1680_v13, 0.0  ;;  %v1362_v18 = vadd.f32 %v1361_v16, %v4927_v1  ;;  %v2010_v19 = vpop.f32.mrf.mxu1 }
  0xda   : > { %v2905_v20 = vmax.f32 %v2329_v15, 0.0  ;;  %v2011_v21 = vadd.f32 %v2010_v19, %v4929_v2 }
  0xdb   : > { %v2650_v22 = vmax.f32 %v1362_v18, 0.0 }
  0xdc   : > { %v3288_v23 = vpack.c.bf16 %v2905_v20, %v2904_v17  ;;  %v2651_v24 = vmax.f32 %v2011_v21, 0.0 }
  0xde   : > { %3544 = vst [vmem:[%s4937_s23 + $0x400] sm:$0xff] %v3288_v23  ;;  %v3161_v25 = vpack.c.bf16 %v2651_v24, %v2650_v22  ;;  %v1681_v26 = vpop.f32.mrf.mxu2 }
  0xdf   : > { %v1682_v27 = vadd.f32 %v1681_v26, %v4927_v1  ;;  %v2330_v28 = vpop.f32.mrf.mxu3 }
  0xe0   : > { %3417 = vst [vmem:[%s4937_s23 + $0x8] sm:$0xff] %v3161_v25  ;;  %v2331_v31 = vadd.f32 %v2330_v28, %v4929_v2  ;;  %v1364_v32 = vpop.f32.mrf.mxu0  ;;  %v4452_v28 = vld [vmem:[%s4901_s30 + $0x258] sm:$0xff] }
  0xe1   : > { %v2906_v33 = vmax.f32 %v1682_v27, 0.0  ;;  %v1365_v34 = vadd.f32 %v1364_v32, %v4927_v1  ;;  %v2013_v35 = vpop.f32.mrf.mxu1  ;;  %v4388_v27 = vld [vmem:[%s4901_s30 + $0x58] sm:$0xff] }
  0xe2   : > { %v2907_v36 = vmax.f32 %v2331_v31, 0.0  ;;  %v2014_v37 = vadd.f32 %v2013_v35, %v4929_v2 }
  0xe3   : > { %v2652_v38 = vmax.f32 %v1365_v34, 0.0  ;;  %1403 = vmatmul.bf16.gmra.mxu0 %v4386_v29  ;;  %1723 = vmatmul.bf16.gmra.mxu2 %v4450_v30 }
  0xe4   : > { %v3289_v39 = vpack.c.bf16 %v2907_v36, %v2906_v33  ;;  %v2653_v40 = vmax.f32 %v2014_v37, 0.0  ;;  %2052 = vmatmul.bf16.gmra.mxu1 %v4386_v29  ;;  %2372 = vmatmul.bf16.gmra.mxu3 %v4450_v30 }
  0xe6   : > { %3545 = vst [vmem:[%s4937_s23 + $0x408] sm:$0xff] %v3289_v39  ;;  %v3162_v41 = vpack.c.bf16 %v2653_v40, %v2652_v38  ;;  %v1684_v42 = vpop.f32.mrf.mxu2 }
  0xe7   : > { %v1685_v43 = vadd.f32 %v1684_v42, %v4927_v1  ;;  %v2333_v44 = vpop.f32.mrf.mxu3 }
  0xe8   : > { %3418 = vst [vmem:[%s4937_s23 + $0x10] sm:$0xff] %v3162_v41  ;;  %v2334_v45 = vadd.f32 %v2333_v44, %v4929_v2  ;;  %v1366_v46 = vpop.f32.mrf.mxu0 }
  0xe9   : > { %v2908_v47 = vmax.f32 %v1685_v43, 0.0  ;;  %v1367_v48 = vadd.f32 %v1366_v46, %v4927_v1  ;;  %v2015_v49 = vpop.f32.mrf.mxu1 }
  0xea   : > { %v2909_v50 = vmax.f32 %v2334_v45, 0.0  ;;  %v2016_v51 = vadd.f32 %v2015_v49, %v4929_v2 }
  0xeb   : > { %v2654_v52 = vmax.f32 %v1367_v48, 0.0 }
  0xec   : > { %v3290_v53 = vpack.c.bf16 %v2909_v50, %v2908_v47  ;;  %v2655_v54 = vmax.f32 %v2016_v51, 0.0 }
  0xee   : > { %3546 = vst [vmem:[%s4937_s23 + $0x410] sm:$0xff] %v3290_v53  ;;  %v3163_v55 = vpack.c.bf16 %v2655_v54, %v2654_v52  ;;  %v1686_v56 = vpop.f32.mrf.mxu2 }
  0xef   : > { %v1687_v57 = vadd.f32 %v1686_v56, %v4927_v1  ;;  %v2335_v58 = vpop.f32.mrf.mxu3 }
  0xf0   : > { %3419 = vst [vmem:[%s4937_s23 + $0x18] sm:$0xff] %v3163_v55  ;;  %v2336_v61 = vadd.f32 %v2335_v58, %v4929_v2  ;;  %v1369_v62 = vpop.f32.mrf.mxu0  ;;  %v4453_v58 = vld [vmem:[%s4901_s30 + $0x260] sm:$0xff] }
  0xf1   : > { %v2910_v63 = vmax.f32 %v1687_v57, 0.0  ;;  %v1370_v0 = vadd.f32 %v1369_v62, %v4927_v1  ;;  %v2018_v3 = vpop.f32.mrf.mxu1  ;;  %v4389_v57 = vld [vmem:[%s4901_s30 + $0x60] sm:$0xff] }
  0xf2   : > { %v2911_v4 = vmax.f32 %v2336_v61, 0.0  ;;  %v2019_v5 = vadd.f32 %v2018_v3, %v4929_v2 }
  0xf3   : > { %v2656_v6 = vmax.f32 %v1370_v0, 0.0  ;;  %1408 = vmatmul.bf16.gmra.mxu0 %v4387_v59  ;;  %1728 = vmatmul.bf16.gmra.mxu2 %v4451_v60 }
  0xf4   : > { %v3291_v7 = vpack.c.bf16 %v2911_v4, %v2910_v63  ;;  %v2657_v8 = vmax.f32 %v2019_v5, 0.0  ;;  %2057 = vmatmul.bf16.gmra.mxu1 %v4387_v59  ;;  %2377 = vmatmul.bf16.gmra.mxu3 %v4451_v60 }
  0xf6   : > { %3547 = vst [vmem:[%s4937_s23 + $0x418] sm:$0xff] %v3291_v7  ;;  %v3164_v9 = vpack.c.bf16 %v2657_v8, %v2656_v6  ;;  %v1689_v10 = vpop.f32.mrf.mxu2 }
  0xf7   : > { %v1690_v11 = vadd.f32 %v1689_v10, %v4927_v1  ;;  %v2338_v12 = vpop.f32.mrf.mxu3 }
  0xf8   : > { %3420 = vst [vmem:[%s4937_s23 + $0x20] sm:$0xff] %v3164_v9  ;;  %v2339_v13 = vadd.f32 %v2338_v12, %v4929_v2  ;;  %v1371_v14 = vpop.f32.mrf.mxu0 }
  0xf9   : > { %v2912_v15 = vmax.f32 %v1690_v11, 0.0  ;;  %v1372_v16 = vadd.f32 %v1371_v14, %v4927_v1  ;;  %v2020_v17 = vpop.f32.mrf.mxu1 }
  0xfa   : > { %v2913_v18 = vmax.f32 %v2339_v13, 0.0  ;;  %v2021_v19 = vadd.f32 %v2020_v17, %v4929_v2 }
  0xfb   : > { %v2658_v20 = vmax.f32 %v1372_v16, 0.0 }
  0xfc   : > { %v3292_v21 = vpack.c.bf16 %v2913_v18, %v2912_v15  ;;  %v2659_v22 = vmax.f32 %v2021_v19, 0.0 }
  0xfe   : > { %3548 = vst [vmem:[%s4937_s23 + $0x420] sm:$0xff] %v3292_v21  ;;  %v3165_v23 = vpack.c.bf16 %v2659_v22, %v2658_v20  ;;  %v1691_v24 = vpop.f32.mrf.mxu2 }
  0xff   : > { %v1692_v25 = vadd.f32 %v1691_v24, %v4927_v1  ;;  %v2340_v26 = vpop.f32.mrf.mxu3 }
 0x100   : > { %3421 = vst [vmem:[%s4937_s23 + $0x28] sm:$0xff] %v3165_v23  ;;  %v2341_v29 = vadd.f32 %v2340_v26, %v4929_v2  ;;  %v1374_v30 = vpop.f32.mrf.mxu0  ;;  %v4454_v26 = vld [vmem:[%s4901_s30 + $0x268] sm:$0xff] }
 0x101   : > { %v2914_v31 = vmax.f32 %v1692_v25, 0.0  ;;  %v1375_v32 = vadd.f32 %v1374_v30, %v4927_v1  ;;  %v2023_v33 = vpop.f32.mrf.mxu1  ;;  %v4390_v25 = vld [vmem:[%s4901_s30 + $0x68] sm:$0xff] }
 0x102   : > { %v2915_v34 = vmax.f32 %v2341_v29, 0.0  ;;  %v2024_v35 = vadd.f32 %v2023_v33, %v4929_v2 }
 0x103   : > { %v2660_v36 = vmax.f32 %v1375_v32, 0.0  ;;  %1413 = vmatmul.bf16.gmra.mxu0 %v4388_v27  ;;  %1733 = vmatmul.bf16.gmra.mxu2 %v4452_v28 }
 0x104   : > { %v3293_v37 = vpack.c.bf16 %v2915_v34, %v2914_v31  ;;  %v2661_v38 = vmax.f32 %v2024_v35, 0.0  ;;  %2062 = vmatmul.bf16.gmra.mxu1 %v4388_v27  ;;  %2382 = vmatmul.bf16.gmra.mxu3 %v4452_v28 }
 0x106   : > { %3549 = vst [vmem:[%s4937_s23 + $0x428] sm:$0xff] %v3293_v37  ;;  %v3166_v39 = vpack.c.bf16 %v2661_v38, %v2660_v36  ;;  %v1694_v40 = vpop.f32.mrf.mxu2 }
 0x107   : > { %v1695_v41 = vadd.f32 %v1694_v40, %v4927_v1  ;;  %v2343_v42 = vpop.f32.mrf.mxu3 }
 0x108   : > { %3422 = vst [vmem:[%s4937_s23 + $0x30] sm:$0xff] %v3166_v39  ;;  %v2344_v43 = vadd.f32 %v2343_v42, %v4929_v2  ;;  %v1376_v44 = vpop.f32.mrf.mxu0 }
 0x109   : > { %v2916_v45 = vmax.f32 %v1695_v41, 0.0  ;;  %v1377_v46 = vadd.f32 %v1376_v44, %v4927_v1  ;;  %v2025_v47 = vpop.f32.mrf.mxu1 }
 0x10a   : > { %v2917_v48 = vmax.f32 %v2344_v43, 0.0  ;;  %v2026_v49 = vadd.f32 %v2025_v47, %v4929_v2 }
 0x10b   : > { %v2662_v50 = vmax.f32 %v1377_v46, 0.0 }
 0x10c   : > { %v3294_v51 = vpack.c.bf16 %v2917_v48, %v2916_v45  ;;  %v2663_v52 = vmax.f32 %v2026_v49, 0.0 }
 0x10e   : > { %3550 = vst [vmem:[%s4937_s23 + $0x430] sm:$0xff] %v3294_v51  ;;  %v3167_v53 = vpack.c.bf16 %v2663_v52, %v2662_v50  ;;  %v1696_v54 = vpop.f32.mrf.mxu2 }
 0x10f   : > { %v1697_v55 = vadd.f32 %v1696_v54, %v4927_v1  ;;  %v2345_v56 = vpop.f32.mrf.mxu3 }
 0x110   : > { %3423 = vst [vmem:[%s4937_s23 + $0x38] sm:$0xff] %v3167_v53  ;;  %v2346_v59 = vadd.f32 %v2345_v56, %v4929_v2  ;;  %v1379_v60 = vpop.f32.mrf.mxu0  ;;  %v4455_v56 = vld [vmem:[%s4901_s30 + $0x270] sm:$0xff] }
 0x111   : > { %v2918_v61 = vmax.f32 %v1697_v55, 0.0  ;;  %v1380_v62 = vadd.f32 %v1379_v60, %v4927_v1  ;;  %v2028_v63 = vpop.f32.mrf.mxu1  ;;  %v4391_v55 = vld [vmem:[%s4901_s30 + $0x70] sm:$0xff] }
 0x112   : > { %v2919_v0 = vmax.f32 %v2346_v59, 0.0  ;;  %v2029_v3 = vadd.f32 %v2028_v63, %v4929_v2 }
 0x113   : > { %v2664_v4 = vmax.f32 %v1380_v62, 0.0  ;;  %1418 = vmatmul.bf16.gmra.mxu0 %v4389_v57  ;;  %1738 = vmatmul.bf16.gmra.mxu2 %v4453_v58 }
 0x114   : > { %v3295_v5 = vpack.c.bf16 %v2919_v0, %v2918_v61  ;;  %v2665_v6 = vmax.f32 %v2029_v3, 0.0  ;;  %2067 = vmatmul.bf16.gmra.mxu1 %v4389_v57  ;;  %2387 = vmatmul.bf16.gmra.mxu3 %v4453_v58 }
 0x116   : > { %3551 = vst [vmem:[%s4937_s23 + $0x438] sm:$0xff] %v3295_v5  ;;  %v3168_v7 = vpack.c.bf16 %v2665_v6, %v2664_v4  ;;  %v1699_v8 = vpop.f32.mrf.mxu2 }
 0x117   : > { %v1700_v9 = vadd.f32 %v1699_v8, %v4927_v1  ;;  %v2348_v10 = vpop.f32.mrf.mxu3 }
 0x118   : > { %3424 = vst [vmem:[%s4937_s23 + $0x40] sm:$0xff] %v3168_v7  ;;  %v2349_v11 = vadd.f32 %v2348_v10, %v4929_v2  ;;  %v1381_v12 = vpop.f32.mrf.mxu0 }
 0x119   : > { %v2920_v13 = vmax.f32 %v1700_v9, 0.0  ;;  %v1382_v14 = vadd.f32 %v1381_v12, %v4927_v1  ;;  %v2030_v15 = vpop.f32.mrf.mxu1 }
 0x11a   : > { %v2921_v16 = vmax.f32 %v2349_v11, 0.0  ;;  %v2031_v17 = vadd.f32 %v2030_v15, %v4929_v2 }
 0x11b   : > { %v2666_v18 = vmax.f32 %v1382_v14, 0.0 }
 0x11c   : > { %v3296_v19 = vpack.c.bf16 %v2921_v16, %v2920_v13  ;;  %v2667_v20 = vmax.f32 %v2031_v17, 0.0 }
 0x11e   : > { %3552 = vst [vmem:[%s4937_s23 + $0x440] sm:$0xff] %v3296_v19  ;;  %v3169_v21 = vpack.c.bf16 %v2667_v20, %v2666_v18  ;;  %v1701_v22 = vpop.f32.mrf.mxu2 }
 0x11f   : > { %v1702_v23 = vadd.f32 %v1701_v22, %v4927_v1  ;;  %v2350_v24 = vpop.f32.mrf.mxu3 }
 0x120   : > { %3425 = vst [vmem:[%s4937_s23 + $0x48] sm:$0xff] %v3169_v21  ;;  %v2351_v27 = vadd.f32 %v2350_v24, %v4929_v2  ;;  %v1384_v28 = vpop.f32.mrf.mxu0  ;;  %v4456_v24 = vld [vmem:[%s4901_s30 + $0x278] sm:$0xff] }
 0x121   : > { %v2922_v29 = vmax.f32 %v1702_v23, 0.0  ;;  %v1385_v30 = vadd.f32 %v1384_v28, %v4927_v1  ;;  %v2033_v31 = vpop.f32.mrf.mxu1  ;;  %v4392_v23 = vld [vmem:[%s4901_s30 + $0x78] sm:$0xff] }
 0x122   : > { %v2923_v32 = vmax.f32 %v2351_v27, 0.0  ;;  %v2034_v33 = vadd.f32 %v2033_v31, %v4929_v2 }
 0x123   : > { %v2668_v34 = vmax.f32 %v1385_v30, 0.0  ;;  %1423 = vmatmul.bf16.gmra.mxu0 %v4390_v25  ;;  %1743 = vmatmul.bf16.gmra.mxu2 %v4454_v26 }
 0x124   : > { %v3297_v35 = vpack.c.bf16 %v2923_v32, %v2922_v29  ;;  %v2669_v36 = vmax.f32 %v2034_v33, 0.0  ;;  %2072 = vmatmul.bf16.gmra.mxu1 %v4390_v25  ;;  %2392 = vmatmul.bf16.gmra.mxu3 %v4454_v26 }
 0x126   : > { %3553 = vst [vmem:[%s4937_s23 + $0x448] sm:$0xff] %v3297_v35  ;;  %v3170_v37 = vpack.c.bf16 %v2669_v36, %v2668_v34  ;;  %v1704_v38 = vpop.f32.mrf.mxu2 }
 0x127   : > { %v1705_v39 = vadd.f32 %v1704_v38, %v4927_v1  ;;  %v2353_v40 = vpop.f32.mrf.mxu3 }
 0x128   : > { %3426 = vst [vmem:[%s4937_s23 + $0x50] sm:$0xff] %v3170_v37  ;;  %v2354_v41 = vadd.f32 %v2353_v40, %v4929_v2  ;;  %v1386_v42 = vpop.f32.mrf.mxu0 }
 0x129   : > { %v2924_v43 = vmax.f32 %v1705_v39, 0.0  ;;  %v1387_v44 = vadd.f32 %v1386_v42, %v4927_v1  ;;  %v2035_v45 = vpop.f32.mrf.mxu1 }
 0x12a   : > { %v2925_v46 = vmax.f32 %v2354_v41, 0.0  ;;  %v2036_v47 = vadd.f32 %v2035_v45, %v4929_v2 }
 0x12b   : > { %v2670_v48 = vmax.f32 %v1387_v44, 0.0 }
 0x12c   : > { %v3298_v49 = vpack.c.bf16 %v2925_v46, %v2924_v43  ;;  %v2671_v50 = vmax.f32 %v2036_v47, 0.0 }
 0x12e   : > { %3554 = vst [vmem:[%s4937_s23 + $0x450] sm:$0xff] %v3298_v49  ;;  %v3171_v51 = vpack.c.bf16 %v2671_v50, %v2670_v48  ;;  %v1706_v52 = vpop.f32.mrf.mxu2 }
 0x12f   : > { %v1707_v53 = vadd.f32 %v1706_v52, %v4927_v1  ;;  %v2355_v54 = vpop.f32.mrf.mxu3 }
 0x130   : > { %3427 = vst [vmem:[%s4937_s23 + $0x58] sm:$0xff] %v3171_v51  ;;  %v2356_v57 = vadd.f32 %v2355_v54, %v4929_v2  ;;  %v1389_v58 = vpop.f32.mrf.mxu0  ;;  %v4457_v54 = vld [vmem:[%s4901_s30 + $0x280] sm:$0xff] }
 0x131   : > { %v2926_v59 = vmax.f32 %v1707_v53, 0.0  ;;  %v1390_v60 = vadd.f32 %v1389_v58, %v4927_v1  ;;  %v2038_v61 = vpop.f32.mrf.mxu1  ;;  %v4393_v53 = vld [vmem:[%s4901_s30 + $0x80] sm:$0xff] }
 0x132   : > { %v2927_v62 = vmax.f32 %v2356_v57, 0.0  ;;  %v2039_v63 = vadd.f32 %v2038_v61, %v4929_v2 }
 0x133   : > { %v2672_v0 = vmax.f32 %v1390_v60, 0.0  ;;  %1428 = vmatmul.bf16.gmra.mxu0 %v4391_v55  ;;  %1748 = vmatmul.bf16.gmra.mxu2 %v4455_v56 }
 0x134   : > { %v3299_v3 = vpack.c.bf16 %v2927_v62, %v2926_v59  ;;  %v2673_v4 = vmax.f32 %v2039_v63, 0.0  ;;  %2077 = vmatmul.bf16.gmra.mxu1 %v4391_v55  ;;  %2397 = vmatmul.bf16.gmra.mxu3 %v4455_v56 }
 0x136   : > { %3555 = vst [vmem:[%s4937_s23 + $0x458] sm:$0xff] %v3299_v3  ;;  %v3172_v5 = vpack.c.bf16 %v2673_v4, %v2672_v0  ;;  %v1709_v6 = vpop.f32.mrf.mxu2 }
 0x137   : > { %v1710_v7 = vadd.f32 %v1709_v6, %v4927_v1  ;;  %v2358_v8 = vpop.f32.mrf.mxu3 }
 0x138   : > { %3428 = vst [vmem:[%s4937_s23 + $0x60] sm:$0xff] %v3172_v5  ;;  %v2359_v9 = vadd.f32 %v2358_v8, %v4929_v2  ;;  %v1391_v10 = vpop.f32.mrf.mxu0 }
 0x139   : > { %v2928_v11 = vmax.f32 %v1710_v7, 0.0  ;;  %v1392_v12 = vadd.f32 %v1391_v10, %v4927_v1  ;;  %v2040_v13 = vpop.f32.mrf.mxu1 }
 0x13a   : > { %v2929_v14 = vmax.f32 %v2359_v9, 0.0  ;;  %v2041_v15 = vadd.f32 %v2040_v13, %v4929_v2 }
 0x13b   : > { %v2674_v16 = vmax.f32 %v1392_v12, 0.0 }
 0x13c   : > { %v3300_v17 = vpack.c.bf16 %v2929_v14, %v2928_v11  ;;  %v2675_v18 = vmax.f32 %v2041_v15, 0.0 }
 0x13e   : > { %3556 = vst [vmem:[%s4937_s23 + $0x460] sm:$0xff] %v3300_v17  ;;  %v3173_v19 = vpack.c.bf16 %v2675_v18, %v2674_v16  ;;  %v1711_v20 = vpop.f32.mrf.mxu2 }
 0x13f   : > { %v1712_v21 = vadd.f32 %v1711_v20, %v4927_v1  ;;  %v2360_v22 = vpop.f32.mrf.mxu3 }
 0x140   : > { %3429 = vst [vmem:[%s4937_s23 + $0x68] sm:$0xff] %v3173_v19  ;;  %v2361_v25 = vadd.f32 %v2360_v22, %v4929_v2  ;;  %v1394_v26 = vpop.f32.mrf.mxu0  ;;  %v4458_v22 = vld [vmem:[%s4901_s30 + $0x288] sm:$0xff] }
 0x141   : > { %v2930_v27 = vmax.f32 %v1712_v21, 0.0  ;;  %v1395_v28 = vadd.f32 %v1394_v26, %v4927_v1  ;;  %v2043_v29 = vpop.f32.mrf.mxu1  ;;  %v4394_v21 = vld [vmem:[%s4901_s30 + $0x88] sm:$0xff] }
 0x142   : > { %v2931_v30 = vmax.f32 %v2361_v25, 0.0  ;;  %v2044_v31 = vadd.f32 %v2043_v29, %v4929_v2 }
 0x143   : > { %v2676_v32 = vmax.f32 %v1395_v28, 0.0  ;;  %1433 = vmatmul.bf16.gmra.mxu0 %v4392_v23  ;;  %1753 = vmatmul.bf16.gmra.mxu2 %v4456_v24 }
 0x144   : > { %v3301_v33 = vpack.c.bf16 %v2931_v30, %v2930_v27  ;;  %v2677_v34 = vmax.f32 %v2044_v31, 0.0  ;;  %2082 = vmatmul.bf16.gmra.mxu1 %v4392_v23  ;;  %2402 = vmatmul.bf16.gmra.mxu3 %v4456_v24 }
 0x146   : > { %3557 = vst [vmem:[%s4937_s23 + $0x468] sm:$0xff] %v3301_v33  ;;  %v3174_v35 = vpack.c.bf16 %v2677_v34, %v2676_v32  ;;  %v1714_v36 = vpop.f32.mrf.mxu2 }
 0x147   : > { %v1715_v37 = vadd.f32 %v1714_v36, %v4927_v1  ;;  %v2363_v38 = vpop.f32.mrf.mxu3 }
 0x148   : > { %3430 = vst [vmem:[%s4937_s23 + $0x70] sm:$0xff] %v3174_v35  ;;  %v2364_v39 = vadd.f32 %v2363_v38, %v4929_v2  ;;  %v1396_v40 = vpop.f32.mrf.mxu0 }
 0x149   : > { %v2932_v41 = vmax.f32 %v1715_v37, 0.0  ;;  %v1397_v42 = vadd.f32 %v1396_v40, %v4927_v1  ;;  %v2045_v43 = vpop.f32.mrf.mxu1 }
 0x14a   : > { %v2933_v44 = vmax.f32 %v2364_v39, 0.0  ;;  %v2046_v45 = vadd.f32 %v2045_v43, %v4929_v2 }
 0x14b   : > { %v2678_v46 = vmax.f32 %v1397_v42, 0.0 }
 0x14c   : > { %v3302_v47 = vpack.c.bf16 %v2933_v44, %v2932_v41  ;;  %v2679_v48 = vmax.f32 %v2046_v45, 0.0 }
 0x14e   : > { %3558 = vst [vmem:[%s4937_s23 + $0x470] sm:$0xff] %v3302_v47  ;;  %v3175_v49 = vpack.c.bf16 %v2679_v48, %v2678_v46  ;;  %v1716_v50 = vpop.f32.mrf.mxu2 }
 0x14f   : > { %v1717_v51 = vadd.f32 %v1716_v50, %v4927_v1  ;;  %v2365_v52 = vpop.f32.mrf.mxu3 }
 0x150   : > { %3431 = vst [vmem:[%s4937_s23 + $0x78] sm:$0xff] %v3175_v49  ;;  %v2366_v55 = vadd.f32 %v2365_v52, %v4929_v2  ;;  %v1399_v56 = vpop.f32.mrf.mxu0  ;;  %v4459_v52 = vld [vmem:[%s4901_s30 + $0x290] sm:$0xff] }
 0x151   : > { %v2934_v57 = vmax.f32 %v1717_v51, 0.0  ;;  %v1400_v58 = vadd.f32 %v1399_v56, %v4927_v1  ;;  %v2048_v59 = vpop.f32.mrf.mxu1  ;;  %v4395_v51 = vld [vmem:[%s4901_s30 + $0x90] sm:$0xff] }
 0x152   : > { %v2935_v60 = vmax.f32 %v2366_v55, 0.0  ;;  %v2049_v61 = vadd.f32 %v2048_v59, %v4929_v2 }
 0x153   : > { %v2680_v62 = vmax.f32 %v1400_v58, 0.0  ;;  %1438 = vmatmul.bf16.gmra.mxu0 %v4393_v53  ;;  %1758 = vmatmul.bf16.gmra.mxu2 %v4457_v54 }
 0x154   : > { %v3303_v63 = vpack.c.bf16 %v2935_v60, %v2934_v57  ;;  %v2681_v0 = vmax.f32 %v2049_v61, 0.0  ;;  %2087 = vmatmul.bf16.gmra.mxu1 %v4393_v53  ;;  %2407 = vmatmul.bf16.gmra.mxu3 %v4457_v54 }
 0x156   : > { %3559 = vst [vmem:[%s4937_s23 + $0x478] sm:$0xff] %v3303_v63  ;;  %v3176_v3 = vpack.c.bf16 %v2681_v0, %v2680_v62  ;;  %v1719_v4 = vpop.f32.mrf.mxu2 }
 0x157   : > { %v1720_v5 = vadd.f32 %v1719_v4, %v4927_v1  ;;  %v2368_v6 = vpop.f32.mrf.mxu3 }
 0x158   : > { %3432 = vst [vmem:[%s4937_s23 + $0x80] sm:$0xff] %v3176_v3  ;;  %v2369_v7 = vadd.f32 %v2368_v6, %v4929_v2  ;;  %v1401_v8 = vpop.f32.mrf.mxu0 }
 0x159   : > { %v2936_v9 = vmax.f32 %v1720_v5, 0.0  ;;  %v1402_v10 = vadd.f32 %v1401_v8, %v4927_v1  ;;  %v2050_v11 = vpop.f32.mrf.mxu1 }
 0x15a   : > { %v2937_v12 = vmax.f32 %v2369_v7, 0.0  ;;  %v2051_v13 = vadd.f32 %v2050_v11, %v4929_v2 }
 0x15b   : > { %v2682_v14 = vmax.f32 %v1402_v10, 0.0 }
 0x15c   : > { %v3304_v15 = vpack.c.bf16 %v2937_v12, %v2936_v9  ;;  %v2683_v16 = vmax.f32 %v2051_v13, 0.0 }
 0x15e   : > { %3560 = vst [vmem:[%s4937_s23 + $0x480] sm:$0xff] %v3304_v15  ;;  %v3177_v17 = vpack.c.bf16 %v2683_v16, %v2682_v14  ;;  %v1721_v18 = vpop.f32.mrf.mxu2 }
 0x15f   : > { %v1722_v19 = vadd.f32 %v1721_v18, %v4927_v1  ;;  %v2370_v20 = vpop.f32.mrf.mxu3 }
 0x160   : > { %3433 = vst [vmem:[%s4937_s23 + $0x88] sm:$0xff] %v3177_v17  ;;  %v2371_v23 = vadd.f32 %v2370_v20, %v4929_v2  ;;  %v1404_v24 = vpop.f32.mrf.mxu0  ;;  %v4460_v20 = vld [vmem:[%s4901_s30 + $0x298] sm:$0xff] }
 0x161   : > { %v2938_v25 = vmax.f32 %v1722_v19, 0.0  ;;  %v1405_v26 = vadd.f32 %v1404_v24, %v4927_v1  ;;  %v2053_v27 = vpop.f32.mrf.mxu1  ;;  %v4396_v19 = vld [vmem:[%s4901_s30 + $0x98] sm:$0xff] }
 0x162   : > { %v2939_v28 = vmax.f32 %v2371_v23, 0.0  ;;  %v2054_v29 = vadd.f32 %v2053_v27, %v4929_v2 }
 0x163   : > { %v2684_v30 = vmax.f32 %v1405_v26, 0.0  ;;  %1443 = vmatmul.bf16.gmra.mxu0 %v4394_v21  ;;  %1763 = vmatmul.bf16.gmra.mxu2 %v4458_v22 }
 0x164   : > { %v3305_v31 = vpack.c.bf16 %v2939_v28, %v2938_v25  ;;  %v2685_v32 = vmax.f32 %v2054_v29, 0.0  ;;  %2092 = vmatmul.bf16.gmra.mxu1 %v4394_v21  ;;  %2412 = vmatmul.bf16.gmra.mxu3 %v4458_v22 }
 0x166   : > { %3561 = vst [vmem:[%s4937_s23 + $0x488] sm:$0xff] %v3305_v31  ;;  %v3178_v33 = vpack.c.bf16 %v2685_v32, %v2684_v30  ;;  %v1724_v34 = vpop.f32.mrf.mxu2 }
 0x167   : > { %v1725_v35 = vadd.f32 %v1724_v34, %v4927_v1  ;;  %v2373_v36 = vpop.f32.mrf.mxu3 }
 0x168   : > { %3434 = vst [vmem:[%s4937_s23 + $0x90] sm:$0xff] %v3178_v33  ;;  %v2374_v37 = vadd.f32 %v2373_v36, %v4929_v2  ;;  %v1406_v38 = vpop.f32.mrf.mxu0 }
 0x169   : > { %v2940_v39 = vmax.f32 %v1725_v35, 0.0  ;;  %v1407_v40 = vadd.f32 %v1406_v38, %v4927_v1  ;;  %v2055_v41 = vpop.f32.mrf.mxu1 }
 0x16a   : > { %v2941_v42 = vmax.f32 %v2374_v37, 0.0  ;;  %v2056_v43 = vadd.f32 %v2055_v41, %v4929_v2 }
 0x16b   : > { %v2686_v44 = vmax.f32 %v1407_v40, 0.0 }
 0x16c   : > { %v3306_v45 = vpack.c.bf16 %v2941_v42, %v2940_v39  ;;  %v2687_v46 = vmax.f32 %v2056_v43, 0.0 }
 0x16e   : > { %3562 = vst [vmem:[%s4937_s23 + $0x490] sm:$0xff] %v3306_v45  ;;  %v3179_v47 = vpack.c.bf16 %v2687_v46, %v2686_v44  ;;  %v1726_v48 = vpop.f32.mrf.mxu2 }
 0x16f   : > { %v1727_v49 = vadd.f32 %v1726_v48, %v4927_v1  ;;  %v2375_v50 = vpop.f32.mrf.mxu3 }
 0x170   : > { %3435 = vst [vmem:[%s4937_s23 + $0x98] sm:$0xff] %v3179_v47  ;;  %v2376_v53 = vadd.f32 %v2375_v50, %v4929_v2  ;;  %v1409_v54 = vpop.f32.mrf.mxu0  ;;  %v4461_v50 = vld [vmem:[%s4901_s30 + $0x2a0] sm:$0xff] }
 0x171   : > { %v2942_v55 = vmax.f32 %v1727_v49, 0.0  ;;  %v1410_v56 = vadd.f32 %v1409_v54, %v4927_v1  ;;  %v2058_v57 = vpop.f32.mrf.mxu1  ;;  %v4397_v49 = vld [vmem:[%s4901_s30 + $0xa0] sm:$0xff] }
 0x172   : > { %v2943_v58 = vmax.f32 %v2376_v53, 0.0  ;;  %v2059_v59 = vadd.f32 %v2058_v57, %v4929_v2 }
 0x173   : > { %v2688_v60 = vmax.f32 %v1410_v56, 0.0  ;;  %1448 = vmatmul.bf16.gmra.mxu0 %v4395_v51  ;;  %1768 = vmatmul.bf16.gmra.mxu2 %v4459_v52 }
 0x174   : > { %v3307_v61 = vpack.c.bf16 %v2943_v58, %v2942_v55  ;;  %v2689_v62 = vmax.f32 %v2059_v59, 0.0  ;;  %2097 = vmatmul.bf16.gmra.mxu1 %v4395_v51  ;;  %2417 = vmatmul.bf16.gmra.mxu3 %v4459_v52 }
 0x176   : > { %3563 = vst [vmem:[%s4937_s23 + $0x498] sm:$0xff] %v3307_v61  ;;  %v3180_v63 = vpack.c.bf16 %v2689_v62, %v2688_v60  ;;  %v1729_v0 = vpop.f32.mrf.mxu2 }
 0x177   : > { %v1730_v3 = vadd.f32 %v1729_v0, %v4927_v1  ;;  %v2378_v4 = vpop.f32.mrf.mxu3 }
 0x178   : > { %3436 = vst [vmem:[%s4937_s23 + $0xa0] sm:$0xff] %v3180_v63  ;;  %v2379_v5 = vadd.f32 %v2378_v4, %v4929_v2  ;;  %v1411_v6 = vpop.f32.mrf.mxu0 }
 0x179   : > { %v2944_v7 = vmax.f32 %v1730_v3, 0.0  ;;  %v1412_v8 = vadd.f32 %v1411_v6, %v4927_v1  ;;  %v2060_v9 = vpop.f32.mrf.mxu1 }
 0x17a   : > { %v2945_v10 = vmax.f32 %v2379_v5, 0.0  ;;  %v2061_v11 = vadd.f32 %v2060_v9, %v4929_v2 }
 0x17b   : > { %v2690_v12 = vmax.f32 %v1412_v8, 0.0 }
 0x17c   : > { %v3308_v13 = vpack.c.bf16 %v2945_v10, %v2944_v7  ;;  %v2691_v14 = vmax.f32 %v2061_v11, 0.0 }
 0x17e   : > { %3564 = vst [vmem:[%s4937_s23 + $0x4a0] sm:$0xff] %v3308_v13  ;;  %v3181_v15 = vpack.c.bf16 %v2691_v14, %v2690_v12  ;;  %v1731_v16 = vpop.f32.mrf.mxu2 }
 0x17f   : > { %v1732_v17 = vadd.f32 %v1731_v16, %v4927_v1  ;;  %v2380_v18 = vpop.f32.mrf.mxu3 }
 0x180   : > { %3437 = vst [vmem:[%s4937_s23 + $0xa8] sm:$0xff] %v3181_v15  ;;  %v2381_v21 = vadd.f32 %v2380_v18, %v4929_v2  ;;  %v1414_v22 = vpop.f32.mrf.mxu0  ;;  %v4462_v18 = vld [vmem:[%s4901_s30 + $0x2a8] sm:$0xff] }
 0x181   : > { %v2946_v23 = vmax.f32 %v1732_v17, 0.0  ;;  %v1415_v24 = vadd.f32 %v1414_v22, %v4927_v1  ;;  %v2063_v25 = vpop.f32.mrf.mxu1  ;;  %v4398_v17 = vld [vmem:[%s4901_s30 + $0xa8] sm:$0xff] }
 0x182   : > { %v2947_v26 = vmax.f32 %v2381_v21, 0.0  ;;  %v2064_v27 = vadd.f32 %v2063_v25, %v4929_v2 }
 0x183   : > { %v2692_v28 = vmax.f32 %v1415_v24, 0.0  ;;  %1453 = vmatmul.bf16.gmra.mxu0 %v4396_v19  ;;  %1773 = vmatmul.bf16.gmra.mxu2 %v4460_v20 }
 0x184   : > { %v3309_v29 = vpack.c.bf16 %v2947_v26, %v2946_v23  ;;  %v2693_v30 = vmax.f32 %v2064_v27, 0.0  ;;  %2102 = vmatmul.bf16.gmra.mxu1 %v4396_v19  ;;  %2422 = vmatmul.bf16.gmra.mxu3 %v4460_v20 }
 0x186   : > { %3565 = vst [vmem:[%s4937_s23 + $0x4a8] sm:$0xff] %v3309_v29  ;;  %v3182_v31 = vpack.c.bf16 %v2693_v30, %v2692_v28  ;;  %v1734_v32 = vpop.f32.mrf.mxu2 }
 0x187   : > { %v1735_v33 = vadd.f32 %v1734_v32, %v4927_v1  ;;  %v2383_v34 = vpop.f32.mrf.mxu3 }
 0x188   : > { %3438 = vst [vmem:[%s4937_s23 + $0xb0] sm:$0xff] %v3182_v31  ;;  %v2384_v35 = vadd.f32 %v2383_v34, %v4929_v2  ;;  %v1416_v36 = vpop.f32.mrf.mxu0 }
 0x189   : > { %v2948_v37 = vmax.f32 %v1735_v33, 0.0  ;;  %v1417_v38 = vadd.f32 %v1416_v36, %v4927_v1  ;;  %v2065_v39 = vpop.f32.mrf.mxu1 }
 0x18a   : > { %v2949_v40 = vmax.f32 %v2384_v35, 0.0  ;;  %v2066_v41 = vadd.f32 %v2065_v39, %v4929_v2 }
 0x18b   : > { %v2694_v42 = vmax.f32 %v1417_v38, 0.0 }
 0x18c   : > { %v3310_v43 = vpack.c.bf16 %v2949_v40, %v2948_v37  ;;  %v2695_v44 = vmax.f32 %v2066_v41, 0.0 }
 0x18e   : > { %3566 = vst [vmem:[%s4937_s23 + $0x4b0] sm:$0xff] %v3310_v43  ;;  %v3183_v45 = vpack.c.bf16 %v2695_v44, %v2694_v42  ;;  %v1736_v46 = vpop.f32.mrf.mxu2 }
 0x18f   : > { %v1737_v47 = vadd.f32 %v1736_v46, %v4927_v1  ;;  %v2385_v48 = vpop.f32.mrf.mxu3 }
 0x190   : > { %3439 = vst [vmem:[%s4937_s23 + $0xb8] sm:$0xff] %v3183_v45  ;;  %v2386_v51 = vadd.f32 %v2385_v48, %v4929_v2  ;;  %v1419_v52 = vpop.f32.mrf.mxu0  ;;  %v4463_v48 = vld [vmem:[%s4901_s30 + $0x2b0] sm:$0xff] }
 0x191   : > { %v2950_v53 = vmax.f32 %v1737_v47, 0.0  ;;  %v1420_v54 = vadd.f32 %v1419_v52, %v4927_v1  ;;  %v2068_v55 = vpop.f32.mrf.mxu1  ;;  %v4399_v47 = vld [vmem:[%s4901_s30 + $0xb0] sm:$0xff] }
 0x192   : > { %v2951_v56 = vmax.f32 %v2386_v51, 0.0  ;;  %v2069_v57 = vadd.f32 %v2068_v55, %v4929_v2 }
 0x193   : > { %v2696_v58 = vmax.f32 %v1420_v54, 0.0  ;;  %1458 = vmatmul.bf16.gmra.mxu0 %v4397_v49  ;;  %1778 = vmatmul.bf16.gmra.mxu2 %v4461_v50 }
 0x194   : > { %v3311_v59 = vpack.c.bf16 %v2951_v56, %v2950_v53  ;;  %v2697_v60 = vmax.f32 %v2069_v57, 0.0  ;;  %2107 = vmatmul.bf16.gmra.mxu1 %v4397_v49  ;;  %2427 = vmatmul.bf16.gmra.mxu3 %v4461_v50 }
 0x196   : > { %3567 = vst [vmem:[%s4937_s23 + $0x4b8] sm:$0xff] %v3311_v59  ;;  %v3184_v61 = vpack.c.bf16 %v2697_v60, %v2696_v58  ;;  %v1739_v62 = vpop.f32.mrf.mxu2 }
 0x197   : > { %v1740_v63 = vadd.f32 %v1739_v62, %v4927_v1  ;;  %v2388_v0 = vpop.f32.mrf.mxu3 }
 0x198   : > { %3440 = vst [vmem:[%s4937_s23 + $0xc0] sm:$0xff] %v3184_v61  ;;  %v2389_v3 = vadd.f32 %v2388_v0, %v4929_v2  ;;  %v1421_v4 = vpop.f32.mrf.mxu0 }
 0x199   : > { %v2952_v5 = vmax.f32 %v1740_v63, 0.0  ;;  %v1422_v6 = vadd.f32 %v1421_v4, %v4927_v1  ;;  %v2070_v7 = vpop.f32.mrf.mxu1 }
 0x19a   : > { %v2953_v8 = vmax.f32 %v2389_v3, 0.0  ;;  %v2071_v9 = vadd.f32 %v2070_v7, %v4929_v2 }
 0x19b   : > { %v2698_v10 = vmax.f32 %v1422_v6, 0.0 }
 0x19c   : > { %v3312_v11 = vpack.c.bf16 %v2953_v8, %v2952_v5  ;;  %v2699_v12 = vmax.f32 %v2071_v9, 0.0 }
 0x19e   : > { %3568 = vst [vmem:[%s4937_s23 + $0x4c0] sm:$0xff] %v3312_v11  ;;  %v3185_v13 = vpack.c.bf16 %v2699_v12, %v2698_v10  ;;  %v1741_v14 = vpop.f32.mrf.mxu2 }
 0x19f   : > { %v1742_v15 = vadd.f32 %v1741_v14, %v4927_v1  ;;  %v2390_v16 = vpop.f32.mrf.mxu3 }
 0x1a0   : > { %3441 = vst [vmem:[%s4937_s23 + $0xc8] sm:$0xff] %v3185_v13  ;;  %v2391_v19 = vadd.f32 %v2390_v16, %v4929_v2  ;;  %v1424_v20 = vpop.f32.mrf.mxu0  ;;  %v4464_v16 = vld [vmem:[%s4901_s30 + $0x2b8] sm:$0xff] }
 0x1a1   : > { %v2954_v21 = vmax.f32 %v1742_v15, 0.0  ;;  %v1425_v22 = vadd.f32 %v1424_v20, %v4927_v1  ;;  %v2073_v23 = vpop.f32.mrf.mxu1  ;;  %v4400_v15 = vld [vmem:[%s4901_s30 + $0xb8] sm:$0xff] }
 0x1a2   : > { %v2955_v24 = vmax.f32 %v2391_v19, 0.0  ;;  %v2074_v25 = vadd.f32 %v2073_v23, %v4929_v2 }
 0x1a3   : > { %v2700_v26 = vmax.f32 %v1425_v22, 0.0  ;;  %1463 = vmatmul.bf16.gmra.mxu0 %v4398_v17  ;;  %1783 = vmatmul.bf16.gmra.mxu2 %v4462_v18 }
 0x1a4   : > { %v3313_v27 = vpack.c.bf16 %v2955_v24, %v2954_v21  ;;  %v2701_v28 = vmax.f32 %v2074_v25, 0.0  ;;  %2112 = vmatmul.bf16.gmra.mxu1 %v4398_v17  ;;  %2432 = vmatmul.bf16.gmra.mxu3 %v4462_v18 }
 0x1a6   : > { %3569 = vst [vmem:[%s4937_s23 + $0x4c8] sm:$0xff] %v3313_v27  ;;  %v3186_v29 = vpack.c.bf16 %v2701_v28, %v2700_v26  ;;  %v1744_v30 = vpop.f32.mrf.mxu2 }
 0x1a7   : > { %v1745_v31 = vadd.f32 %v1744_v30, %v4927_v1  ;;  %v2393_v32 = vpop.f32.mrf.mxu3 }
 0x1a8   : > { %3442 = vst [vmem:[%s4937_s23 + $0xd0] sm:$0xff] %v3186_v29  ;;  %v2394_v33 = vadd.f32 %v2393_v32, %v4929_v2  ;;  %v1426_v34 = vpop.f32.mrf.mxu0 }
 0x1a9   : > { %v2956_v35 = vmax.f32 %v1745_v31, 0.0  ;;  %v1427_v36 = vadd.f32 %v1426_v34, %v4927_v1  ;;  %v2075_v37 = vpop.f32.mrf.mxu1 }
 0x1aa   : > { %v2957_v38 = vmax.f32 %v2394_v33, 0.0  ;;  %v2076_v39 = vadd.f32 %v2075_v37, %v4929_v2 }
 0x1ab   : > { %v2702_v40 = vmax.f32 %v1427_v36, 0.0 }
 0x1ac   : > { %v3314_v41 = vpack.c.bf16 %v2957_v38, %v2956_v35  ;;  %v2703_v42 = vmax.f32 %v2076_v39, 0.0 }
 0x1ae   : > { %3570 = vst [vmem:[%s4937_s23 + $0x4d0] sm:$0xff] %v3314_v41  ;;  %v3187_v43 = vpack.c.bf16 %v2703_v42, %v2702_v40  ;;  %v1746_v44 = vpop.f32.mrf.mxu2 }
 0x1af   : > { %v1747_v45 = vadd.f32 %v1746_v44, %v4927_v1  ;;  %v2395_v46 = vpop.f32.mrf.mxu3 }
 0x1b0   : > { %3443 = vst [vmem:[%s4937_s23 + $0xd8] sm:$0xff] %v3187_v43  ;;  %v2396_v49 = vadd.f32 %v2395_v46, %v4929_v2  ;;  %v1429_v50 = vpop.f32.mrf.mxu0  ;;  %v4465_v46 = vld [vmem:[%s4901_s30 + $0x2c0] sm:$0xff] }
 0x1b1   : > { %v2958_v51 = vmax.f32 %v1747_v45, 0.0  ;;  %v1430_v52 = vadd.f32 %v1429_v50, %v4927_v1  ;;  %v2078_v53 = vpop.f32.mrf.mxu1  ;;  %v4401_v45 = vld [vmem:[%s4901_s30 + $0xc0] sm:$0xff] }
 0x1b2   : > { %v2959_v54 = vmax.f32 %v2396_v49, 0.0  ;;  %v2079_v55 = vadd.f32 %v2078_v53, %v4929_v2 }
 0x1b3   : > { %v2704_v56 = vmax.f32 %v1430_v52, 0.0  ;;  %1468 = vmatmul.bf16.gmra.mxu0 %v4399_v47  ;;  %1788 = vmatmul.bf16.gmra.mxu2 %v4463_v48 }
 0x1b4   : > { %v3315_v57 = vpack.c.bf16 %v2959_v54, %v2958_v51  ;;  %v2705_v58 = vmax.f32 %v2079_v55, 0.0  ;;  %2117 = vmatmul.bf16.gmra.mxu1 %v4399_v47  ;;  %2437 = vmatmul.bf16.gmra.mxu3 %v4463_v48 }
 0x1b6   : > { %3571 = vst [vmem:[%s4937_s23 + $0x4d8] sm:$0xff] %v3315_v57  ;;  %v3188_v59 = vpack.c.bf16 %v2705_v58, %v2704_v56  ;;  %v1749_v60 = vpop.f32.mrf.mxu2 }
 0x1b7   : > { %v1750_v61 = vadd.f32 %v1749_v60, %v4927_v1  ;;  %v2398_v62 = vpop.f32.mrf.mxu3 }
 0x1b8   : > { %3444 = vst [vmem:[%s4937_s23 + $0xe0] sm:$0xff] %v3188_v59  ;;  %v2399_v63 = vadd.f32 %v2398_v62, %v4929_v2  ;;  %v1431_v0 = vpop.f32.mrf.mxu0 }
 0x1b9   : > { %v2960_v3 = vmax.f32 %v1750_v61, 0.0  ;;  %v1432_v4 = vadd.f32 %v1431_v0, %v4927_v1  ;;  %v2080_v5 = vpop.f32.mrf.mxu1 }
 0x1ba   : > { %v2961_v6 = vmax.f32 %v2399_v63, 0.0  ;;  %v2081_v7 = vadd.f32 %v2080_v5, %v4929_v2 }
 0x1bb   : > { %v2706_v8 = vmax.f32 %v1432_v4, 0.0 }
 0x1bc   : > { %v3316_v9 = vpack.c.bf16 %v2961_v6, %v2960_v3  ;;  %v2707_v10 = vmax.f32 %v2081_v7, 0.0 }
 0x1be   : > { %3572 = vst [vmem:[%s4937_s23 + $0x4e0] sm:$0xff] %v3316_v9  ;;  %v3189_v11 = vpack.c.bf16 %v2707_v10, %v2706_v8  ;;  %v1751_v12 = vpop.f32.mrf.mxu2 }
 0x1bf   : > { %v1752_v13 = vadd.f32 %v1751_v12, %v4927_v1  ;;  %v2400_v14 = vpop.f32.mrf.mxu3 }
 0x1c0   : > { %3445 = vst [vmem:[%s4937_s23 + $0xe8] sm:$0xff] %v3189_v11  ;;  %v2401_v17 = vadd.f32 %v2400_v14, %v4929_v2  ;;  %v1434_v18 = vpop.f32.mrf.mxu0  ;;  %v4466_v14 = vld [vmem:[%s4901_s30 + $0x2c8] sm:$0xff] }
 0x1c1   : > { %v2962_v19 = vmax.f32 %v1752_v13, 0.0  ;;  %v1435_v20 = vadd.f32 %v1434_v18, %v4927_v1  ;;  %v2083_v21 = vpop.f32.mrf.mxu1  ;;  %v4402_v13 = vld [vmem:[%s4901_s30 + $0xc8] sm:$0xff] }
 0x1c2   : > { %v2963_v22 = vmax.f32 %v2401_v17, 0.0  ;;  %v2084_v23 = vadd.f32 %v2083_v21, %v4929_v2 }
 0x1c3   : > { %v2708_v24 = vmax.f32 %v1435_v20, 0.0  ;;  %1473 = vmatmul.bf16.gmra.mxu0 %v4400_v15  ;;  %1793 = vmatmul.bf16.gmra.mxu2 %v4464_v16 }
 0x1c4   : > { %v3317_v25 = vpack.c.bf16 %v2963_v22, %v2962_v19  ;;  %v2709_v26 = vmax.f32 %v2084_v23, 0.0  ;;  %2122 = vmatmul.bf16.gmra.mxu1 %v4400_v15  ;;  %2442 = vmatmul.bf16.gmra.mxu3 %v4464_v16 }
 0x1c6   : > { %3573 = vst [vmem:[%s4937_s23 + $0x4e8] sm:$0xff] %v3317_v25  ;;  %v3190_v27 = vpack.c.bf16 %v2709_v26, %v2708_v24  ;;  %v1754_v28 = vpop.f32.mrf.mxu2 }
 0x1c7   : > { %v1755_v29 = vadd.f32 %v1754_v28, %v4927_v1  ;;  %v2403_v30 = vpop.f32.mrf.mxu3 }
 0x1c8   : > { %3446 = vst [vmem:[%s4937_s23 + $0xf0] sm:$0xff] %v3190_v27  ;;  %v2404_v31 = vadd.f32 %v2403_v30, %v4929_v2  ;;  %v1436_v32 = vpop.f32.mrf.mxu0 }
 0x1c9   : > { %v2964_v33 = vmax.f32 %v1755_v29, 0.0  ;;  %v1437_v34 = vadd.f32 %v1436_v32, %v4927_v1  ;;  %v2085_v35 = vpop.f32.mrf.mxu1 }
 0x1ca   : > { %v2965_v36 = vmax.f32 %v2404_v31, 0.0  ;;  %v2086_v37 = vadd.f32 %v2085_v35, %v4929_v2 }
 0x1cb   : > { %v2710_v38 = vmax.f32 %v1437_v34, 0.0 }
 0x1cc   : > { %v3318_v39 = vpack.c.bf16 %v2965_v36, %v2964_v33  ;;  %v2711_v40 = vmax.f32 %v2086_v37, 0.0 }
 0x1ce   : > { %3574 = vst [vmem:[%s4937_s23 + $0x4f0] sm:$0xff] %v3318_v39  ;;  %v3191_v41 = vpack.c.bf16 %v2711_v40, %v2710_v38  ;;  %v1756_v42 = vpop.f32.mrf.mxu2 }
 0x1cf   : > { %v1757_v43 = vadd.f32 %v1756_v42, %v4927_v1  ;;  %v2405_v44 = vpop.f32.mrf.mxu3 }
 0x1d0   : > { %3447 = vst [vmem:[%s4937_s23 + $0xf8] sm:$0xff] %v3191_v41  ;;  %v2406_v47 = vadd.f32 %v2405_v44, %v4929_v2  ;;  %v1439_v48 = vpop.f32.mrf.mxu0  ;;  %v4467_v44 = vld [vmem:[%s4901_s30 + $0x2d0] sm:$0xff] }
 0x1d1   : > { %v2966_v49 = vmax.f32 %v1757_v43, 0.0  ;;  %v1440_v50 = vadd.f32 %v1439_v48, %v4927_v1  ;;  %v2088_v51 = vpop.f32.mrf.mxu1  ;;  %v4403_v43 = vld [vmem:[%s4901_s30 + $0xd0] sm:$0xff] }
 0x1d2   : > { %v2967_v52 = vmax.f32 %v2406_v47, 0.0  ;;  %v2089_v53 = vadd.f32 %v2088_v51, %v4929_v2 }
 0x1d3   : > { %v2712_v54 = vmax.f32 %v1440_v50, 0.0  ;;  %1478 = vmatmul.bf16.gmra.mxu0 %v4401_v45  ;;  %1798 = vmatmul.bf16.gmra.mxu2 %v4465_v46 }
 0x1d4   : > { %v3319_v55 = vpack.c.bf16 %v2967_v52, %v2966_v49  ;;  %v2713_v56 = vmax.f32 %v2089_v53, 0.0  ;;  %2127 = vmatmul.bf16.gmra.mxu1 %v4401_v45  ;;  %2447 = vmatmul.bf16.gmra.mxu3 %v4465_v46 }
 0x1d6   : > { %3575 = vst [vmem:[%s4937_s23 + $0x4f8] sm:$0xff] %v3319_v55  ;;  %v3192_v57 = vpack.c.bf16 %v2713_v56, %v2712_v54  ;;  %v1759_v58 = vpop.f32.mrf.mxu2 }
 0x1d7   : > { %v1760_v59 = vadd.f32 %v1759_v58, %v4927_v1  ;;  %v2408_v60 = vpop.f32.mrf.mxu3 }
 0x1d8   : > { %3448 = vst [vmem:[%s4937_s23 + $0x100] sm:$0xff] %v3192_v57  ;;  %v2409_v61 = vadd.f32 %v2408_v60, %v4929_v2  ;;  %v1441_v62 = vpop.f32.mrf.mxu0 }
 0x1d9   : > { %v2968_v63 = vmax.f32 %v1760_v59, 0.0  ;;  %v1442_v0 = vadd.f32 %v1441_v62, %v4927_v1  ;;  %v2090_v3 = vpop.f32.mrf.mxu1 }
 0x1da   : > { %v2969_v4 = vmax.f32 %v2409_v61, 0.0  ;;  %v2091_v5 = vadd.f32 %v2090_v3, %v4929_v2 }
 0x1db   : > { %v2714_v6 = vmax.f32 %v1442_v0, 0.0 }
 0x1dc   : > { %v3320_v7 = vpack.c.bf16 %v2969_v4, %v2968_v63  ;;  %v2715_v8 = vmax.f32 %v2091_v5, 0.0 }
 0x1de   : > { %3576 = vst [vmem:[%s4937_s23 + $0x500] sm:$0xff] %v3320_v7  ;;  %v3193_v9 = vpack.c.bf16 %v2715_v8, %v2714_v6  ;;  %v1761_v10 = vpop.f32.mrf.mxu2 }
 0x1df   : > { %v1762_v11 = vadd.f32 %v1761_v10, %v4927_v1  ;;  %v2410_v12 = vpop.f32.mrf.mxu3 }
 0x1e0   : > { %3449 = vst [vmem:[%s4937_s23 + $0x108] sm:$0xff] %v3193_v9  ;;  %v2411_v15 = vadd.f32 %v2410_v12, %v4929_v2  ;;  %v1444_v16 = vpop.f32.mrf.mxu0  ;;  %v4468_v12 = vld [vmem:[%s4901_s30 + $0x2d8] sm:$0xff] }
 0x1e1   : > { %v2970_v17 = vmax.f32 %v1762_v11, 0.0  ;;  %v1445_v18 = vadd.f32 %v1444_v16, %v4927_v1  ;;  %v2093_v19 = vpop.f32.mrf.mxu1  ;;  %v4404_v11 = vld [vmem:[%s4901_s30 + $0xd8] sm:$0xff] }
 0x1e2   : > { %v2971_v20 = vmax.f32 %v2411_v15, 0.0  ;;  %v2094_v21 = vadd.f32 %v2093_v19, %v4929_v2 }
 0x1e3   : > { %v2716_v22 = vmax.f32 %v1445_v18, 0.0  ;;  %1483 = vmatmul.bf16.gmra.mxu0 %v4402_v13  ;;  %1803 = vmatmul.bf16.gmra.mxu2 %v4466_v14 }
 0x1e4   : > { %v3321_v23 = vpack.c.bf16 %v2971_v20, %v2970_v17  ;;  %v2717_v24 = vmax.f32 %v2094_v21, 0.0  ;;  %2132 = vmatmul.bf16.gmra.mxu1 %v4402_v13  ;;  %2452 = vmatmul.bf16.gmra.mxu3 %v4466_v14 }
 0x1e6   : > { %3577 = vst [vmem:[%s4937_s23 + $0x508] sm:$0xff] %v3321_v23  ;;  %v3194_v25 = vpack.c.bf16 %v2717_v24, %v2716_v22  ;;  %v1764_v26 = vpop.f32.mrf.mxu2 }
 0x1e7   : > { %v1765_v27 = vadd.f32 %v1764_v26, %v4927_v1  ;;  %v2413_v28 = vpop.f32.mrf.mxu3 }
 0x1e8   : > { %3450 = vst [vmem:[%s4937_s23 + $0x110] sm:$0xff] %v3194_v25  ;;  %v2414_v29 = vadd.f32 %v2413_v28, %v4929_v2  ;;  %v1446_v30 = vpop.f32.mrf.mxu0 }
 0x1e9   : > { %v2972_v31 = vmax.f32 %v1765_v27, 0.0  ;;  %v1447_v32 = vadd.f32 %v1446_v30, %v4927_v1  ;;  %v2095_v33 = vpop.f32.mrf.mxu1 }
 0x1ea   : > { %v2973_v34 = vmax.f32 %v2414_v29, 0.0  ;;  %v2096_v35 = vadd.f32 %v2095_v33, %v4929_v2 }
 0x1eb   : > { %v2718_v36 = vmax.f32 %v1447_v32, 0.0 }
 0x1ec   : > { %v3322_v37 = vpack.c.bf16 %v2973_v34, %v2972_v31  ;;  %v2719_v38 = vmax.f32 %v2096_v35, 0.0 }
 0x1ee   : > { %3578 = vst [vmem:[%s4937_s23 + $0x510] sm:$0xff] %v3322_v37  ;;  %v3195_v39 = vpack.c.bf16 %v2719_v38, %v2718_v36  ;;  %v1766_v40 = vpop.f32.mrf.mxu2 }
 0x1ef   : > { %v1767_v41 = vadd.f32 %v1766_v40, %v4927_v1  ;;  %v2415_v42 = vpop.f32.mrf.mxu3 }
 0x1f0   : > { %3451 = vst [vmem:[%s4937_s23 + $0x118] sm:$0xff] %v3195_v39  ;;  %v2416_v45 = vadd.f32 %v2415_v42, %v4929_v2  ;;  %v1449_v46 = vpop.f32.mrf.mxu0  ;;  %v4469_v42 = vld [vmem:[%s4901_s30 + $0x2e0] sm:$0xff] }
 0x1f1   : > { %v2974_v47 = vmax.f32 %v1767_v41, 0.0  ;;  %v1450_v48 = vadd.f32 %v1449_v46, %v4927_v1  ;;  %v2098_v49 = vpop.f32.mrf.mxu1  ;;  %v4405_v41 = vld [vmem:[%s4901_s30 + $0xe0] sm:$0xff] }
 0x1f2   : > { %v2975_v50 = vmax.f32 %v2416_v45, 0.0  ;;  %v2099_v51 = vadd.f32 %v2098_v49, %v4929_v2 }
 0x1f3   : > { %v2720_v52 = vmax.f32 %v1450_v48, 0.0  ;;  %1488 = vmatmul.bf16.gmra.mxu0 %v4403_v43  ;;  %1808 = vmatmul.bf16.gmra.mxu2 %v4467_v44 }
 0x1f4   : > { %v3323_v53 = vpack.c.bf16 %v2975_v50, %v2974_v47  ;;  %v2721_v54 = vmax.f32 %v2099_v51, 0.0  ;;  %2137 = vmatmul.bf16.gmra.mxu1 %v4403_v43  ;;  %2457 = vmatmul.bf16.gmra.mxu3 %v4467_v44 }
 0x1f6   : > { %3579 = vst [vmem:[%s4937_s23 + $0x518] sm:$0xff] %v3323_v53  ;;  %v3196_v55 = vpack.c.bf16 %v2721_v54, %v2720_v52  ;;  %v1769_v56 = vpop.f32.mrf.mxu2 }
 0x1f7   : > { %v1770_v57 = vadd.f32 %v1769_v56, %v4927_v1  ;;  %v2418_v58 = vpop.f32.mrf.mxu3 }
 0x1f8   : > { %3452 = vst [vmem:[%s4937_s23 + $0x120] sm:$0xff] %v3196_v55  ;;  %v2419_v59 = vadd.f32 %v2418_v58, %v4929_v2  ;;  %v1451_v60 = vpop.f32.mrf.mxu0 }
 0x1f9   : > { %v2976_v61 = vmax.f32 %v1770_v57, 0.0  ;;  %v1452_v62 = vadd.f32 %v1451_v60, %v4927_v1  ;;  %v2100_v63 = vpop.f32.mrf.mxu1 }
 0x1fa   : > { %v2977_v0 = vmax.f32 %v2419_v59, 0.0  ;;  %v2101_v3 = vadd.f32 %v2100_v63, %v4929_v2 }
 0x1fb   : > { %v2722_v4 = vmax.f32 %v1452_v62, 0.0 }
 0x1fc   : > { %v3324_v5 = vpack.c.bf16 %v2977_v0, %v2976_v61  ;;  %v2723_v6 = vmax.f32 %v2101_v3, 0.0 }
 0x1fe   : > { %3580 = vst [vmem:[%s4937_s23 + $0x520] sm:$0xff] %v3324_v5  ;;  %v3197_v7 = vpack.c.bf16 %v2723_v6, %v2722_v4  ;;  %v1771_v8 = vpop.f32.mrf.mxu2 }
 0x1ff   : > { %v1772_v9 = vadd.f32 %v1771_v8, %v4927_v1  ;;  %v2420_v10 = vpop.f32.mrf.mxu3 }
 0x200   : > { %3453 = vst [vmem:[%s4937_s23 + $0x128] sm:$0xff] %v3197_v7  ;;  %v2421_v13 = vadd.f32 %v2420_v10, %v4929_v2  ;;  %v1454_v14 = vpop.f32.mrf.mxu0  ;;  %v4470_v10 = vld [vmem:[%s4901_s30 + $0x2e8] sm:$0xff] }
 0x201   : > { %v2978_v15 = vmax.f32 %v1772_v9, 0.0  ;;  %v1455_v16 = vadd.f32 %v1454_v14, %v4927_v1  ;;  %v2103_v17 = vpop.f32.mrf.mxu1  ;;  %v4406_v9 = vld [vmem:[%s4901_s30 + $0xe8] sm:$0xff] }
 0x202   : > { %v2979_v18 = vmax.f32 %v2421_v13, 0.0  ;;  %v2104_v19 = vadd.f32 %v2103_v17, %v4929_v2 }
 0x203   : > { %v2724_v20 = vmax.f32 %v1455_v16, 0.0  ;;  %1493 = vmatmul.bf16.gmra.mxu0 %v4404_v11  ;;  %1813 = vmatmul.bf16.gmra.mxu2 %v4468_v12 }
 0x204   : > { %v3325_v21 = vpack.c.bf16 %v2979_v18, %v2978_v15  ;;  %v2725_v22 = vmax.f32 %v2104_v19, 0.0  ;;  %2142 = vmatmul.bf16.gmra.mxu1 %v4404_v11  ;;  %2462 = vmatmul.bf16.gmra.mxu3 %v4468_v12 }
 0x206   : > { %3581 = vst [vmem:[%s4937_s23 + $0x528] sm:$0xff] %v3325_v21  ;;  %v3198_v23 = vpack.c.bf16 %v2725_v22, %v2724_v20  ;;  %v1774_v24 = vpop.f32.mrf.mxu2 }
 0x207   : > { %v1775_v25 = vadd.f32 %v1774_v24, %v4927_v1  ;;  %v2423_v26 = vpop.f32.mrf.mxu3 }
 0x208   : > { %3454 = vst [vmem:[%s4937_s23 + $0x130] sm:$0xff] %v3198_v23  ;;  %v2424_v27 = vadd.f32 %v2423_v26, %v4929_v2  ;;  %v1456_v28 = vpop.f32.mrf.mxu0 }
 0x209   : > { %v2980_v29 = vmax.f32 %v1775_v25, 0.0  ;;  %v1457_v30 = vadd.f32 %v1456_v28, %v4927_v1  ;;  %v2105_v31 = vpop.f32.mrf.mxu1 }
 0x20a   : > { %v2981_v32 = vmax.f32 %v2424_v27, 0.0  ;;  %v2106_v33 = vadd.f32 %v2105_v31, %v4929_v2 }
 0x20b   : > { %v2726_v34 = vmax.f32 %v1457_v30, 0.0 }
 0x20c   : > { %v3326_v35 = vpack.c.bf16 %v2981_v32, %v2980_v29  ;;  %v2727_v36 = vmax.f32 %v2106_v33, 0.0 }
 0x20e   : > { %3582 = vst [vmem:[%s4937_s23 + $0x530] sm:$0xff] %v3326_v35  ;;  %v3199_v37 = vpack.c.bf16 %v2727_v36, %v2726_v34  ;;  %v1776_v38 = vpop.f32.mrf.mxu2 }
 0x20f   : > { %v1777_v39 = vadd.f32 %v1776_v38, %v4927_v1  ;;  %v2425_v40 = vpop.f32.mrf.mxu3 }
 0x210   : > { %3455 = vst [vmem:[%s4937_s23 + $0x138] sm:$0xff] %v3199_v37  ;;  %v2426_v43 = vadd.f32 %v2425_v40, %v4929_v2  ;;  %v1459_v44 = vpop.f32.mrf.mxu0  ;;  %v4471_v40 = vld [vmem:[%s4901_s30 + $0x2f0] sm:$0xff] }
 0x211   : > { %v2982_v45 = vmax.f32 %v1777_v39, 0.0  ;;  %v1460_v46 = vadd.f32 %v1459_v44, %v4927_v1  ;;  %v2108_v47 = vpop.f32.mrf.mxu1  ;;  %v4407_v39 = vld [vmem:[%s4901_s30 + $0xf0] sm:$0xff] }
 0x212   : > { %v2983_v48 = vmax.f32 %v2426_v43, 0.0  ;;  %v2109_v49 = vadd.f32 %v2108_v47, %v4929_v2 }
 0x213   : > { %v2728_v50 = vmax.f32 %v1460_v46, 0.0  ;;  %1498 = vmatmul.bf16.gmra.mxu0 %v4405_v41  ;;  %1818 = vmatmul.bf16.gmra.mxu2 %v4469_v42 }
 0x214   : > { %v3327_v51 = vpack.c.bf16 %v2983_v48, %v2982_v45  ;;  %v2729_v52 = vmax.f32 %v2109_v49, 0.0  ;;  %2147 = vmatmul.bf16.gmra.mxu1 %v4405_v41  ;;  %2467 = vmatmul.bf16.gmra.mxu3 %v4469_v42 }
 0x216   : > { %3583 = vst [vmem:[%s4937_s23 + $0x538] sm:$0xff] %v3327_v51  ;;  %v3200_v53 = vpack.c.bf16 %v2729_v52, %v2728_v50  ;;  %v1779_v54 = vpop.f32.mrf.mxu2 }
 0x217   : > { %v1780_v55 = vadd.f32 %v1779_v54, %v4927_v1  ;;  %v2428_v56 = vpop.f32.mrf.mxu3 }
 0x218   : > { %3456 = vst [vmem:[%s4937_s23 + $0x140] sm:$0xff] %v3200_v53  ;;  %v2429_v57 = vadd.f32 %v2428_v56, %v4929_v2  ;;  %v1461_v58 = vpop.f32.mrf.mxu0 }
 0x219   : > { %v2984_v59 = vmax.f32 %v1780_v55, 0.0  ;;  %v1462_v60 = vadd.f32 %v1461_v58, %v4927_v1  ;;  %v2110_v61 = vpop.f32.mrf.mxu1 }
 0x21a   : > { %v2985_v62 = vmax.f32 %v2429_v57, 0.0  ;;  %v2111_v63 = vadd.f32 %v2110_v61, %v4929_v2 }
 0x21b   : > { %v2730_v0 = vmax.f32 %v1462_v60, 0.0 }
 0x21c   : > { %v3328_v3 = vpack.c.bf16 %v2985_v62, %v2984_v59  ;;  %v2731_v4 = vmax.f32 %v2111_v63, 0.0 }
 0x21e   : > { %3584 = vst [vmem:[%s4937_s23 + $0x540] sm:$0xff] %v3328_v3  ;;  %v3201_v5 = vpack.c.bf16 %v2731_v4, %v2730_v0  ;;  %v1781_v6 = vpop.f32.mrf.mxu2 }
 0x21f   : > { %v1782_v7 = vadd.f32 %v1781_v6, %v4927_v1  ;;  %v2430_v8 = vpop.f32.mrf.mxu3 }
 0x220   : > { %3457 = vst [vmem:[%s4937_s23 + $0x148] sm:$0xff] %v3201_v5  ;;  %v2431_v11 = vadd.f32 %v2430_v8, %v4929_v2  ;;  %v1464_v12 = vpop.f32.mrf.mxu0  ;;  %v4472_v8 = vld [vmem:[%s4901_s30 + $0x2f8] sm:$0xff] }
 0x221   : > { %v2986_v13 = vmax.f32 %v1782_v7, 0.0  ;;  %v1465_v14 = vadd.f32 %v1464_v12, %v4927_v1  ;;  %v2113_v15 = vpop.f32.mrf.mxu1  ;;  %v4408_v7 = vld [vmem:[%s4901_s30 + $0xf8] sm:$0xff] }
 0x222   : > { %v2987_v16 = vmax.f32 %v2431_v11, 0.0  ;;  %v2114_v17 = vadd.f32 %v2113_v15, %v4929_v2 }
 0x223   : > { %v2732_v18 = vmax.f32 %v1465_v14, 0.0  ;;  %1503 = vmatmul.bf16.gmra.mxu0 %v4406_v9  ;;  %1823 = vmatmul.bf16.gmra.mxu2 %v4470_v10 }
 0x224   : > { %v3329_v19 = vpack.c.bf16 %v2987_v16, %v2986_v13  ;;  %v2733_v20 = vmax.f32 %v2114_v17, 0.0  ;;  %2152 = vmatmul.bf16.gmra.mxu1 %v4406_v9  ;;  %2472 = vmatmul.bf16.gmra.mxu3 %v4470_v10 }
 0x226   : > { %3585 = vst [vmem:[%s4937_s23 + $0x548] sm:$0xff] %v3329_v19  ;;  %v3202_v21 = vpack.c.bf16 %v2733_v20, %v2732_v18  ;;  %v1784_v22 = vpop.f32.mrf.mxu2 }
 0x227   : > { %v1785_v23 = vadd.f32 %v1784_v22, %v4927_v1  ;;  %v2433_v24 = vpop.f32.mrf.mxu3 }
 0x228   : > { %3458 = vst [vmem:[%s4937_s23 + $0x150] sm:$0xff] %v3202_v21  ;;  %v2434_v25 = vadd.f32 %v2433_v24, %v4929_v2  ;;  %v1466_v26 = vpop.f32.mrf.mxu0 }
 0x229   : > { %v2988_v27 = vmax.f32 %v1785_v23, 0.0  ;;  %v1467_v28 = vadd.f32 %v1466_v26, %v4927_v1  ;;  %v2115_v29 = vpop.f32.mrf.mxu1 }
 0x22a   : > { %v2989_v30 = vmax.f32 %v2434_v25, 0.0  ;;  %v2116_v31 = vadd.f32 %v2115_v29, %v4929_v2 }
 0x22b   : > { %v2734_v32 = vmax.f32 %v1467_v28, 0.0 }
 0x22c   : > { %v3330_v33 = vpack.c.bf16 %v2989_v30, %v2988_v27  ;;  %v2735_v34 = vmax.f32 %v2116_v31, 0.0 }
 0x22e   : > { %3586 = vst [vmem:[%s4937_s23 + $0x550] sm:$0xff] %v3330_v33  ;;  %v3203_v35 = vpack.c.bf16 %v2735_v34, %v2734_v32  ;;  %v1786_v36 = vpop.f32.mrf.mxu2 }
 0x22f   : > { %v1787_v37 = vadd.f32 %v1786_v36, %v4927_v1  ;;  %v2435_v38 = vpop.f32.mrf.mxu3 }
 0x230   : > { %3459 = vst [vmem:[%s4937_s23 + $0x158] sm:$0xff] %v3203_v35  ;;  %v2436_v41 = vadd.f32 %v2435_v38, %v4929_v2  ;;  %v1469_v42 = vpop.f32.mrf.mxu0  ;;  %v4473_v38 = vld [vmem:[%s4901_s30 + $0x300] sm:$0xff] }
 0x231   : > { %v2990_v43 = vmax.f32 %v1787_v37, 0.0  ;;  %v1470_v44 = vadd.f32 %v1469_v42, %v4927_v1  ;;  %v2118_v45 = vpop.f32.mrf.mxu1  ;;  %v4409_v37 = vld [vmem:[%s4901_s30 + $0x100] sm:$0xff] }
 0x232   : > { %v2991_v46 = vmax.f32 %v2436_v41, 0.0  ;;  %v2119_v47 = vadd.f32 %v2118_v45, %v4929_v2 }
 0x233   : > { %v2736_v48 = vmax.f32 %v1470_v44, 0.0  ;;  %1508 = vmatmul.bf16.gmra.mxu0 %v4407_v39  ;;  %1828 = vmatmul.bf16.gmra.mxu2 %v4471_v40 }
 0x234   : > { %v3331_v49 = vpack.c.bf16 %v2991_v46, %v2990_v43  ;;  %v2737_v50 = vmax.f32 %v2119_v47, 0.0  ;;  %2157 = vmatmul.bf16.gmra.mxu1 %v4407_v39  ;;  %2477 = vmatmul.bf16.gmra.mxu3 %v4471_v40 }
 0x236   : > { %3587 = vst [vmem:[%s4937_s23 + $0x558] sm:$0xff] %v3331_v49  ;;  %v3204_v51 = vpack.c.bf16 %v2737_v50, %v2736_v48  ;;  %v1789_v52 = vpop.f32.mrf.mxu2 }
 0x237   : > { %v1790_v53 = vadd.f32 %v1789_v52, %v4927_v1  ;;  %v2438_v54 = vpop.f32.mrf.mxu3 }
 0x238   : > { %3460 = vst [vmem:[%s4937_s23 + $0x160] sm:$0xff] %v3204_v51  ;;  %v2439_v55 = vadd.f32 %v2438_v54, %v4929_v2  ;;  %v1471_v56 = vpop.f32.mrf.mxu0 }
 0x239   : > { %v2992_v57 = vmax.f32 %v1790_v53, 0.0  ;;  %v1472_v58 = vadd.f32 %v1471_v56, %v4927_v1  ;;  %v2120_v59 = vpop.f32.mrf.mxu1 }
 0x23a   : > { %v2993_v60 = vmax.f32 %v2439_v55, 0.0  ;;  %v2121_v61 = vadd.f32 %v2120_v59, %v4929_v2 }
 0x23b   : > { %v2738_v62 = vmax.f32 %v1472_v58, 0.0 }
 0x23c   : > { %v3332_v63 = vpack.c.bf16 %v2993_v60, %v2992_v57  ;;  %v2739_v0 = vmax.f32 %v2121_v61, 0.0 }
 0x23e   : > { %3588 = vst [vmem:[%s4937_s23 + $0x560] sm:$0xff] %v3332_v63  ;;  %v3205_v3 = vpack.c.bf16 %v2739_v0, %v2738_v62  ;;  %v1791_v4 = vpop.f32.mrf.mxu2 }
 0x23f   : > { %v1792_v5 = vadd.f32 %v1791_v4, %v4927_v1  ;;  %v2440_v6 = vpop.f32.mrf.mxu3 }
 0x240   : > { %3461 = vst [vmem:[%s4937_s23 + $0x168] sm:$0xff] %v3205_v3  ;;  %v2441_v9 = vadd.f32 %v2440_v6, %v4929_v2  ;;  %v1474_v10 = vpop.f32.mrf.mxu0  ;;  %v4474_v6 = vld [vmem:[%s4901_s30 + $0x308] sm:$0xff] }
 0x241   : > { %v2994_v11 = vmax.f32 %v1792_v5, 0.0  ;;  %v1475_v12 = vadd.f32 %v1474_v10, %v4927_v1  ;;  %v2123_v13 = vpop.f32.mrf.mxu1  ;;  %v4410_v5 = vld [vmem:[%s4901_s30 + $0x108] sm:$0xff] }
 0x242   : > { %v2995_v14 = vmax.f32 %v2441_v9, 0.0  ;;  %v2124_v15 = vadd.f32 %v2123_v13, %v4929_v2 }
 0x243   : > { %v2740_v16 = vmax.f32 %v1475_v12, 0.0  ;;  %1513 = vmatmul.bf16.gmra.mxu0 %v4408_v7  ;;  %1833 = vmatmul.bf16.gmra.mxu2 %v4472_v8 }
 0x244   : > { %v3333_v17 = vpack.c.bf16 %v2995_v14, %v2994_v11  ;;  %v2741_v18 = vmax.f32 %v2124_v15, 0.0  ;;  %2162 = vmatmul.bf16.gmra.mxu1 %v4408_v7  ;;  %2482 = vmatmul.bf16.gmra.mxu3 %v4472_v8 }
 0x246   : > { %3589 = vst [vmem:[%s4937_s23 + $0x568] sm:$0xff] %v3333_v17  ;;  %v3206_v19 = vpack.c.bf16 %v2741_v18, %v2740_v16  ;;  %v1794_v20 = vpop.f32.mrf.mxu2 }
 0x247   : > { %v1795_v21 = vadd.f32 %v1794_v20, %v4927_v1  ;;  %v2443_v22 = vpop.f32.mrf.mxu3 }
 0x248   : > { %3462 = vst [vmem:[%s4937_s23 + $0x170] sm:$0xff] %v3206_v19  ;;  %v2444_v23 = vadd.f32 %v2443_v22, %v4929_v2  ;;  %v1476_v24 = vpop.f32.mrf.mxu0 }
 0x249   : > { %v2996_v25 = vmax.f32 %v1795_v21, 0.0  ;;  %v1477_v26 = vadd.f32 %v1476_v24, %v4927_v1  ;;  %v2125_v27 = vpop.f32.mrf.mxu1 }
 0x24a   : > { %v2997_v28 = vmax.f32 %v2444_v23, 0.0  ;;  %v2126_v29 = vadd.f32 %v2125_v27, %v4929_v2 }
 0x24b   : > { %v2742_v30 = vmax.f32 %v1477_v26, 0.0 }
 0x24c   : > { %v3334_v31 = vpack.c.bf16 %v2997_v28, %v2996_v25  ;;  %v2743_v32 = vmax.f32 %v2126_v29, 0.0 }
 0x24e   : > { %3590 = vst [vmem:[%s4937_s23 + $0x570] sm:$0xff] %v3334_v31  ;;  %v3207_v33 = vpack.c.bf16 %v2743_v32, %v2742_v30  ;;  %v1796_v34 = vpop.f32.mrf.mxu2 }
 0x24f   : > { %v1797_v35 = vadd.f32 %v1796_v34, %v4927_v1  ;;  %v2445_v36 = vpop.f32.mrf.mxu3 }
 0x250   : > { %3463 = vst [vmem:[%s4937_s23 + $0x178] sm:$0xff] %v3207_v33  ;;  %v2446_v39 = vadd.f32 %v2445_v36, %v4929_v2  ;;  %v1479_v40 = vpop.f32.mrf.mxu0  ;;  %v4475_v36 = vld [vmem:[%s4901_s30 + $0x310] sm:$0xff] }
 0x251   : > { %v2998_v41 = vmax.f32 %v1797_v35, 0.0  ;;  %v1480_v42 = vadd.f32 %v1479_v40, %v4927_v1  ;;  %v2128_v43 = vpop.f32.mrf.mxu1  ;;  %v4411_v35 = vld [vmem:[%s4901_s30 + $0x110] sm:$0xff] }
 0x252   : > { %v2999_v44 = vmax.f32 %v2446_v39, 0.0  ;;  %v2129_v45 = vadd.f32 %v2128_v43, %v4929_v2 }
 0x253   : > { %v2744_v46 = vmax.f32 %v1480_v42, 0.0  ;;  %1518 = vmatmul.bf16.gmra.mxu0 %v4409_v37  ;;  %1838 = vmatmul.bf16.gmra.mxu2 %v4473_v38 }
 0x254   : > { %v3335_v47 = vpack.c.bf16 %v2999_v44, %v2998_v41  ;;  %v2745_v48 = vmax.f32 %v2129_v45, 0.0  ;;  %2167 = vmatmul.bf16.gmra.mxu1 %v4409_v37  ;;  %2487 = vmatmul.bf16.gmra.mxu3 %v4473_v38 }
 0x256   : > { %3591 = vst [vmem:[%s4937_s23 + $0x578] sm:$0xff] %v3335_v47  ;;  %v3208_v49 = vpack.c.bf16 %v2745_v48, %v2744_v46  ;;  %v1799_v50 = vpop.f32.mrf.mxu2 }
 0x257   : > { %v1800_v51 = vadd.f32 %v1799_v50, %v4927_v1  ;;  %v2448_v52 = vpop.f32.mrf.mxu3 }
 0x258   : > { %3464 = vst [vmem:[%s4937_s23 + $0x180] sm:$0xff] %v3208_v49  ;;  %v2449_v53 = vadd.f32 %v2448_v52, %v4929_v2  ;;  %v1481_v54 = vpop.f32.mrf.mxu0 }
 0x259   : > { %v3000_v55 = vmax.f32 %v1800_v51, 0.0  ;;  %v1482_v56 = vadd.f32 %v1481_v54, %v4927_v1  ;;  %v2130_v57 = vpop.f32.mrf.mxu1 }
 0x25a   : > { %v3001_v58 = vmax.f32 %v2449_v53, 0.0  ;;  %v2131_v59 = vadd.f32 %v2130_v57, %v4929_v2 }
 0x25b   : > { %v2746_v60 = vmax.f32 %v1482_v56, 0.0 }
 0x25c   : > { %v3336_v61 = vpack.c.bf16 %v3001_v58, %v3000_v55  ;;  %v2747_v62 = vmax.f32 %v2131_v59, 0.0 }
 0x25e   : > { %3592 = vst [vmem:[%s4937_s23 + $0x580] sm:$0xff] %v3336_v61  ;;  %v3209_v63 = vpack.c.bf16 %v2747_v62, %v2746_v60  ;;  %v1801_v0 = vpop.f32.mrf.mxu2 }
 0x25f   : > { %v1802_v3 = vadd.f32 %v1801_v0, %v4927_v1  ;;  %v2450_v4 = vpop.f32.mrf.mxu3 }
 0x260   : > { %3465 = vst [vmem:[%s4937_s23 + $0x188] sm:$0xff] %v3209_v63  ;;  %v2451_v7 = vadd.f32 %v2450_v4, %v4929_v2  ;;  %v1484_v8 = vpop.f32.mrf.mxu0  ;;  %v4476_v4 = vld [vmem:[%s4901_s30 + $0x318] sm:$0xff] }
 0x261   : > { %v3002_v9 = vmax.f32 %v1802_v3, 0.0  ;;  %v1485_v10 = vadd.f32 %v1484_v8, %v4927_v1  ;;  %v2133_v11 = vpop.f32.mrf.mxu1  ;;  %v4412_v3 = vld [vmem:[%s4901_s30 + $0x118] sm:$0xff] }
 0x262   : > { %v3003_v12 = vmax.f32 %v2451_v7, 0.0  ;;  %v2134_v13 = vadd.f32 %v2133_v11, %v4929_v2 }
 0x263   : > { %v2748_v14 = vmax.f32 %v1485_v10, 0.0  ;;  %1523 = vmatmul.bf16.gmra.mxu0 %v4410_v5  ;;  %1843 = vmatmul.bf16.gmra.mxu2 %v4474_v6 }
 0x264   : > { %v3337_v15 = vpack.c.bf16 %v3003_v12, %v3002_v9  ;;  %v2749_v16 = vmax.f32 %v2134_v13, 0.0  ;;  %2172 = vmatmul.bf16.gmra.mxu1 %v4410_v5  ;;  %2492 = vmatmul.bf16.gmra.mxu3 %v4474_v6 }
 0x266   : > { %3593 = vst [vmem:[%s4937_s23 + $0x588] sm:$0xff] %v3337_v15  ;;  %v3210_v17 = vpack.c.bf16 %v2749_v16, %v2748_v14  ;;  %v1804_v18 = vpop.f32.mrf.mxu2 }
 0x267   : > { %v1805_v19 = vadd.f32 %v1804_v18, %v4927_v1  ;;  %v2453_v20 = vpop.f32.mrf.mxu3 }
 0x268   : > { %3466 = vst [vmem:[%s4937_s23 + $0x190] sm:$0xff] %v3210_v17  ;;  %v2454_v21 = vadd.f32 %v2453_v20, %v4929_v2  ;;  %v1486_v22 = vpop.f32.mrf.mxu0 }
 0x269   : > { %v3004_v23 = vmax.f32 %v1805_v19, 0.0  ;;  %v1487_v24 = vadd.f32 %v1486_v22, %v4927_v1  ;;  %v2135_v25 = vpop.f32.mrf.mxu1 }
 0x26a   : > { %v3005_v26 = vmax.f32 %v2454_v21, 0.0  ;;  %v2136_v27 = vadd.f32 %v2135_v25, %v4929_v2 }
 0x26b   : > { %v2750_v28 = vmax.f32 %v1487_v24, 0.0 }
 0x26c   : > { %v3338_v29 = vpack.c.bf16 %v3005_v26, %v3004_v23  ;;  %v2751_v30 = vmax.f32 %v2136_v27, 0.0 }
 0x26e   : > { %3594 = vst [vmem:[%s4937_s23 + $0x590] sm:$0xff] %v3338_v29  ;;  %v3211_v31 = vpack.c.bf16 %v2751_v30, %v2750_v28  ;;  %v1806_v32 = vpop.f32.mrf.mxu2 }
 0x26f   : > { %v1807_v33 = vadd.f32 %v1806_v32, %v4927_v1  ;;  %v2455_v34 = vpop.f32.mrf.mxu3 }
 0x270   : > { %3467 = vst [vmem:[%s4937_s23 + $0x198] sm:$0xff] %v3211_v31  ;;  %v2456_v37 = vadd.f32 %v2455_v34, %v4929_v2  ;;  %v1489_v38 = vpop.f32.mrf.mxu0  ;;  %v4477_v34 = vld [vmem:[%s4901_s30 + $0x320] sm:$0xff] }
 0x271   : > { %v3006_v39 = vmax.f32 %v1807_v33, 0.0  ;;  %v1490_v40 = vadd.f32 %v1489_v38, %v4927_v1  ;;  %v2138_v41 = vpop.f32.mrf.mxu1  ;;  %v4413_v33 = vld [vmem:[%s4901_s30 + $0x120] sm:$0xff] }
 0x272   : > { %v3007_v42 = vmax.f32 %v2456_v37, 0.0  ;;  %v2139_v43 = vadd.f32 %v2138_v41, %v4929_v2 }
 0x273   : > { %v2752_v44 = vmax.f32 %v1490_v40, 0.0  ;;  %1528 = vmatmul.bf16.gmra.mxu0 %v4411_v35  ;;  %1848 = vmatmul.bf16.gmra.mxu2 %v4475_v36 }
 0x274   : > { %v3339_v45 = vpack.c.bf16 %v3007_v42, %v3006_v39  ;;  %v2753_v46 = vmax.f32 %v2139_v43, 0.0  ;;  %2177 = vmatmul.bf16.gmra.mxu1 %v4411_v35  ;;  %2497 = vmatmul.bf16.gmra.mxu3 %v4475_v36 }
 0x276   : > { %3595 = vst [vmem:[%s4937_s23 + $0x598] sm:$0xff] %v3339_v45  ;;  %v3212_v47 = vpack.c.bf16 %v2753_v46, %v2752_v44  ;;  %v1809_v48 = vpop.f32.mrf.mxu2 }
 0x277   : > { %v1810_v49 = vadd.f32 %v1809_v48, %v4927_v1  ;;  %v2458_v50 = vpop.f32.mrf.mxu3 }
 0x278   : > { %3468 = vst [vmem:[%s4937_s23 + $0x1a0] sm:$0xff] %v3212_v47  ;;  %v2459_v51 = vadd.f32 %v2458_v50, %v4929_v2  ;;  %v1491_v52 = vpop.f32.mrf.mxu0 }
 0x279   : > { %v3008_v53 = vmax.f32 %v1810_v49, 0.0  ;;  %v1492_v54 = vadd.f32 %v1491_v52, %v4927_v1  ;;  %v2140_v55 = vpop.f32.mrf.mxu1 }
 0x27a   : > { %v3009_v56 = vmax.f32 %v2459_v51, 0.0  ;;  %v2141_v57 = vadd.f32 %v2140_v55, %v4929_v2 }
 0x27b   : > { %v2754_v58 = vmax.f32 %v1492_v54, 0.0 }
 0x27c   : > { %v3340_v59 = vpack.c.bf16 %v3009_v56, %v3008_v53  ;;  %v2755_v60 = vmax.f32 %v2141_v57, 0.0 }
 0x27e   : > { %3596 = vst [vmem:[%s4937_s23 + $0x5a0] sm:$0xff] %v3340_v59  ;;  %v3213_v61 = vpack.c.bf16 %v2755_v60, %v2754_v58  ;;  %v1811_v62 = vpop.f32.mrf.mxu2 }
 0x27f   : > { %v1812_v63 = vadd.f32 %v1811_v62, %v4927_v1  ;;  %v2460_v0 = vpop.f32.mrf.mxu3 }
 0x280   : > { %3469 = vst [vmem:[%s4937_s23 + $0x1a8] sm:$0xff] %v3213_v61  ;;  %v2461_v5 = vadd.f32 %v2460_v0, %v4929_v2  ;;  %v1494_v6 = vpop.f32.mrf.mxu0  ;;  %v4478_v0 = vld [vmem:[%s4901_s30 + $0x328] sm:$0xff] }
 0x281   : > { %v3010_v7 = vmax.f32 %v1812_v63, 0.0  ;;  %v1495_v8 = vadd.f32 %v1494_v6, %v4927_v1  ;;  %v2143_v9 = vpop.f32.mrf.mxu1  ;;  %v4414_v63 = vld [vmem:[%s4901_s30 + $0x128] sm:$0xff] }
 0x282   : > { %v3011_v10 = vmax.f32 %v2461_v5, 0.0  ;;  %v2144_v11 = vadd.f32 %v2143_v9, %v4929_v2 }
 0x283   : > { %v2756_v12 = vmax.f32 %v1495_v8, 0.0  ;;  %1533 = vmatmul.bf16.gmra.mxu0 %v4412_v3  ;;  %1853 = vmatmul.bf16.gmra.mxu2 %v4476_v4 }
 0x284   : > { %v3341_v13 = vpack.c.bf16 %v3011_v10, %v3010_v7  ;;  %v2757_v14 = vmax.f32 %v2144_v11, 0.0  ;;  %2182 = vmatmul.bf16.gmra.mxu1 %v4412_v3  ;;  %2502 = vmatmul.bf16.gmra.mxu3 %v4476_v4 }
 0x286   : > { %3597 = vst [vmem:[%s4937_s23 + $0x5a8] sm:$0xff] %v3341_v13  ;;  %v3214_v15 = vpack.c.bf16 %v2757_v14, %v2756_v12  ;;  %v1814_v16 = vpop.f32.mrf.mxu2 }
 0x287   : > { %v1815_v17 = vadd.f32 %v1814_v16, %v4927_v1  ;;  %v2463_v18 = vpop.f32.mrf.mxu3 }
 0x288   : > { %3470 = vst [vmem:[%s4937_s23 + $0x1b0] sm:$0xff] %v3214_v15  ;;  %v2464_v19 = vadd.f32 %v2463_v18, %v4929_v2  ;;  %v1496_v20 = vpop.f32.mrf.mxu0 }
 0x289   : > { %v3012_v21 = vmax.f32 %v1815_v17, 0.0  ;;  %v1497_v22 = vadd.f32 %v1496_v20, %v4927_v1  ;;  %v2145_v23 = vpop.f32.mrf.mxu1 }
 0x28a   : > { %v3013_v24 = vmax.f32 %v2464_v19, 0.0  ;;  %v2146_v25 = vadd.f32 %v2145_v23, %v4929_v2 }
 0x28b   : > { %v2758_v26 = vmax.f32 %v1497_v22, 0.0 }
 0x28c   : > { %v3342_v27 = vpack.c.bf16 %v3013_v24, %v3012_v21  ;;  %v2759_v28 = vmax.f32 %v2146_v25, 0.0 }
 0x28e   : > { %3598 = vst [vmem:[%s4937_s23 + $0x5b0] sm:$0xff] %v3342_v27  ;;  %v3215_v29 = vpack.c.bf16 %v2759_v28, %v2758_v26  ;;  %v1816_v30 = vpop.f32.mrf.mxu2 }
 0x28f   : > { %v1817_v31 = vadd.f32 %v1816_v30, %v4927_v1  ;;  %v2465_v32 = vpop.f32.mrf.mxu3 }
 0x290   : > { %3471 = vst [vmem:[%s4937_s23 + $0x1b8] sm:$0xff] %v3215_v29  ;;  %v2466_v35 = vadd.f32 %v2465_v32, %v4929_v2  ;;  %v1499_v36 = vpop.f32.mrf.mxu0  ;;  %v4479_v32 = vld [vmem:[%s4901_s30 + $0x330] sm:$0xff] }
 0x291   : > { %v3014_v37 = vmax.f32 %v1817_v31, 0.0  ;;  %v1500_v38 = vadd.f32 %v1499_v36, %v4927_v1  ;;  %v2148_v39 = vpop.f32.mrf.mxu1  ;;  %v4415_v31 = vld [vmem:[%s4901_s30 + $0x130] sm:$0xff] }
 0x292   : > { %v3015_v40 = vmax.f32 %v2466_v35, 0.0  ;;  %v2149_v41 = vadd.f32 %v2148_v39, %v4929_v2 }
 0x293   : > { %v2760_v42 = vmax.f32 %v1500_v38, 0.0  ;;  %1538 = vmatmul.bf16.gmra.mxu0 %v4413_v33  ;;  %1858 = vmatmul.bf16.gmra.mxu2 %v4477_v34 }
 0x294   : > { %v3343_v43 = vpack.c.bf16 %v3015_v40, %v3014_v37  ;;  %v2761_v44 = vmax.f32 %v2149_v41, 0.0  ;;  %2187 = vmatmul.bf16.gmra.mxu1 %v4413_v33  ;;  %2507 = vmatmul.bf16.gmra.mxu3 %v4477_v34 }
 0x296   : > { %3599 = vst [vmem:[%s4937_s23 + $0x5b8] sm:$0xff] %v3343_v43  ;;  %v3216_v45 = vpack.c.bf16 %v2761_v44, %v2760_v42  ;;  %v1819_v46 = vpop.f32.mrf.mxu2 }
 0x297   : > { %v1820_v47 = vadd.f32 %v1819_v46, %v4927_v1  ;;  %v2468_v48 = vpop.f32.mrf.mxu3 }
 0x298   : > { %3472 = vst [vmem:[%s4937_s23 + $0x1c0] sm:$0xff] %v3216_v45  ;;  %v2469_v49 = vadd.f32 %v2468_v48, %v4929_v2  ;;  %v1501_v50 = vpop.f32.mrf.mxu0 }
 0x299   : > { %v3016_v51 = vmax.f32 %v1820_v47, 0.0  ;;  %v1502_v52 = vadd.f32 %v1501_v50, %v4927_v1  ;;  %v2150_v53 = vpop.f32.mrf.mxu1 }
 0x29a   : > { %v3017_v54 = vmax.f32 %v2469_v49, 0.0  ;;  %v2151_v55 = vadd.f32 %v2150_v53, %v4929_v2 }
 0x29b   : > { %v2762_v56 = vmax.f32 %v1502_v52, 0.0 }
 0x29c   : > { %v3344_v57 = vpack.c.bf16 %v3017_v54, %v3016_v51  ;;  %v2763_v58 = vmax.f32 %v2151_v55, 0.0 }
 0x29e   : > { %3600 = vst [vmem:[%s4937_s23 + $0x5c0] sm:$0xff] %v3344_v57  ;;  %v3217_v59 = vpack.c.bf16 %v2763_v58, %v2762_v56  ;;  %v1821_v60 = vpop.f32.mrf.mxu2 }
 0x29f   : > { %v1822_v61 = vadd.f32 %v1821_v60, %v4927_v1  ;;  %v2470_v62 = vpop.f32.mrf.mxu3 }
 0x2a0   : > { %3473 = vst [vmem:[%s4937_s23 + $0x1c8] sm:$0xff] %v3217_v59  ;;  %v2471_v3 = vadd.f32 %v2470_v62, %v4929_v2  ;;  %v1504_v4 = vpop.f32.mrf.mxu0  ;;  %v4480_v62 = vld [vmem:[%s4901_s30 + $0x338] sm:$0xff] }
 0x2a1   : > { %v3018_v5 = vmax.f32 %v1822_v61, 0.0  ;;  %v1505_v6 = vadd.f32 %v1504_v4, %v4927_v1  ;;  %v2153_v7 = vpop.f32.mrf.mxu1  ;;  %v4416_v61 = vld [vmem:[%s4901_s30 + $0x138] sm:$0xff] }
 0x2a2   : > { %v3019_v8 = vmax.f32 %v2471_v3, 0.0  ;;  %v2154_v9 = vadd.f32 %v2153_v7, %v4929_v2 }
 0x2a3   : > { %v2764_v10 = vmax.f32 %v1505_v6, 0.0  ;;  %1543 = vmatmul.bf16.gmra.mxu0 %v4414_v63  ;;  %1863 = vmatmul.bf16.gmra.mxu2 %v4478_v0 }
 0x2a4   : > { %v3345_v11 = vpack.c.bf16 %v3019_v8, %v3018_v5  ;;  %v2765_v12 = vmax.f32 %v2154_v9, 0.0  ;;  %2192 = vmatmul.bf16.gmra.mxu1 %v4414_v63  ;;  %2512 = vmatmul.bf16.gmra.mxu3 %v4478_v0 }
 0x2a6   : > { %3601 = vst [vmem:[%s4937_s23 + $0x5c8] sm:$0xff] %v3345_v11  ;;  %v3218_v13 = vpack.c.bf16 %v2765_v12, %v2764_v10  ;;  %v1824_v14 = vpop.f32.mrf.mxu2 }
 0x2a7   : > { %v1825_v15 = vadd.f32 %v1824_v14, %v4927_v1  ;;  %v2473_v16 = vpop.f32.mrf.mxu3 }
 0x2a8   : > { %3474 = vst [vmem:[%s4937_s23 + $0x1d0] sm:$0xff] %v3218_v13  ;;  %v2474_v17 = vadd.f32 %v2473_v16, %v4929_v2  ;;  %v1506_v18 = vpop.f32.mrf.mxu0 }
 0x2a9   : > { %v3020_v19 = vmax.f32 %v1825_v15, 0.0  ;;  %v1507_v20 = vadd.f32 %v1506_v18, %v4927_v1  ;;  %v2155_v21 = vpop.f32.mrf.mxu1 }
 0x2aa   : > { %v3021_v22 = vmax.f32 %v2474_v17, 0.0  ;;  %v2156_v23 = vadd.f32 %v2155_v21, %v4929_v2 }
 0x2ab   : > { %v2766_v24 = vmax.f32 %v1507_v20, 0.0 }
 0x2ac   : > { %v3346_v25 = vpack.c.bf16 %v3021_v22, %v3020_v19  ;;  %v2767_v26 = vmax.f32 %v2156_v23, 0.0 }
 0x2ae   : > { %3602 = vst [vmem:[%s4937_s23 + $0x5d0] sm:$0xff] %v3346_v25  ;;  %v3219_v27 = vpack.c.bf16 %v2767_v26, %v2766_v24  ;;  %v1826_v28 = vpop.f32.mrf.mxu2 }
 0x2af   : > { %v1827_v29 = vadd.f32 %v1826_v28, %v4927_v1  ;;  %v2475_v30 = vpop.f32.mrf.mxu3 }
 0x2b0   : > { %3475 = vst [vmem:[%s4937_s23 + $0x1d8] sm:$0xff] %v3219_v27  ;;  %v2476_v33 = vadd.f32 %v2475_v30, %v4929_v2  ;;  %v1509_v34 = vpop.f32.mrf.mxu0  ;;  %v4481_v30 = vld [vmem:[%s4901_s30 + $0x340] sm:$0xff] }
 0x2b1   : > { %v3022_v35 = vmax.f32 %v1827_v29, 0.0  ;;  %v1510_v36 = vadd.f32 %v1509_v34, %v4927_v1  ;;  %v2158_v37 = vpop.f32.mrf.mxu1  ;;  %v4417_v29 = vld [vmem:[%s4901_s30 + $0x140] sm:$0xff] }
 0x2b2   : > { %v3023_v38 = vmax.f32 %v2476_v33, 0.0  ;;  %v2159_v39 = vadd.f32 %v2158_v37, %v4929_v2 }
 0x2b3   : > { %v2768_v40 = vmax.f32 %v1510_v36, 0.0  ;;  %1548 = vmatmul.bf16.gmra.mxu0 %v4415_v31  ;;  %1868 = vmatmul.bf16.gmra.mxu2 %v4479_v32 }
 0x2b4   : > { %v3347_v41 = vpack.c.bf16 %v3023_v38, %v3022_v35  ;;  %v2769_v42 = vmax.f32 %v2159_v39, 0.0  ;;  %2197 = vmatmul.bf16.gmra.mxu1 %v4415_v31  ;;  %2517 = vmatmul.bf16.gmra.mxu3 %v4479_v32 }
 0x2b6   : > { %3603 = vst [vmem:[%s4937_s23 + $0x5d8] sm:$0xff] %v3347_v41  ;;  %v3220_v43 = vpack.c.bf16 %v2769_v42, %v2768_v40  ;;  %v1829_v44 = vpop.f32.mrf.mxu2 }
 0x2b7   : > { %v1830_v45 = vadd.f32 %v1829_v44, %v4927_v1  ;;  %v2478_v46 = vpop.f32.mrf.mxu3 }
 0x2b8   : > { %3476 = vst [vmem:[%s4937_s23 + $0x1e0] sm:$0xff] %v3220_v43  ;;  %v2479_v47 = vadd.f32 %v2478_v46, %v4929_v2  ;;  %v1511_v48 = vpop.f32.mrf.mxu0 }
 0x2b9   : > { %v3024_v49 = vmax.f32 %v1830_v45, 0.0  ;;  %v1512_v50 = vadd.f32 %v1511_v48, %v4927_v1  ;;  %v2160_v51 = vpop.f32.mrf.mxu1 }
 0x2ba   : > { %v3025_v52 = vmax.f32 %v2479_v47, 0.0  ;;  %v2161_v53 = vadd.f32 %v2160_v51, %v4929_v2 }
 0x2bb   : > { %v2770_v54 = vmax.f32 %v1512_v50, 0.0 }
 0x2bc   : > { %v3348_v55 = vpack.c.bf16 %v3025_v52, %v3024_v49  ;;  %v2771_v56 = vmax.f32 %v2161_v53, 0.0 }
 0x2be   : > { %3604 = vst [vmem:[%s4937_s23 + $0x5e0] sm:$0xff] %v3348_v55  ;;  %v3221_v57 = vpack.c.bf16 %v2771_v56, %v2770_v54  ;;  %v1831_v58 = vpop.f32.mrf.mxu2 }
 0x2bf   : > { %v1832_v59 = vadd.f32 %v1831_v58, %v4927_v1  ;;  %v2480_v60 = vpop.f32.mrf.mxu3 }
 0x2c0   : > { %3477 = vst [vmem:[%s4937_s23 + $0x1e8] sm:$0xff] %v3221_v57  ;;  %v2481_v63 = vadd.f32 %v2480_v60, %v4929_v2  ;;  %v1514_v0 = vpop.f32.mrf.mxu0  ;;  %v4482_v60 = vld [vmem:[%s4901_s30 + $0x348] sm:$0xff] }
 0x2c1   : > { %v3026_v3 = vmax.f32 %v1832_v59, 0.0  ;;  %v1515_v4 = vadd.f32 %v1514_v0, %v4927_v1  ;;  %v2163_v5 = vpop.f32.mrf.mxu1  ;;  %v4418_v59 = vld [vmem:[%s4901_s30 + $0x148] sm:$0xff] }
 0x2c2   : > { %v3027_v6 = vmax.f32 %v2481_v63, 0.0  ;;  %v2164_v7 = vadd.f32 %v2163_v5, %v4929_v2 }
 0x2c3   : > { %v2772_v8 = vmax.f32 %v1515_v4, 0.0  ;;  %1553 = vmatmul.bf16.gmra.mxu0 %v4416_v61  ;;  %1873 = vmatmul.bf16.gmra.mxu2 %v4480_v62 }
 0x2c4   : > { %v3349_v9 = vpack.c.bf16 %v3027_v6, %v3026_v3  ;;  %v2773_v10 = vmax.f32 %v2164_v7, 0.0  ;;  %2202 = vmatmul.bf16.gmra.mxu1 %v4416_v61  ;;  %2522 = vmatmul.bf16.gmra.mxu3 %v4480_v62 }
 0x2c6   : > { %3605 = vst [vmem:[%s4937_s23 + $0x5e8] sm:$0xff] %v3349_v9  ;;  %v3222_v11 = vpack.c.bf16 %v2773_v10, %v2772_v8  ;;  %v1834_v12 = vpop.f32.mrf.mxu2 }
 0x2c7   : > { %v1835_v13 = vadd.f32 %v1834_v12, %v4927_v1  ;;  %v2483_v14 = vpop.f32.mrf.mxu3 }
 0x2c8   : > { %3478 = vst [vmem:[%s4937_s23 + $0x1f0] sm:$0xff] %v3222_v11  ;;  %v2484_v15 = vadd.f32 %v2483_v14, %v4929_v2  ;;  %v1516_v16 = vpop.f32.mrf.mxu0 }
 0x2c9   : > { %v3028_v17 = vmax.f32 %v1835_v13, 0.0  ;;  %v1517_v18 = vadd.f32 %v1516_v16, %v4927_v1  ;;  %v2165_v19 = vpop.f32.mrf.mxu1 }
 0x2ca   : > { %v3029_v20 = vmax.f32 %v2484_v15, 0.0  ;;  %v2166_v21 = vadd.f32 %v2165_v19, %v4929_v2 }
 0x2cb   : > { %v2774_v22 = vmax.f32 %v1517_v18, 0.0 }
 0x2cc   : > { %v3350_v23 = vpack.c.bf16 %v3029_v20, %v3028_v17  ;;  %v2775_v24 = vmax.f32 %v2166_v21, 0.0 }
 0x2ce   : > { %3606 = vst [vmem:[%s4937_s23 + $0x5f0] sm:$0xff] %v3350_v23  ;;  %v3223_v25 = vpack.c.bf16 %v2775_v24, %v2774_v22  ;;  %v1836_v26 = vpop.f32.mrf.mxu2 }
 0x2cf   : > { %v1837_v27 = vadd.f32 %v1836_v26, %v4927_v1  ;;  %v2485_v28 = vpop.f32.mrf.mxu3 }
 0x2d0   : > { %3479 = vst [vmem:[%s4937_s23 + $0x1f8] sm:$0xff] %v3223_v25  ;;  %v2486_v31 = vadd.f32 %v2485_v28, %v4929_v2  ;;  %v1519_v32 = vpop.f32.mrf.mxu0  ;;  %v4483_v28 = vld [vmem:[%s4901_s30 + $0x350] sm:$0xff] }
 0x2d1   : > { %v3030_v33 = vmax.f32 %v1837_v27, 0.0  ;;  %v1520_v34 = vadd.f32 %v1519_v32, %v4927_v1  ;;  %v2168_v35 = vpop.f32.mrf.mxu1  ;;  %v4419_v27 = vld [vmem:[%s4901_s30 + $0x150] sm:$0xff] }
 0x2d2   : > { %v3031_v36 = vmax.f32 %v2486_v31, 0.0  ;;  %v2169_v37 = vadd.f32 %v2168_v35, %v4929_v2 }
 0x2d3   : > { %v2776_v38 = vmax.f32 %v1520_v34, 0.0  ;;  %1558 = vmatmul.bf16.gmra.mxu0 %v4417_v29  ;;  %1878 = vmatmul.bf16.gmra.mxu2 %v4481_v30 }
 0x2d4   : > { %v3351_v39 = vpack.c.bf16 %v3031_v36, %v3030_v33  ;;  %v2777_v40 = vmax.f32 %v2169_v37, 0.0  ;;  %2207 = vmatmul.bf16.gmra.mxu1 %v4417_v29  ;;  %2527 = vmatmul.bf16.gmra.mxu3 %v4481_v30 }
 0x2d6   : > { %3607 = vst [vmem:[%s4937_s23 + $0x5f8] sm:$0xff] %v3351_v39  ;;  %v3224_v41 = vpack.c.bf16 %v2777_v40, %v2776_v38  ;;  %v1839_v42 = vpop.f32.mrf.mxu2 }
 0x2d7   : > { %v1840_v43 = vadd.f32 %v1839_v42, %v4927_v1  ;;  %v2488_v44 = vpop.f32.mrf.mxu3 }
 0x2d8   : > { %3480 = vst [vmem:[%s4937_s23 + $0x200] sm:$0xff] %v3224_v41  ;;  %v2489_v45 = vadd.f32 %v2488_v44, %v4929_v2  ;;  %v1521_v46 = vpop.f32.mrf.mxu0 }
 0x2d9   : > { %v3032_v47 = vmax.f32 %v1840_v43, 0.0  ;;  %v1522_v48 = vadd.f32 %v1521_v46, %v4927_v1  ;;  %v2170_v49 = vpop.f32.mrf.mxu1 }
 0x2da   : > { %v3033_v50 = vmax.f32 %v2489_v45, 0.0  ;;  %v2171_v51 = vadd.f32 %v2170_v49, %v4929_v2 }
 0x2db   : > { %v2778_v52 = vmax.f32 %v1522_v48, 0.0 }
 0x2dc   : > { %v3352_v53 = vpack.c.bf16 %v3033_v50, %v3032_v47  ;;  %v2779_v54 = vmax.f32 %v2171_v51, 0.0 }
 0x2de   : > { %3608 = vst [vmem:[%s4937_s23 + $0x600] sm:$0xff] %v3352_v53  ;;  %v3225_v55 = vpack.c.bf16 %v2779_v54, %v2778_v52  ;;  %v1841_v56 = vpop.f32.mrf.mxu2 }
 0x2df   : > { %v1842_v57 = vadd.f32 %v1841_v56, %v4927_v1  ;;  %v2490_v58 = vpop.f32.mrf.mxu3 }
 0x2e0   : > { %3481 = vst [vmem:[%s4937_s23 + $0x208] sm:$0xff] %v3225_v55  ;;  %v2491_v61 = vadd.f32 %v2490_v58, %v4929_v2  ;;  %v1524_v62 = vpop.f32.mrf.mxu0  ;;  %v4484_v58 = vld [vmem:[%s4901_s30 + $0x358] sm:$0xff] }
 0x2e1   : > { %v3034_v63 = vmax.f32 %v1842_v57, 0.0  ;;  %v1525_v0 = vadd.f32 %v1524_v62, %v4927_v1  ;;  %v2173_v3 = vpop.f32.mrf.mxu1  ;;  %v4420_v57 = vld [vmem:[%s4901_s30 + $0x158] sm:$0xff] }
 0x2e2   : > { %v3035_v4 = vmax.f32 %v2491_v61, 0.0  ;;  %v2174_v5 = vadd.f32 %v2173_v3, %v4929_v2 }
 0x2e3   : > { %v2780_v6 = vmax.f32 %v1525_v0, 0.0  ;;  %1563 = vmatmul.bf16.gmra.mxu0 %v4418_v59  ;;  %1883 = vmatmul.bf16.gmra.mxu2 %v4482_v60 }
 0x2e4   : > { %v3353_v7 = vpack.c.bf16 %v3035_v4, %v3034_v63  ;;  %v2781_v8 = vmax.f32 %v2174_v5, 0.0  ;;  %2212 = vmatmul.bf16.gmra.mxu1 %v4418_v59  ;;  %2532 = vmatmul.bf16.gmra.mxu3 %v4482_v60 }
 0x2e6   : > { %3609 = vst [vmem:[%s4937_s23 + $0x608] sm:$0xff] %v3353_v7  ;;  %v3226_v9 = vpack.c.bf16 %v2781_v8, %v2780_v6  ;;  %v1844_v10 = vpop.f32.mrf.mxu2 }
 0x2e7   : > { %v1845_v11 = vadd.f32 %v1844_v10, %v4927_v1  ;;  %v2493_v12 = vpop.f32.mrf.mxu3 }
 0x2e8   : > { %3482 = vst [vmem:[%s4937_s23 + $0x210] sm:$0xff] %v3226_v9  ;;  %v2494_v13 = vadd.f32 %v2493_v12, %v4929_v2  ;;  %v1526_v14 = vpop.f32.mrf.mxu0 }
 0x2e9   : > { %v3036_v15 = vmax.f32 %v1845_v11, 0.0  ;;  %v1527_v16 = vadd.f32 %v1526_v14, %v4927_v1  ;;  %v2175_v17 = vpop.f32.mrf.mxu1 }
 0x2ea   : > { %v3037_v18 = vmax.f32 %v2494_v13, 0.0  ;;  %v2176_v19 = vadd.f32 %v2175_v17, %v4929_v2 }
 0x2eb   : > { %v2782_v20 = vmax.f32 %v1527_v16, 0.0 }
 0x2ec   : > { %v3354_v21 = vpack.c.bf16 %v3037_v18, %v3036_v15  ;;  %v2783_v22 = vmax.f32 %v2176_v19, 0.0 }
 0x2ee   : > { %3610 = vst [vmem:[%s4937_s23 + $0x610] sm:$0xff] %v3354_v21  ;;  %v3227_v23 = vpack.c.bf16 %v2783_v22, %v2782_v20  ;;  %v1846_v24 = vpop.f32.mrf.mxu2 }
 0x2ef   : > { %v1847_v25 = vadd.f32 %v1846_v24, %v4927_v1  ;;  %v2495_v26 = vpop.f32.mrf.mxu3 }
 0x2f0   : > { %3483 = vst [vmem:[%s4937_s23 + $0x218] sm:$0xff] %v3227_v23  ;;  %v2496_v29 = vadd.f32 %v2495_v26, %v4929_v2  ;;  %v1529_v30 = vpop.f32.mrf.mxu0  ;;  %v4485_v26 = vld [vmem:[%s4901_s30 + $0x360] sm:$0xff] }
 0x2f1   : > { %v3038_v31 = vmax.f32 %v1847_v25, 0.0  ;;  %v1530_v32 = vadd.f32 %v1529_v30, %v4927_v1  ;;  %v2178_v33 = vpop.f32.mrf.mxu1  ;;  %v4421_v25 = vld [vmem:[%s4901_s30 + $0x160] sm:$0xff] }
 0x2f2   : > { %v3039_v34 = vmax.f32 %v2496_v29, 0.0  ;;  %v2179_v35 = vadd.f32 %v2178_v33, %v4929_v2 }
 0x2f3   : > { %v2784_v36 = vmax.f32 %v1530_v32, 0.0  ;;  %1568 = vmatmul.bf16.gmra.mxu0 %v4419_v27  ;;  %1888 = vmatmul.bf16.gmra.mxu2 %v4483_v28 }
 0x2f4   : > { %v3355_v37 = vpack.c.bf16 %v3039_v34, %v3038_v31  ;;  %v2785_v38 = vmax.f32 %v2179_v35, 0.0  ;;  %2217 = vmatmul.bf16.gmra.mxu1 %v4419_v27  ;;  %2537 = vmatmul.bf16.gmra.mxu3 %v4483_v28 }
 0x2f6   : > { %3611 = vst [vmem:[%s4937_s23 + $0x618] sm:$0xff] %v3355_v37  ;;  %v3228_v39 = vpack.c.bf16 %v2785_v38, %v2784_v36  ;;  %v1849_v40 = vpop.f32.mrf.mxu2 }
 0x2f7   : > { %v1850_v41 = vadd.f32 %v1849_v40, %v4927_v1  ;;  %v2498_v42 = vpop.f32.mrf.mxu3 }
 0x2f8   : > { %3484 = vst [vmem:[%s4937_s23 + $0x220] sm:$0xff] %v3228_v39  ;;  %v2499_v43 = vadd.f32 %v2498_v42, %v4929_v2  ;;  %v1531_v44 = vpop.f32.mrf.mxu0 }
 0x2f9   : > { %v3040_v45 = vmax.f32 %v1850_v41, 0.0  ;;  %v1532_v46 = vadd.f32 %v1531_v44, %v4927_v1  ;;  %v2180_v47 = vpop.f32.mrf.mxu1 }
 0x2fa   : > { %v3041_v48 = vmax.f32 %v2499_v43, 0.0  ;;  %v2181_v49 = vadd.f32 %v2180_v47, %v4929_v2 }
 0x2fb   : > { %v2786_v50 = vmax.f32 %v1532_v46, 0.0 }
 0x2fc   : > { %v3356_v51 = vpack.c.bf16 %v3041_v48, %v3040_v45  ;;  %v2787_v52 = vmax.f32 %v2181_v49, 0.0 }
 0x2fe   : > { %3612 = vst [vmem:[%s4937_s23 + $0x620] sm:$0xff] %v3356_v51  ;;  %v3229_v53 = vpack.c.bf16 %v2787_v52, %v2786_v50  ;;  %v1851_v54 = vpop.f32.mrf.mxu2 }
 0x2ff   : > { %v1852_v55 = vadd.f32 %v1851_v54, %v4927_v1  ;;  %v2500_v56 = vpop.f32.mrf.mxu3 }
 0x300   : > { %3485 = vst [vmem:[%s4937_s23 + $0x228] sm:$0xff] %v3229_v53  ;;  %v2501_v59 = vadd.f32 %v2500_v56, %v4929_v2  ;;  %v1534_v60 = vpop.f32.mrf.mxu0  ;;  %v4486_v56 = vld [vmem:[%s4901_s30 + $0x368] sm:$0xff] }
 0x301   : > { %v3042_v61 = vmax.f32 %v1852_v55, 0.0  ;;  %v1535_v62 = vadd.f32 %v1534_v60, %v4927_v1  ;;  %v2183_v63 = vpop.f32.mrf.mxu1  ;;  %v4422_v55 = vld [vmem:[%s4901_s30 + $0x168] sm:$0xff] }
 0x302   : > { %v3043_v0 = vmax.f32 %v2501_v59, 0.0  ;;  %v2184_v3 = vadd.f32 %v2183_v63, %v4929_v2 }
 0x303   : > { %v2788_v4 = vmax.f32 %v1535_v62, 0.0  ;;  %1573 = vmatmul.bf16.gmra.mxu0 %v4420_v57  ;;  %1893 = vmatmul.bf16.gmra.mxu2 %v4484_v58 }
 0x304   : > { %v3357_v5 = vpack.c.bf16 %v3043_v0, %v3042_v61  ;;  %v2789_v6 = vmax.f32 %v2184_v3, 0.0  ;;  %2222 = vmatmul.bf16.gmra.mxu1 %v4420_v57  ;;  %2542 = vmatmul.bf16.gmra.mxu3 %v4484_v58 }
 0x306   : > { %3613 = vst [vmem:[%s4937_s23 + $0x628] sm:$0xff] %v3357_v5  ;;  %v3230_v7 = vpack.c.bf16 %v2789_v6, %v2788_v4  ;;  %v1854_v8 = vpop.f32.mrf.mxu2 }
 0x307   : > { %v1855_v9 = vadd.f32 %v1854_v8, %v4927_v1  ;;  %v2503_v10 = vpop.f32.mrf.mxu3 }
 0x308   : > { %3486 = vst [vmem:[%s4937_s23 + $0x230] sm:$0xff] %v3230_v7  ;;  %v2504_v11 = vadd.f32 %v2503_v10, %v4929_v2  ;;  %v1536_v12 = vpop.f32.mrf.mxu0 }
 0x309   : > { %v3044_v13 = vmax.f32 %v1855_v9, 0.0  ;;  %v1537_v14 = vadd.f32 %v1536_v12, %v4927_v1  ;;  %v2185_v15 = vpop.f32.mrf.mxu1 }
 0x30a   : > { %v3045_v16 = vmax.f32 %v2504_v11, 0.0  ;;  %v2186_v17 = vadd.f32 %v2185_v15, %v4929_v2 }
 0x30b   : > { %v2790_v18 = vmax.f32 %v1537_v14, 0.0 }
 0x30c   : > { %v3358_v19 = vpack.c.bf16 %v3045_v16, %v3044_v13  ;;  %v2791_v20 = vmax.f32 %v2186_v17, 0.0 }
 0x30e   : > { %3614 = vst [vmem:[%s4937_s23 + $0x630] sm:$0xff] %v3358_v19  ;;  %v3231_v21 = vpack.c.bf16 %v2791_v20, %v2790_v18  ;;  %v1856_v22 = vpop.f32.mrf.mxu2 }
 0x30f   : > { %v1857_v23 = vadd.f32 %v1856_v22, %v4927_v1  ;;  %v2505_v24 = vpop.f32.mrf.mxu3 }
 0x310   : > { %3487 = vst [vmem:[%s4937_s23 + $0x238] sm:$0xff] %v3231_v21  ;;  %v2506_v27 = vadd.f32 %v2505_v24, %v4929_v2  ;;  %v1539_v28 = vpop.f32.mrf.mxu0  ;;  %v4487_v24 = vld [vmem:[%s4901_s30 + $0x370] sm:$0xff] }
 0x311   : > { %v3046_v29 = vmax.f32 %v1857_v23, 0.0  ;;  %v1540_v30 = vadd.f32 %v1539_v28, %v4927_v1  ;;  %v2188_v31 = vpop.f32.mrf.mxu1  ;;  %v4423_v23 = vld [vmem:[%s4901_s30 + $0x170] sm:$0xff] }
 0x312   : > { %v3047_v32 = vmax.f32 %v2506_v27, 0.0  ;;  %v2189_v33 = vadd.f32 %v2188_v31, %v4929_v2 }
 0x313   : > { %v2792_v34 = vmax.f32 %v1540_v30, 0.0  ;;  %1578 = vmatmul.bf16.gmra.mxu0 %v4421_v25  ;;  %1898 = vmatmul.bf16.gmra.mxu2 %v4485_v26 }
 0x314   : > { %v3359_v35 = vpack.c.bf16 %v3047_v32, %v3046_v29  ;;  %v2793_v36 = vmax.f32 %v2189_v33, 0.0  ;;  %2227 = vmatmul.bf16.gmra.mxu1 %v4421_v25  ;;  %2547 = vmatmul.bf16.gmra.mxu3 %v4485_v26 }
 0x316   : > { %3615 = vst [vmem:[%s4937_s23 + $0x638] sm:$0xff] %v3359_v35  ;;  %v3232_v37 = vpack.c.bf16 %v2793_v36, %v2792_v34  ;;  %v1859_v38 = vpop.f32.mrf.mxu2 }
 0x317   : > { %v1860_v39 = vadd.f32 %v1859_v38, %v4927_v1  ;;  %v2508_v40 = vpop.f32.mrf.mxu3 }
 0x318   : > { %3488 = vst [vmem:[%s4937_s23 + $0x240] sm:$0xff] %v3232_v37  ;;  %v2509_v41 = vadd.f32 %v2508_v40, %v4929_v2  ;;  %v1541_v42 = vpop.f32.mrf.mxu0 }
 0x319   : > { %v3048_v43 = vmax.f32 %v1860_v39, 0.0  ;;  %v1542_v44 = vadd.f32 %v1541_v42, %v4927_v1  ;;  %v2190_v45 = vpop.f32.mrf.mxu1 }
 0x31a   : > { %v3049_v46 = vmax.f32 %v2509_v41, 0.0  ;;  %v2191_v47 = vadd.f32 %v2190_v45, %v4929_v2 }
 0x31b   : > { %v2794_v48 = vmax.f32 %v1542_v44, 0.0 }
 0x31c   : > { %v3360_v49 = vpack.c.bf16 %v3049_v46, %v3048_v43  ;;  %v2795_v50 = vmax.f32 %v2191_v47, 0.0 }
 0x31e   : > { %3616 = vst [vmem:[%s4937_s23 + $0x640] sm:$0xff] %v3360_v49  ;;  %v3233_v51 = vpack.c.bf16 %v2795_v50, %v2794_v48  ;;  %v1861_v52 = vpop.f32.mrf.mxu2 }
 0x31f   : > { %v1862_v53 = vadd.f32 %v1861_v52, %v4927_v1  ;;  %v2510_v54 = vpop.f32.mrf.mxu3 }
 0x320   : > { %3489 = vst [vmem:[%s4937_s23 + $0x248] sm:$0xff] %v3233_v51  ;;  %v2511_v57 = vadd.f32 %v2510_v54, %v4929_v2  ;;  %v1544_v58 = vpop.f32.mrf.mxu0  ;;  %v4488_v54 = vld [vmem:[%s4901_s30 + $0x378] sm:$0xff] }
 0x321   : > { %v3050_v59 = vmax.f32 %v1862_v53, 0.0  ;;  %v1545_v60 = vadd.f32 %v1544_v58, %v4927_v1  ;;  %v2193_v61 = vpop.f32.mrf.mxu1  ;;  %v4424_v53 = vld [vmem:[%s4901_s30 + $0x178] sm:$0xff] }
 0x322   : > { %v3051_v62 = vmax.f32 %v2511_v57, 0.0  ;;  %v2194_v63 = vadd.f32 %v2193_v61, %v4929_v2 }
 0x323   : > { %v2796_v0 = vmax.f32 %v1545_v60, 0.0  ;;  %1583 = vmatmul.bf16.gmra.mxu0 %v4422_v55  ;;  %1903 = vmatmul.bf16.gmra.mxu2 %v4486_v56 }
 0x324   : > { %v3361_v3 = vpack.c.bf16 %v3051_v62, %v3050_v59  ;;  %v2797_v4 = vmax.f32 %v2194_v63, 0.0  ;;  %2232 = vmatmul.bf16.gmra.mxu1 %v4422_v55  ;;  %2552 = vmatmul.bf16.gmra.mxu3 %v4486_v56 }
 0x326   : > { %3617 = vst [vmem:[%s4937_s23 + $0x648] sm:$0xff] %v3361_v3  ;;  %v3234_v5 = vpack.c.bf16 %v2797_v4, %v2796_v0  ;;  %v1864_v6 = vpop.f32.mrf.mxu2 }
 0x327   : > { %v1865_v7 = vadd.f32 %v1864_v6, %v4927_v1  ;;  %v2513_v8 = vpop.f32.mrf.mxu3 }
 0x328   : > { %3490 = vst [vmem:[%s4937_s23 + $0x250] sm:$0xff] %v3234_v5  ;;  %v2514_v9 = vadd.f32 %v2513_v8, %v4929_v2  ;;  %v1546_v10 = vpop.f32.mrf.mxu0 }
 0x329   : > { %v3052_v11 = vmax.f32 %v1865_v7, 0.0  ;;  %v1547_v12 = vadd.f32 %v1546_v10, %v4927_v1  ;;  %v2195_v13 = vpop.f32.mrf.mxu1 }
 0x32a   : > { %v3053_v14 = vmax.f32 %v2514_v9, 0.0  ;;  %v2196_v15 = vadd.f32 %v2195_v13, %v4929_v2 }
 0x32b   : > { %v2798_v16 = vmax.f32 %v1547_v12, 0.0 }
 0x32c   : > { %v3362_v17 = vpack.c.bf16 %v3053_v14, %v3052_v11  ;;  %v2799_v18 = vmax.f32 %v2196_v15, 0.0 }
 0x32e   : > { %3618 = vst [vmem:[%s4937_s23 + $0x650] sm:$0xff] %v3362_v17  ;;  %v3235_v19 = vpack.c.bf16 %v2799_v18, %v2798_v16  ;;  %v1866_v20 = vpop.f32.mrf.mxu2 }
 0x32f   : > { %v1867_v21 = vadd.f32 %v1866_v20, %v4927_v1  ;;  %v2515_v22 = vpop.f32.mrf.mxu3 }
 0x330   : > { %3491 = vst [vmem:[%s4937_s23 + $0x258] sm:$0xff] %v3235_v19  ;;  %v2516_v25 = vadd.f32 %v2515_v22, %v4929_v2  ;;  %v1549_v26 = vpop.f32.mrf.mxu0  ;;  %v4489_v22 = vld [vmem:[%s4901_s30 + $0x380] sm:$0xff] }
 0x331   : > { %v3054_v27 = vmax.f32 %v1867_v21, 0.0  ;;  %v1550_v28 = vadd.f32 %v1549_v26, %v4927_v1  ;;  %v2198_v29 = vpop.f32.mrf.mxu1  ;;  %v4425_v21 = vld [vmem:[%s4901_s30 + $0x180] sm:$0xff] }
 0x332   : > { %v3055_v30 = vmax.f32 %v2516_v25, 0.0  ;;  %v2199_v31 = vadd.f32 %v2198_v29, %v4929_v2 }
 0x333   : > { %v2800_v32 = vmax.f32 %v1550_v28, 0.0  ;;  %1588 = vmatmul.bf16.gmra.mxu0 %v4423_v23  ;;  %1908 = vmatmul.bf16.gmra.mxu2 %v4487_v24 }
 0x334   : > { %v3363_v33 = vpack.c.bf16 %v3055_v30, %v3054_v27  ;;  %v2801_v34 = vmax.f32 %v2199_v31, 0.0  ;;  %2237 = vmatmul.bf16.gmra.mxu1 %v4423_v23  ;;  %2557 = vmatmul.bf16.gmra.mxu3 %v4487_v24 }
 0x336   : > { %3619 = vst [vmem:[%s4937_s23 + $0x658] sm:$0xff] %v3363_v33  ;;  %v3236_v35 = vpack.c.bf16 %v2801_v34, %v2800_v32  ;;  %v1869_v36 = vpop.f32.mrf.mxu2 }
 0x337   : > { %v1870_v37 = vadd.f32 %v1869_v36, %v4927_v1  ;;  %v2518_v38 = vpop.f32.mrf.mxu3 }
 0x338   : > { %3492 = vst [vmem:[%s4937_s23 + $0x260] sm:$0xff] %v3236_v35  ;;  %v2519_v39 = vadd.f32 %v2518_v38, %v4929_v2  ;;  %v1551_v40 = vpop.f32.mrf.mxu0 }
 0x339   : > { %v3056_v41 = vmax.f32 %v1870_v37, 0.0  ;;  %v1552_v42 = vadd.f32 %v1551_v40, %v4927_v1  ;;  %v2200_v43 = vpop.f32.mrf.mxu1 }
 0x33a   : > { %v3057_v44 = vmax.f32 %v2519_v39, 0.0  ;;  %v2201_v45 = vadd.f32 %v2200_v43, %v4929_v2 }
 0x33b   : > { %v2802_v46 = vmax.f32 %v1552_v42, 0.0 }
 0x33c   : > { %v3364_v47 = vpack.c.bf16 %v3057_v44, %v3056_v41  ;;  %v2803_v48 = vmax.f32 %v2201_v45, 0.0 }
 0x33e   : > { %3620 = vst [vmem:[%s4937_s23 + $0x660] sm:$0xff] %v3364_v47  ;;  %v3237_v49 = vpack.c.bf16 %v2803_v48, %v2802_v46  ;;  %v1871_v50 = vpop.f32.mrf.mxu2 }
 0x33f   : > { %v1872_v51 = vadd.f32 %v1871_v50, %v4927_v1  ;;  %v2520_v52 = vpop.f32.mrf.mxu3 }
 0x340   : > { %3493 = vst [vmem:[%s4937_s23 + $0x268] sm:$0xff] %v3237_v49  ;;  %v2521_v55 = vadd.f32 %v2520_v52, %v4929_v2  ;;  %v1554_v56 = vpop.f32.mrf.mxu0  ;;  %v4490_v52 = vld [vmem:[%s4901_s30 + $0x388] sm:$0xff] }
 0x341   : > { %v3058_v57 = vmax.f32 %v1872_v51, 0.0  ;;  %v1555_v58 = vadd.f32 %v1554_v56, %v4927_v1  ;;  %v2203_v59 = vpop.f32.mrf.mxu1  ;;  %v4426_v51 = vld [vmem:[%s4901_s30 + $0x188] sm:$0xff] }
 0x342   : > { %v3059_v60 = vmax.f32 %v2521_v55, 0.0  ;;  %v2204_v61 = vadd.f32 %v2203_v59, %v4929_v2 }
 0x343   : > { %v2804_v62 = vmax.f32 %v1555_v58, 0.0  ;;  %1593 = vmatmul.bf16.gmra.mxu0 %v4424_v53  ;;  %1913 = vmatmul.bf16.gmra.mxu2 %v4488_v54 }
 0x344   : > { %v3365_v63 = vpack.c.bf16 %v3059_v60, %v3058_v57  ;;  %v2805_v0 = vmax.f32 %v2204_v61, 0.0  ;;  %2242 = vmatmul.bf16.gmra.mxu1 %v4424_v53  ;;  %2562 = vmatmul.bf16.gmra.mxu3 %v4488_v54 }
 0x346   : > { %3621 = vst [vmem:[%s4937_s23 + $0x668] sm:$0xff] %v3365_v63  ;;  %v3238_v3 = vpack.c.bf16 %v2805_v0, %v2804_v62  ;;  %v1874_v4 = vpop.f32.mrf.mxu2 }
 0x347   : > { %v1875_v5 = vadd.f32 %v1874_v4, %v4927_v1  ;;  %v2523_v6 = vpop.f32.mrf.mxu3 }
 0x348   : > { %3494 = vst [vmem:[%s4937_s23 + $0x270] sm:$0xff] %v3238_v3  ;;  %v2524_v7 = vadd.f32 %v2523_v6, %v4929_v2  ;;  %v1556_v8 = vpop.f32.mrf.mxu0 }
 0x349   : > { %v3060_v9 = vmax.f32 %v1875_v5, 0.0  ;;  %v1557_v10 = vadd.f32 %v1556_v8, %v4927_v1  ;;  %v2205_v11 = vpop.f32.mrf.mxu1 }
 0x34a   : > { %v3061_v12 = vmax.f32 %v2524_v7, 0.0  ;;  %v2206_v13 = vadd.f32 %v2205_v11, %v4929_v2 }
 0x34b   : > { %v2806_v14 = vmax.f32 %v1557_v10, 0.0 }
 0x34c   : > { %v3366_v15 = vpack.c.bf16 %v3061_v12, %v3060_v9  ;;  %v2807_v16 = vmax.f32 %v2206_v13, 0.0 }
 0x34e   : > { %3622 = vst [vmem:[%s4937_s23 + $0x670] sm:$0xff] %v3366_v15  ;;  %v3239_v17 = vpack.c.bf16 %v2807_v16, %v2806_v14  ;;  %v1876_v18 = vpop.f32.mrf.mxu2 }
 0x34f   : > { %v1877_v19 = vadd.f32 %v1876_v18, %v4927_v1  ;;  %v2525_v20 = vpop.f32.mrf.mxu3 }
 0x350   : > { %3495 = vst [vmem:[%s4937_s23 + $0x278] sm:$0xff] %v3239_v17  ;;  %v2526_v23 = vadd.f32 %v2525_v20, %v4929_v2  ;;  %v1559_v24 = vpop.f32.mrf.mxu0  ;;  %v4491_v20 = vld [vmem:[%s4901_s30 + $0x390] sm:$0xff] }
 0x351   : > { %v3062_v25 = vmax.f32 %v1877_v19, 0.0  ;;  %v1560_v26 = vadd.f32 %v1559_v24, %v4927_v1  ;;  %v2208_v27 = vpop.f32.mrf.mxu1  ;;  %v4427_v19 = vld [vmem:[%s4901_s30 + $0x190] sm:$0xff] }
 0x352   : > { %v3063_v28 = vmax.f32 %v2526_v23, 0.0  ;;  %v2209_v29 = vadd.f32 %v2208_v27, %v4929_v2 }
 0x353   : > { %v2808_v30 = vmax.f32 %v1560_v26, 0.0  ;;  %1598 = vmatmul.bf16.gmra.mxu0 %v4425_v21  ;;  %1918 = vmatmul.bf16.gmra.mxu2 %v4489_v22 }
 0x354   : > { %v3367_v31 = vpack.c.bf16 %v3063_v28, %v3062_v25  ;;  %v2809_v32 = vmax.f32 %v2209_v29, 0.0  ;;  %2247 = vmatmul.bf16.gmra.mxu1 %v4425_v21  ;;  %2567 = vmatmul.bf16.gmra.mxu3 %v4489_v22 }
 0x356   : > { %3623 = vst [vmem:[%s4937_s23 + $0x678] sm:$0xff] %v3367_v31  ;;  %v3240_v33 = vpack.c.bf16 %v2809_v32, %v2808_v30  ;;  %v1879_v34 = vpop.f32.mrf.mxu2 }
 0x357   : > { %v1880_v35 = vadd.f32 %v1879_v34, %v4927_v1  ;;  %v2528_v36 = vpop.f32.mrf.mxu3 }
 0x358   : > { %3496 = vst [vmem:[%s4937_s23 + $0x280] sm:$0xff] %v3240_v33  ;;  %v2529_v37 = vadd.f32 %v2528_v36, %v4929_v2  ;;  %v1561_v38 = vpop.f32.mrf.mxu0 }
 0x359   : > { %v3064_v39 = vmax.f32 %v1880_v35, 0.0  ;;  %v1562_v40 = vadd.f32 %v1561_v38, %v4927_v1  ;;  %v2210_v41 = vpop.f32.mrf.mxu1 }
 0x35a   : > { %v3065_v42 = vmax.f32 %v2529_v37, 0.0  ;;  %v2211_v43 = vadd.f32 %v2210_v41, %v4929_v2 }
 0x35b   : > { %v2810_v44 = vmax.f32 %v1562_v40, 0.0 }
 0x35c   : > { %v3368_v45 = vpack.c.bf16 %v3065_v42, %v3064_v39  ;;  %v2811_v46 = vmax.f32 %v2211_v43, 0.0 }
 0x35e   : > { %3624 = vst [vmem:[%s4937_s23 + $0x680] sm:$0xff] %v3368_v45  ;;  %v3241_v47 = vpack.c.bf16 %v2811_v46, %v2810_v44  ;;  %v1881_v48 = vpop.f32.mrf.mxu2 }
 0x35f   : > { %v1882_v49 = vadd.f32 %v1881_v48, %v4927_v1  ;;  %v2530_v50 = vpop.f32.mrf.mxu3 }
 0x360   : > { %3497 = vst [vmem:[%s4937_s23 + $0x288] sm:$0xff] %v3241_v47  ;;  %v2531_v53 = vadd.f32 %v2530_v50, %v4929_v2  ;;  %v1564_v54 = vpop.f32.mrf.mxu0  ;;  %v4492_v50 = vld [vmem:[%s4901_s30 + $0x398] sm:$0xff] }
 0x361   : > { %v3066_v55 = vmax.f32 %v1882_v49, 0.0  ;;  %v1565_v56 = vadd.f32 %v1564_v54, %v4927_v1  ;;  %v2213_v57 = vpop.f32.mrf.mxu1  ;;  %v4428_v49 = vld [vmem:[%s4901_s30 + $0x198] sm:$0xff] }
 0x362   : > { %v3067_v58 = vmax.f32 %v2531_v53, 0.0  ;;  %v2214_v59 = vadd.f32 %v2213_v57, %v4929_v2 }
 0x363   : > { %v2812_v60 = vmax.f32 %v1565_v56, 0.0  ;;  %1603 = vmatmul.bf16.gmra.mxu0 %v4426_v51  ;;  %1923 = vmatmul.bf16.gmra.mxu2 %v4490_v52 }
 0x364   : > { %v3369_v61 = vpack.c.bf16 %v3067_v58, %v3066_v55  ;;  %v2813_v62 = vmax.f32 %v2214_v59, 0.0  ;;  %2252 = vmatmul.bf16.gmra.mxu1 %v4426_v51  ;;  %2572 = vmatmul.bf16.gmra.mxu3 %v4490_v52 }
 0x366   : > { %3625 = vst [vmem:[%s4937_s23 + $0x688] sm:$0xff] %v3369_v61  ;;  %v3242_v63 = vpack.c.bf16 %v2813_v62, %v2812_v60  ;;  %v1884_v0 = vpop.f32.mrf.mxu2 }
 0x367   : > { %v1885_v3 = vadd.f32 %v1884_v0, %v4927_v1  ;;  %v2533_v4 = vpop.f32.mrf.mxu3 }
 0x368   : > { %3498 = vst [vmem:[%s4937_s23 + $0x290] sm:$0xff] %v3242_v63  ;;  %v2534_v5 = vadd.f32 %v2533_v4, %v4929_v2  ;;  %v1566_v6 = vpop.f32.mrf.mxu0 }
 0x369   : > { %v3068_v7 = vmax.f32 %v1885_v3, 0.0  ;;  %v1567_v8 = vadd.f32 %v1566_v6, %v4927_v1  ;;  %v2215_v9 = vpop.f32.mrf.mxu1 }
 0x36a   : > { %v3069_v10 = vmax.f32 %v2534_v5, 0.0  ;;  %v2216_v11 = vadd.f32 %v2215_v9, %v4929_v2 }
 0x36b   : > { %v2814_v12 = vmax.f32 %v1567_v8, 0.0 }
 0x36c   : > { %v3370_v13 = vpack.c.bf16 %v3069_v10, %v3068_v7  ;;  %v2815_v14 = vmax.f32 %v2216_v11, 0.0 }
 0x36e   : > { %3626 = vst [vmem:[%s4937_s23 + $0x690] sm:$0xff] %v3370_v13  ;;  %v3243_v15 = vpack.c.bf16 %v2815_v14, %v2814_v12  ;;  %v1886_v16 = vpop.f32.mrf.mxu2 }
 0x36f   : > { %v1887_v17 = vadd.f32 %v1886_v16, %v4927_v1  ;;  %v2535_v18 = vpop.f32.mrf.mxu3 }
 0x370   : > { %3499 = vst [vmem:[%s4937_s23 + $0x298] sm:$0xff] %v3243_v15  ;;  %v2536_v21 = vadd.f32 %v2535_v18, %v4929_v2  ;;  %v1569_v22 = vpop.f32.mrf.mxu0  ;;  %v4493_v18 = vld [vmem:[%s4901_s30 + $0x3a0] sm:$0xff] }
 0x371   : > { %v3070_v23 = vmax.f32 %v1887_v17, 0.0  ;;  %v1570_v24 = vadd.f32 %v1569_v22, %v4927_v1  ;;  %v2218_v25 = vpop.f32.mrf.mxu1  ;;  %v4429_v17 = vld [vmem:[%s4901_s30 + $0x1a0] sm:$0xff] }
 0x372   : > { %v3071_v26 = vmax.f32 %v2536_v21, 0.0  ;;  %v2219_v27 = vadd.f32 %v2218_v25, %v4929_v2 }
 0x373   : > { %v2816_v28 = vmax.f32 %v1570_v24, 0.0  ;;  %1608 = vmatmul.bf16.gmra.mxu0 %v4427_v19  ;;  %1928 = vmatmul.bf16.gmra.mxu2 %v4491_v20 }
 0x374   : > { %v3371_v29 = vpack.c.bf16 %v3071_v26, %v3070_v23  ;;  %v2817_v30 = vmax.f32 %v2219_v27, 0.0  ;;  %2257 = vmatmul.bf16.gmra.mxu1 %v4427_v19  ;;  %2577 = vmatmul.bf16.gmra.mxu3 %v4491_v20 }
 0x376   : > { %3627 = vst [vmem:[%s4937_s23 + $0x698] sm:$0xff] %v3371_v29  ;;  %v3244_v31 = vpack.c.bf16 %v2817_v30, %v2816_v28  ;;  %v1889_v32 = vpop.f32.mrf.mxu2 }
 0x377   : > { %v1890_v33 = vadd.f32 %v1889_v32, %v4927_v1  ;;  %v2538_v34 = vpop.f32.mrf.mxu3 }
 0x378   : > { %3500 = vst [vmem:[%s4937_s23 + $0x2a0] sm:$0xff] %v3244_v31  ;;  %v2539_v35 = vadd.f32 %v2538_v34, %v4929_v2  ;;  %v1571_v36 = vpop.f32.mrf.mxu0 }
 0x379   : > { %v3072_v37 = vmax.f32 %v1890_v33, 0.0  ;;  %v1572_v38 = vadd.f32 %v1571_v36, %v4927_v1  ;;  %v2220_v39 = vpop.f32.mrf.mxu1 }
 0x37a   : > { %v3073_v40 = vmax.f32 %v2539_v35, 0.0  ;;  %v2221_v41 = vadd.f32 %v2220_v39, %v4929_v2 }
 0x37b   : > { %v2818_v42 = vmax.f32 %v1572_v38, 0.0 }
 0x37c   : > { %v3372_v43 = vpack.c.bf16 %v3073_v40, %v3072_v37  ;;  %v2819_v44 = vmax.f32 %v2221_v41, 0.0 }
 0x37e   : > { %3628 = vst [vmem:[%s4937_s23 + $0x6a0] sm:$0xff] %v3372_v43  ;;  %v3245_v45 = vpack.c.bf16 %v2819_v44, %v2818_v42  ;;  %v1891_v46 = vpop.f32.mrf.mxu2 }
 0x37f   : > { %v1892_v47 = vadd.f32 %v1891_v46, %v4927_v1  ;;  %v2540_v48 = vpop.f32.mrf.mxu3 }
 0x380   : > { %3501 = vst [vmem:[%s4937_s23 + $0x2a8] sm:$0xff] %v3245_v45  ;;  %v2541_v51 = vadd.f32 %v2540_v48, %v4929_v2  ;;  %v1574_v52 = vpop.f32.mrf.mxu0  ;;  %v4494_v48 = vld [vmem:[%s4901_s30 + $0x3a8] sm:$0xff] }
 0x381   : > { %v3074_v53 = vmax.f32 %v1892_v47, 0.0  ;;  %v1575_v54 = vadd.f32 %v1574_v52, %v4927_v1  ;;  %v2223_v55 = vpop.f32.mrf.mxu1  ;;  %v4430_v47 = vld [vmem:[%s4901_s30 + $0x1a8] sm:$0xff] }
 0x382   : > { %v3075_v56 = vmax.f32 %v2541_v51, 0.0  ;;  %v2224_v57 = vadd.f32 %v2223_v55, %v4929_v2 }
 0x383   : > { %v2820_v58 = vmax.f32 %v1575_v54, 0.0  ;;  %1613 = vmatmul.bf16.gmra.mxu0 %v4428_v49  ;;  %1933 = vmatmul.bf16.gmra.mxu2 %v4492_v50 }
 0x384   : > { %v3373_v59 = vpack.c.bf16 %v3075_v56, %v3074_v53  ;;  %v2821_v60 = vmax.f32 %v2224_v57, 0.0  ;;  %2262 = vmatmul.bf16.gmra.mxu1 %v4428_v49  ;;  %2582 = vmatmul.bf16.gmra.mxu3 %v4492_v50 }
 0x386   : > { %3629 = vst [vmem:[%s4937_s23 + $0x6a8] sm:$0xff] %v3373_v59  ;;  %v3246_v61 = vpack.c.bf16 %v2821_v60, %v2820_v58  ;;  %v1894_v62 = vpop.f32.mrf.mxu2 }
 0x387   : > { %v1895_v63 = vadd.f32 %v1894_v62, %v4927_v1  ;;  %v2543_v0 = vpop.f32.mrf.mxu3 }
 0x388   : > { %3502 = vst [vmem:[%s4937_s23 + $0x2b0] sm:$0xff] %v3246_v61  ;;  %v2544_v3 = vadd.f32 %v2543_v0, %v4929_v2  ;;  %v1576_v4 = vpop.f32.mrf.mxu0 }
 0x389   : > { %v3076_v5 = vmax.f32 %v1895_v63, 0.0  ;;  %v1577_v6 = vadd.f32 %v1576_v4, %v4927_v1  ;;  %v2225_v7 = vpop.f32.mrf.mxu1 }
 0x38a   : > { %v3077_v8 = vmax.f32 %v2544_v3, 0.0  ;;  %v2226_v9 = vadd.f32 %v2225_v7, %v4929_v2 }
 0x38b   : > { %v2822_v10 = vmax.f32 %v1577_v6, 0.0 }
 0x38c   : > { %v3374_v11 = vpack.c.bf16 %v3077_v8, %v3076_v5  ;;  %v2823_v12 = vmax.f32 %v2226_v9, 0.0 }
 0x38e   : > { %3630 = vst [vmem:[%s4937_s23 + $0x6b0] sm:$0xff] %v3374_v11  ;;  %v3247_v13 = vpack.c.bf16 %v2823_v12, %v2822_v10  ;;  %v1896_v14 = vpop.f32.mrf.mxu2 }
 0x38f   : > { %v1897_v15 = vadd.f32 %v1896_v14, %v4927_v1  ;;  %v2545_v16 = vpop.f32.mrf.mxu3 }
 0x390   : > { %3503 = vst [vmem:[%s4937_s23 + $0x2b8] sm:$0xff] %v3247_v13  ;;  %v2546_v19 = vadd.f32 %v2545_v16, %v4929_v2  ;;  %v1579_v20 = vpop.f32.mrf.mxu0  ;;  %v4495_v16 = vld [vmem:[%s4901_s30 + $0x3b0] sm:$0xff] }
 0x391   : > { %v3078_v21 = vmax.f32 %v1897_v15, 0.0  ;;  %v1580_v22 = vadd.f32 %v1579_v20, %v4927_v1  ;;  %v2228_v23 = vpop.f32.mrf.mxu1  ;;  %v4431_v15 = vld [vmem:[%s4901_s30 + $0x1b0] sm:$0xff] }
 0x392   : > { %v3079_v24 = vmax.f32 %v2546_v19, 0.0  ;;  %v2229_v25 = vadd.f32 %v2228_v23, %v4929_v2 }
 0x393   : > { %v2824_v26 = vmax.f32 %v1580_v22, 0.0  ;;  %1618 = vmatmul.bf16.gmra.mxu0 %v4429_v17  ;;  %1938 = vmatmul.bf16.gmra.mxu2 %v4493_v18 }
 0x394   : > { %v3375_v27 = vpack.c.bf16 %v3079_v24, %v3078_v21  ;;  %v2825_v28 = vmax.f32 %v2229_v25, 0.0  ;;  %2267 = vmatmul.bf16.gmra.mxu1 %v4429_v17  ;;  %2587 = vmatmul.bf16.gmra.mxu3 %v4493_v18 }
 0x396   : > { %3631 = vst [vmem:[%s4937_s23 + $0x6b8] sm:$0xff] %v3375_v27  ;;  %v3248_v29 = vpack.c.bf16 %v2825_v28, %v2824_v26  ;;  %v1899_v30 = vpop.f32.mrf.mxu2 }
 0x397   : > { %v1900_v31 = vadd.f32 %v1899_v30, %v4927_v1  ;;  %v2548_v32 = vpop.f32.mrf.mxu3 }
 0x398   : > { %3504 = vst [vmem:[%s4937_s23 + $0x2c0] sm:$0xff] %v3248_v29  ;;  %v2549_v33 = vadd.f32 %v2548_v32, %v4929_v2  ;;  %v1581_v34 = vpop.f32.mrf.mxu0 }
 0x399   : > { %v3080_v35 = vmax.f32 %v1900_v31, 0.0  ;;  %v1582_v36 = vadd.f32 %v1581_v34, %v4927_v1  ;;  %v2230_v37 = vpop.f32.mrf.mxu1 }
 0x39a   : > { %v3081_v38 = vmax.f32 %v2549_v33, 0.0  ;;  %v2231_v39 = vadd.f32 %v2230_v37, %v4929_v2 }
 0x39b   : > { %v2826_v40 = vmax.f32 %v1582_v36, 0.0 }
 0x39c   : > { %v3376_v41 = vpack.c.bf16 %v3081_v38, %v3080_v35  ;;  %v2827_v42 = vmax.f32 %v2231_v39, 0.0 }
 0x39e   : > { %3632 = vst [vmem:[%s4937_s23 + $0x6c0] sm:$0xff] %v3376_v41  ;;  %v3249_v43 = vpack.c.bf16 %v2827_v42, %v2826_v40  ;;  %v1901_v44 = vpop.f32.mrf.mxu2 }
 0x39f   : > { %v1902_v45 = vadd.f32 %v1901_v44, %v4927_v1  ;;  %v2550_v46 = vpop.f32.mrf.mxu3 }
 0x3a0   : > { %3505 = vst [vmem:[%s4937_s23 + $0x2c8] sm:$0xff] %v3249_v43  ;;  %v2551_v49 = vadd.f32 %v2550_v46, %v4929_v2  ;;  %v1584_v50 = vpop.f32.mrf.mxu0  ;;  %v4496_v46 = vld [vmem:[%s4901_s30 + $0x3b8] sm:$0xff] }
 0x3a1   : > { %v3082_v51 = vmax.f32 %v1902_v45, 0.0  ;;  %v1585_v52 = vadd.f32 %v1584_v50, %v4927_v1  ;;  %v2233_v53 = vpop.f32.mrf.mxu1  ;;  %v4432_v45 = vld [vmem:[%s4901_s30 + $0x1b8] sm:$0xff] }
 0x3a2   : > { %v3083_v54 = vmax.f32 %v2551_v49, 0.0  ;;  %v2234_v55 = vadd.f32 %v2233_v53, %v4929_v2 }
 0x3a3   : > { %v2828_v56 = vmax.f32 %v1585_v52, 0.0  ;;  %1623 = vmatmul.bf16.gmra.mxu0 %v4430_v47  ;;  %1943 = vmatmul.bf16.gmra.mxu2 %v4494_v48 }
 0x3a4   : > { %v3377_v57 = vpack.c.bf16 %v3083_v54, %v3082_v51  ;;  %v2829_v58 = vmax.f32 %v2234_v55, 0.0  ;;  %2272 = vmatmul.bf16.gmra.mxu1 %v4430_v47  ;;  %2592 = vmatmul.bf16.gmra.mxu3 %v4494_v48 }
 0x3a6   : > { %3633 = vst [vmem:[%s4937_s23 + $0x6c8] sm:$0xff] %v3377_v57  ;;  %v3250_v59 = vpack.c.bf16 %v2829_v58, %v2828_v56  ;;  %v1904_v60 = vpop.f32.mrf.mxu2 }
 0x3a7   : > { %v1905_v61 = vadd.f32 %v1904_v60, %v4927_v1  ;;  %v2553_v62 = vpop.f32.mrf.mxu3 }
 0x3a8   : > { %3506 = vst [vmem:[%s4937_s23 + $0x2d0] sm:$0xff] %v3250_v59  ;;  %v2554_v63 = vadd.f32 %v2553_v62, %v4929_v2  ;;  %v1586_v0 = vpop.f32.mrf.mxu0 }
 0x3a9   : > { %v3084_v3 = vmax.f32 %v1905_v61, 0.0  ;;  %v1587_v4 = vadd.f32 %v1586_v0, %v4927_v1  ;;  %v2235_v5 = vpop.f32.mrf.mxu1 }
 0x3aa   : > { %v3085_v6 = vmax.f32 %v2554_v63, 0.0  ;;  %v2236_v7 = vadd.f32 %v2235_v5, %v4929_v2 }
 0x3ab   : > { %v2830_v8 = vmax.f32 %v1587_v4, 0.0 }
 0x3ac   : > { %v3378_v9 = vpack.c.bf16 %v3085_v6, %v3084_v3  ;;  %v2831_v10 = vmax.f32 %v2236_v7, 0.0 }
 0x3ae   : > { %3634 = vst [vmem:[%s4937_s23 + $0x6d0] sm:$0xff] %v3378_v9  ;;  %v3251_v11 = vpack.c.bf16 %v2831_v10, %v2830_v8  ;;  %v1906_v12 = vpop.f32.mrf.mxu2 }
 0x3af   : > { %v1907_v13 = vadd.f32 %v1906_v12, %v4927_v1  ;;  %v2555_v14 = vpop.f32.mrf.mxu3 }
 0x3b0   : > { %3507 = vst [vmem:[%s4937_s23 + $0x2d8] sm:$0xff] %v3251_v11  ;;  %v2556_v17 = vadd.f32 %v2555_v14, %v4929_v2  ;;  %v1589_v18 = vpop.f32.mrf.mxu0  ;;  %v4497_v14 = vld [vmem:[%s4901_s30 + $0x3c0] sm:$0xff] }
 0x3b1   : > { %v3086_v19 = vmax.f32 %v1907_v13, 0.0  ;;  %v1590_v20 = vadd.f32 %v1589_v18, %v4927_v1  ;;  %v2238_v21 = vpop.f32.mrf.mxu1  ;;  %v4433_v13 = vld [vmem:[%s4901_s30 + $0x1c0] sm:$0xff] }
 0x3b2   : > { %v3087_v22 = vmax.f32 %v2556_v17, 0.0  ;;  %v2239_v23 = vadd.f32 %v2238_v21, %v4929_v2 }
 0x3b3   : > { %v2832_v24 = vmax.f32 %v1590_v20, 0.0  ;;  %1628 = vmatmul.bf16.gmra.mxu0 %v4431_v15  ;;  %1948 = vmatmul.bf16.gmra.mxu2 %v4495_v16 }
 0x3b4   : > { %v3379_v25 = vpack.c.bf16 %v3087_v22, %v3086_v19  ;;  %v2833_v26 = vmax.f32 %v2239_v23, 0.0  ;;  %2277 = vmatmul.bf16.gmra.mxu1 %v4431_v15  ;;  %2597 = vmatmul.bf16.gmra.mxu3 %v4495_v16 }
 0x3b6   : > { %3635 = vst [vmem:[%s4937_s23 + $0x6d8] sm:$0xff] %v3379_v25  ;;  %v3252_v27 = vpack.c.bf16 %v2833_v26, %v2832_v24  ;;  %v1909_v28 = vpop.f32.mrf.mxu2 }
 0x3b7   : > { %v1910_v29 = vadd.f32 %v1909_v28, %v4927_v1  ;;  %v2558_v30 = vpop.f32.mrf.mxu3 }
 0x3b8   : > { %3508 = vst [vmem:[%s4937_s23 + $0x2e0] sm:$0xff] %v3252_v27  ;;  %v2559_v31 = vadd.f32 %v2558_v30, %v4929_v2  ;;  %v1591_v32 = vpop.f32.mrf.mxu0 }
 0x3b9   : > { %v3088_v33 = vmax.f32 %v1910_v29, 0.0  ;;  %v1592_v34 = vadd.f32 %v1591_v32, %v4927_v1  ;;  %v2240_v35 = vpop.f32.mrf.mxu1 }
 0x3ba   : > { %v3089_v36 = vmax.f32 %v2559_v31, 0.0  ;;  %v2241_v37 = vadd.f32 %v2240_v35, %v4929_v2 }
 0x3bb   : > { %v2834_v38 = vmax.f32 %v1592_v34, 0.0 }
 0x3bc   : > { %v3380_v39 = vpack.c.bf16 %v3089_v36, %v3088_v33  ;;  %v2835_v40 = vmax.f32 %v2241_v37, 0.0 }
 0x3be   : > { %3636 = vst [vmem:[%s4937_s23 + $0x6e0] sm:$0xff] %v3380_v39  ;;  %v3253_v41 = vpack.c.bf16 %v2835_v40, %v2834_v38  ;;  %v1911_v42 = vpop.f32.mrf.mxu2 }
 0x3bf   : > { %v1912_v43 = vadd.f32 %v1911_v42, %v4927_v1  ;;  %v2560_v44 = vpop.f32.mrf.mxu3 }
 0x3c0   : > { %3509 = vst [vmem:[%s4937_s23 + $0x2e8] sm:$0xff] %v3253_v41  ;;  %v2561_v47 = vadd.f32 %v2560_v44, %v4929_v2  ;;  %v1594_v48 = vpop.f32.mrf.mxu0  ;;  %v4498_v44 = vld [vmem:[%s4901_s30 + $0x3c8] sm:$0xff] }
 0x3c1   : > { %v3090_v49 = vmax.f32 %v1912_v43, 0.0  ;;  %v1595_v50 = vadd.f32 %v1594_v48, %v4927_v1  ;;  %v2243_v51 = vpop.f32.mrf.mxu1  ;;  %v4434_v43 = vld [vmem:[%s4901_s30 + $0x1c8] sm:$0xff] }
 0x3c2   : > { %v3091_v52 = vmax.f32 %v2561_v47, 0.0  ;;  %v2244_v53 = vadd.f32 %v2243_v51, %v4929_v2 }
 0x3c3   : > { %v2836_v54 = vmax.f32 %v1595_v50, 0.0  ;;  %1633 = vmatmul.bf16.gmra.mxu0 %v4432_v45  ;;  %1953 = vmatmul.bf16.gmra.mxu2 %v4496_v46 }
 0x3c4   : > { %v3381_v55 = vpack.c.bf16 %v3091_v52, %v3090_v49  ;;  %v2837_v56 = vmax.f32 %v2244_v53, 0.0  ;;  %2282 = vmatmul.bf16.gmra.mxu1 %v4432_v45  ;;  %2602 = vmatmul.bf16.gmra.mxu3 %v4496_v46 }
 0x3c6   : > { %3637 = vst [vmem:[%s4937_s23 + $0x6e8] sm:$0xff] %v3381_v55  ;;  %v3254_v57 = vpack.c.bf16 %v2837_v56, %v2836_v54  ;;  %v1914_v58 = vpop.f32.mrf.mxu2 }
 0x3c7   : > { %v1915_v59 = vadd.f32 %v1914_v58, %v4927_v1  ;;  %v2563_v60 = vpop.f32.mrf.mxu3 }
 0x3c8   : > { %3510 = vst [vmem:[%s4937_s23 + $0x2f0] sm:$0xff] %v3254_v57  ;;  %v2564_v61 = vadd.f32 %v2563_v60, %v4929_v2  ;;  %v1596_v62 = vpop.f32.mrf.mxu0 }
 0x3c9   : > { %v3092_v63 = vmax.f32 %v1915_v59, 0.0  ;;  %v1597_v0 = vadd.f32 %v1596_v62, %v4927_v1  ;;  %v2245_v3 = vpop.f32.mrf.mxu1 }
 0x3ca   : > { %v3093_v4 = vmax.f32 %v2564_v61, 0.0  ;;  %v2246_v5 = vadd.f32 %v2245_v3, %v4929_v2 }
 0x3cb   : > { %v2838_v6 = vmax.f32 %v1597_v0, 0.0 }
 0x3cc   : > { %v3382_v7 = vpack.c.bf16 %v3093_v4, %v3092_v63  ;;  %v2839_v8 = vmax.f32 %v2246_v5, 0.0 }
 0x3ce   : > { %3638 = vst [vmem:[%s4937_s23 + $0x6f0] sm:$0xff] %v3382_v7  ;;  %v3255_v9 = vpack.c.bf16 %v2839_v8, %v2838_v6  ;;  %v1916_v10 = vpop.f32.mrf.mxu2 }
 0x3cf   : > { %v1917_v11 = vadd.f32 %v1916_v10, %v4927_v1  ;;  %v2565_v12 = vpop.f32.mrf.mxu3 }
 0x3d0   : > { %3511 = vst [vmem:[%s4937_s23 + $0x2f8] sm:$0xff] %v3255_v9  ;;  %v2566_v15 = vadd.f32 %v2565_v12, %v4929_v2  ;;  %v1599_v16 = vpop.f32.mrf.mxu0  ;;  %v4499_v12 = vld [vmem:[%s4901_s30 + $0x3d0] sm:$0xff] }
 0x3d1   : > { %v3094_v17 = vmax.f32 %v1917_v11, 0.0  ;;  %v1600_v18 = vadd.f32 %v1599_v16, %v4927_v1  ;;  %v2248_v19 = vpop.f32.mrf.mxu1  ;;  %v4435_v11 = vld [vmem:[%s4901_s30 + $0x1d0] sm:$0xff] }
 0x3d2   : > { %v3095_v20 = vmax.f32 %v2566_v15, 0.0  ;;  %v2249_v21 = vadd.f32 %v2248_v19, %v4929_v2 }
 0x3d3   : > { %v2840_v22 = vmax.f32 %v1600_v18, 0.0  ;;  %1638 = vmatmul.bf16.gmra.mxu0 %v4433_v13  ;;  %1958 = vmatmul.bf16.gmra.mxu2 %v4497_v14 }
 0x3d4   : > { %v3383_v23 = vpack.c.bf16 %v3095_v20, %v3094_v17  ;;  %v2841_v24 = vmax.f32 %v2249_v21, 0.0  ;;  %2287 = vmatmul.bf16.gmra.mxu1 %v4433_v13  ;;  %2607 = vmatmul.bf16.gmra.mxu3 %v4497_v14 }
 0x3d6   : > { %3639 = vst [vmem:[%s4937_s23 + $0x6f8] sm:$0xff] %v3383_v23  ;;  %v3256_v25 = vpack.c.bf16 %v2841_v24, %v2840_v22  ;;  %v1919_v26 = vpop.f32.mrf.mxu2 }
 0x3d7   : > { %v1920_v27 = vadd.f32 %v1919_v26, %v4927_v1  ;;  %v2568_v28 = vpop.f32.mrf.mxu3 }
 0x3d8   : > { %3512 = vst [vmem:[%s4937_s23 + $0x300] sm:$0xff] %v3256_v25  ;;  %v2569_v29 = vadd.f32 %v2568_v28, %v4929_v2  ;;  %v1601_v30 = vpop.f32.mrf.mxu0 }
 0x3d9   : > { %v3096_v31 = vmax.f32 %v1920_v27, 0.0  ;;  %v1602_v32 = vadd.f32 %v1601_v30, %v4927_v1  ;;  %v2250_v33 = vpop.f32.mrf.mxu1 }
 0x3da   : > { %v3097_v34 = vmax.f32 %v2569_v29, 0.0  ;;  %v2251_v35 = vadd.f32 %v2250_v33, %v4929_v2 }
 0x3db   : > { %v2842_v36 = vmax.f32 %v1602_v32, 0.0 }
 0x3dc   : > { %v3384_v37 = vpack.c.bf16 %v3097_v34, %v3096_v31  ;;  %v2843_v38 = vmax.f32 %v2251_v35, 0.0 }
 0x3de   : > { %3640 = vst [vmem:[%s4937_s23 + $0x700] sm:$0xff] %v3384_v37  ;;  %v3257_v39 = vpack.c.bf16 %v2843_v38, %v2842_v36  ;;  %v1921_v40 = vpop.f32.mrf.mxu2 }
 0x3df   : > { %v1922_v41 = vadd.f32 %v1921_v40, %v4927_v1  ;;  %v2570_v42 = vpop.f32.mrf.mxu3 }
 0x3e0   : > { %3513 = vst [vmem:[%s4937_s23 + $0x308] sm:$0xff] %v3257_v39  ;;  %v2571_v45 = vadd.f32 %v2570_v42, %v4929_v2  ;;  %v1604_v46 = vpop.f32.mrf.mxu0  ;;  %v4500_v42 = vld [vmem:[%s4901_s30 + $0x3d8] sm:$0xff] }
 0x3e1   : > { %v3098_v47 = vmax.f32 %v1922_v41, 0.0  ;;  %v1605_v48 = vadd.f32 %v1604_v46, %v4927_v1  ;;  %v2253_v49 = vpop.f32.mrf.mxu1  ;;  %v4436_v41 = vld [vmem:[%s4901_s30 + $0x1d8] sm:$0xff] }
 0x3e2   : > { %v3099_v50 = vmax.f32 %v2571_v45, 0.0  ;;  %v2254_v51 = vadd.f32 %v2253_v49, %v4929_v2 }
 0x3e3   : > { %v2844_v52 = vmax.f32 %v1605_v48, 0.0  ;;  %1643 = vmatmul.bf16.gmra.mxu0 %v4434_v43  ;;  %1963 = vmatmul.bf16.gmra.mxu2 %v4498_v44 }
 0x3e4   : > { %v3385_v53 = vpack.c.bf16 %v3099_v50, %v3098_v47  ;;  %v2845_v54 = vmax.f32 %v2254_v51, 0.0  ;;  %2292 = vmatmul.bf16.gmra.mxu1 %v4434_v43  ;;  %2612 = vmatmul.bf16.gmra.mxu3 %v4498_v44 }
 0x3e6   : > { %3641 = vst [vmem:[%s4937_s23 + $0x708] sm:$0xff] %v3385_v53  ;;  %v3258_v55 = vpack.c.bf16 %v2845_v54, %v2844_v52  ;;  %v1924_v56 = vpop.f32.mrf.mxu2 }
 0x3e7   : > { %v1925_v57 = vadd.f32 %v1924_v56, %v4927_v1  ;;  %v2573_v58 = vpop.f32.mrf.mxu3 }
 0x3e8   : > { %3514 = vst [vmem:[%s4937_s23 + $0x310] sm:$0xff] %v3258_v55  ;;  %v2574_v59 = vadd.f32 %v2573_v58, %v4929_v2  ;;  %v1606_v60 = vpop.f32.mrf.mxu0 }
 0x3e9   : > { %v3100_v61 = vmax.f32 %v1925_v57, 0.0  ;;  %v1607_v62 = vadd.f32 %v1606_v60, %v4927_v1  ;;  %v2255_v63 = vpop.f32.mrf.mxu1 }
 0x3ea   : > { %v3101_v0 = vmax.f32 %v2574_v59, 0.0  ;;  %v2256_v3 = vadd.f32 %v2255_v63, %v4929_v2 }
 0x3eb   : > { %v2846_v4 = vmax.f32 %v1607_v62, 0.0 }
 0x3ec   : > { %v3386_v5 = vpack.c.bf16 %v3101_v0, %v3100_v61  ;;  %v2847_v6 = vmax.f32 %v2256_v3, 0.0 }
 0x3ee   : > { %3642 = vst [vmem:[%s4937_s23 + $0x710] sm:$0xff] %v3386_v5  ;;  %v3259_v7 = vpack.c.bf16 %v2847_v6, %v2846_v4  ;;  %v1926_v8 = vpop.f32.mrf.mxu2 }
 0x3ef   : > { %v1927_v9 = vadd.f32 %v1926_v8, %v4927_v1  ;;  %v2575_v10 = vpop.f32.mrf.mxu3 }
 0x3f0   : > { %3515 = vst [vmem:[%s4937_s23 + $0x318] sm:$0xff] %v3259_v7  ;;  %v2576_v13 = vadd.f32 %v2575_v10, %v4929_v2  ;;  %v1609_v14 = vpop.f32.mrf.mxu0  ;;  %v4501_v10 = vld [vmem:[%s4901_s30 + $0x3e0] sm:$0xff] }
 0x3f1   : > { %v3102_v15 = vmax.f32 %v1927_v9, 0.0  ;;  %v1610_v16 = vadd.f32 %v1609_v14, %v4927_v1  ;;  %v2258_v17 = vpop.f32.mrf.mxu1  ;;  %v4437_v9 = vld [vmem:[%s4901_s30 + $0x1e0] sm:$0xff] }
 0x3f2   : > { %v3103_v18 = vmax.f32 %v2576_v13, 0.0  ;;  %v2259_v19 = vadd.f32 %v2258_v17, %v4929_v2 }
 0x3f3   : > { %v2848_v20 = vmax.f32 %v1610_v16, 0.0  ;;  %1648 = vmatmul.bf16.gmra.mxu0 %v4435_v11  ;;  %1968 = vmatmul.bf16.gmra.mxu2 %v4499_v12 }
 0x3f4   : > { %v3387_v21 = vpack.c.bf16 %v3103_v18, %v3102_v15  ;;  %v2849_v22 = vmax.f32 %v2259_v19, 0.0  ;;  %2297 = vmatmul.bf16.gmra.mxu1 %v4435_v11  ;;  %2617 = vmatmul.bf16.gmra.mxu3 %v4499_v12 }
 0x3f6   : > { %3643 = vst [vmem:[%s4937_s23 + $0x718] sm:$0xff] %v3387_v21  ;;  %v3260_v23 = vpack.c.bf16 %v2849_v22, %v2848_v20  ;;  %v1929_v24 = vpop.f32.mrf.mxu2 }
 0x3f7   : > { %v1930_v25 = vadd.f32 %v1929_v24, %v4927_v1  ;;  %v2578_v26 = vpop.f32.mrf.mxu3 }
 0x3f8   : > { %3516 = vst [vmem:[%s4937_s23 + $0x320] sm:$0xff] %v3260_v23  ;;  %v2579_v27 = vadd.f32 %v2578_v26, %v4929_v2  ;;  %v1611_v28 = vpop.f32.mrf.mxu0 }
 0x3f9   : > { %v3104_v29 = vmax.f32 %v1930_v25, 0.0  ;;  %v1612_v30 = vadd.f32 %v1611_v28, %v4927_v1  ;;  %v2260_v31 = vpop.f32.mrf.mxu1 }
 0x3fa   : > { %v3105_v32 = vmax.f32 %v2579_v27, 0.0  ;;  %v2261_v33 = vadd.f32 %v2260_v31, %v4929_v2 }
 0x3fb   : > { %v2850_v34 = vmax.f32 %v1612_v30, 0.0 }
 0x3fc   : > { %v3388_v35 = vpack.c.bf16 %v3105_v32, %v3104_v29  ;;  %v2851_v36 = vmax.f32 %v2261_v33, 0.0 }
 0x3fe   : > { %3644 = vst [vmem:[%s4937_s23 + $0x720] sm:$0xff] %v3388_v35  ;;  %v3261_v37 = vpack.c.bf16 %v2851_v36, %v2850_v34  ;;  %v1931_v38 = vpop.f32.mrf.mxu2 }
 0x3ff   : > { %v1932_v39 = vadd.f32 %v1931_v38, %v4927_v1  ;;  %v2580_v40 = vpop.f32.mrf.mxu3 }
 0x400   : > { %3517 = vst [vmem:[%s4937_s23 + $0x328] sm:$0xff] %v3261_v37  ;;  %v2581_v43 = vadd.f32 %v2580_v40, %v4929_v2  ;;  %v1614_v44 = vpop.f32.mrf.mxu0  ;;  %v4502_v40 = vld [vmem:[%s4901_s30 + $0x3e8] sm:$0xff] }
 0x401   : > { %v3106_v45 = vmax.f32 %v1932_v39, 0.0  ;;  %v1615_v46 = vadd.f32 %v1614_v44, %v4927_v1  ;;  %v2263_v47 = vpop.f32.mrf.mxu1  ;;  %v4438_v39 = vld [vmem:[%s4901_s30 + $0x1e8] sm:$0xff] }
 0x402   : > { %v3107_v48 = vmax.f32 %v2581_v43, 0.0  ;;  %v2264_v49 = vadd.f32 %v2263_v47, %v4929_v2 }
 0x403   : > { %v2852_v50 = vmax.f32 %v1615_v46, 0.0  ;;  %1653 = vmatmul.bf16.gmra.mxu0 %v4436_v41  ;;  %1973 = vmatmul.bf16.gmra.mxu2 %v4500_v42 }
 0x404   : > { %v3389_v51 = vpack.c.bf16 %v3107_v48, %v3106_v45  ;;  %v2853_v52 = vmax.f32 %v2264_v49, 0.0  ;;  %2302 = vmatmul.bf16.gmra.mxu1 %v4436_v41  ;;  %2622 = vmatmul.bf16.gmra.mxu3 %v4500_v42 }
 0x406   : > { %3645 = vst [vmem:[%s4937_s23 + $0x728] sm:$0xff] %v3389_v51  ;;  %v3262_v53 = vpack.c.bf16 %v2853_v52, %v2852_v50  ;;  %v1934_v54 = vpop.f32.mrf.mxu2 }
 0x407   : > { %v1935_v55 = vadd.f32 %v1934_v54, %v4927_v1  ;;  %v2583_v56 = vpop.f32.mrf.mxu3 }
 0x408   : > { %3518 = vst [vmem:[%s4937_s23 + $0x330] sm:$0xff] %v3262_v53  ;;  %v2584_v57 = vadd.f32 %v2583_v56, %v4929_v2  ;;  %v1616_v58 = vpop.f32.mrf.mxu0 }
 0x409   : > { %v3108_v59 = vmax.f32 %v1935_v55, 0.0  ;;  %v1617_v60 = vadd.f32 %v1616_v58, %v4927_v1  ;;  %v2265_v61 = vpop.f32.mrf.mxu1 }
 0x40a   : > { %v3109_v62 = vmax.f32 %v2584_v57, 0.0  ;;  %v2266_v63 = vadd.f32 %v2265_v61, %v4929_v2 }
 0x40b   : > { %v2854_v0 = vmax.f32 %v1617_v60, 0.0 }
 0x40c   : > { %v3390_v3 = vpack.c.bf16 %v3109_v62, %v3108_v59  ;;  %v2855_v4 = vmax.f32 %v2266_v63, 0.0 }
 0x40e   : > { %3646 = vst [vmem:[%s4937_s23 + $0x730] sm:$0xff] %v3390_v3  ;;  %v3263_v5 = vpack.c.bf16 %v2855_v4, %v2854_v0  ;;  %v1936_v6 = vpop.f32.mrf.mxu2 }
 0x40f   : > { %v1937_v7 = vadd.f32 %v1936_v6, %v4927_v1  ;;  %v2585_v8 = vpop.f32.mrf.mxu3 }
 0x410   : > { %3519 = vst [vmem:[%s4937_s23 + $0x338] sm:$0xff] %v3263_v5  ;;  %v2586_v11 = vadd.f32 %v2585_v8, %v4929_v2  ;;  %v1619_v12 = vpop.f32.mrf.mxu0  ;;  %v4503_v8 = vld [vmem:[%s4901_s30 + $0x3f0] sm:$0xff] }
 0x411   : > { %v3110_v13 = vmax.f32 %v1937_v7, 0.0  ;;  %v1620_v14 = vadd.f32 %v1619_v12, %v4927_v1  ;;  %v2268_v15 = vpop.f32.mrf.mxu1  ;;  %v4439_v7 = vld [vmem:[%s4901_s30 + $0x1f0] sm:$0xff] }
 0x412   : > { %v3111_v16 = vmax.f32 %v2586_v11, 0.0  ;;  %v2269_v17 = vadd.f32 %v2268_v15, %v4929_v2 }
 0x413   : > { %v2856_v18 = vmax.f32 %v1620_v14, 0.0  ;;  %1658 = vmatmul.bf16.gmra.mxu0 %v4437_v9  ;;  %1978 = vmatmul.bf16.gmra.mxu2 %v4501_v10 }
 0x414   : > { %v3391_v19 = vpack.c.bf16 %v3111_v16, %v3110_v13  ;;  %v2857_v20 = vmax.f32 %v2269_v17, 0.0  ;;  %2307 = vmatmul.bf16.gmra.mxu1 %v4437_v9  ;;  %2627 = vmatmul.bf16.gmra.mxu3 %v4501_v10 }
 0x416   : > { %3647 = vst [vmem:[%s4937_s23 + $0x738] sm:$0xff] %v3391_v19  ;;  %v3264_v21 = vpack.c.bf16 %v2857_v20, %v2856_v18  ;;  %v1939_v22 = vpop.f32.mrf.mxu2 }
 0x417   : > { %v1940_v23 = vadd.f32 %v1939_v22, %v4927_v1  ;;  %v2588_v24 = vpop.f32.mrf.mxu3 }
 0x418   : > { %3520 = vst [vmem:[%s4937_s23 + $0x340] sm:$0xff] %v3264_v21  ;;  %v2589_v25 = vadd.f32 %v2588_v24, %v4929_v2  ;;  %v1621_v26 = vpop.f32.mrf.mxu0 }
 0x419   : > { %v3112_v27 = vmax.f32 %v1940_v23, 0.0  ;;  %v1622_v28 = vadd.f32 %v1621_v26, %v4927_v1  ;;  %v2270_v29 = vpop.f32.mrf.mxu1 }
 0x41a   : > { %v3113_v30 = vmax.f32 %v2589_v25, 0.0  ;;  %v2271_v31 = vadd.f32 %v2270_v29, %v4929_v2 }
 0x41b   : > { %v2858_v32 = vmax.f32 %v1622_v28, 0.0 }
 0x41c   : > { %v3392_v33 = vpack.c.bf16 %v3113_v30, %v3112_v27  ;;  %v2859_v34 = vmax.f32 %v2271_v31, 0.0 }
 0x41e   : > { %3648 = vst [vmem:[%s4937_s23 + $0x740] sm:$0xff] %v3392_v33  ;;  %v3265_v35 = vpack.c.bf16 %v2859_v34, %v2858_v32  ;;  %v1941_v36 = vpop.f32.mrf.mxu2 }
 0x41f   : > { %v1942_v37 = vadd.f32 %v1941_v36, %v4927_v1  ;;  %v2590_v38 = vpop.f32.mrf.mxu3 }
 0x420   : > { %3521 = vst [vmem:[%s4937_s23 + $0x348] sm:$0xff] %v3265_v35  ;;  %v2591_v41 = vadd.f32 %v2590_v38, %v4929_v2  ;;  %v1624_v42 = vpop.f32.mrf.mxu0  ;;  %v4504_v38 = vld [vmem:[%s4901_s30 + $0x3f8] sm:$0xff] }
 0x421   : > { %v3114_v43 = vmax.f32 %v1942_v37, 0.0  ;;  %v1625_v44 = vadd.f32 %v1624_v42, %v4927_v1  ;;  %v2273_v45 = vpop.f32.mrf.mxu1  ;;  %v4440_v37 = vld [vmem:[%s4901_s30 + $0x1f8] sm:$0xff] }
 0x422   : > { %v3115_v46 = vmax.f32 %v2591_v41, 0.0  ;;  %v2274_v47 = vadd.f32 %v2273_v45, %v4929_v2 }
 0x423   : > { %v2860_v48 = vmax.f32 %v1625_v44, 0.0  ;;  %1663 = vmatmul.bf16.gmra.mxu0 %v4438_v39  ;;  %1983 = vmatmul.bf16.gmra.mxu2 %v4502_v40 }
 0x424   : > { %v3393_v49 = vpack.c.bf16 %v3115_v46, %v3114_v43  ;;  %v2861_v50 = vmax.f32 %v2274_v47, 0.0  ;;  %2312 = vmatmul.bf16.gmra.mxu1 %v4438_v39  ;;  %2632 = vmatmul.bf16.gmra.mxu3 %v4502_v40 }
 0x426   : > { %3649 = vst [vmem:[%s4937_s23 + $0x748] sm:$0xff] %v3393_v49  ;;  %v3266_v51 = vpack.c.bf16 %v2861_v50, %v2860_v48  ;;  %v1944_v52 = vpop.f32.mrf.mxu2 }
 0x427   : > { %v1945_v53 = vadd.f32 %v1944_v52, %v4927_v1  ;;  %v2593_v54 = vpop.f32.mrf.mxu3 }
 0x428   : > { %3522 = vst [vmem:[%s4937_s23 + $0x350] sm:$0xff] %v3266_v51  ;;  %v2594_v55 = vadd.f32 %v2593_v54, %v4929_v2  ;;  %v1626_v56 = vpop.f32.mrf.mxu0 }
 0x429   : > { %v3116_v57 = vmax.f32 %v1945_v53, 0.0  ;;  %v1627_v58 = vadd.f32 %v1626_v56, %v4927_v1  ;;  %v2275_v59 = vpop.f32.mrf.mxu1 }
 0x42a   : > { %v3117_v60 = vmax.f32 %v2594_v55, 0.0  ;;  %v2276_v61 = vadd.f32 %v2275_v59, %v4929_v2 }
 0x42b   : > { %v2862_v62 = vmax.f32 %v1627_v58, 0.0 }
 0x42c   : > { %v3394_v63 = vpack.c.bf16 %v3117_v60, %v3116_v57  ;;  %v2863_v0 = vmax.f32 %v2276_v61, 0.0 }
 0x42e   : > { %3650 = vst [vmem:[%s4937_s23 + $0x750] sm:$0xff] %v3394_v63  ;;  %v3267_v3 = vpack.c.bf16 %v2863_v0, %v2862_v62  ;;  %v1946_v4 = vpop.f32.mrf.mxu2 }
 0x42f   : > { %v1947_v5 = vadd.f32 %v1946_v4, %v4927_v1  ;;  %v2595_v6 = vpop.f32.mrf.mxu3 }
 0x430   : > { %3523 = vst [vmem:[%s4937_s23 + $0x358] sm:$0xff] %v3267_v3  ;;  %v2596_v9 = vadd.f32 %v2595_v6, %v4929_v2  ;;  %v1629_v10 = vpop.f32.mrf.mxu0 }
 0x431   : > { %v3118_v11 = vmax.f32 %v1947_v5, 0.0  ;;  %v1630_v12 = vadd.f32 %v1629_v10, %v4927_v1  ;;  %v2278_v13 = vpop.f32.mrf.mxu1 }
 0x432   : > { %v3119_v14 = vmax.f32 %v2596_v9, 0.0  ;;  %v2279_v15 = vadd.f32 %v2278_v13, %v4929_v2 }
 0x433   : > { %v2864_v16 = vmax.f32 %v1630_v12, 0.0  ;;  %1668 = vmatmul.bf16.gmra.mxu0 %v4439_v7  ;;  %1988 = vmatmul.bf16.gmra.mxu2 %v4503_v8 }
 0x434   : > { %v3395_v17 = vpack.c.bf16 %v3119_v14, %v3118_v11  ;;  %v2865_v18 = vmax.f32 %v2279_v15, 0.0  ;;  %2317 = vmatmul.bf16.gmra.mxu1 %v4439_v7  ;;  %2637 = vmatmul.bf16.gmra.mxu3 %v4503_v8 }
 0x436   : > { %3651 = vst [vmem:[%s4937_s23 + $0x758] sm:$0xff] %v3395_v17  ;;  %v3268_v19 = vpack.c.bf16 %v2865_v18, %v2864_v16  ;;  %v1949_v20 = vpop.f32.mrf.mxu2 }
 0x437   : > { %v1950_v21 = vadd.f32 %v1949_v20, %v4927_v1  ;;  %v2598_v22 = vpop.f32.mrf.mxu3 }
 0x438   : > { %3524 = vst [vmem:[%s4937_s23 + $0x360] sm:$0xff] %v3268_v19  ;;  %v2599_v23 = vadd.f32 %v2598_v22, %v4929_v2  ;;  %v1631_v24 = vpop.f32.mrf.mxu0 }
 0x439   : > { %v3120_v25 = vmax.f32 %v1950_v21, 0.0  ;;  %v1632_v26 = vadd.f32 %v1631_v24, %v4927_v1  ;;  %v2280_v27 = vpop.f32.mrf.mxu1 }
 0x43a   : > { %v3121_v28 = vmax.f32 %v2599_v23, 0.0  ;;  %v2281_v29 = vadd.f32 %v2280_v27, %v4929_v2 }
 0x43b   : > { %v2866_v30 = vmax.f32 %v1632_v26, 0.0 }
 0x43c   : > { %v3396_v31 = vpack.c.bf16 %v3121_v28, %v3120_v25  ;;  %v2867_v32 = vmax.f32 %v2281_v29, 0.0 }
 0x43e   : > { %3652 = vst [vmem:[%s4937_s23 + $0x760] sm:$0xff] %v3396_v31  ;;  %v3269_v33 = vpack.c.bf16 %v2867_v32, %v2866_v30  ;;  %v1951_v34 = vpop.f32.mrf.mxu2 }
 0x43f   : > { %v1952_v35 = vadd.f32 %v1951_v34, %v4927_v1  ;;  %v2600_v36 = vpop.f32.mrf.mxu3 }
 0x440   : > { %3525 = vst [vmem:[%s4937_s23 + $0x368] sm:$0xff] %v3269_v33  ;;  %v2601_v39 = vadd.f32 %v2600_v36, %v4929_v2  ;;  %v1634_v40 = vpop.f32.mrf.mxu0 }
 0x441   : > { %v3122_v41 = vmax.f32 %v1952_v35, 0.0  ;;  %v1635_v42 = vadd.f32 %v1634_v40, %v4927_v1  ;;  %v2283_v43 = vpop.f32.mrf.mxu1 }
 0x442   : > { %v3123_v44 = vmax.f32 %v2601_v39, 0.0  ;;  %v2284_v45 = vadd.f32 %v2283_v43, %v4929_v2 }
 0x443   : > { %v2868_v46 = vmax.f32 %v1635_v42, 0.0  ;;  %1673 = vmatmul.bf16.gmra.mxu0 %v4440_v37  ;;  %1993 = vmatmul.bf16.gmra.mxu2 %v4504_v38 }
 0x444   : > { %v3397_v47 = vpack.c.bf16 %v3123_v44, %v3122_v41  ;;  %v2869_v48 = vmax.f32 %v2284_v45, 0.0  ;;  %2322 = vmatmul.bf16.gmra.mxu1 %v4440_v37  ;;  %2642 = vmatmul.bf16.gmra.mxu3 %v4504_v38 }
 0x446   : > { %3653 = vst [vmem:[%s4937_s23 + $0x768] sm:$0xff] %v3397_v47  ;;  %v3270_v49 = vpack.c.bf16 %v2869_v48, %v2868_v46  ;;  %v1954_v50 = vpop.f32.mrf.mxu2 }
 0x447   : > { %v1955_v51 = vadd.f32 %v1954_v50, %v4927_v1  ;;  %v2603_v52 = vpop.f32.mrf.mxu3 }
 0x448   : > { %3526 = vst [vmem:[%s4937_s23 + $0x370] sm:$0xff] %v3270_v49  ;;  %v2604_v53 = vadd.f32 %v2603_v52, %v4929_v2  ;;  %v1636_v54 = vpop.f32.mrf.mxu0 }
 0x449   : > { %v3124_v55 = vmax.f32 %v1955_v51, 0.0  ;;  %v1637_v56 = vadd.f32 %v1636_v54, %v4927_v1  ;;  %v2285_v57 = vpop.f32.mrf.mxu1 }
 0x44a   : > { %v3125_v58 = vmax.f32 %v2604_v53, 0.0  ;;  %v2286_v59 = vadd.f32 %v2285_v57, %v4929_v2 }
 0x44b   : > { %v2870_v60 = vmax.f32 %v1637_v56, 0.0 }
 0x44c   : > { %v3398_v61 = vpack.c.bf16 %v3125_v58, %v3124_v55  ;;  %v2871_v62 = vmax.f32 %v2286_v59, 0.0 }
 0x44e   : > { %3654 = vst [vmem:[%s4937_s23 + $0x770] sm:$0xff] %v3398_v61  ;;  %v3271_v63 = vpack.c.bf16 %v2871_v62, %v2870_v60  ;;  %v1956_v0 = vpop.f32.mrf.mxu2 }
 0x44f   : > { %v1957_v3 = vadd.f32 %v1956_v0, %v4927_v1  ;;  %v2605_v4 = vpop.f32.mrf.mxu3 }
 0x450   : > { %3527 = vst [vmem:[%s4937_s23 + $0x378] sm:$0xff] %v3271_v63  ;;  %v2606_v5 = vadd.f32 %v2605_v4, %v4929_v2  ;;  %v1639_v6 = vpop.f32.mrf.mxu0 }
 0x451   : > { %v3126_v7 = vmax.f32 %v1957_v3, 0.0  ;;  %v1640_v8 = vadd.f32 %v1639_v6, %v4927_v1  ;;  %v2288_v9 = vpop.f32.mrf.mxu1 }
 0x452   : > { %v3127_v10 = vmax.f32 %v2606_v5, 0.0  ;;  %v2289_v11 = vadd.f32 %v2288_v9, %v4929_v2 }
 0x453   : > { %v2872_v12 = vmax.f32 %v1640_v8, 0.0 }
 0x454   : > { %v3399_v13 = vpack.c.bf16 %v3127_v10, %v3126_v7  ;;  %v2873_v14 = vmax.f32 %v2289_v11, 0.0 }
 0x456   : > { %3655 = vst [vmem:[%s4937_s23 + $0x778] sm:$0xff] %v3399_v13  ;;  %v3272_v15 = vpack.c.bf16 %v2873_v14, %v2872_v12  ;;  %v1959_v16 = vpop.f32.mrf.mxu2 }
 0x457   : > { %v1960_v17 = vadd.f32 %v1959_v16, %v4927_v1  ;;  %v2608_v18 = vpop.f32.mrf.mxu3 }
 0x458   : > { %3528 = vst [vmem:[%s4937_s23 + $0x380] sm:$0xff] %v3272_v15  ;;  %v2609_v19 = vadd.f32 %v2608_v18, %v4929_v2  ;;  %v1641_v20 = vpop.f32.mrf.mxu0 }
 0x459   : > { %v3128_v21 = vmax.f32 %v1960_v17, 0.0  ;;  %v1642_v22 = vadd.f32 %v1641_v20, %v4927_v1  ;;  %v2290_v23 = vpop.f32.mrf.mxu1 }
 0x45a   : > { %v3129_v24 = vmax.f32 %v2609_v19, 0.0  ;;  %v2291_v25 = vadd.f32 %v2290_v23, %v4929_v2 }
 0x45b   : > { %v2874_v26 = vmax.f32 %v1642_v22, 0.0 }
 0x45c   : > { %v3400_v27 = vpack.c.bf16 %v3129_v24, %v3128_v21  ;;  %v2875_v28 = vmax.f32 %v2291_v25, 0.0 }
 0x45e   : > { %3656 = vst [vmem:[%s4937_s23 + $0x780] sm:$0xff] %v3400_v27  ;;  %v3273_v29 = vpack.c.bf16 %v2875_v28, %v2874_v26  ;;  %v1961_v30 = vpop.f32.mrf.mxu2 }
 0x45f   : > { %v1962_v31 = vadd.f32 %v1961_v30, %v4927_v1  ;;  %v2610_v32 = vpop.f32.mrf.mxu3 }
 0x460   : > { %3529 = vst [vmem:[%s4937_s23 + $0x388] sm:$0xff] %v3273_v29  ;;  %v2611_v33 = vadd.f32 %v2610_v32, %v4929_v2  ;;  %v1644_v34 = vpop.f32.mrf.mxu0 }
 0x461   : > { %v3130_v35 = vmax.f32 %v1962_v31, 0.0  ;;  %v1645_v36 = vadd.f32 %v1644_v34, %v4927_v1  ;;  %v2293_v37 = vpop.f32.mrf.mxu1 }
 0x462   : > { %v3131_v38 = vmax.f32 %v2611_v33, 0.0  ;;  %v2294_v39 = vadd.f32 %v2293_v37, %v4929_v2 }
 0x463   : > { %v2876_v40 = vmax.f32 %v1645_v36, 0.0 }
 0x464   : > { %v3401_v41 = vpack.c.bf16 %v3131_v38, %v3130_v35  ;;  %v2877_v42 = vmax.f32 %v2294_v39, 0.0 }
 0x466   : > { %3657 = vst [vmem:[%s4937_s23 + $0x788] sm:$0xff] %v3401_v41  ;;  %v3274_v43 = vpack.c.bf16 %v2877_v42, %v2876_v40  ;;  %v1964_v44 = vpop.f32.mrf.mxu2 }
 0x467   : > { %v1965_v45 = vadd.f32 %v1964_v44, %v4927_v1  ;;  %v2613_v46 = vpop.f32.mrf.mxu3 }
 0x468   : > { %3530 = vst [vmem:[%s4937_s23 + $0x390] sm:$0xff] %v3274_v43  ;;  %v2614_v47 = vadd.f32 %v2613_v46, %v4929_v2  ;;  %v1646_v48 = vpop.f32.mrf.mxu0 }
 0x469   : > { %v3132_v49 = vmax.f32 %v1965_v45, 0.0  ;;  %v1647_v50 = vadd.f32 %v1646_v48, %v4927_v1  ;;  %v2295_v51 = vpop.f32.mrf.mxu1 }
 0x46a   : > { %v3133_v52 = vmax.f32 %v2614_v47, 0.0  ;;  %v2296_v53 = vadd.f32 %v2295_v51, %v4929_v2 }
 0x46b   : > { %v2878_v54 = vmax.f32 %v1647_v50, 0.0 }
 0x46c   : > { %v3402_v55 = vpack.c.bf16 %v3133_v52, %v3132_v49  ;;  %v2879_v56 = vmax.f32 %v2296_v53, 0.0 }
 0x46e   : > { %3658 = vst [vmem:[%s4937_s23 + $0x790] sm:$0xff] %v3402_v55  ;;  %v3275_v57 = vpack.c.bf16 %v2879_v56, %v2878_v54  ;;  %v1966_v58 = vpop.f32.mrf.mxu2 }
 0x46f   : > { %v1967_v59 = vadd.f32 %v1966_v58, %v4927_v1  ;;  %v2615_v60 = vpop.f32.mrf.mxu3 }
 0x470   : > { %3531 = vst [vmem:[%s4937_s23 + $0x398] sm:$0xff] %v3275_v57  ;;  %v2616_v61 = vadd.f32 %v2615_v60, %v4929_v2  ;;  %v1649_v62 = vpop.f32.mrf.mxu0 }
 0x471   : > { %v3134_v63 = vmax.f32 %v1967_v59, 0.0  ;;  %v1650_v0 = vadd.f32 %v1649_v62, %v4927_v1  ;;  %v2298_v3 = vpop.f32.mrf.mxu1 }
 0x472   : > { %v3135_v4 = vmax.f32 %v2616_v61, 0.0  ;;  %v2299_v5 = vadd.f32 %v2298_v3, %v4929_v2 }
 0x473   : > { %v2880_v6 = vmax.f32 %v1650_v0, 0.0 }
 0x474   : > { %v3403_v7 = vpack.c.bf16 %v3135_v4, %v3134_v63  ;;  %v2881_v8 = vmax.f32 %v2299_v5, 0.0 }
 0x476   : > { %3659 = vst [vmem:[%s4937_s23 + $0x798] sm:$0xff] %v3403_v7  ;;  %v3276_v9 = vpack.c.bf16 %v2881_v8, %v2880_v6  ;;  %v1969_v10 = vpop.f32.mrf.mxu2 }
 0x477   : > { %v1970_v11 = vadd.f32 %v1969_v10, %v4927_v1  ;;  %v2618_v12 = vpop.f32.mrf.mxu3 }
 0x478   : > { %3532 = vst [vmem:[%s4937_s23 + $0x3a0] sm:$0xff] %v3276_v9  ;;  %v2619_v13 = vadd.f32 %v2618_v12, %v4929_v2  ;;  %v1651_v14 = vpop.f32.mrf.mxu0 }
 0x479   : > { %v3136_v15 = vmax.f32 %v1970_v11, 0.0  ;;  %v1652_v16 = vadd.f32 %v1651_v14, %v4927_v1  ;;  %v2300_v17 = vpop.f32.mrf.mxu1 }
 0x47a   : > { %v3137_v18 = vmax.f32 %v2619_v13, 0.0  ;;  %v2301_v19 = vadd.f32 %v2300_v17, %v4929_v2 }
 0x47b   : > { %v2882_v20 = vmax.f32 %v1652_v16, 0.0 }
 0x47c   : > { %v3404_v21 = vpack.c.bf16 %v3137_v18, %v3136_v15  ;;  %v2883_v22 = vmax.f32 %v2301_v19, 0.0 }
 0x47e   : > { %3660 = vst [vmem:[%s4937_s23 + $0x7a0] sm:$0xff] %v3404_v21  ;;  %v3277_v23 = vpack.c.bf16 %v2883_v22, %v2882_v20  ;;  %v1971_v24 = vpop.f32.mrf.mxu2 }
 0x47f   : > { %v1972_v25 = vadd.f32 %v1971_v24, %v4927_v1  ;;  %v2620_v26 = vpop.f32.mrf.mxu3 }
 0x480   : > { %3533 = vst [vmem:[%s4937_s23 + $0x3a8] sm:$0xff] %v3277_v23  ;;  %v2621_v27 = vadd.f32 %v2620_v26, %v4929_v2  ;;  %v1654_v28 = vpop.f32.mrf.mxu0 }
 0x481   : > { %v3138_v29 = vmax.f32 %v1972_v25, 0.0  ;;  %v1655_v30 = vadd.f32 %v1654_v28, %v4927_v1  ;;  %v2303_v31 = vpop.f32.mrf.mxu1 }
 0x482   : > { %v3139_v32 = vmax.f32 %v2621_v27, 0.0  ;;  %v2304_v33 = vadd.f32 %v2303_v31, %v4929_v2 }
 0x483   : > { %v2884_v34 = vmax.f32 %v1655_v30, 0.0 }
 0x484   : > { %v3405_v35 = vpack.c.bf16 %v3139_v32, %v3138_v29  ;;  %v2885_v36 = vmax.f32 %v2304_v33, 0.0 }
 0x486   : > { %3661 = vst [vmem:[%s4937_s23 + $0x7a8] sm:$0xff] %v3405_v35  ;;  %v3278_v37 = vpack.c.bf16 %v2885_v36, %v2884_v34  ;;  %v1974_v38 = vpop.f32.mrf.mxu2 }
 0x487   : > { %v1975_v39 = vadd.f32 %v1974_v38, %v4927_v1  ;;  %v2623_v40 = vpop.f32.mrf.mxu3 }
 0x488   : > { %3534 = vst [vmem:[%s4937_s23 + $0x3b0] sm:$0xff] %v3278_v37  ;;  %v2624_v41 = vadd.f32 %v2623_v40, %v4929_v2  ;;  %v1656_v42 = vpop.f32.mrf.mxu0 }
 0x489   : > { %v3140_v43 = vmax.f32 %v1975_v39, 0.0  ;;  %v1657_v44 = vadd.f32 %v1656_v42, %v4927_v1  ;;  %v2305_v45 = vpop.f32.mrf.mxu1 }
 0x48a   : > { %v3141_v46 = vmax.f32 %v2624_v41, 0.0  ;;  %v2306_v47 = vadd.f32 %v2305_v45, %v4929_v2 }
 0x48b   : > { %v2886_v48 = vmax.f32 %v1657_v44, 0.0 }
 0x48c   : > { %v3406_v49 = vpack.c.bf16 %v3141_v46, %v3140_v43  ;;  %v2887_v50 = vmax.f32 %v2306_v47, 0.0 }
 0x48e   : > { %3662 = vst [vmem:[%s4937_s23 + $0x7b0] sm:$0xff] %v3406_v49  ;;  %v3279_v51 = vpack.c.bf16 %v2887_v50, %v2886_v48  ;;  %v1976_v52 = vpop.f32.mrf.mxu2 }
 0x48f   : > { %v1977_v53 = vadd.f32 %v1976_v52, %v4927_v1  ;;  %v2625_v54 = vpop.f32.mrf.mxu3 }
 0x490   : > { %3535 = vst [vmem:[%s4937_s23 + $0x3b8] sm:$0xff] %v3279_v51  ;;  %v2626_v55 = vadd.f32 %v2625_v54, %v4929_v2  ;;  %v1659_v56 = vpop.f32.mrf.mxu0 }
 0x491   : > { %v3142_v57 = vmax.f32 %v1977_v53, 0.0  ;;  %v1660_v58 = vadd.f32 %v1659_v56, %v4927_v1  ;;  %v2308_v59 = vpop.f32.mrf.mxu1 }
 0x492   : > { %v3143_v60 = vmax.f32 %v2626_v55, 0.0  ;;  %v2309_v61 = vadd.f32 %v2308_v59, %v4929_v2 }
 0x493   : > { %v2888_v62 = vmax.f32 %v1660_v58, 0.0 }
 0x494   : > { %v3407_v63 = vpack.c.bf16 %v3143_v60, %v3142_v57  ;;  %v2889_v0 = vmax.f32 %v2309_v61, 0.0 }
 0x496   : > { %3663 = vst [vmem:[%s4937_s23 + $0x7b8] sm:$0xff] %v3407_v63  ;;  %v3280_v3 = vpack.c.bf16 %v2889_v0, %v2888_v62  ;;  %v1979_v4 = vpop.f32.mrf.mxu2 }
 0x497   : > { %v1980_v5 = vadd.f32 %v1979_v4, %v4927_v1  ;;  %v2628_v6 = vpop.f32.mrf.mxu3 }
 0x498   : > { %3536 = vst [vmem:[%s4937_s23 + $0x3c0] sm:$0xff] %v3280_v3  ;;  %v2629_v7 = vadd.f32 %v2628_v6, %v4929_v2  ;;  %v1661_v8 = vpop.f32.mrf.mxu0 }
 0x499   : > { %v3144_v9 = vmax.f32 %v1980_v5, 0.0  ;;  %v1662_v10 = vadd.f32 %v1661_v8, %v4927_v1  ;;  %v2310_v11 = vpop.f32.mrf.mxu1 }
 0x49a   : > { %v3145_v12 = vmax.f32 %v2629_v7, 0.0  ;;  %v2311_v13 = vadd.f32 %v2310_v11, %v4929_v2 }
 0x49b   : > { %v2890_v14 = vmax.f32 %v1662_v10, 0.0 }
 0x49c   : > { %v3408_v15 = vpack.c.bf16 %v3145_v12, %v3144_v9  ;;  %v2891_v16 = vmax.f32 %v2311_v13, 0.0 }
 0x49e   : > { %3664 = vst [vmem:[%s4937_s23 + $0x7c0] sm:$0xff] %v3408_v15  ;;  %v3281_v17 = vpack.c.bf16 %v2891_v16, %v2890_v14  ;;  %v1981_v18 = vpop.f32.mrf.mxu2 }
 0x49f   : > { %v1982_v19 = vadd.f32 %v1981_v18, %v4927_v1  ;;  %v2630_v20 = vpop.f32.mrf.mxu3 }
 0x4a0   : > { %3537 = vst [vmem:[%s4937_s23 + $0x3c8] sm:$0xff] %v3281_v17  ;;  %v2631_v21 = vadd.f32 %v2630_v20, %v4929_v2  ;;  %v1664_v22 = vpop.f32.mrf.mxu0 }
 0x4a1   : > { %v3146_v23 = vmax.f32 %v1982_v19, 0.0  ;;  %v1665_v24 = vadd.f32 %v1664_v22, %v4927_v1  ;;  %v2313_v25 = vpop.f32.mrf.mxu1 }
 0x4a2   : > { %v3147_v26 = vmax.f32 %v2631_v21, 0.0  ;;  %v2314_v27 = vadd.f32 %v2313_v25, %v4929_v2 }
 0x4a3   : > { %v2892_v28 = vmax.f32 %v1665_v24, 0.0 }
 0x4a4   : > { %v3409_v29 = vpack.c.bf16 %v3147_v26, %v3146_v23  ;;  %v2893_v30 = vmax.f32 %v2314_v27, 0.0 }
 0x4a6   : > { %3665 = vst [vmem:[%s4937_s23 + $0x7c8] sm:$0xff] %v3409_v29  ;;  %v3282_v31 = vpack.c.bf16 %v2893_v30, %v2892_v28  ;;  %v1984_v32 = vpop.f32.mrf.mxu2 }
 0x4a7   : > { %v1985_v33 = vadd.f32 %v1984_v32, %v4927_v1  ;;  %v2633_v34 = vpop.f32.mrf.mxu3 }
 0x4a8   : > { %3538 = vst [vmem:[%s4937_s23 + $0x3d0] sm:$0xff] %v3282_v31  ;;  %v2634_v35 = vadd.f32 %v2633_v34, %v4929_v2  ;;  %v1666_v36 = vpop.f32.mrf.mxu0 }
 0x4a9   : > { %v3148_v37 = vmax.f32 %v1985_v33, 0.0  ;;  %v1667_v38 = vadd.f32 %v1666_v36, %v4927_v1  ;;  %v2315_v39 = vpop.f32.mrf.mxu1 }
 0x4aa   : > { %v3149_v40 = vmax.f32 %v2634_v35, 0.0  ;;  %v2316_v41 = vadd.f32 %v2315_v39, %v4929_v2 }
 0x4ab   : > { %v2894_v42 = vmax.f32 %v1667_v38, 0.0 }
 0x4ac   : > { %v3410_v43 = vpack.c.bf16 %v3149_v40, %v3148_v37  ;;  %v2895_v44 = vmax.f32 %v2316_v41, 0.0 }
 0x4ae   : > { %3666 = vst [vmem:[%s4937_s23 + $0x7d0] sm:$0xff] %v3410_v43  ;;  %v3283_v45 = vpack.c.bf16 %v2895_v44, %v2894_v42  ;;  %v1986_v46 = vpop.f32.mrf.mxu2 }
 0x4af   : > { %v1987_v47 = vadd.f32 %v1986_v46, %v4927_v1  ;;  %v2635_v48 = vpop.f32.mrf.mxu3 }
 0x4b0   : > { %3539 = vst [vmem:[%s4937_s23 + $0x3d8] sm:$0xff] %v3283_v45  ;;  %v2636_v49 = vadd.f32 %v2635_v48, %v4929_v2  ;;  %v1669_v50 = vpop.f32.mrf.mxu0 }
 0x4b1   : > { %v3150_v51 = vmax.f32 %v1987_v47, 0.0  ;;  %v1670_v52 = vadd.f32 %v1669_v50, %v4927_v1  ;;  %v2318_v53 = vpop.f32.mrf.mxu1 }
 0x4b2   : > { %v3151_v54 = vmax.f32 %v2636_v49, 0.0  ;;  %v2319_v55 = vadd.f32 %v2318_v53, %v4929_v2 }
 0x4b3   : > { %v2896_v56 = vmax.f32 %v1670_v52, 0.0 }
 0x4b4   : > { %v3411_v57 = vpack.c.bf16 %v3151_v54, %v3150_v51  ;;  %v2897_v58 = vmax.f32 %v2319_v55, 0.0 }
 0x4b6   : > { %3667 = vst [vmem:[%s4937_s23 + $0x7d8] sm:$0xff] %v3411_v57  ;;  %v3284_v59 = vpack.c.bf16 %v2897_v58, %v2896_v56  ;;  %v1989_v60 = vpop.f32.mrf.mxu2 }
 0x4b7   : > { %v1990_v61 = vadd.f32 %v1989_v60, %v4927_v1  ;;  %v2638_v62 = vpop.f32.mrf.mxu3 }
 0x4b8   : > { %3540 = vst [vmem:[%s4937_s23 + $0x3e0] sm:$0xff] %v3284_v59  ;;  %v2639_v63 = vadd.f32 %v2638_v62, %v4929_v2  ;;  %v1671_v0 = vpop.f32.mrf.mxu0 }
 0x4b9   : > { %v3152_v3 = vmax.f32 %v1990_v61, 0.0  ;;  %v1672_v4 = vadd.f32 %v1671_v0, %v4927_v1  ;;  %v2320_v5 = vpop.f32.mrf.mxu1 }
 0x4ba   : > { %v3153_v6 = vmax.f32 %v2639_v63, 0.0  ;;  %v2321_v7 = vadd.f32 %v2320_v5, %v4929_v2 }
 0x4bb   : > { %v2898_v8 = vmax.f32 %v1672_v4, 0.0 }
 0x4bc   : > { %v3412_v9 = vpack.c.bf16 %v3153_v6, %v3152_v3  ;;  %v2899_v10 = vmax.f32 %v2321_v7, 0.0 }
 0x4be   : > { %3668 = vst [vmem:[%s4937_s23 + $0x7e0] sm:$0xff] %v3412_v9  ;;  %v3285_v11 = vpack.c.bf16 %v2899_v10, %v2898_v8  ;;  %v1991_v12 = vpop.f32.mrf.mxu2 }
 0x4bf   : > { %v1992_v13 = vadd.f32 %v1991_v12, %v4927_v1  ;;  %v2640_v14 = vpop.f32.mrf.mxu3 }
 0x4c0   : > { %3541 = vst [vmem:[%s4937_s23 + $0x3e8] sm:$0xff] %v3285_v11  ;;  %v2641_v15 = vadd.f32 %v2640_v14, %v4929_v2  ;;  %v1674_v16 = vpop.f32.mrf.mxu0 }
 0x4c1   : > { %v3154_v17 = vmax.f32 %v1992_v13, 0.0  ;;  %v1675_v18 = vadd.f32 %v1674_v16, %v4927_v1  ;;  %v2323_v19 = vpop.f32.mrf.mxu1 }
 0x4c2   : > { %v3155_v20 = vmax.f32 %v2641_v15, 0.0  ;;  %v2324_v21 = vadd.f32 %v2323_v19, %v4929_v2 }
 0x4c3   : > { %v2900_v22 = vmax.f32 %v1675_v18, 0.0 }
 0x4c4   : > { %v3413_v23 = vpack.c.bf16 %v3155_v20, %v3154_v17  ;;  %v2901_v24 = vmax.f32 %v2324_v21, 0.0 }
 0x4c6   : > { %3669 = vst [vmem:[%s4937_s23 + $0x7e8] sm:$0xff] %v3413_v23  ;;  %v3286_v25 = vpack.c.bf16 %v2901_v24, %v2900_v22  ;;  %v1994_v26 = vpop.f32.mrf.mxu2 }
 0x4c7   : > { %v1995_v27 = vadd.f32 %v1994_v26, %v4927_v1  ;;  %v2643_v28 = vpop.f32.mrf.mxu3 }
 0x4c8   : > { %3542 = vst [vmem:[%s4937_s23 + $0x3f0] sm:$0xff] %v3286_v25  ;;  %v2644_v29 = vadd.f32 %v2643_v28, %v4929_v2  ;;  %v1676_v30 = vpop.f32.mrf.mxu0 }
 0x4c9   : > { %v3156_v31 = vmax.f32 %v1995_v27, 0.0  ;;  %v1677_v32 = vadd.f32 %v1676_v30, %v4927_v1  ;;  %v2325_v33 = vpop.f32.mrf.mxu1 }
 0x4ca   : > { %v3157_v34 = vmax.f32 %v2644_v29, 0.0  ;;  %v2326_v35 = vadd.f32 %v2325_v33, %v4929_v2 }
 0x4cb   : > { %v2902_v36 = vmax.f32 %v1677_v32, 0.0 }
 0x4cc   : > { %v3414_v37 = vpack.c.bf16 %v3157_v34, %v3156_v31  ;;  %v2903_v38 = vmax.f32 %v2326_v35, 0.0 }
 0x4ce   : > { %3670 = vst [vmem:[%s4937_s23 + $0x7f0] sm:$0xff] %v3414_v37  ;;  %v3287_v39 = vpack.c.bf16 %v2903_v38, %v2902_v36  ;;  %v1996_v40 = vpop.f32.mrf.mxu2 }
 0x4cf   : > { %v1997_v41 = vadd.f32 %v1996_v40, %v4927_v1  ;;  %v2645_v42 = vpop.f32.mrf.mxu3 }
 0x4d0   : > { %3543 = vst [vmem:[%s4937_s23 + $0x3f8] sm:$0xff] %v3287_v39  ;;  %v2646_v43 = vadd.f32 %v2645_v42, %v4929_v2 }
 0x4d1   : > { %v3158_v44 = vmax.f32 %v1997_v41, 0.0 }
 0x4d2   : > { %v3159_v45 = vmax.f32 %v2646_v43, 0.0 }
 0x4d4   : > { %v3415_v46 = vpack.c.bf16 %v3159_v45, %v3158_v44 }
 0x4d6   : > { %3671 = vst [vmem:[%s4937_s23 + $0x7f8] sm:$0xff] %v3415_v46 }
 0x4d7   : > { %4729 = shalt.err (!%p4726_p10)
}
 0x4d8   : > { %s4780_s22 = smov 128   ;;  %s4781_s25 = smov 8  }
 0x4d9   : > { %4549 = dma.vmem_to_hbm [thread:$0]  (%p4867_p0), %s3687_s16, 32768, %s3689_s4, %s3673_s5, %s4780_s22, %s4780_s22, %s4781_s25  }
 0x4da PF: > { %p4571_p11 = scmp.ge.s32.totalorder %s4772_s15, 2  ;;  %s3703_s30 = sand.u32 1, %s4760_s12  }
 0x4db   : > { %s3704_s18 = scalar_lea.sflag [#allocation4], %s3703_s30 }
 0x4dc   : > { %p4563_p12 = pnand %p4571_p11, %p4837_p6 }
 0x4de   : > { %p4564_p13 = pneg %p4563_p12 }
 0x4e0   : > { %4755 = dma.done.wait (%p4564_p13), %s3704_s18, 32768  }
 0x4e1   : > { %4757 = vsyncadd (%p4564_p13), %s3704_s18, 4294934528  ;;  %p17_p3 = scmp.ge.s32.totalorder %s4857_s6, 6   ;;  %s5856_s12 = smov %s4764_s13 }
 0x4e2   : > { %s5857_s13 = smov %s4768_s14  ;;  %s5858_s14 = smov %s4873_s10 }
 0x4e3   : > { %s5859_s15 = smov %s4857_s6  ;;  %19 = sbr.rel (!%p17_p3) target bundleno = 6 (0x6), region = 85 }
 0x4e8   :  { %3710 = vsyncpa [#allocation3], 1 }
 0x4e9   :  { %3712 = vsyncpa [#allocation3 + $0x1], 1 }
 0x4ea   :  { %3713 = vsyncpa [#allocation6], 1 }
 0x4eb   :  { %3714 = vsyncpa [#allocation4], 1 }
 0x4ec   :  { %3716 = vsyncpa [#allocation4 + $0x1], 1 }

// kernel: tpu_custom_call.1
= control target key start
LH: loop header
LB: loop body
LE: loop exit
PB: predicated region body
PF: predicated region fallthrough
CT: control target
= control target key end

     0   :  { %8 = vsyncpa [#allocation3], 0  ;;  %s5847_s0 = inlined_call_operand.hbm [shape: bf16[8192,128], index: 0, kind: input, shape index: {}]   ;;  %s5848_s1 = inlined_call_operand.hbm [shape: bf16[128,256], index: 1, kind: input, shape index: {}]   ;;  %s5849_s2 = inlined_call_operand.hbm [shape: f32[1,256], index: 2, kind: input, shape index: {}]   ;;  %s5850_s3 = inlined_call_operand.hbm [shape: bf16[8192,256], index: 3, kind: output, shape index: {}]  }
   0x1   :  { %10 = vsyncpa [#allocation3 + $0x1], 0 }
   0x2   :  { %11 = vsyncpa [#allocation6], 0 }
   0x3   :  { %12 = vsyncpa [#allocation4], 0 }
   0x4   :  { %14 = vsyncpa [#allocation4 + $0x1], 0  ;;  %s4802_s12 = smov 0   ;;  %s4804_s13 = smov 0  }
   0x5   :  { %s4806_s14 = smov 0   ;;  %s4808_s15 = smov 0  }
   0x6 LB: > { %s4823_s16 = sadd.s32 4294967295, %s4772_s15   ;;  %s3781_s17 = sadd.s32 4294967294, %s4772_s15   ;;  %s4772_s15 = sphi %s4808_s15, %s5859_s15   ;;  %s4768_s14 = sphi %s4806_s14, %s5858_s14   ;;  %s4764_s13 = sphi %s4804_s13, %s5857_s13   ;;  %s4760_s12 = sphi %s4802_s12, %s5856_s12  }
   0x7   : > { %p40_p0 = scmp.ne.s32.totalorder %s4764_s13, %s4760_s12  ;;  %p41_p1 = scmp.eq.s32.totalorder %s4823_s16, 0 }
   0x8   : > { %p106_p2 = scmp.eq.s32.totalorder %s4823_s16, 3  ;;  %p112_p3 = scmp.eq.s32.totalorder %s3781_s17, 3 }
   0x9   : > { %p4832_p4 = por %p41_p1, %p40_p0  ;;  %p3782_p5 = scmp.ge.s32.totalorder %s4772_s15, 1 }
   0xa   : > { %p4837_p6 = por %p112_p3, %p40_p0  ;;  %p119_p7 = scmp.lt.s32.totalorder %s4772_s15, 5 }
   0xb   : > { %s130_s22 = sshll.u32 %s5848_s1, 4  ;;  %s4774_s24 = smov [#allocation5]   ;;  %s131_s22 = int_to_ptr.hbm [resolvable:$true] %s130_s22 }
   0xc   : > { %p4845_p8 = pnand %p3782_p5, %p119_p7  ;;  %s132_s25 = sshll.u32 %s4774_s24, 4  ;;  %s133_s25 = int_to_ptr.vmem [resolvable:$true] %s132_s25 }
   0xd   : > { %s145_s28 = sshll.u32 %s5849_s2, 4  ;;  %s4775_s29 = smov 128   ;;  %s146_s28 = int_to_ptr.hbm [resolvable:$true] %s145_s28 }
   0xe   : > { %p4551_p9 = pneg %p4845_p8  ;;  %s4776_s30 = smov 8  }
   0xf   : > { %s4777_s4 = smov [#allocation7]   ;;  %s4857_s6 = sadd.s32 1, %s4772_s15  }
  0x10   : > { %p4552_p10 = pnand %p4551_p9, %p41_p1  ;;  %s147_s5 = sshll.u32 %s4777_s4, 4  ;;  %s148_s5 = int_to_ptr.vmem [resolvable:$true] %s147_s5 }
  0x11   : > { %s27_s7 = sadd.s32 1, %s4768_s14  ;;  %s24_s8 = ssub.s32 %s4772_s15, %s4857_s6 }
  0x12   : > { %4554 = dma.hbm_to_vmem [thread:$0]  (!%p4552_p10), %s131_s22, 2048, %s133_s25, [#allocation6], %s4775_s29, %s4775_s29, %s4776_s30  }
  0x13   : > { %4557 = dma.hbm_to_vmem [thread:$0]  (!%p4552_p10), %s146_s28, 32, %s148_s5, [#allocation6]  }
  0x14   : > { %p34_p11 = scmp.ne.s32.totalorder %s4768_s14, %s4764_s13  ;;  %p25_p12 = scmp.eq.s32.totalorder %s24_s8, 0 }
  0x15   : > { %p35_p13 = scmp.eq.s32.totalorder %s4772_s15, 0  ;;  %p4568_p3 = scmp.lt.s32.totalorder %s4772_s15, 4 }
  0x16   : > { %p4867_p0 = por %p106_p2, %p34_p11  ;;  %s158_s11 = sand.u32 1, %s4768_s14  }
  0x17   : > { %s4873_s10 = scalar_select %p25_p12, %s4768_s14, %s27_s7  }
  0x18   : > { %p36_p5 = por %p35_p13, %p34_p11  ;;  %s3786_s17 = sshll.u32 %s158_s11, 10 }
  0x19   : > { %s4376_s20 = sshll.u32 %s4772_s15, 10  ;;  %s162_s25 = scalar_lea.vmem [#allocation2], %s3786_s17 }
  0x1a   : > { %s167_s24 = scalar_lea.hbm %s5847_s0, %s4376_s20  ;;  %s170_s26 = sshll.u32 %s162_s25, 4  ;;  %s171_s26 = int_to_ptr.vmem [resolvable:$true] %s170_s26 }
  0x1b   : > { %s168_s27 = sshll.u32 %s167_s24, 4  ;;  %p4880_p2 = pnand %p4568_p3, %p36_p5  ;;  %s169_s27 = int_to_ptr.hbm [resolvable:$true] %s168_s27 }
  0x1c   : > { %s159_s29 = scalar_lea.sflag [#allocation3], %s158_s11  ;;  %s4672_s30 = sshra.s32 %s169_s27, 4  ;;  %s4673_s30 = int_to_ptr.hbm [resolvable:$true] %s4672_s30 }
  0x1d   : > { %s4674_s4 = scalar_lea.hbm %s4673_s30, 1024  ;;  %p4676_p9 = pneg %p4880_p2 }
  0x1e   : > { %p4675_p7 = scmp.ne.s32.totalorder %s4673_s30, %s4674_s4  ;;  %s4679_s8 = scalar_lea.hbm %s5847_s0, 4096 }
  0x1f   : > { %p4680_p12 = scmp.lt.s32.totalorder %s4673_s30, %s5847_s0  ;;  %p4681_p13 = scmp.lt.s32.totalorder %s4679_s8, %s4674_s4 }
  0x20   : > { %p4677_p10 = pnand %p4676_p9, %p4675_p7 }
  0x21   : > { %p4682_p3 = por %p4681_p13, %p4680_p12 }
  0x22   : > { %p4678_p11 = pneg %p4677_p10 }
  0x24   : > { %p4683_p5 = pnand %p4682_p3, %p4678_p11 }
  0x26   : > { %4686 = shalt.err (!%p4683_p5)
}
  0x27   : > { %s4778_s11 = smov 64   ;;  %s4779_s21 = smov 4  }
  0x28   : > { %4561 = dma.hbm_to_vmem [thread:$0]  (!%p4880_p2), %s169_s27, 16384, %s171_s26, %s159_s29, %s4778_s11, %s4778_s11, %s4779_s21  }
  0x29   : > { %182 = sbr.rel (%p4845_p8) target bundleno = 1242 (0x4da), region = 32  ;;  %s4897_s22 = sand.u32 (!%p4845_p8), 1, %s4764_s13  }
  0x2a   : > { %s3790_s24 = sshll.u32 (!%p4845_p8), %s4897_s22, 10  ;;  %s185_s25 = scalar_lea.sflag (!%p4845_p8), [#allocation3], %s4897_s22 }
  0x2b   : > { %s4901_s30 = scalar_lea.vmem (!%p4845_p8), [#allocation2], %s3790_s24 }
  0x2e   : > { %4747 = dma.done.wait (%p4832_p4), %s185_s25, 16384  }
  0x2f   : > { %4749 = vsyncadd (%p4832_p4), %s185_s25, 4294950912 }
  0x30   : > { %4751 = dma.done.wait (%p41_p1), [#allocation6], 2080  }
  0x31   : > { %4753 = vsyncadd (%p41_p1), [#allocation6], 4294965216  ;;  %v4364_v0 = vld [vmem:[#allocation5 + $0x70] sm:$0xf]  ;;  %v4520_v1 = vld [vmem:[#allocation5 + $0x74] sm:$0xf0] }
  0x32   : > { %v4519_v2 = vld [vmem:[#allocation5 + $0x74] sm:$0xf]  ;;  %v4365_v3 = vor.u32 %v4520_v1, %v4364_v0  ;;  %v4366_v4 = vld [vmem:[#allocation5 + $0x78] sm:$0xf0]  ;;  %v4356_v5 = vld [vmem:[#allocation5 + $0x60] sm:$0xf] }
  0x33   : > { %v4518_v6 = vld [vmem:[#allocation5 + $0x64] sm:$0xf0]  ;;  %v4369_v7 = vor.u32 %v4519_v2, %v4366_v4  ;;  %v4517_v8 = vld [vmem:[#allocation5 + $0x64] sm:$0xf]  ;;  %v4358_v9 = vld [vmem:[#allocation5 + $0x68] sm:$0xf0] }
  0x34   : > { %1350 = vmatpush.bf16.msra.mxu0 %v4365_v3  ;;  %4523 = vmatpush.bf16.msra.mxu2 %v4365_v3  ;;  %v4357_v10 = vor.u32 %v4518_v6, %v4356_v5  ;;  %v4361_v11 = vor.u32 %v4517_v8, %v4358_v9  ;;  %v4348_v12 = vld [vmem:[#allocation5 + $0x50] sm:$0xf]  ;;  %v4516_v13 = vld [vmem:[#allocation5 + $0x54] sm:$0xf0]  ;;  %v4515_v14 = vld [vmem:[#allocation5 + $0x54] sm:$0xf] }
  0x35   : > { %1999 = vmatpush.bf16.msra.mxu1 %v4369_v7  ;;  %4531 = vmatpush.bf16.msra.mxu3 %v4369_v7  ;;  %v4350_v15 = vld [vmem:[#allocation5 + $0x58] sm:$0xf0]  ;;  %v4349_v16 = vor.u32 %v4516_v13, %v4348_v12  ;;  %v4340_v18 = vld [vmem:[#allocation5 + $0x40] sm:$0xf]  ;;  %v4514_v19 = vld [vmem:[#allocation5 + $0x44] sm:$0xf0] }
  0x36   : > { %v4353_v17 = vor.u32 %v4515_v14, %v4350_v15  ;;  %v4513_v20 = vld [vmem:[#allocation5 + $0x44] sm:$0xf]  ;;  %v4342_v21 = vld [vmem:[#allocation5 + $0x48] sm:$0xf0]  ;;  %v4341_v22 = vor.u32 %v4514_v19, %v4340_v18  ;;  %v4332_v24 = vld [vmem:[#allocation5 + $0x30] sm:$0xf] }
  0x37   : > { %v4345_v23 = vor.u32 %v4513_v20, %v4342_v21  ;;  %v4512_v25 = vld [vmem:[#allocation5 + $0x34] sm:$0xf0]  ;;  %v4511_v26 = vld [vmem:[#allocation5 + $0x34] sm:$0xf]  ;;  %v4334_v27 = vld [vmem:[#allocation5 + $0x38] sm:$0xf0] }
  0x38   : > { %1351 = vmatpush.bf16.msra.mxu0 %v4357_v10  ;;  %4524 = vmatpush.bf16.msra.mxu2 %v4357_v10  ;;  %v4333_v28 = vor.u32 %v4512_v25, %v4332_v24  ;;  %v4337_v29 = vor.u32 %v4511_v26, %v4334_v27  ;;  %v4324_v30 = vld [vmem:[#allocation5 + $0x20] sm:$0xf]  ;;  %v4510_v31 = vld [vmem:[#allocation5 + $0x24] sm:$0xf0]  ;;  %v4509_v32 = vld [vmem:[#allocation5 + $0x24] sm:$0xf] }
  0x39   : > { %2000 = vmatpush.bf16.msra.mxu1 %v4361_v11  ;;  %4532 = vmatpush.bf16.msra.mxu3 %v4361_v11  ;;  %v4326_v33 = vld [vmem:[#allocation5 + $0x28] sm:$0xf0]  ;;  %v4325_v34 = vor.u32 %v4510_v31, %v4324_v30  ;;  %v4316_v36 = vld [vmem:[#allocation5 + $0x10] sm:$0xf]  ;;  %v4508_v37 = vld [vmem:[#allocation5 + $0x14] sm:$0xf0] }
  0x3a   : > { %v4329_v35 = vor.u32 %v4509_v32, %v4326_v33  ;;  %v4507_v38 = vld [vmem:[#allocation5 + $0x14] sm:$0xf]  ;;  %v4318_v39 = vld [vmem:[#allocation5 + $0x18] sm:$0xf0]  ;;  %v4317_v40 = vor.u32 %v4508_v37, %v4316_v36  ;;  %v4308_v42 = vld [vmem:[#allocation5] sm:$0xf] }
  0x3b   : > { %v4321_v41 = vor.u32 %v4507_v38, %v4318_v39  ;;  %v4506_v43 = vld [vmem:[#allocation5 + $0x4] sm:$0xf0]  ;;  %v4505_v44 = vld [vmem:[#allocation5 + $0x4] sm:$0xf]  ;;  %v4310_v45 = vld [vmem:[#allocation5 + $0x8] sm:$0xf0] }
  0x3c   : > { %1352 = vmatpush.bf16.msra.mxu0 %v4349_v16  ;;  %4525 = vmatpush.bf16.msra.mxu2 %v4349_v16  ;;  %v4309_v46 = vor.u32 %v4506_v43, %v4308_v42  ;;  %v4313_v47 = vor.u32 %v4505_v44, %v4310_v45  ;;  %v4377_v48 = vld [vmem:[%s4901_s30] sm:$0xff]  ;;  %v4378_v50 = vld [vmem:[%s4901_s30 + $0x8] sm:$0xff]  ;;  %v4379_v52 = vld [vmem:[%s4901_s30 + $0x10] sm:$0xff]  ;;  %s3793_s18 = sshll.u32 %s4897_s22, 11  ;;  %s4522_s26 = sshll.u32 %s4823_s16, 11 }
  0x3d   : > { %2001 = vmatpush.bf16.msra.mxu1 %v4353_v17  ;;  %4533 = vmatpush.bf16.msra.mxu3 %v4353_v17  ;;  %v4441_v49 = vld [vmem:[%s4901_s30 + $0x200] sm:$0xff]  ;;  %v4442_v51 = vld [vmem:[%s4901_s30 + $0x208] sm:$0xff]  ;;  %v4443_v53 = vld [vmem:[%s4901_s30 + $0x210] sm:$0xff]  ;;  %s4937_s23 = scalar_lea.vmem [#allocation8], %s3793_s18  ;;  %s3685_s29 = scalar_lea.hbm %s5850_s3, %s4522_s26 }
  0x3e   : > { %v4380_v54 = vld [vmem:[%s4901_s30 + $0x18] sm:$0xff]  ;;  %v4381_v56 = vld [vmem:[%s4901_s30 + $0x20] sm:$0xff]  ;;  %v4382_v58 = vld [vmem:[%s4901_s30 + $0x28] sm:$0xff]  ;;  %s3686_s16 = sshll.u32 %s4937_s23, 4  ;;  %s3688_s4 = sshll.u32 %s3685_s29, 4  ;;  %s3687_s16 = int_to_ptr.vmem [resolvable:$true] %s3686_s16  ;;  %s3689_s4 = int_to_ptr.hbm [resolvable:$true] %s3688_s4 }
  0x3f   : > { %v4444_v55 = vld [vmem:[%s4901_s30 + $0x218] sm:$0xff]  ;;  %v4445_v57 = vld [vmem:[%s4901_s30 + $0x220] sm:$0xff]  ;;  %v4446_v59 = vld [vmem:[%s4901_s30 + $0x228] sm:$0xff]  ;;  %s3673_s5 = scalar_lea.sflag [#allocation4], %s4897_s22  ;;  %s4716_s7 = sshra.s32 %s3689_s4, 4  ;;  %s4717_s7 = int_to_ptr.hbm [resolvable:$true] %s4716_s7 }
  0x40   : > { %1353 = vmatpush.bf16.msra.mxu0 %v4341_v22  ;;  %4526 = vmatpush.bf16.msra.mxu2 %v4341_v22  ;;  %v4383_v60 = vld [vmem:[%s4901_s30 + $0x30] sm:$0xff]  ;;  %v4384_v62 = vld [vmem:[%s4901_s30 + $0x38] sm:$0xff]  ;;  %v496_v0 = vld [vmem:[#allocation7] sm:$0x3]  ;;  %s4718_s8 = scalar_lea.hbm %s4717_s7, 2048  ;;  %s4722_s11 = scalar_lea.hbm %s5850_s3, 8192 }
  0x41   : > { %2002 = vmatpush.bf16.msra.mxu1 %v4345_v23  ;;  %4534 = vmatpush.bf16.msra.mxu3 %v4345_v23  ;;  %v4447_v61 = vld [vmem:[%s4901_s30 + $0x230] sm:$0xff]  ;;  %v4448_v63 = vld [vmem:[%s4901_s30 + $0x238] sm:$0xff]  ;;  %v4927_v1 = vperm.slane %v496_v0, 0  ;;  %v4929_v2 = vperm.slane %v496_v0, 1  ;;  %v4385_v3 = vld [vmem:[%s4901_s30 + $0x40] sm:$0xff]  ;;  %p4719_p1 = scmp.ne.s32.totalorder %s4717_s7, %s4718_s8  ;;  %p4723_p2 = scmp.lt.s32.totalorder %s4717_s7, %s5850_s3 }
  0x42   : > { %v4449_v4 = vld [vmem:[%s4901_s30 + $0x240] sm:$0xff]  ;;  %v4450_v30 = vld [vmem:[%s4901_s30 + $0x248] sm:$0xff]  ;;  %p4724_p7 = scmp.lt.s32.totalorder %s4722_s11, %s4718_s8 }
  0x43   : > { %p4720_p4 = pnand %p4719_p1, %p4867_p0 }
  0x44   : > { %1354 = vmatpush.bf16.msra.mxu0 %v4333_v28  ;;  %4527 = vmatpush.bf16.msra.mxu2 %v4333_v28  ;;  %p4725_p9 = por %p4724_p7, %p4723_p2 }
  0x45   : > { %2003 = vmatpush.bf16.msra.mxu1 %v4337_v29  ;;  %4535 = vmatpush.bf16.msra.mxu3 %v4337_v29  ;;  %v4386_v29 = vld [vmem:[%s4901_s30 + $0x48] sm:$0xff]  ;;  %p4721_p8 = pneg %p4720_p4 }
  0x47   : > { %p4726_p10 = pnand %p4725_p9, %p4721_p8 }
  0x48   : > { %1355 = vmatpush.bf16.msra.mxu0 %v4325_v34  ;;  %4528 = vmatpush.bf16.msra.mxu2 %v4325_v34 }
  0x49   : > { %2004 = vmatpush.bf16.msra.mxu1 %v4329_v35  ;;  %4536 = vmatpush.bf16.msra.mxu3 %v4329_v35 }
  0x4c   : > { %1356 = vmatpush.bf16.msra.mxu0 %v4317_v40  ;;  %4529 = vmatpush.bf16.msra.mxu2 %v4317_v40 }
  0x4d   : > { %2005 = vmatpush.bf16.msra.mxu1 %v4321_v41  ;;  %4537 = vmatpush.bf16.msra.mxu3 %v4321_v41 }
  0x50   : > { %1357 = vmatpush.bf16.msra.mxu0 %v4309_v46  ;;  %4530 = vmatpush.bf16.msra.mxu2 %v4309_v46 }
  0x51   : > { %2006 = vmatpush.bf16.msra.mxu1 %v4313_v47  ;;  %4538 = vmatpush.bf16.msra.mxu3 %v4313_v47 }
  0x53   : > { %1358 = vmatmul.bf16.vlgmr.msra.gmra.mxu0 %v4377_v48  ;;  %1678 = vmatmul.bf16.vlgmr.msra.gmra.mxu2 %v4441_v49 }
  0x54   : > { %2007 = vmatmul.bf16.vlgmr.msra.gmra.mxu1 %v4377_v48  ;;  %2327 = vmatmul.bf16.vlgmr.msra.gmra.mxu3 %v4441_v49 }
  0x63   : > { %1363 = vmatmul.bf16.gmra.mxu0 %v4378_v50  ;;  %1683 = vmatmul.bf16.gmra.mxu2 %v4442_v51 }
  0x64   : > { %2012 = vmatmul.bf16.gmra.mxu1 %v4378_v50  ;;  %2332 = vmatmul.bf16.gmra.mxu3 %v4442_v51 }
  0x73   : > { %1368 = vmatmul.bf16.gmra.mxu0 %v4379_v52  ;;  %1688 = vmatmul.bf16.gmra.mxu2 %v4443_v53 }
  0x74   : > { %2017 = vmatmul.bf16.gmra.mxu1 %v4379_v52  ;;  %2337 = vmatmul.bf16.gmra.mxu3 %v4443_v53 }
  0x83   : > { %1373 = vmatmul.bf16.gmra.mxu0 %v4380_v54  ;;  %1693 = vmatmul.bf16.gmra.mxu2 %v4444_v55 }
  0x84   : > { %2022 = vmatmul.bf16.gmra.mxu1 %v4380_v54  ;;  %2342 = vmatmul.bf16.gmra.mxu3 %v4444_v55 }
  0x93   : > { %1378 = vmatmul.bf16.gmra.mxu0 %v4381_v56  ;;  %1698 = vmatmul.bf16.gmra.mxu2 %v4445_v57 }
  0x94   : > { %2027 = vmatmul.bf16.gmra.mxu1 %v4381_v56  ;;  %2347 = vmatmul.bf16.gmra.mxu3 %v4445_v57 }
  0xa3   : > { %1383 = vmatmul.bf16.gmra.mxu0 %v4382_v58  ;;  %1703 = vmatmul.bf16.gmra.mxu2 %v4446_v59 }
  0xa4   : > { %2032 = vmatmul.bf16.gmra.mxu1 %v4382_v58  ;;  %2352 = vmatmul.bf16.gmra.mxu3 %v4446_v59  ;;  %v4387_v59 = vld [vmem:[%s4901_s30 + $0x50] sm:$0xff] }
  0xb3   : > { %1388 = vmatmul.bf16.gmra.mxu0 %v4383_v60  ;;  %1708 = vmatmul.bf16.gmra.mxu2 %v4447_v61 }
  0xb4   : > { %2037 = vmatmul.bf16.gmra.mxu1 %v4383_v60  ;;  %2357 = vmatmul.bf16.gmra.mxu3 %v4447_v61  ;;  %v4451_v60 = vld [vmem:[%s4901_s30 + $0x250] sm:$0xff] }
  0xc3   : > { %1393 = vmatmul.bf16.gmra.mxu0 %v4384_v62  ;;  %1713 = vmatmul.bf16.gmra.mxu2 %v4448_v63 }
  0xc4   : > { %2042 = vmatmul.bf16.gmra.mxu1 %v4384_v62  ;;  %2362 = vmatmul.bf16.gmra.mxu3 %v4448_v63 }
  0xd0   : > { %v1359_v5 = vpop.f32.mrf.mxu0 }
  0xd1   : > { %v1360_v6 = vadd.f32 %v1359_v5, %v4927_v1  ;;  %v2008_v7 = vpop.f32.mrf.mxu1 }
  0xd2   : > { %v2009_v8 = vadd.f32 %v2008_v7, %v4929_v2 }
  0xd3   : > { %v2648_v9 = vmax.f32 %v1360_v6, 0.0  ;;  %1398 = vmatmul.bf16.gmra.mxu0 %v4385_v3  ;;  %1718 = vmatmul.bf16.gmra.mxu2 %v4449_v4 }
  0xd4   : > { %v2649_v10 = vmax.f32 %v2009_v8, 0.0  ;;  %2047 = vmatmul.bf16.gmra.mxu1 %v4385_v3  ;;  %2367 = vmatmul.bf16.gmra.mxu3 %v4449_v4 }
  0xd6   : > { %v3160_v11 = vpack.c.bf16 %v2649_v10, %v2648_v9  ;;  %v1679_v12 = vpop.f32.mrf.mxu2 }
  0xd7   : > { %v1680_v13 = vadd.f32 %v1679_v12, %v4927_v1  ;;  %v2328_v14 = vpop.f32.mrf.mxu3 }
  0xd8   : > { %3416 = vst [vmem:[%s4937_s23] sm:$0xff] %v3160_v11  ;;  %v2329_v15 = vadd.f32 %v2328_v14, %v4929_v2  ;;  %v1361_v16 = vpop.f32.mrf.mxu0 }
  0xd9   : > { %v2904_v17 = vmax.f32 %v1680_v13, 0.0  ;;  %v1362_v18 = vadd.f32 %v1361_v16, %v4927_v1  ;;  %v2010_v19 = vpop.f32.mrf.mxu1 }
  0xda   : > { %v2905_v20 = vmax.f32 %v2329_v15, 0.0  ;;  %v2011_v21 = vadd.f32 %v2010_v19, %v4929_v2 }
  0xdb   : > { %v2650_v22 = vmax.f32 %v1362_v18, 0.0 }
  0xdc   : > { %v3288_v23 = vpack.c.bf16 %v2905_v20, %v2904_v17  ;;  %v2651_v24 = vmax.f32 %v2011_v21, 0.0 }
  0xde   : > { %3544 = vst [vmem:[%s4937_s23 + $0x400] sm:$0xff] %v3288_v23  ;;  %v3161_v25 = vpack.c.bf16 %v2651_v24, %v2650_v22  ;;  %v1681_v26 = vpop.f32.mrf.mxu2 }
  0xdf   : > { %v1682_v27 = vadd.f32 %v1681_v26, %v4927_v1  ;;  %v2330_v28 = vpop.f32.mrf.mxu3 }
  0xe0   : > { %3417 = vst [vmem:[%s4937_s23 + $0x8] sm:$0xff] %v3161_v25  ;;  %v2331_v31 = vadd.f32 %v2330_v28, %v4929_v2  ;;  %v1364_v32 = vpop.f32.mrf.mxu0  ;;  %v4452_v28 = vld [vmem:[%s4901_s30 + $0x258] sm:$0xff] }
  0xe1   : > { %v2906_v33 = vmax.f32 %v1682_v27, 0.0  ;;  %v1365_v34 = vadd.f32 %v1364_v32, %v4927_v1  ;;  %v2013_v35 = vpop.f32.mrf.mxu1  ;;  %v4388_v27 = vld [vmem:[%s4901_s30 + $0x58] sm:$0xff] }
  0xe2   : > { %v2907_v36 = vmax.f32 %v2331_v31, 0.0  ;;  %v2014_v37 = vadd.f32 %v2013_v35, %v4929_v2 }
  0xe3   : > { %v2652_v38 = vmax.f32 %v1365_v34, 0.0  ;;  %1403 = vmatmul.bf16.gmra.mxu0 %v4386_v29  ;;  %1723 = vmatmul.bf16.gmra.mxu2 %v4450_v30 }
  0xe4   : > { %v3289_v39 = vpack.c.bf16 %v2907_v36, %v2906_v33  ;;  %v2653_v40 = vmax.f32 %v2014_v37, 0.0  ;;  %2052 = vmatmul.bf16.gmra.mxu1 %v4386_v29  ;;  %2372 = vmatmul.bf16.gmra.mxu3 %v4450_v30 }
  0xe6   : > { %3545 = vst [vmem:[%s4937_s23 + $0x408] sm:$0xff] %v3289_v39  ;;  %v3162_v41 = vpack.c.bf16 %v2653_v40, %v2652_v38  ;;  %v1684_v42 = vpop.f32.mrf.mxu2 }
  0xe7   : > { %v1685_v43 = vadd.f32 %v1684_v42, %v4927_v1  ;;  %v2333_v44 = vpop.f32.mrf.mxu3 }
  0xe8   : > { %3418 = vst [vmem:[%s4937_s23 + $0x10] sm:$0xff] %v3162_v41  ;;  %v2334_v45 = vadd.f32 %v2333_v44, %v4929_v2  ;;  %v1366_v46 = vpop.f32.mrf.mxu0 }
  0xe9   : > { %v2908_v47 = vmax.f32 %v1685_v43, 0.0  ;;  %v1367_v48 = vadd.f32 %v1366_v46, %v4927_v1  ;;  %v2015_v49 = vpop.f32.mrf.mxu1 }
  0xea   : > { %v2909_v50 = vmax.f32 %v2334_v45, 0.0  ;;  %v2016_v51 = vadd.f32 %v2015_v49, %v4929_v2 }
  0xeb   : > { %v2654_v52 = vmax.f32 %v1367_v48, 0.0 }
  0xec   : > { %v3290_v53 = vpack.c.bf16 %v2909_v50, %v2908_v47  ;;  %v2655_v54 = vmax.f32 %v2016_v51, 0.0 }
  0xee   : > { %3546 = vst [vmem:[%s4937_s23 + $0x410] sm:$0xff] %v3290_v53  ;;  %v3163_v55 = vpack.c.bf16 %v2655_v54, %v2654_v52  ;;  %v1686_v56 = vpop.f32.mrf.mxu2 }
  0xef   : > { %v1687_v57 = vadd.f32 %v1686_v56, %v4927_v1  ;;  %v2335_v58 = vpop.f32.mrf.mxu3 }
  0xf0   : > { %3419 = vst [vmem:[%s4937_s23 + $0x18] sm:$0xff] %v3163_v55  ;;  %v2336_v61 = vadd.f32 %v2335_v58, %v4929_v2  ;;  %v1369_v62 = vpop.f32.mrf.mxu0  ;;  %v4453_v58 = vld [vmem:[%s4901_s30 + $0x260] sm:$0xff] }
  0xf1   : > { %v2910_v63 = vmax.f32 %v1687_v57, 0.0  ;;  %v1370_v0 = vadd.f32 %v1369_v62, %v4927_v1  ;;  %v2018_v3 = vpop.f32.mrf.mxu1  ;;  %v4389_v57 = vld [vmem:[%s4901_s30 + $0x60] sm:$0xff] }
  0xf2   : > { %v2911_v4 = vmax.f32 %v2336_v61, 0.0  ;;  %v2019_v5 = vadd.f32 %v2018_v3, %v4929_v2 }
  0xf3   : > { %v2656_v6 = vmax.f32 %v1370_v0, 0.0  ;;  %1408 = vmatmul.bf16.gmra.mxu0 %v4387_v59  ;;  %1728 = vmatmul.bf16.gmra.mxu2 %v4451_v60 }
  0xf4   : > { %v3291_v7 = vpack.c.bf16 %v2911_v4, %v2910_v63  ;;  %v2657_v8 = vmax.f32 %v2019_v5, 0.0  ;;  %2057 = vmatmul.bf16.gmra.mxu1 %v4387_v59  ;;  %2377 = vmatmul.bf16.gmra.mxu3 %v4451_v60 }
  0xf6   : > { %3547 = vst [vmem:[%s4937_s23 + $0x418] sm:$0xff] %v3291_v7  ;;  %v3164_v9 = vpack.c.bf16 %v2657_v8, %v2656_v6  ;;  %v1689_v10 = vpop.f32.mrf.mxu2 }
  0xf7   : > { %v1690_v11 = vadd.f32 %v1689_v10, %v4927_v1  ;;  %v2338_v12 = vpop.f32.mrf.mxu3 }
  0xf8   : > { %3420 = vst [vmem:[%s4937_s23 + $0x20] sm:$0xff] %v3164_v9  ;;  %v2339_v13 = vadd.f32 %v2338_v12, %v4929_v2  ;;  %v1371_v14 = vpop.f32.mrf.mxu0 }
  0xf9   : > { %v2912_v15 = vmax.f32 %v1690_v11, 0.0  ;;  %v1372_v16 = vadd.f32 %v1371_v14, %v4927_v1  ;;  %v2020_v17 = vpop.f32.mrf.mxu1 }
  0xfa   : > { %v2913_v18 = vmax.f32 %v2339_v13, 0.0  ;;  %v2021_v19 = vadd.f32 %v2020_v17, %v4929_v2 }
  0xfb   : > { %v2658_v20 = vmax.f32 %v1372_v16, 0.0 }
  0xfc   : > { %v3292_v21 = vpack.c.bf16 %v2913_v18, %v2912_v15  ;;  %v2659_v22 = vmax.f32 %v2021_v19, 0.0 }
  0xfe   : > { %3548 = vst [vmem:[%s4937_s23 + $0x420] sm:$0xff] %v3292_v21  ;;  %v3165_v23 = vpack.c.bf16 %v2659_v22, %v2658_v20  ;;  %v1691_v24 = vpop.f32.mrf.mxu2 }
  0xff   : > { %v1692_v25 = vadd.f32 %v1691_v24, %v4927_v1  ;;  %v2340_v26 = vpop.f32.mrf.mxu3 }
 0x100   : > { %3421 = vst [vmem:[%s4937_s23 + $0x28] sm:$0xff] %v3165_v23  ;;  %v2341_v29 = vadd.f32 %v2340_v26, %v4929_v2  ;;  %v1374_v30 = vpop.f32.mrf.mxu0  ;;  %v4454_v26 = vld [vmem:[%s4901_s30 + $0x268] sm:$0xff] }
 0x101   : > { %v2914_v31 = vmax.f32 %v1692_v25, 0.0  ;;  %v1375_v32 = vadd.f32 %v1374_v30, %v4927_v1  ;;  %v2023_v33 = vpop.f32.mrf.mxu1  ;;  %v4390_v25 = vld [vmem:[%s4901_s30 + $0x68] sm:$0xff] }
 0x102   : > { %v2915_v34 = vmax.f32 %v2341_v29, 0.0  ;;  %v2024_v35 = vadd.f32 %v2023_v33, %v4929_v2 }
 0x103   : > { %v2660_v36 = vmax.f32 %v1375_v32, 0.0  ;;  %1413 = vmatmul.bf16.gmra.mxu0 %v4388_v27  ;;  %1733 = vmatmul.bf16.gmra.mxu2 %v4452_v28 }
 0x104   : > { %v3293_v37 = vpack.c.bf16 %v2915_v34, %v2914_v31  ;;  %v2661_v38 = vmax.f32 %v2024_v35, 0.0  ;;  %2062 = vmatmul.bf16.gmra.mxu1 %v4388_v27  ;;  %2382 = vmatmul.bf16.gmra.mxu3 %v4452_v28 }
 0x106   : > { %3549 = vst [vmem:[%s4937_s23 + $0x428] sm:$0xff] %v3293_v37  ;;  %v3166_v39 = vpack.c.bf16 %v2661_v38, %v2660_v36  ;;  %v1694_v40 = vpop.f32.mrf.mxu2 }
 0x107   : > { %v1695_v41 = vadd.f32 %v1694_v40, %v4927_v1  ;;  %v2343_v42 = vpop.f32.mrf.mxu3 }
 0x108   : > { %3422 = vst [vmem:[%s4937_s23 + $0x30] sm:$0xff] %v3166_v39  ;;  %v2344_v43 = vadd.f32 %v2343_v42, %v4929_v2  ;;  %v1376_v44 = vpop.f32.mrf.mxu0 }
 0x109   : > { %v2916_v45 = vmax.f32 %v1695_v41, 0.0  ;;  %v1377_v46 = vadd.f32 %v1376_v44, %v4927_v1  ;;  %v2025_v47 = vpop.f32.mrf.mxu1 }
 0x10a   : > { %v2917_v48 = vmax.f32 %v2344_v43, 0.0  ;;  %v2026_v49 = vadd.f32 %v2025_v47, %v4929_v2 }
 0x10b   : > { %v2662_v50 = vmax.f32 %v1377_v46, 0.0 }
 0x10c   : > { %v3294_v51 = vpack.c.bf16 %v2917_v48, %v2916_v45  ;;  %v2663_v52 = vmax.f32 %v2026_v49, 0.0 }
 0x10e   : > { %3550 = vst [vmem:[%s4937_s23 + $0x430] sm:$0xff] %v3294_v51  ;;  %v3167_v53 = vpack.c.bf16 %v2663_v52, %v2662_v50  ;;  %v1696_v54 = vpop.f32.mrf.mxu2 }
 0x10f   : > { %v1697_v55 = vadd.f32 %v1696_v54, %v4927_v1  ;;  %v2345_v56 = vpop.f32.mrf.mxu3 }
 0x110   : > { %3423 = vst [vmem:[%s4937_s23 + $0x38] sm:$0xff] %v3167_v53  ;;  %v2346_v59 = vadd.f32 %v2345_v56, %v4929_v2  ;;  %v1379_v60 = vpop.f32.mrf.mxu0  ;;  %v4455_v56 = vld [vmem:[%s4901_s30 + $0x270] sm:$0xff] }
 0x111   : > { %v2918_v61 = vmax.f32 %v1697_v55, 0.0  ;;  %v1380_v62 = vadd.f32 %v1379_v60, %v4927_v1  ;;  %v2028_v63 = vpop.f32.mrf.mxu1  ;;  %v4391_v55 = vld [vmem:[%s4901_s30 + $0x70] sm:$0xff] }
 0x112   : > { %v2919_v0 = vmax.f32 %v2346_v59, 0.0  ;;  %v2029_v3 = vadd.f32 %v2028_v63, %v4929_v2 }
 0x113   : > { %v2664_v4 = vmax.f32 %v1380_v62, 0.0  ;;  %1418 = vmatmul.bf16.gmra.mxu0 %v4389_v57  ;;  %1738 = vmatmul.bf16.gmra.mxu2 %v4453_v58 }
 0x114   : > { %v3295_v5 = vpack.c.bf16 %v2919_v0, %v2918_v61  ;;  %v2665_v6 = vmax.f32 %v2029_v3, 0.0  ;;  %2067 = vmatmul.bf16.gmra.mxu1 %v4389_v57  ;;  %2387 = vmatmul.bf16.gmra.mxu3 %v4453_v58 }
 0x116   : > { %3551 = vst [vmem:[%s4937_s23 + $0x438] sm:$0xff] %v3295_v5  ;;  %v3168_v7 = vpack.c.bf16 %v2665_v6, %v2664_v4  ;;  %v1699_v8 = vpop.f32.mrf.mxu2 }
 0x117   : > { %v1700_v9 = vadd.f32 %v1699_v8, %v4927_v1  ;;  %v2348_v10 = vpop.f32.mrf.mxu3 }
 0x118   : > { %3424 = vst [vmem:[%s4937_s23 + $0x40] sm:$0xff] %v3168_v7  ;;  %v2349_v11 = vadd.f32 %v2348_v10, %v4929_v2  ;;  %v1381_v12 = vpop.f32.mrf.mxu0 }
 0x119   : > { %v2920_v13 = vmax.f32 %v1700_v9, 0.0  ;;  %v1382_v14 = vadd.f32 %v1381_v12, %v4927_v1  ;;  %v2030_v15 = vpop.f32.mrf.mxu1 }
 0x11a   : > { %v2921_v16 = vmax.f32 %v2349_v11, 0.0  ;;  %v2031_v17 = vadd.f32 %v2030_v15, %v4929_v2 }
 0x11b   : > { %v2666_v18 = vmax.f32 %v1382_v14, 0.0 }
 0x11c   : > { %v3296_v19 = vpack.c.bf16 %v2921_v16, %v2920_v13  ;;  %v2667_v20 = vmax.f32 %v2031_v17, 0.0 }
 0x11e   : > { %3552 = vst [vmem:[%s4937_s23 + $0x440] sm:$0xff] %v3296_v19  ;;  %v3169_v21 = vpack.c.bf16 %v2667_v20, %v2666_v18  ;;  %v1701_v22 = vpop.f32.mrf.mxu2 }
 0x11f   : > { %v1702_v23 = vadd.f32 %v1701_v22, %v4927_v1  ;;  %v2350_v24 = vpop.f32.mrf.mxu3 }
 0x120   : > { %3425 = vst [vmem:[%s4937_s23 + $0x48] sm:$0xff] %v3169_v21  ;;  %v2351_v27 = vadd.f32 %v2350_v24, %v4929_v2  ;;  %v1384_v28 = vpop.f32.mrf.mxu0  ;;  %v4456_v24 = vld [vmem:[%s4901_s30 + $0x278] sm:$0xff] }
 0x121   : > { %v2922_v29 = vmax.f32 %v1702_v23, 0.0  ;;  %v1385_v30 = vadd.f32 %v1384_v28, %v4927_v1  ;;  %v2033_v31 = vpop.f32.mrf.mxu1  ;;  %v4392_v23 = vld [vmem:[%s4901_s30 + $0x78] sm:$0xff] }
 0x122   : > { %v2923_v32 = vmax.f32 %v2351_v27, 0.0  ;;  %v2034_v33 = vadd.f32 %v2033_v31, %v4929_v2 }
 0x123   : > { %v2668_v34 = vmax.f32 %v1385_v30, 0.0  ;;  %1423 = vmatmul.bf16.gmra.mxu0 %v4390_v25  ;;  %1743 = vmatmul.bf16.gmra.mxu2 %v4454_v26 }
 0x124   : > { %v3297_v35 = vpack.c.bf16 %v2923_v32, %v2922_v29  ;;  %v2669_v36 = vmax.f32 %v2034_v33, 0.0  ;;  %2072 = vmatmul.bf16.gmra.mxu1 %v4390_v25  ;;  %2392 = vmatmul.bf16.gmra.mxu3 %v4454_v26 }
 0x126   : > { %3553 = vst [vmem:[%s4937_s23 + $0x448] sm:$0xff] %v3297_v35  ;;  %v3170_v37 = vpack.c.bf16 %v2669_v36, %v2668_v34  ;;  %v1704_v38 = vpop.f32.mrf.mxu2 }
 0x127   : > { %v1705_v39 = vadd.f32 %v1704_v38, %v4927_v1  ;;  %v2353_v40 = vpop.f32.mrf.mxu3 }
 0x128   : > { %3426 = vst [vmem:[%s4937_s23 + $0x50] sm:$0xff] %v3170_v37  ;;  %v2354_v41 = vadd.f32 %v2353_v40, %v4929_v2  ;;  %v1386_v42 = vpop.f32.mrf.mxu0 }
 0x129   : > { %v2924_v43 = vmax.f32 %v1705_v39, 0.0  ;;  %v1387_v44 = vadd.f32 %v1386_v42, %v4927_v1  ;;  %v2035_v45 = vpop.f32.mrf.mxu1 }
 0x12a   : > { %v2925_v46 = vmax.f32 %v2354_v41, 0.0  ;;  %v2036_v47 = vadd.f32 %v2035_v45, %v4929_v2 }
 0x12b   : > { %v2670_v48 = vmax.f32 %v1387_v44, 0.0 }
 0x12c   : > { %v3298_v49 = vpack.c.bf16 %v2925_v46, %v2924_v43  ;;  %v2671_v50 = vmax.f32 %v2036_v47, 0.0 }
 0x12e   : > { %3554 = vst [vmem:[%s4937_s23 + $0x450] sm:$0xff] %v3298_v49  ;;  %v3171_v51 = vpack.c.bf16 %v2671_v50, %v2670_v48  ;;  %v1706_v52 = vpop.f32.mrf.mxu2 }
 0x12f   : > { %v1707_v53 = vadd.f32 %v1706_v52, %v4927_v1  ;;  %v2355_v54 = vpop.f32.mrf.mxu3 }
 0x130   : > { %3427 = vst [vmem:[%s4937_s23 + $0x58] sm:$0xff] %v3171_v51  ;;  %v2356_v57 = vadd.f32 %v2355_v54, %v4929_v2  ;;  %v1389_v58 = vpop.f32.mrf.mxu0  ;;  %v4457_v54 = vld [vmem:[%s4901_s30 + $0x280] sm:$0xff] }
 0x131   : > { %v2926_v59 = vmax.f32 %v1707_v53, 0.0  ;;  %v1390_v60 = vadd.f32 %v1389_v58, %v4927_v1  ;;  %v2038_v61 = vpop.f32.mrf.mxu1  ;;  %v4393_v53 = vld [vmem:[%s4901_s30 + $0x80] sm:$0xff] }
 0x132   : > { %v2927_v62 = vmax.f32 %v2356_v57, 0.0  ;;  %v2039_v63 = vadd.f32 %v2038_v61, %v4929_v2 }
 0x133   : > { %v2672_v0 = vmax.f32 %v1390_v60, 0.0  ;;  %1428 = vmatmul.bf16.gmra.mxu0 %v4391_v55  ;;  %1748 = vmatmul.bf16.gmra.mxu2 %v4455_v56 }
 0x134   : > { %v3299_v3 = vpack.c.bf16 %v2927_v62, %v2926_v59  ;;  %v2673_v4 = vmax.f32 %v2039_v63, 0.0  ;;  %2077 = vmatmul.bf16.gmra.mxu1 %v4391_v55  ;;  %2397 = vmatmul.bf16.gmra.mxu3 %v4455_v56 }
 0x136   : > { %3555 = vst [vmem:[%s4937_s23 + $0x458] sm:$0xff] %v3299_v3  ;;  %v3172_v5 = vpack.c.bf16 %v2673_v4, %v2672_v0  ;;  %v1709_v6 = vpop.f32.mrf.mxu2 }
 0x137   : > { %v1710_v7 = vadd.f32 %v1709_v6, %v4927_v1  ;;  %v2358_v8 = vpop.f32.mrf.mxu3 }
 0x138   : > { %3428 = vst [vmem:[%s4937_s23 + $0x60] sm:$0xff] %v3172_v5  ;;  %v2359_v9 = vadd.f32 %v2358_v8, %v4929_v2  ;;  %v1391_v10 = vpop.f32.mrf.mxu0 }
 0x139   : > { %v2928_v11 = vmax.f32 %v1710_v7, 0.0  ;;  %v1392_v12 = vadd.f32 %v1391_v10, %v4927_v1  ;;  %v2040_v13 = vpop.f32.mrf.mxu1 }
 0x13a   : > { %v2929_v14 = vmax.f32 %v2359_v9, 0.0  ;;  %v2041_v15 = vadd.f32 %v2040_v13, %v4929_v2 }
 0x13b   : > { %v2674_v16 = vmax.f32 %v1392_v12, 0.0 }
 0x13c   : > { %v3300_v17 = vpack.c.bf16 %v2929_v14, %v2928_v11  ;;  %v2675_v18 = vmax.f32 %v2041_v15, 0.0 }
 0x13e   : > { %3556 = vst [vmem:[%s4937_s23 + $0x460] sm:$0xff] %v3300_v17  ;;  %v3173_v19 = vpack.c.bf16 %v2675_v18, %v2674_v16  ;;  %v1711_v20 = vpop.f32.mrf.mxu2 }
 0x13f   : > { %v1712_v21 = vadd.f32 %v1711_v20, %v4927_v1  ;;  %v2360_v22 = vpop.f32.mrf.mxu3 }
 0x140   : > { %3429 = vst [vmem:[%s4937_s23 + $0x68] sm:$0xff] %v3173_v19  ;;  %v2361_v25 = vadd.f32 %v2360_v22, %v4929_v2  ;;  %v1394_v26 = vpop.f32.mrf.mxu0  ;;  %v4458_v22 = vld [vmem:[%s4901_s30 + $0x288] sm:$0xff] }
 0x141   : > { %v2930_v27 = vmax.f32 %v1712_v21, 0.0  ;;  %v1395_v28 = vadd.f32 %v1394_v26, %v4927_v1  ;;  %v2043_v29 = vpop.f32.mrf.mxu1  ;;  %v4394_v21 = vld [vmem:[%s4901_s30 + $0x88] sm:$0xff] }
 0x142   : > { %v2931_v30 = vmax.f32 %v2361_v25, 0.0  ;;  %v2044_v31 = vadd.f32 %v2043_v29, %v4929_v2 }
 0x143   : > { %v2676_v32 = vmax.f32 %v1395_v28, 0.0  ;;  %1433 = vmatmul.bf16.gmra.mxu0 %v4392_v23  ;;  %1753 = vmatmul.bf16.gmra.mxu2 %v4456_v24 }
 0x144   : > { %v3301_v33 = vpack.c.bf16 %v2931_v30, %v2930_v27  ;;  %v2677_v34 = vmax.f32 %v2044_v31, 0.0  ;;  %2082 = vmatmul.bf16.gmra.mxu1 %v4392_v23  ;;  %2402 = vmatmul.bf16.gmra.mxu3 %v4456_v24 }
 0x146   : > { %3557 = vst [vmem:[%s4937_s23 + $0x468] sm:$0xff] %v3301_v33  ;;  %v3174_v35 = vpack.c.bf16 %v2677_v34, %v2676_v32  ;;  %v1714_v36 = vpop.f32.mrf.mxu2 }
 0x147   : > { %v1715_v37 = vadd.f32 %v1714_v36, %v4927_v1  ;;  %v2363_v38 = vpop.f32.mrf.mxu3 }
 0x148   : > { %3430 = vst [vmem:[%s4937_s23 + $0x70] sm:$0xff] %v3174_v35  ;;  %v2364_v39 = vadd.f32 %v2363_v38, %v4929_v2  ;;  %v1396_v40 = vpop.f32.mrf.mxu0 }
 0x149   : > { %v2932_v41 = vmax.f32 %v1715_v37, 0.0  ;;  %v1397_v42 = vadd.f32 %v1396_v40, %v4927_v1  ;;  %v2045_v43 = vpop.f32.mrf.mxu1 }
 0x14a   : > { %v2933_v44 = vmax.f32 %v2364_v39, 0.0  ;;  %v2046_v45 = vadd.f32 %v2045_v43, %v4929_v2 }
 0x14b   : > { %v2678_v46 = vmax.f32 %v1397_v42, 0.0 }
 0x14c   : > { %v3302_v47 = vpack.c.bf16 %v2933_v44, %v2932_v41  ;;  %v2679_v48 = vmax.f32 %v2046_v45, 0.0 }
 0x14e   : > { %3558 = vst [vmem:[%s4937_s23 + $0x470] sm:$0xff] %v3302_v47  ;;  %v3175_v49 = vpack.c.bf16 %v2679_v48, %v2678_v46  ;;  %v1716_v50 = vpop.f32.mrf.mxu2 }
 0x14f   : > { %v1717_v51 = vadd.f32 %v1716_v50, %v4927_v1  ;;  %v2365_v52 = vpop.f32.mrf.mxu3 }
 0x150   : > { %3431 = vst [vmem:[%s4937_s23 + $0x78] sm:$0xff] %v3175_v49  ;;  %v2366_v55 = vadd.f32 %v2365_v52, %v4929_v2  ;;  %v1399_v56 = vpop.f32.mrf.mxu0  ;;  %v4459_v52 = vld [vmem:[%s4901_s30 + $0x290] sm:$0xff] }
 0x151   : > { %v2934_v57 = vmax.f32 %v1717_v51, 0.0  ;;  %v1400_v58 = vadd.f32 %v1399_v56, %v4927_v1  ;;  %v2048_v59 = vpop.f32.mrf.mxu1  ;;  %v4395_v51 = vld [vmem:[%s4901_s30 + $0x90] sm:$0xff] }
 0x152   : > { %v2935_v60 = vmax.f32 %v2366_v55, 0.0  ;;  %v2049_v61 = vadd.f32 %v2048_v59, %v4929_v2 }
 0x153   : > { %v2680_v62 = vmax.f32 %v1400_v58, 0.0  ;;  %1438 = vmatmul.bf16.gmra.mxu0 %v4393_v53  ;;  %1758 = vmatmul.bf16.gmra.mxu2 %v4457_v54 }
 0x154   : > { %v3303_v63 = vpack.c.bf16 %v2935_v60, %v2934_v57  ;;  %v2681_v0 = vmax.f32 %v2049_v61, 0.0  ;;  %2087 = vmatmul.bf16.gmra.mxu1 %v4393_v53  ;;  %2407 = vmatmul.bf16.gmra.mxu3 %v4457_v54 }
 0x156   : > { %3559 = vst [vmem:[%s4937_s23 + $0x478] sm:$0xff] %v3303_v63  ;;  %v3176_v3 = vpack.c.bf16 %v2681_v0, %v2680_v62  ;;  %v1719_v4 = vpop.f32.mrf.mxu2 }
 0x157   : > { %v1720_v5 = vadd.f32 %v1719_v4, %v4927_v1  ;;  %v2368_v6 = vpop.f32.mrf.mxu3 }
 0x158   : > { %3432 = vst [vmem:[%s4937_s23 + $0x80] sm:$0xff] %v3176_v3  ;;  %v2369_v7 = vadd.f32 %v2368_v6, %v4929_v2  ;;  %v1401_v8 = vpop.f32.mrf.mxu0 }
 0x159   : > { %v2936_v9 = vmax.f32 %v1720_v5, 0.0  ;;  %v1402_v10 = vadd.f32 %v1401_v8, %v4927_v1  ;;  %v2050_v11 = vpop.f32.mrf.mxu1 }
 0x15a   : > { %v2937_v12 = vmax.f32 %v2369_v7, 0.0  ;;  %v2051_v13 = vadd.f32 %v2050_v11, %v4929_v2 }
 0x15b   : > { %v2682_v14 = vmax.f32 %v1402_v10, 0.0 }
 0x15c   : > { %v3304_v15 = vpack.c.bf16 %v2937_v12, %v2936_v9  ;;  %v2683_v16 = vmax.f32 %v2051_v13, 0.0 }
 0x15e   : > { %3560 = vst [vmem:[%s4937_s23 + $0x480] sm:$0xff] %v3304_v15  ;;  %v3177_v17 = vpack.c.bf16 %v2683_v16, %v2682_v14  ;;  %v1721_v18 = vpop.f32.mrf.mxu2 }
 0x15f   : > { %v1722_v19 = vadd.f32 %v1721_v18, %v4927_v1  ;;  %v2370_v20 = vpop.f32.mrf.mxu3 }
 0x160   : > { %3433 = vst [vmem:[%s4937_s23 + $0x88] sm:$0xff] %v3177_v17  ;;  %v2371_v23 = vadd.f32 %v2370_v20, %v4929_v2  ;;  %v1404_v24 = vpop.f32.mrf.mxu0  ;;  %v4460_v20 = vld [vmem:[%s4901_s30 + $0x298] sm:$0xff] }
 0x161   : > { %v2938_v25 = vmax.f32 %v1722_v19, 0.0  ;;  %v1405_v26 = vadd.f32 %v1404_v24, %v4927_v1  ;;  %v2053_v27 = vpop.f32.mrf.mxu1  ;;  %v4396_v19 = vld [vmem:[%s4901_s30 + $0x98] sm:$0xff] }
 0x162   : > { %v2939_v28 = vmax.f32 %v2371_v23, 0.0  ;;  %v2054_v29 = vadd.f32 %v2053_v27, %v4929_v2 }
 0x163   : > { %v2684_v30 = vmax.f32 %v1405_v26, 0.0  ;;  %1443 = vmatmul.bf16.gmra.mxu0 %v4394_v21  ;;  %1763 = vmatmul.bf16.gmra.mxu2 %v4458_v22 }
 0x164   : > { %v3305_v31 = vpack.c.bf16 %v2939_v28, %v2938_v25  ;;  %v2685_v32 = vmax.f32 %v2054_v29, 0.0  ;;  %2092 = vmatmul.bf16.gmra.mxu1 %v4394_v21  ;;  %2412 = vmatmul.bf16.gmra.mxu3 %v4458_v22 }
 0x166   : > { %3561 = vst [vmem:[%s4937_s23 + $0x488] sm:$0xff] %v3305_v31  ;;  %v3178_v33 = vpack.c.bf16 %v2685_v32, %v2684_v30  ;;  %v1724_v34 = vpop.f32.mrf.mxu2 }
 0x167   : > { %v1725_v35 = vadd.f32 %v1724_v34, %v4927_v1  ;;  %v2373_v36 = vpop.f32.mrf.mxu3 }
 0x168   : > { %3434 = vst [vmem:[%s4937_s23 + $0x90] sm:$0xff] %v3178_v33  ;;  %v2374_v37 = vadd.f32 %v2373_v36, %v4929_v2  ;;  %v1406_v38 = vpop.f32.mrf.mxu0 }
 0x169   : > { %v2940_v39 = vmax.f32 %v1725_v35, 0.0  ;;  %v1407_v40 = vadd.f32 %v1406_v38, %v4927_v1  ;;  %v2055_v41 = vpop.f32.mrf.mxu1 }
 0x16a   : > { %v2941_v42 = vmax.f32 %v2374_v37, 0.0  ;;  %v2056_v43 = vadd.f32 %v2055_v41, %v4929_v2 }
 0x16b   : > { %v2686_v44 = vmax.f32 %v1407_v40, 0.0 }
 0x16c   : > { %v3306_v45 = vpack.c.bf16 %v2941_v42, %v2940_v39  ;;  %v2687_v46 = vmax.f32 %v2056_v43, 0.0 }
 0x16e   : > { %3562 = vst [vmem:[%s4937_s23 + $0x490] sm:$0xff] %v3306_v45  ;;  %v3179_v47 = vpack.c.bf16 %v2687_v46, %v2686_v44  ;;  %v1726_v48 = vpop.f32.mrf.mxu2 }
 0x16f   : > { %v1727_v49 = vadd.f32 %v1726_v48, %v4927_v1  ;;  %v2375_v50 = vpop.f32.mrf.mxu3 }
 0x170   : > { %3435 = vst [vmem:[%s4937_s23 + $0x98] sm:$0xff] %v3179_v47  ;;  %v2376_v53 = vadd.f32 %v2375_v50, %v4929_v2  ;;  %v1409_v54 = vpop.f32.mrf.mxu0  ;;  %v4461_v50 = vld [vmem:[%s4901_s30 + $0x2a0] sm:$0xff] }
 0x171   : > { %v2942_v55 = vmax.f32 %v1727_v49, 0.0  ;;  %v1410_v56 = vadd.f32 %v1409_v54, %v4927_v1  ;;  %v2058_v57 = vpop.f32.mrf.mxu1  ;;  %v4397_v49 = vld [vmem:[%s4901_s30 + $0xa0] sm:$0xff] }
 0x172   : > { %v2943_v58 = vmax.f32 %v2376_v53, 0.0  ;;  %v2059_v59 = vadd.f32 %v2058_v57, %v4929_v2 }
 0x173   : > { %v2688_v60 = vmax.f32 %v1410_v56, 0.0  ;;  %1448 = vmatmul.bf16.gmra.mxu0 %v4395_v51  ;;  %1768 = vmatmul.bf16.gmra.mxu2 %v4459_v52 }
 0x174   : > { %v3307_v61 = vpack.c.bf16 %v2943_v58, %v2942_v55  ;;  %v2689_v62 = vmax.f32 %v2059_v59, 0.0  ;;  %2097 = vmatmul.bf16.gmra.mxu1 %v4395_v51  ;;  %2417 = vmatmul.bf16.gmra.mxu3 %v4459_v52 }
 0x176   : > { %3563 = vst [vmem:[%s4937_s23 + $0x498] sm:$0xff] %v3307_v61  ;;  %v3180_v63 = vpack.c.bf16 %v2689_v62, %v2688_v60  ;;  %v1729_v0 = vpop.f32.mrf.mxu2 }
 0x177   : > { %v1730_v3 = vadd.f32 %v1729_v0, %v4927_v1  ;;  %v2378_v4 = vpop.f32.mrf.mxu3 }
 0x178   : > { %3436 = vst [vmem:[%s4937_s23 + $0xa0] sm:$0xff] %v3180_v63  ;;  %v2379_v5 = vadd.f32 %v2378_v4, %v4929_v2  ;;  %v1411_v6 = vpop.f32.mrf.mxu0 }
 0x179   : > { %v2944_v7 = vmax.f32 %v1730_v3, 0.0  ;;  %v1412_v8 = vadd.f32 %v1411_v6, %v4927_v1  ;;  %v2060_v9 = vpop.f32.mrf.mxu1 }
 0x17a   : > { %v2945_v10 = vmax.f32 %v2379_v5, 0.0  ;;  %v2061_v11 = vadd.f32 %v2060_v9, %v4929_v2 }
 0x17b   : > { %v2690_v12 = vmax.f32 %v1412_v8, 0.0 }
 0x17c   : > { %v3308_v13 = vpack.c.bf16 %v2945_v10, %v2944_v7  ;;  %v2691_v14 = vmax.f32 %v2061_v11, 0.0 }
 0x17e   : > { %3564 = vst [vmem:[%s4937_s23 + $0x4a0] sm:$0xff] %v3308_v13  ;;  %v3181_v15 = vpack.c.bf16 %v2691_v14, %v2690_v12  ;;  %v1731_v16 = vpop.f32.mrf.mxu2 }
 0x17f   : > { %v1732_v17 = vadd.f32 %v1731_v16, %v4927_v1  ;;  %v2380_v18 = vpop.f32.mrf.mxu3 }
 0x180   : > { %3437 = vst [vmem:[%s4937_s23 + $0xa8] sm:$0xff] %v3181_v15  ;;  %v2381_v21 = vadd.f32 %v2380_v18, %v4929_v2  ;;  %v1414_v22 = vpop.f32.mrf.mxu0  ;;  %v4462_v18 = vld [vmem:[%s4901_s30 + $0x2a8] sm:$0xff] }
 0x181   : > { %v2946_v23 = vmax.f32 %v1732_v17, 0.0  ;;  %v1415_v24 = vadd.f32 %v1414_v22, %v4927_v1  ;;  %v2063_v25 = vpop.f32.mrf.mxu1  ;;  %v4398_v17 = vld [vmem:[%s4901_s30 + $0xa8] sm:$0xff] }
 0x182   : > { %v2947_v26 = vmax.f32 %v2381_v21, 0.0  ;;  %v2064_v27 = vadd.f32 %v2063_v25, %v4929_v2 }
 0x183   : > { %v2692_v28 = vmax.f32 %v1415_v24, 0.0  ;;  %1453 = vmatmul.bf16.gmra.mxu0 %v4396_v19  ;;  %1773 = vmatmul.bf16.gmra.mxu2 %v4460_v20 }
 0x184   : > { %v3309_v29 = vpack.c.bf16 %v2947_v26, %v2946_v23  ;;  %v2693_v30 = vmax.f32 %v2064_v27, 0.0  ;;  %2102 = vmatmul.bf16.gmra.mxu1 %v4396_v19  ;;  %2422 = vmatmul.bf16.gmra.mxu3 %v4460_v20 }
 0x186   : > { %3565 = vst [vmem:[%s4937_s23 + $0x4a8] sm:$0xff] %v3309_v29  ;;  %v3182_v31 = vpack.c.bf16 %v2693_v30, %v2692_v28  ;;  %v1734_v32 = vpop.f32.mrf.mxu2 }
 0x187   : > { %v1735_v33 = vadd.f32 %v1734_v32, %v4927_v1  ;;  %v2383_v34 = vpop.f32.mrf.mxu3 }
 0x188   : > { %3438 = vst [vmem:[%s4937_s23 + $0xb0] sm:$0xff] %v3182_v31  ;;  %v2384_v35 = vadd.f32 %v2383_v34, %v4929_v2  ;;  %v1416_v36 = vpop.f32.mrf.mxu0 }
 0x189   : > { %v2948_v37 = vmax.f32 %v1735_v33, 0.0  ;;  %v1417_v38 = vadd.f32 %v1416_v36, %v4927_v1  ;;  %v2065_v39 = vpop.f32.mrf.mxu1 }
 0x18a   : > { %v2949_v40 = vmax.f32 %v2384_v35, 0.0  ;;  %v2066_v41 = vadd.f32 %v2065_v39, %v4929_v2 }
 0x18b   : > { %v2694_v42 = vmax.f32 %v1417_v38, 0.0 }
 0x18c   : > { %v3310_v43 = vpack.c.bf16 %v2949_v40, %v2948_v37  ;;  %v2695_v44 = vmax.f32 %v2066_v41, 0.0 }
 0x18e   : > { %3566 = vst [vmem:[%s4937_s23 + $0x4b0] sm:$0xff] %v3310_v43  ;;  %v3183_v45 = vpack.c.bf16 %v2695_v44, %v2694_v42  ;;  %v1736_v46 = vpop.f32.mrf.mxu2 }
 0x18f   : > { %v1737_v47 = vadd.f32 %v1736_v46, %v4927_v1  ;;  %v2385_v48 = vpop.f32.mrf.mxu3 }
 0x190   : > { %3439 = vst [vmem:[%s4937_s23 + $0xb8] sm:$0xff] %v3183_v45  ;;  %v2386_v51 = vadd.f32 %v2385_v48, %v4929_v2  ;;  %v1419_v52 = vpop.f32.mrf.mxu0  ;;  %v4463_v48 = vld [vmem:[%s4901_s30 + $0x2b0] sm:$0xff] }
 0x191   : > { %v2950_v53 = vmax.f32 %v1737_v47, 0.0  ;;  %v1420_v54 = vadd.f32 %v1419_v52, %v4927_v1  ;;  %v2068_v55 = vpop.f32.mrf.mxu1  ;;  %v4399_v47 = vld [vmem:[%s4901_s30 + $0xb0] sm:$0xff] }
 0x192   : > { %v2951_v56 = vmax.f32 %v2386_v51, 0.0  ;;  %v2069_v57 = vadd.f32 %v2068_v55, %v4929_v2 }
 0x193   : > { %v2696_v58 = vmax.f32 %v1420_v54, 0.0  ;;  %1458 = vmatmul.bf16.gmra.mxu0 %v4397_v49  ;;  %1778 = vmatmul.bf16.gmra.mxu2 %v4461_v50 }
 0x194   : > { %v3311_v59 = vpack.c.bf16 %v2951_v56, %v2950_v53  ;;  %v2697_v60 = vmax.f32 %v2069_v57, 0.0  ;;  %2107 = vmatmul.bf16.gmra.mxu1 %v4397_v49  ;;  %2427 = vmatmul.bf16.gmra.mxu3 %v4461_v50 }
 0x196   : > { %3567 = vst [vmem:[%s4937_s23 + $0x4b8] sm:$0xff] %v3311_v59  ;;  %v3184_v61 = vpack.c.bf16 %v2697_v60, %v2696_v58  ;;  %v1739_v62 = vpop.f32.mrf.mxu2 }
 0x197   : > { %v1740_v63 = vadd.f32 %v1739_v62, %v4927_v1  ;;  %v2388_v0 = vpop.f32.mrf.mxu3 }
 0x198   : > { %3440 = vst [vmem:[%s4937_s23 + $0xc0] sm:$0xff] %v3184_v61  ;;  %v2389_v3 = vadd.f32 %v2388_v0, %v4929_v2  ;;  %v1421_v4 = vpop.f32.mrf.mxu0 }
 0x199   : > { %v2952_v5 = vmax.f32 %v1740_v63, 0.0  ;;  %v1422_v6 = vadd.f32 %v1421_v4, %v4927_v1  ;;  %v2070_v7 = vpop.f32.mrf.mxu1 }
 0x19a   : > { %v2953_v8 = vmax.f32 %v2389_v3, 0.0  ;;  %v2071_v9 = vadd.f32 %v2070_v7, %v4929_v2 }
 0x19b   : > { %v2698_v10 = vmax.f32 %v1422_v6, 0.0 }
 0x19c   : > { %v3312_v11 = vpack.c.bf16 %v2953_v8, %v2952_v5  ;;  %v2699_v12 = vmax.f32 %v2071_v9, 0.0 }
 0x19e   : > { %3568 = vst [vmem:[%s4937_s23 + $0x4c0] sm:$0xff] %v3312_v11  ;;  %v3185_v13 = vpack.c.bf16 %v2699_v12, %v2698_v10  ;;  %v1741_v14 = vpop.f32.mrf.mxu2 }
 0x19f   : > { %v1742_v15 = vadd.f32 %v1741_v14, %v4927_v1  ;;  %v2390_v16 = vpop.f32.mrf.mxu3 }
 0x1a0   : > { %3441 = vst [vmem:[%s4937_s23 + $0xc8] sm:$0xff] %v3185_v13  ;;  %v2391_v19 = vadd.f32 %v2390_v16, %v4929_v2  ;;  %v1424_v20 = vpop.f32.mrf.mxu0  ;;  %v4464_v16 = vld [vmem:[%s4901_s30 + $0x2b8] sm:$0xff] }
 0x1a1   : > { %v2954_v21 = vmax.f32 %v1742_v15, 0.0  ;;  %v1425_v22 = vadd.f32 %v1424_v20, %v4927_v1  ;;  %v2073_v23 = vpop.f32.mrf.mxu1  ;;  %v4400_v15 = vld [vmem:[%s4901_s30 + $0xb8] sm:$0xff] }
 0x1a2   : > { %v2955_v24 = vmax.f32 %v2391_v19, 0.0  ;;  %v2074_v25 = vadd.f32 %v2073_v23, %v4929_v2 }
 0x1a3   : > { %v2700_v26 = vmax.f32 %v1425_v22, 0.0  ;;  %1463 = vmatmul.bf16.gmra.mxu0 %v4398_v17  ;;  %1783 = vmatmul.bf16.gmra.mxu2 %v4462_v18 }
 0x1a4   : > { %v3313_v27 = vpack.c.bf16 %v2955_v24, %v2954_v21  ;;  %v2701_v28 = vmax.f32 %v2074_v25, 0.0  ;;  %2112 = vmatmul.bf16.gmra.mxu1 %v4398_v17  ;;  %2432 = vmatmul.bf16.gmra.mxu3 %v4462_v18 }
 0x1a6   : > { %3569 = vst [vmem:[%s4937_s23 + $0x4c8] sm:$0xff] %v3313_v27  ;;  %v3186_v29 = vpack.c.bf16 %v2701_v28, %v2700_v26  ;;  %v1744_v30 = vpop.f32.mrf.mxu2 }
 0x1a7   : > { %v1745_v31 = vadd.f32 %v1744_v30, %v4927_v1  ;;  %v2393_v32 = vpop.f32.mrf.mxu3 }
 0x1a8   : > { %3442 = vst [vmem:[%s4937_s23 + $0xd0] sm:$0xff] %v3186_v29  ;;  %v2394_v33 = vadd.f32 %v2393_v32, %v4929_v2  ;;  %v1426_v34 = vpop.f32.mrf.mxu0 }
 0x1a9   : > { %v2956_v35 = vmax.f32 %v1745_v31, 0.0  ;;  %v1427_v36 = vadd.f32 %v1426_v34, %v4927_v1  ;;  %v2075_v37 = vpop.f32.mrf.mxu1 }
 0x1aa   : > { %v2957_v38 = vmax.f32 %v2394_v33, 0.0  ;;  %v2076_v39 = vadd.f32 %v2075_v37, %v4929_v2 }
 0x1ab   : > { %v2702_v40 = vmax.f32 %v1427_v36, 0.0 }
 0x1ac   : > { %v3314_v41 = vpack.c.bf16 %v2957_v38, %v2956_v35  ;;  %v2703_v42 = vmax.f32 %v2076_v39, 0.0 }
 0x1ae   : > { %3570 = vst [vmem:[%s4937_s23 + $0x4d0] sm:$0xff] %v3314_v41  ;;  %v3187_v43 = vpack.c.bf16 %v2703_v42, %v2702_v40  ;;  %v1746_v44 = vpop.f32.mrf.mxu2 }
 0x1af   : > { %v1747_v45 = vadd.f32 %v1746_v44, %v4927_v1  ;;  %v2395_v46 = vpop.f32.mrf.mxu3 }
 0x1b0   : > { %3443 = vst [vmem:[%s4937_s23 + $0xd8] sm:$0xff] %v3187_v43  ;;  %v2396_v49 = vadd.f32 %v2395_v46, %v4929_v2  ;;  %v1429_v50 = vpop.f32.mrf.mxu0  ;;  %v4465_v46 = vld [vmem:[%s4901_s30 + $0x2c0] sm:$0xff] }
 0x1b1   : > { %v2958_v51 = vmax.f32 %v1747_v45, 0.0  ;;  %v1430_v52 = vadd.f32 %v1429_v50, %v4927_v1  ;;  %v2078_v53 = vpop.f32.mrf.mxu1  ;;  %v4401_v45 = vld [vmem:[%s4901_s30 + $0xc0] sm:$0xff] }
 0x1b2   : > { %v2959_v54 = vmax.f32 %v2396_v49, 0.0  ;;  %v2079_v55 = vadd.f32 %v2078_v53, %v4929_v2 }
 0x1b3   : > { %v2704_v56 = vmax.f32 %v1430_v52, 0.0  ;;  %1468 = vmatmul.bf16.gmra.mxu0 %v4399_v47  ;;  %1788 = vmatmul.bf16.gmra.mxu2 %v4463_v48 }
 0x1b4   : > { %v3315_v57 = vpack.c.bf16 %v2959_v54, %v2958_v51  ;;  %v2705_v58 = vmax.f32 %v2079_v55, 0.0  ;;  %2117 = vmatmul.bf16.gmra.mxu1 %v4399_v47  ;;  %2437 = vmatmul.bf16.gmra.mxu3 %v4463_v48 }
 0x1b6   : > { %3571 = vst [vmem:[%s4937_s23 + $0x4d8] sm:$0xff] %v3315_v57  ;;  %v3188_v59 = vpack.c.bf16 %v2705_v58, %v2704_v56  ;;  %v1749_v60 = vpop.f32.mrf.mxu2 }
 0x1b7   : > { %v1750_v61 = vadd.f32 %v1749_v60, %v4927_v1  ;;  %v2398_v62 = vpop.f32.mrf.mxu3 }
 0x1b8   : > { %3444 = vst [vmem:[%s4937_s23 + $0xe0] sm:$0xff] %v3188_v59  ;;  %v2399_v63 = vadd.f32 %v2398_v62, %v4929_v2  ;;  %v1431_v0 = vpop.f32.mrf.mxu0 }
 0x1b9   : > { %v2960_v3 = vmax.f32 %v1750_v61, 0.0  ;;  %v1432_v4 = vadd.f32 %v1431_v0, %v4927_v1  ;;  %v2080_v5 = vpop.f32.mrf.mxu1 }
 0x1ba   : > { %v2961_v6 = vmax.f32 %v2399_v63, 0.0  ;;  %v2081_v7 = vadd.f32 %v2080_v5, %v4929_v2 }
 0x1bb   : > { %v2706_v8 = vmax.f32 %v1432_v4, 0.0 }
 0x1bc   : > { %v3316_v9 = vpack.c.bf16 %v2961_v6, %v2960_v3  ;;  %v2707_v10 = vmax.f32 %v2081_v7, 0.0 }
 0x1be   : > { %3572 = vst [vmem:[%s4937_s23 + $0x4e0] sm:$0xff] %v3316_v9  ;;  %v3189_v11 = vpack.c.bf16 %v2707_v10, %v2706_v8  ;;  %v1751_v12 = vpop.f32.mrf.mxu2 }
 0x1bf   : > { %v1752_v13 = vadd.f32 %v1751_v12, %v4927_v1  ;;  %v2400_v14 = vpop.f32.mrf.mxu3 }
 0x1c0   : > { %3445 = vst [vmem:[%s4937_s23 + $0xe8] sm:$0xff] %v3189_v11  ;;  %v2401_v17 = vadd.f32 %v2400_v14, %v4929_v2  ;;  %v1434_v18 = vpop.f32.mrf.mxu0  ;;  %v4466_v14 = vld [vmem:[%s4901_s30 + $0x2c8] sm:$0xff] }
 0x1c1   : > { %v2962_v19 = vmax.f32 %v1752_v13, 0.0  ;;  %v1435_v20 = vadd.f32 %v1434_v18, %v4927_v1  ;;  %v2083_v21 = vpop.f32.mrf.mxu1  ;;  %v4402_v13 = vld [vmem:[%s4901_s30 + $0xc8] sm:$0xff] }
 0x1c2   : > { %v2963_v22 = vmax.f32 %v2401_v17, 0.0  ;;  %v2084_v23 = vadd.f32 %v2083_v21, %v4929_v2 }
 0x1c3   : > { %v2708_v24 = vmax.f32 %v1435_v20, 0.0  ;;  %1473 = vmatmul.bf16.gmra.mxu0 %v4400_v15  ;;  %1793 = vmatmul.bf16.gmra.mxu2 %v4464_v16 }
 0x1c4   : > { %v3317_v25 = vpack.c.bf16 %v2963_v22, %v2962_v19  ;;  %v2709_v26 = vmax.f32 %v2084_v23, 0.0  ;;  %2122 = vmatmul.bf16.gmra.mxu1 %v4400_v15  ;;  %2442 = vmatmul.bf16.gmra.mxu3 %v4464_v16 }
 0x1c6   : > { %3573 = vst [vmem:[%s4937_s23 + $0x4e8] sm:$0xff] %v3317_v25  ;;  %v3190_v27 = vpack.c.bf16 %v2709_v26, %v2708_v24  ;;  %v1754_v28 = vpop.f32.mrf.mxu2 }
 0x1c7   : > { %v1755_v29 = vadd.f32 %v1754_v28, %v4927_v1  ;;  %v2403_v30 = vpop.f32.mrf.mxu3 }
 0x1c8   : > { %3446 = vst [vmem:[%s4937_s23 + $0xf0] sm:$0xff] %v3190_v27  ;;  %v2404_v31 = vadd.f32 %v2403_v30, %v4929_v2  ;;  %v1436_v32 = vpop.f32.mrf.mxu0 }
 0x1c9   : > { %v2964_v33 = vmax.f32 %v1755_v29, 0.0  ;;  %v1437_v34 = vadd.f32 %v1436_v32, %v4927_v1  ;;  %v2085_v35 = vpop.f32.mrf.mxu1 }
 0x1ca   : > { %v2965_v36 = vmax.f32 %v2404_v31, 0.0  ;;  %v2086_v37 = vadd.f32 %v2085_v35, %v4929_v2 }
 0x1cb   : > { %v2710_v38 = vmax.f32 %v1437_v34, 0.0 }
 0x1cc   : > { %v3318_v39 = vpack.c.bf16 %v2965_v36, %v2964_v33  ;;  %v2711_v40 = vmax.f32 %v2086_v37, 0.0 }
 0x1ce   : > { %3574 = vst [vmem:[%s4937_s23 + $0x4f0] sm:$0xff] %v3318_v39  ;;  %v3191_v41 = vpack.c.bf16 %v2711_v40, %v2710_v38  ;;  %v1756_v42 = vpop.f32.mrf.mxu2 }
 0x1cf   : > { %v1757_v43 = vadd.f32 %v1756_v42, %v4927_v1  ;;  %v2405_v44 = vpop.f32.mrf.mxu3 }
 0x1d0   : > { %3447 = vst [vmem:[%s4937_s23 + $0xf8] sm:$0xff] %v3191_v41  ;;  %v2406_v47 = vadd.f32 %v2405_v44, %v4929_v2  ;;  %v1439_v48 = vpop.f32.mrf.mxu0  ;;  %v4467_v44 = vld [vmem:[%s4901_s30 + $0x2d0] sm:$0xff] }
 0x1d1   : > { %v2966_v49 = vmax.f32 %v1757_v43, 0.0  ;;  %v1440_v50 = vadd.f32 %v1439_v48, %v4927_v1  ;;  %v2088_v51 = vpop.f32.mrf.mxu1  ;;  %v4403_v43 = vld [vmem:[%s4901_s30 + $0xd0] sm:$0xff] }
 0x1d2   : > { %v2967_v52 = vmax.f32 %v2406_v47, 0.0  ;;  %v2089_v53 = vadd.f32 %v2088_v51, %v4929_v2 }
 0x1d3   : > { %v2712_v54 = vmax.f32 %v1440_v50, 0.0  ;;  %1478 = vmatmul.bf16.gmra.mxu0 %v4401_v45  ;;  %1798 = vmatmul.bf16.gmra.mxu2 %v4465_v46 }
 0x1d4   : > { %v3319_v55 = vpack.c.bf16 %v2967_v52, %v2966_v49  ;;  %v2713_v56 = vmax.f32 %v2089_v53, 0.0  ;;  %2127 = vmatmul.bf16.gmra.mxu1 %v4401_v45  ;;  %2447 = vmatmul.bf16.gmra.mxu3 %v4465_v46 }
 0x1d6   : > { %3575 = vst [vmem:[%s4937_s23 + $0x4f8] sm:$0xff] %v3319_v55  ;;  %v3192_v57 = vpack.c.bf16 %v2713_v56, %v2712_v54  ;;  %v1759_v58 = vpop.f32.mrf.mxu2 }
 0x1d7   : > { %v1760_v59 = vadd.f32 %v1759_v58, %v4927_v1  ;;  %v2408_v60 = vpop.f32.mrf.mxu3 }
 0x1d8   : > { %3448 = vst [vmem:[%s4937_s23 + $0x100] sm:$0xff] %v3192_v57  ;;  %v2409_v61 = vadd.f32 %v2408_v60, %v4929_v2  ;;  %v1441_v62 = vpop.f32.mrf.mxu0 }
 0x1d9   : > { %v2968_v63 = vmax.f32 %v1760_v59, 0.0  ;;  %v1442_v0 = vadd.f32 %v1441_v62, %v4927_v1  ;;  %v2090_v3 = vpop.f32.mrf.mxu1 }
 0x1da   : > { %v2969_v4 = vmax.f32 %v2409_v61, 0.0  ;;  %v2091_v5 = vadd.f32 %v2090_v3, %v4929_v2 }
 0x1db   : > { %v2714_v6 = vmax.f32 %v1442_v0, 0.0 }
 0x1dc   : > { %v3320_v7 = vpack.c.bf16 %v2969_v4, %v2968_v63  ;;  %v2715_v8 = vmax.f32 %v2091_v5, 0.0 }
 0x1de   : > { %3576 = vst [vmem:[%s4937_s23 + $0x500] sm:$0xff] %v3320_v7  ;;  %v3193_v9 = vpack.c.bf16 %v2715_v8, %v2714_v6  ;;  %v1761_v10 = vpop.f32.mrf.mxu2 }
 0x1df   : > { %v1762_v11 = vadd.f32 %v1761_v10, %v4927_v1  ;;  %v2410_v12 = vpop.f32.mrf.mxu3 }
 0x1e0   : > { %3449 = vst [vmem:[%s4937_s23 + $0x108] sm:$0xff] %v3193_v9  ;;  %v2411_v15 = vadd.f32 %v2410_v12, %v4929_v2  ;;  %v1444_v16 = vpop.f32.mrf.mxu0  ;;  %v4468_v12 = vld [vmem:[%s4901_s30 + $0x2d8] sm:$0xff] }
 0x1e1   : > { %v2970_v17 = vmax.f32 %v1762_v11, 0.0  ;;  %v1445_v18 = vadd.f32 %v1444_v16, %v4927_v1  ;;  %v2093_v19 = vpop.f32.mrf.mxu1  ;;  %v4404_v11 = vld [vmem:[%s4901_s30 + $0xd8] sm:$0xff] }
 0x1e2   : > { %v2971_v20 = vmax.f32 %v2411_v15, 0.0  ;;  %v2094_v21 = vadd.f32 %v2093_v19, %v4929_v2 }
 0x1e3   : > { %v2716_v22 = vmax.f32 %v1445_v18, 0.0  ;;  %1483 = vmatmul.bf16.gmra.mxu0 %v4402_v13  ;;  %1803 = vmatmul.bf16.gmra.mxu2 %v4466_v14 }
 0x1e4   : > { %v3321_v23 = vpack.c.bf16 %v2971_v20, %v2970_v17  ;;  %v2717_v24 = vmax.f32 %v2094_v21, 0.0  ;;  %2132 = vmatmul.bf16.gmra.mxu1 %v4402_v13  ;;  %2452 = vmatmul.bf16.gmra.mxu3 %v4466_v14 }
 0x1e6   : > { %3577 = vst [vmem:[%s4937_s23 + $0x508] sm:$0xff] %v3321_v23  ;;  %v3194_v25 = vpack.c.bf16 %v2717_v24, %v2716_v22  ;;  %v1764_v26 = vpop.f32.mrf.mxu2 }
 0x1e7   : > { %v1765_v27 = vadd.f32 %v1764_v26, %v4927_v1  ;;  %v2413_v28 = vpop.f32.mrf.mxu3 }
 0x1e8   : > { %3450 = vst [vmem:[%s4937_s23 + $0x110] sm:$0xff] %v3194_v25  ;;  %v2414_v29 = vadd.f32 %v2413_v28, %v4929_v2  ;;  %v1446_v30 = vpop.f32.mrf.mxu0 }
 0x1e9   : > { %v2972_v31 = vmax.f32 %v1765_v27, 0.0  ;;  %v1447_v32 = vadd.f32 %v1446_v30, %v4927_v1  ;;  %v2095_v33 = vpop.f32.mrf.mxu1 }
 0x1ea   : > { %v2973_v34 = vmax.f32 %v2414_v29, 0.0  ;;  %v2096_v35 = vadd.f32 %v2095_v33, %v4929_v2 }
 0x1eb   : > { %v2718_v36 = vmax.f32 %v1447_v32, 0.0 }
 0x1ec   : > { %v3322_v37 = vpack.c.bf16 %v2973_v34, %v2972_v31  ;;  %v2719_v38 = vmax.f32 %v2096_v35, 0.0 }
 0x1ee   : > { %3578 = vst [vmem:[%s4937_s23 + $0x510] sm:$0xff] %v3322_v37  ;;  %v3195_v39 = vpack.c.bf16 %v2719_v38, %v2718_v36  ;;  %v1766_v40 = vpop.f32.mrf.mxu2 }
 0x1ef   : > { %v1767_v41 = vadd.f32 %v1766_v40, %v4927_v1  ;;  %v2415_v42 = vpop.f32.mrf.mxu3 }
 0x1f0   : > { %3451 = vst [vmem:[%s4937_s23 + $0x118] sm:$0xff] %v3195_v39  ;;  %v2416_v45 = vadd.f32 %v2415_v42, %v4929_v2  ;;  %v1449_v46 = vpop.f32.mrf.mxu0  ;;  %v4469_v42 = vld [vmem:[%s4901_s30 + $0x2e0] sm:$0xff] }
 0x1f1   : > { %v2974_v47 = vmax.f32 %v1767_v41, 0.0  ;;  %v1450_v48 = vadd.f32 %v1449_v46, %v4927_v1  ;;  %v2098_v49 = vpop.f32.mrf.mxu1  ;;  %v4405_v41 = vld [vmem:[%s4901_s30 + $0xe0] sm:$0xff] }
 0x1f2   : > { %v2975_v50 = vmax.f32 %v2416_v45, 0.0  ;;  %v2099_v51 = vadd.f32 %v2098_v49, %v4929_v2 }
 0x1f3   : > { %v2720_v52 = vmax.f32 %v1450_v48, 0.0  ;;  %1488 = vmatmul.bf16.gmra.mxu0 %v4403_v43  ;;  %1808 = vmatmul.bf16.gmra.mxu2 %v4467_v44 }
 0x1f4   : > { %v3323_v53 = vpack.c.bf16 %v2975_v50, %v2974_v47  ;;  %v2721_v54 = vmax.f32 %v2099_v51, 0.0  ;;  %2137 = vmatmul.bf16.gmra.mxu1 %v4403_v43  ;;  %2457 = vmatmul.bf16.gmra.mxu3 %v4467_v44 }
 0x1f6   : > { %3579 = vst [vmem:[%s4937_s23 + $0x518] sm:$0xff] %v3323_v53  ;;  %v3196_v55 = vpack.c.bf16 %v2721_v54, %v2720_v52  ;;  %v1769_v56 = vpop.f32.mrf.mxu2 }
 0x1f7   : > { %v1770_v57 = vadd.f32 %v1769_v56, %v4927_v1  ;;  %v2418_v58 = vpop.f32.mrf.mxu3 }
 0x1f8   : > { %3452 = vst [vmem:[%s4937_s23 + $0x120] sm:$0xff] %v3196_v55  ;;  %v2419_v59 = vadd.f32 %v2418_v58, %v4929_v2  ;;  %v1451_v60 = vpop.f32.mrf.mxu0 }
 0x1f9   : > { %v2976_v61 = vmax.f32 %v1770_v57, 0.0  ;;  %v1452_v62 = vadd.f32 %v1451_v60, %v4927_v1  ;;  %v2100_v63 = vpop.f32.mrf.mxu1 }
 0x1fa   : > { %v2977_v0 = vmax.f32 %v2419_v59, 0.0  ;;  %v2101_v3 = vadd.f32 %v2100_v63, %v4929_v2 }
 0x1fb   : > { %v2722_v4 = vmax.f32 %v1452_v62, 0.0 }
 0x1fc   : > { %v3324_v5 = vpack.c.bf16 %v2977_v0, %v2976_v61  ;;  %v2723_v6 = vmax.f32 %v2101_v3, 0.0 }
 0x1fe   : > { %3580 = vst [vmem:[%s4937_s23 + $0x520] sm:$0xff] %v3324_v5  ;;  %v3197_v7 = vpack.c.bf16 %v2723_v6, %v2722_v4  ;;  %v1771_v8 = vpop.f32.mrf.mxu2 }
 0x1ff   : > { %v1772_v9 = vadd.f32 %v1771_v8, %v4927_v1  ;;  %v2420_v10 = vpop.f32.mrf.mxu3 }
 0x200   : > { %3453 = vst [vmem:[%s4937_s23 + $0x128] sm:$0xff] %v3197_v7  ;;  %v2421_v13 = vadd.f32 %v2420_v10, %v4929_v2  ;;  %v1454_v14 = vpop.f32.mrf.mxu0  ;;  %v4470_v10 = vld [vmem:[%s4901_s30 + $0x2e8] sm:$0xff] }
 0x201   : > { %v2978_v15 = vmax.f32 %v1772_v9, 0.0  ;;  %v1455_v16 = vadd.f32 %v1454_v14, %v4927_v1  ;;  %v2103_v17 = vpop.f32.mrf.mxu1  ;;  %v4406_v9 = vld [vmem:[%s4901_s30 + $0xe8] sm:$0xff] }
 0x202   : > { %v2979_v18 = vmax.f32 %v2421_v13, 0.0  ;;  %v2104_v19 = vadd.f32 %v2103_v17, %v4929_v2 }
 0x203   : > { %v2724_v20 = vmax.f32 %v1455_v16, 0.0  ;;  %1493 = vmatmul.bf16.gmra.mxu0 %v4404_v11  ;;  %1813 = vmatmul.bf16.gmra.mxu2 %v4468_v12 }
 0x204   : > { %v3325_v21 = vpack.c.bf16 %v2979_v18, %v2978_v15  ;;  %v2725_v22 = vmax.f32 %v2104_v19, 0.0  ;;  %2142 = vmatmul.bf16.gmra.mxu1 %v4404_v11  ;;  %2462 = vmatmul.bf16.gmra.mxu3 %v4468_v12 }
 0x206   : > { %3581 = vst [vmem:[%s4937_s23 + $0x528] sm:$0xff] %v3325_v21  ;;  %v3198_v23 = vpack.c.bf16 %v2725_v22, %v2724_v20  ;;  %v1774_v24 = vpop.f32.mrf.mxu2 }
 0x207   : > { %v1775_v25 = vadd.f32 %v1774_v24, %v4927_v1  ;;  %v2423_v26 = vpop.f32.mrf.mxu3 }
 0x208   : > { %3454 = vst [vmem:[%s4937_s23 + $0x130] sm:$0xff] %v3198_v23  ;;  %v2424_v27 = vadd.f32 %v2423_v26, %v4929_v2  ;;  %v1456_v28 = vpop.f32.mrf.mxu0 }
 0x209   : > { %v2980_v29 = vmax.f32 %v1775_v25, 0.0  ;;  %v1457_v30 = vadd.f32 %v1456_v28, %v4927_v1  ;;  %v2105_v31 = vpop.f32.mrf.mxu1 }
 0x20a   : > { %v2981_v32 = vmax.f32 %v2424_v27, 0.0  ;;  %v2106_v33 = vadd.f32 %v2105_v31, %v4929_v2 }
 0x20b   : > { %v2726_v34 = vmax.f32 %v1457_v30, 0.0 }
 0x20c   : > { %v3326_v35 = vpack.c.bf16 %v2981_v32, %v2980_v29  ;;  %v2727_v36 = vmax.f32 %v2106_v33, 0.0 }
 0x20e   : > { %3582 = vst [vmem:[%s4937_s23 + $0x530] sm:$0xff] %v3326_v35  ;;  %v3199_v37 = vpack.c.bf16 %v2727_v36, %v2726_v34  ;;  %v1776_v38 = vpop.f32.mrf.mxu2 }
 0x20f   : > { %v1777_v39 = vadd.f32 %v1776_v38, %v4927_v1  ;;  %v2425_v40 = vpop.f32.mrf.mxu3 }
 0x210   : > { %3455 = vst [vmem:[%s4937_s23 + $0x138] sm:$0xff] %v3199_v37  ;;  %v2426_v43 = vadd.f32 %v2425_v40, %v4929_v2  ;;  %v1459_v44 = vpop.f32.mrf.mxu0  ;;  %v4471_v40 = vld [vmem:[%s4901_s30 + $0x2f0] sm:$0xff] }
 0x211   : > { %v2982_v45 = vmax.f32 %v1777_v39, 0.0  ;;  %v1460_v46 = vadd.f32 %v1459_v44, %v4927_v1  ;;  %v2108_v47 = vpop.f32.mrf.mxu1  ;;  %v4407_v39 = vld [vmem:[%s4901_s30 + $0xf0] sm:$0xff] }
 0x212   : > { %v2983_v48 = vmax.f32 %v2426_v43, 0.0  ;;  %v2109_v49 = vadd.f32 %v2108_v47, %v4929_v2 }
 0x213   : > { %v2728_v50 = vmax.f32 %v1460_v46, 0.0  ;;  %1498 = vmatmul.bf16.gmra.mxu0 %v4405_v41  ;;  %1818 = vmatmul.bf16.gmra.mxu2 %v4469_v42 }
 0x214   : > { %v3327_v51 = vpack.c.bf16 %v2983_v48, %v2982_v45  ;;  %v2729_v52 = vmax.f32 %v2109_v49, 0.0  ;;  %2147 = vmatmul.bf16.gmra.mxu1 %v4405_v41  ;;  %2467 = vmatmul.bf16.gmra.mxu3 %v4469_v42 }
 0x216   : > { %3583 = vst [vmem:[%s4937_s23 + $0x538] sm:$0xff] %v3327_v51  ;;  %v3200_v53 = vpack.c.bf16 %v2729_v52, %v2728_v50  ;;  %v1779_v54 = vpop.f32.mrf.mxu2 }
 0x217   : > { %v1780_v55 = vadd.f32 %v1779_v54, %v4927_v1  ;;  %v2428_v56 = vpop.f32.mrf.mxu3 }
 0x218   : > { %3456 = vst [vmem:[%s4937_s23 + $0x140] sm:$0xff] %v3200_v53  ;;  %v2429_v57 = vadd.f32 %v2428_v56, %v4929_v2  ;;  %v1461_v58 = vpop.f32.mrf.mxu0 }
 0x219   : > { %v2984_v59 = vmax.f32 %v1780_v55, 0.0  ;;  %v1462_v60 = vadd.f32 %v1461_v58, %v4927_v1  ;;  %v2110_v61 = vpop.f32.mrf.mxu1 }
 0x21a   : > { %v2985_v62 = vmax.f32 %v2429_v57, 0.0  ;;  %v2111_v63 = vadd.f32 %v2110_v61, %v4929_v2 }
 0x21b   : > { %v2730_v0 = vmax.f32 %v1462_v60, 0.0 }
 0x21c   : > { %v3328_v3 = vpack.c.bf16 %v2985_v62, %v2984_v59  ;;  %v2731_v4 = vmax.f32 %v2111_v63, 0.0 }
 0x21e   : > { %3584 = vst [vmem:[%s4937_s23 + $0x540] sm:$0xff] %v3328_v3  ;;  %v3201_v5 = vpack.c.bf16 %v2731_v4, %v2730_v0  ;;  %v1781_v6 = vpop.f32.mrf.mxu2 }
 0x21f   : > { %v1782_v7 = vadd.f32 %v1781_v6, %v4927_v1  ;;  %v2430_v8 = vpop.f32.mrf.mxu3 }
 0x220   : > { %3457 = vst [vmem:[%s4937_s23 + $0x148] sm:$0xff] %v3201_v5  ;;  %v2431_v11 = vadd.f32 %v2430_v8, %v4929_v2  ;;  %v1464_v12 = vpop.f32.mrf.mxu0  ;;  %v4472_v8 = vld [vmem:[%s4901_s30 + $0x2f8] sm:$0xff] }
 0x221   : > { %v2986_v13 = vmax.f32 %v1782_v7, 0.0  ;;  %v1465_v14 = vadd.f32 %v1464_v12, %v4927_v1  ;;  %v2113_v15 = vpop.f32.mrf.mxu1  ;;  %v4408_v7 = vld [vmem:[%s4901_s30 + $0xf8] sm:$0xff] }
 0x222   : > { %v2987_v16 = vmax.f32 %v2431_v11, 0.0  ;;  %v2114_v17 = vadd.f32 %v2113_v15, %v4929_v2 }
 0x223   : > { %v2732_v18 = vmax.f32 %v1465_v14, 0.0  ;;  %1503 = vmatmul.bf16.gmra.mxu0 %v4406_v9  ;;  %1823 = vmatmul.bf16.gmra.mxu2 %v4470_v10 }
 0x224   : > { %v3329_v19 = vpack.c.bf16 %v2987_v16, %v2986_v13  ;;  %v2733_v20 = vmax.f32 %v2114_v17, 0.0  ;;  %2152 = vmatmul.bf16.gmra.mxu1 %v4406_v9  ;;  %2472 = vmatmul.bf16.gmra.mxu3 %v4470_v10 }
 0x226   : > { %3585 = vst [vmem:[%s4937_s23 + $0x548] sm:$0xff] %v3329_v19  ;;  %v3202_v21 = vpack.c.bf16 %v2733_v20, %v2732_v18  ;;  %v1784_v22 = vpop.f32.mrf.mxu2 }
 0x227   : > { %v1785_v23 = vadd.f32 %v1784_v22, %v4927_v1  ;;  %v2433_v24 = vpop.f32.mrf.mxu3 }
 0x228   : > { %3458 = vst [vmem:[%s4937_s23 + $0x150] sm:$0xff] %v3202_v21  ;;  %v2434_v25 = vadd.f32 %v2433_v24, %v4929_v2  ;;  %v1466_v26 = vpop.f32.mrf.mxu0 }
 0x229   : > { %v2988_v27 = vmax.f32 %v1785_v23, 0.0  ;;  %v1467_v28 = vadd.f32 %v1466_v26, %v4927_v1  ;;  %v2115_v29 = vpop.f32.mrf.mxu1 }
 0x22a   : > { %v2989_v30 = vmax.f32 %v2434_v25, 0.0  ;;  %v2116_v31 = vadd.f32 %v2115_v29, %v4929_v2 }
 0x22b   : > { %v2734_v32 = vmax.f32 %v1467_v28, 0.0 }
 0x22c   : > { %v3330_v33 = vpack.c.bf16 %v2989_v30, %v2988_v27  ;;  %v2735_v34 = vmax.f32 %v2116_v31, 0.0 }
 0x22e   : > { %3586 = vst [vmem:[%s4937_s23 + $0x550] sm:$0xff] %v3330_v33  ;;  %v3203_v35 = vpack.c.bf16 %v2735_v34, %v2734_v32  ;;  %v1786_v36 = vpop.f32.mrf.mxu2 }
 0x22f   : > { %v1787_v37 = vadd.f32 %v1786_v36, %v4927_v1  ;;  %v2435_v38 = vpop.f32.mrf.mxu3 }
 0x230   : > { %3459 = vst [vmem:[%s4937_s23 + $0x158] sm:$0xff] %v3203_v35  ;;  %v2436_v41 = vadd.f32 %v2435_v38, %v4929_v2  ;;  %v1469_v42 = vpop.f32.mrf.mxu0  ;;  %v4473_v38 = vld [vmem:[%s4901_s30 + $0x300] sm:$0xff] }
 0x231   : > { %v2990_v43 = vmax.f32 %v1787_v37, 0.0  ;;  %v1470_v44 = vadd.f32 %v1469_v42, %v4927_v1  ;;  %v2118_v45 = vpop.f32.mrf.mxu1  ;;  %v4409_v37 = vld [vmem:[%s4901_s30 + $0x100] sm:$0xff] }
 0x232   : > { %v2991_v46 = vmax.f32 %v2436_v41, 0.0  ;;  %v2119_v47 = vadd.f32 %v2118_v45, %v4929_v2 }
 0x233   : > { %v2736_v48 = vmax.f32 %v1470_v44, 0.0  ;;  %1508 = vmatmul.bf16.gmra.mxu0 %v4407_v39  ;;  %1828 = vmatmul.bf16.gmra.mxu2 %v4471_v40 }
 0x234   : > { %v3331_v49 = vpack.c.bf16 %v2991_v46, %v2990_v43  ;;  %v2737_v50 = vmax.f32 %v2119_v47, 0.0  ;;  %2157 = vmatmul.bf16.gmra.mxu1 %v4407_v39  ;;  %2477 = vmatmul.bf16.gmra.mxu3 %v4471_v40 }
 0x236   : > { %3587 = vst [vmem:[%s4937_s23 + $0x558] sm:$0xff] %v3331_v49  ;;  %v3204_v51 = vpack.c.bf16 %v2737_v50, %v2736_v48  ;;  %v1789_v52 = vpop.f32.mrf.mxu2 }
 0x237   : > { %v1790_v53 = vadd.f32 %v1789_v52, %v4927_v1  ;;  %v2438_v54 = vpop.f32.mrf.mxu3 }
 0x238   : > { %3460 = vst [vmem:[%s4937_s23 + $0x160] sm:$0xff] %v3204_v51  ;;  %v2439_v55 = vadd.f32 %v2438_v54, %v4929_v2  ;;  %v1471_v56 = vpop.f32.mrf.mxu0 }
 0x239   : > { %v2992_v57 = vmax.f32 %v1790_v53, 0.0  ;;  %v1472_v58 = vadd.f32 %v1471_v56, %v4927_v1  ;;  %v2120_v59 = vpop.f32.mrf.mxu1 }
 0x23a   : > { %v2993_v60 = vmax.f32 %v2439_v55, 0.0  ;;  %v2121_v61 = vadd.f32 %v2120_v59, %v4929_v2 }
 0x23b   : > { %v2738_v62 = vmax.f32 %v1472_v58, 0.0 }
 0x23c   : > { %v3332_v63 = vpack.c.bf16 %v2993_v60, %v2992_v57  ;;  %v2739_v0 = vmax.f32 %v2121_v61, 0.0 }
 0x23e   : > { %3588 = vst [vmem:[%s4937_s23 + $0x560] sm:$0xff] %v3332_v63  ;;  %v3205_v3 = vpack.c.bf16 %v2739_v0, %v2738_v62  ;;  %v1791_v4 = vpop.f32.mrf.mxu2 }
 0x23f   : > { %v1792_v5 = vadd.f32 %v1791_v4, %v4927_v1  ;;  %v2440_v6 = vpop.f32.mrf.mxu3 }
 0x240   : > { %3461 = vst [vmem:[%s4937_s23 + $0x168] sm:$0xff] %v3205_v3  ;;  %v2441_v9 = vadd.f32 %v2440_v6, %v4929_v2  ;;  %v1474_v10 = vpop.f32.mrf.mxu0  ;;  %v4474_v6 = vld [vmem:[%s4901_s30 + $0x308] sm:$0xff] }
 0x241   : > { %v2994_v11 = vmax.f32 %v1792_v5, 0.0  ;;  %v1475_v12 = vadd.f32 %v1474_v10, %v4927_v1  ;;  %v2123_v13 = vpop.f32.mrf.mxu1  ;;  %v4410_v5 = vld [vmem:[%s4901_s30 + $0x108] sm:$0xff] }
 0x242   : > { %v2995_v14 = vmax.f32 %v2441_v9, 0.0  ;;  %v2124_v15 = vadd.f32 %v2123_v13, %v4929_v2 }
 0x243   : > { %v2740_v16 = vmax.f32 %v1475_v12, 0.0  ;;  %1513 = vmatmul.bf16.gmra.mxu0 %v4408_v7  ;;  %1833 = vmatmul.bf16.gmra.mxu2 %v4472_v8 }
 0x244   : > { %v3333_v17 = vpack.c.bf16 %v2995_v14, %v2994_v11  ;;  %v2741_v18 = vmax.f32 %v2124_v15, 0.0  ;;  %2162 = vmatmul.bf16.gmra.mxu1 %v4408_v7  ;;  %2482 = vmatmul.bf16.gmra.mxu3 %v4472_v8 }
 0x246   : > { %3589 = vst [vmem:[%s4937_s23 + $0x568] sm:$0xff] %v3333_v17  ;;  %v3206_v19 = vpack.c.bf16 %v2741_v18, %v2740_v16  ;;  %v1794_v20 = vpop.f32.mrf.mxu2 }
 0x247   : > { %v1795_v21 = vadd.f32 %v1794_v20, %v4927_v1  ;;  %v2443_v22 = vpop.f32.mrf.mxu3 }
 0x248   : > { %3462 = vst [vmem:[%s4937_s23 + $0x170] sm:$0xff] %v3206_v19  ;;  %v2444_v23 = vadd.f32 %v2443_v22, %v4929_v2  ;;  %v1476_v24 = vpop.f32.mrf.mxu0 }
 0x249   : > { %v2996_v25 = vmax.f32 %v1795_v21, 0.0  ;;  %v1477_v26 = vadd.f32 %v1476_v24, %v4927_v1  ;;  %v2125_v27 = vpop.f32.mrf.mxu1 }
 0x24a   : > { %v2997_v28 = vmax.f32 %v2444_v23, 0.0  ;;  %v2126_v29 = vadd.f32 %v2125_v27, %v4929_v2 }
 0x24b   : > { %v2742_v30 = vmax.f32 %v1477_v26, 0.0 }
 0x24c   : > { %v3334_v31 = vpack.c.bf16 %v2997_v28, %v2996_v25  ;;  %v2743_v32 = vmax.f32 %v2126_v29, 0.0 }
 0x24e   : > { %3590 = vst [vmem:[%s4937_s23 + $0x570] sm:$0xff] %v3334_v31  ;;  %v3207_v33 = vpack.c.bf16 %v2743_v32, %v2742_v30  ;;  %v1796_v34 = vpop.f32.mrf.mxu2 }
 0x24f   : > { %v1797_v35 = vadd.f32 %v1796_v34, %v4927_v1  ;;  %v2445_v36 = vpop.f32.mrf.mxu3 }
 0x250   : > { %3463 = vst [vmem:[%s4937_s23 + $0x178] sm:$0xff] %v3207_v33  ;;  %v2446_v39 = vadd.f32 %v2445_v36, %v4929_v2  ;;  %v1479_v40 = vpop.f32.mrf.mxu0  ;;  %v4475_v36 = vld [vmem:[%s4901_s30 + $0x310] sm:$0xff] }
 0x251   : > { %v2998_v41 = vmax.f32 %v1797_v35, 0.0  ;;  %v1480_v42 = vadd.f32 %v1479_v40, %v4927_v1  ;;  %v2128_v43 = vpop.f32.mrf.mxu1  ;;  %v4411_v35 = vld [vmem:[%s4901_s30 + $0x110] sm:$0xff] }
 0x252   : > { %v2999_v44 = vmax.f32 %v2446_v39, 0.0  ;;  %v2129_v45 = vadd.f32 %v2128_v43, %v4929_v2 }
 0x253   : > { %v2744_v46 = vmax.f32 %v1480_v42, 0.0  ;;  %1518 = vmatmul.bf16.gmra.mxu0 %v4409_v37  ;;  %1838 = vmatmul.bf16.gmra.mxu2 %v4473_v38 }
 0x254   : > { %v3335_v47 = vpack.c.bf16 %v2999_v44, %v2998_v41  ;;  %v2745_v48 = vmax.f32 %v2129_v45, 0.0  ;;  %2167 = vmatmul.bf16.gmra.mxu1 %v4409_v37  ;;  %2487 = vmatmul.bf16.gmra.mxu3 %v4473_v38 }
 0x256   : > { %3591 = vst [vmem:[%s4937_s23 + $0x578] sm:$0xff] %v3335_v47  ;;  %v3208_v49 = vpack.c.bf16 %v2745_v48, %v2744_v46  ;;  %v1799_v50 = vpop.f32.mrf.mxu2 }
 0x257   : > { %v1800_v51 = vadd.f32 %v1799_v50, %v4927_v1  ;;  %v2448_v52 = vpop.f32.mrf.mxu3 }
 0x258   : > { %3464 = vst [vmem:[%s4937_s23 + $0x180] sm:$0xff] %v3208_v49  ;;  %v2449_v53 = vadd.f32 %v2448_v52, %v4929_v2  ;;  %v1481_v54 = vpop.f32.mrf.mxu0 }
 0x259   : > { %v3000_v55 = vmax.f32 %v1800_v51, 0.0  ;;  %v1482_v56 = vadd.f32 %v1481_v54, %v4927_v1  ;;  %v2130_v57 = vpop.f32.mrf.mxu1 }
 0x25a   : > { %v3001_v58 = vmax.f32 %v2449_v53, 0.0  ;;  %v2131_v59 = vadd.f32 %v2130_v57, %v4929_v2 }
 0x25b   : > { %v2746_v60 = vmax.f32 %v1482_v56, 0.0 }
 0x25c   : > { %v3336_v61 = vpack.c.bf16 %v3001_v58, %v3000_v55  ;;  %v2747_v62 = vmax.f32 %v2131_v59, 0.0 }
 0x25e   : > { %3592 = vst [vmem:[%s4937_s23 + $0x580] sm:$0xff] %v3336_v61  ;;  %v3209_v63 = vpack.c.bf16 %v2747_v62, %v2746_v60  ;;  %v1801_v0 = vpop.f32.mrf.mxu2 }
 0x25f   : > { %v1802_v3 = vadd.f32 %v1801_v0, %v4927_v1  ;;  %v2450_v4 = vpop.f32.mrf.mxu3 }
 0x260   : > { %3465 = vst [vmem:[%s4937_s23 + $0x188] sm:$0xff] %v3209_v63  ;;  %v2451_v7 = vadd.f32 %v2450_v4, %v4929_v2  ;;  %v1484_v8 = vpop.f32.mrf.mxu0  ;;  %v4476_v4 = vld [vmem:[%s4901_s30 + $0x318] sm:$0xff] }
 0x261   : > { %v3002_v9 = vmax.f32 %v1802_v3, 0.0  ;;  %v1485_v10 = vadd.f32 %v1484_v8, %v4927_v1  ;;  %v2133_v11 = vpop.f32.mrf.mxu1  ;;  %v4412_v3 = vld [vmem:[%s4901_s30 + $0x118] sm:$0xff] }
 0x262   : > { %v3003_v12 = vmax.f32 %v2451_v7, 0.0  ;;  %v2134_v13 = vadd.f32 %v2133_v11, %v4929_v2 }
 0x263   : > { %v2748_v14 = vmax.f32 %v1485_v10, 0.0  ;;  %1523 = vmatmul.bf16.gmra.mxu0 %v4410_v5  ;;  %1843 = vmatmul.bf16.gmra.mxu2 %v4474_v6 }
 0x264   : > { %v3337_v15 = vpack.c.bf16 %v3003_v12, %v3002_v9  ;;  %v2749_v16 = vmax.f32 %v2134_v13, 0.0  ;;  %2172 = vmatmul.bf16.gmra.mxu1 %v4410_v5  ;;  %2492 = vmatmul.bf16.gmra.mxu3 %v4474_v6 }
 0x266   : > { %3593 = vst [vmem:[%s4937_s23 + $0x588] sm:$0xff] %v3337_v15  ;;  %v3210_v17 = vpack.c.bf16 %v2749_v16, %v2748_v14  ;;  %v1804_v18 = vpop.f32.mrf.mxu2 }
 0x267   : > { %v1805_v19 = vadd.f32 %v1804_v18, %v4927_v1  ;;  %v2453_v20 = vpop.f32.mrf.mxu3 }
 0x268   : > { %3466 = vst [vmem:[%s4937_s23 + $0x190] sm:$0xff] %v3210_v17  ;;  %v2454_v21 = vadd.f32 %v2453_v20, %v4929_v2  ;;  %v1486_v22 = vpop.f32.mrf.mxu0 }
 0x269   : > { %v3004_v23 = vmax.f32 %v1805_v19, 0.0  ;;  %v1487_v24 = vadd.f32 %v1486_v22, %v4927_v1  ;;  %v2135_v25 = vpop.f32.mrf.mxu1 }
 0x26a   : > { %v3005_v26 = vmax.f32 %v2454_v21, 0.0  ;;  %v2136_v27 = vadd.f32 %v2135_v25, %v4929_v2 }
 0x26b   : > { %v2750_v28 = vmax.f32 %v1487_v24, 0.0 }
 0x26c   : > { %v3338_v29 = vpack.c.bf16 %v3005_v26, %v3004_v23  ;;  %v2751_v30 = vmax.f32 %v2136_v27, 0.0 }
 0x26e   : > { %3594 = vst [vmem:[%s4937_s23 + $0x590] sm:$0xff] %v3338_v29  ;;  %v3211_v31 = vpack.c.bf16 %v2751_v30, %v2750_v28  ;;  %v1806_v32 = vpop.f32.mrf.mxu2 }
 0x26f   : > { %v1807_v33 = vadd.f32 %v1806_v32, %v4927_v1  ;;  %v2455_v34 = vpop.f32.mrf.mxu3 }
 0x270   : > { %3467 = vst [vmem:[%s4937_s23 + $0x198] sm:$0xff] %v3211_v31  ;;  %v2456_v37 = vadd.f32 %v2455_v34, %v4929_v2  ;;  %v1489_v38 = vpop.f32.mrf.mxu0  ;;  %v4477_v34 = vld [vmem:[%s4901_s30 + $0x320] sm:$0xff] }
 0x271   : > { %v3006_v39 = vmax.f32 %v1807_v33, 0.0  ;;  %v1490_v40 = vadd.f32 %v1489_v38, %v4927_v1  ;;  %v2138_v41 = vpop.f32.mrf.mxu1  ;;  %v4413_v33 = vld [vmem:[%s4901_s30 + $0x120] sm:$0xff] }
 0x272   : > { %v3007_v42 = vmax.f32 %v2456_v37, 0.0  ;;  %v2139_v43 = vadd.f32 %v2138_v41, %v4929_v2 }
 0x273   : > { %v2752_v44 = vmax.f32 %v1490_v40, 0.0  ;;  %1528 = vmatmul.bf16.gmra.mxu0 %v4411_v35  ;;  %1848 = vmatmul.bf16.gmra.mxu2 %v4475_v36 }
 0x274   : > { %v3339_v45 = vpack.c.bf16 %v3007_v42, %v3006_v39  ;;  %v2753_v46 = vmax.f32 %v2139_v43, 0.0  ;;  %2177 = vmatmul.bf16.gmra.mxu1 %v4411_v35  ;;  %2497 = vmatmul.bf16.gmra.mxu3 %v4475_v36 }
 0x276   : > { %3595 = vst [vmem:[%s4937_s23 + $0x598] sm:$0xff] %v3339_v45  ;;  %v3212_v47 = vpack.c.bf16 %v2753_v46, %v2752_v44  ;;  %v1809_v48 = vpop.f32.mrf.mxu2 }
 0x277   : > { %v1810_v49 = vadd.f32 %v1809_v48, %v4927_v1  ;;  %v2458_v50 = vpop.f32.mrf.mxu3 }
 0x278   : > { %3468 = vst [vmem:[%s4937_s23 + $0x1a0] sm:$0xff] %v3212_v47  ;;  %v2459_v51 = vadd.f32 %v2458_v50, %v4929_v2  ;;  %v1491_v52 = vpop.f32.mrf.mxu0 }
 0x279   : > { %v3008_v53 = vmax.f32 %v1810_v49, 0.0  ;;  %v1492_v54 = vadd.f32 %v1491_v52, %v4927_v1  ;;  %v2140_v55 = vpop.f32.mrf.mxu1 }
 0x27a   : > { %v3009_v56 = vmax.f32 %v2459_v51, 0.0  ;;  %v2141_v57 = vadd.f32 %v2140_v55, %v4929_v2 }
 0x27b   : > { %v2754_v58 = vmax.f32 %v1492_v54, 0.0 }
 0x27c   : > { %v3340_v59 = vpack.c.bf16 %v3009_v56, %v3008_v53  ;;  %v2755_v60 = vmax.f32 %v2141_v57, 0.0 }
 0x27e   : > { %3596 = vst [vmem:[%s4937_s23 + $0x5a0] sm:$0xff] %v3340_v59  ;;  %v3213_v61 = vpack.c.bf16 %v2755_v60, %v2754_v58  ;;  %v1811_v62 = vpop.f32.mrf.mxu2 }
 0x27f   : > { %v1812_v63 = vadd.f32 %v1811_v62, %v4927_v1  ;;  %v2460_v0 = vpop.f32.mrf.mxu3 }
 0x280   : > { %3469 = vst [vmem:[%s4937_s23 + $0x1a8] sm:$0xff] %v3213_v61  ;;  %v2461_v5 = vadd.f32 %v2460_v0, %v4929_v2  ;;  %v1494_v6 = vpop.f32.mrf.mxu0  ;;  %v4478_v0 = vld [vmem:[%s4901_s30 + $0x328] sm:$0xff] }
 0x281   : > { %v3010_v7 = vmax.f32 %v1812_v63, 0.0  ;;  %v1495_v8 = vadd.f32 %v1494_v6, %v4927_v1  ;;  %v2143_v9 = vpop.f32.mrf.mxu1  ;;  %v4414_v63 = vld [vmem:[%s4901_s30 + $0x128] sm:$0xff] }
 0x282   : > { %v3011_v10 = vmax.f32 %v2461_v5, 0.0  ;;  %v2144_v11 = vadd.f32 %v2143_v9, %v4929_v2 }
 0x283   : > { %v2756_v12 = vmax.f32 %v1495_v8, 0.0  ;;  %1533 = vmatmul.bf16.gmra.mxu0 %v4412_v3  ;;  %1853 = vmatmul.bf16.gmra.mxu2 %v4476_v4 }
 0x284   : > { %v3341_v13 = vpack.c.bf16 %v3011_v10, %v3010_v7  ;;  %v2757_v14 = vmax.f32 %v2144_v11, 0.0  ;;  %2182 = vmatmul.bf16.gmra.mxu1 %v4412_v3  ;;  %2502 = vmatmul.bf16.gmra.mxu3 %v4476_v4 }
 0x286   : > { %3597 = vst [vmem:[%s4937_s23 + $0x5a8] sm:$0xff] %v3341_v13  ;;  %v3214_v15 = vpack.c.bf16 %v2757_v14, %v2756_v12  ;;  %v1814_v16 = vpop.f32.mrf.mxu2 }
 0x287   : > { %v1815_v17 = vadd.f32 %v1814_v16, %v4927_v1  ;;  %v2463_v18 = vpop.f32.mrf.mxu3 }
 0x288   : > { %3470 = vst [vmem:[%s4937_s23 + $0x1b0] sm:$0xff] %v3214_v15  ;;  %v2464_v19 = vadd.f32 %v2463_v18, %v4929_v2  ;;  %v1496_v20 = vpop.f32.mrf.mxu0 }
 0x289   : > { %v3012_v21 = vmax.f32 %v1815_v17, 0.0  ;;  %v1497_v22 = vadd.f32 %v1496_v20, %v4927_v1  ;;  %v2145_v23 = vpop.f32.mrf.mxu1 }
 0x28a   : > { %v3013_v24 = vmax.f32 %v2464_v19, 0.0  ;;  %v2146_v25 = vadd.f32 %v2145_v23, %v4929_v2 }
 0x28b   : > { %v2758_v26 = vmax.f32 %v1497_v22, 0.0 }
 0x28c   : > { %v3342_v27 = vpack.c.bf16 %v3013_v24, %v3012_v21  ;;  %v2759_v28 = vmax.f32 %v2146_v25, 0.0 }
 0x28e   : > { %3598 = vst [vmem:[%s4937_s23 + $0x5b0] sm:$0xff] %v3342_v27  ;;  %v3215_v29 = vpack.c.bf16 %v2759_v28, %v2758_v26  ;;  %v1816_v30 = vpop.f32.mrf.mxu2 }
 0x28f   : > { %v1817_v31 = vadd.f32 %v1816_v30, %v4927_v1  ;;  %v2465_v32 = vpop.f32.mrf.mxu3 }
 0x290   : > { %3471 = vst [vmem:[%s4937_s23 + $0x1b8] sm:$0xff] %v3215_v29  ;;  %v2466_v35 = vadd.f32 %v2465_v32, %v4929_v2  ;;  %v1499_v36 = vpop.f32.mrf.mxu0  ;;  %v4479_v32 = vld [vmem:[%s4901_s30 + $0x330] sm:$0xff] }
 0x291   : > { %v3014_v37 = vmax.f32 %v1817_v31, 0.0  ;;  %v1500_v38 = vadd.f32 %v1499_v36, %v4927_v1  ;;  %v2148_v39 = vpop.f32.mrf.mxu1  ;;  %v4415_v31 = vld [vmem:[%s4901_s30 + $0x130] sm:$0xff] }
 0x292   : > { %v3015_v40 = vmax.f32 %v2466_v35, 0.0  ;;  %v2149_v41 = vadd.f32 %v2148_v39, %v4929_v2 }
 0x293   : > { %v2760_v42 = vmax.f32 %v1500_v38, 0.0  ;;  %1538 = vmatmul.bf16.gmra.mxu0 %v4413_v33  ;;  %1858 = vmatmul.bf16.gmra.mxu2 %v4477_v34 }
 0x294   : > { %v3343_v43 = vpack.c.bf16 %v3015_v40, %v3014_v37  ;;  %v2761_v44 = vmax.f32 %v2149_v41, 0.0  ;;  %2187 = vmatmul.bf16.gmra.mxu1 %v4413_v33  ;;  %2507 = vmatmul.bf16.gmra.mxu3 %v4477_v34 }
 0x296   : > { %3599 = vst [vmem:[%s4937_s23 + $0x5b8] sm:$0xff] %v3343_v43  ;;  %v3216_v45 = vpack.c.bf16 %v2761_v44, %v2760_v42  ;;  %v1819_v46 = vpop.f32.mrf.mxu2 }
 0x297   : > { %v1820_v47 = vadd.f32 %v1819_v46, %v4927_v1  ;;  %v2468_v48 = vpop.f32.mrf.mxu3 }
 0x298   : > { %3472 = vst [vmem:[%s4937_s23 + $0x1c0] sm:$0xff] %v3216_v45  ;;  %v2469_v49 = vadd.f32 %v2468_v48, %v4929_v2  ;;  %v1501_v50 = vpop.f32.mrf.mxu0 }
 0x299   : > { %v3016_v51 = vmax.f32 %v1820_v47, 0.0  ;;  %v1502_v52 = vadd.f32 %v1501_v50, %v4927_v1  ;;  %v2150_v53 = vpop.f32.mrf.mxu1 }
 0x29a   : > { %v3017_v54 = vmax.f32 %v2469_v49, 0.0  ;;  %v2151_v55 = vadd.f32 %v2150_v53, %v4929_v2 }
 0x29b   : > { %v2762_v56 = vmax.f32 %v1502_v52, 0.0 }
 0x29c   : > { %v3344_v57 = vpack.c.bf16 %v3017_v54, %v3016_v51  ;;  %v2763_v58 = vmax.f32 %v2151_v55, 0.0 }
 0x29e   : > { %3600 = vst [vmem:[%s4937_s23 + $0x5c0] sm:$0xff] %v3344_v57  ;;  %v3217_v59 = vpack.c.bf16 %v2763_v58, %v2762_v56  ;;  %v1821_v60 = vpop.f32.mrf.mxu2 }
 0x29f   : > { %v1822_v61 = vadd.f32 %v1821_v60, %v4927_v1  ;;  %v2470_v62 = vpop.f32.mrf.mxu3 }
 0x2a0   : > { %3473 = vst [vmem:[%s4937_s23 + $0x1c8] sm:$0xff] %v3217_v59  ;;  %v2471_v3 = vadd.f32 %v2470_v62, %v4929_v2  ;;  %v1504_v4 = vpop.f32.mrf.mxu0  ;;  %v4480_v62 = vld [vmem:[%s4901_s30 + $0x338] sm:$0xff] }
 0x2a1   : > { %v3018_v5 = vmax.f32 %v1822_v61, 0.0  ;;  %v1505_v6 = vadd.f32 %v1504_v4, %v4927_v1  ;;  %v2153_v7 = vpop.f32.mrf.mxu1  ;;  %v4416_v61 = vld [vmem:[%s4901_s30 + $0x138] sm:$0xff] }
 0x2a2   : > { %v3019_v8 = vmax.f32 %v2471_v3, 0.0  ;;  %v2154_v9 = vadd.f32 %v2153_v7, %v4929_v2 }
 0x2a3   : > { %v2764_v10 = vmax.f32 %v1505_v6, 0.0  ;;  %1543 = vmatmul.bf16.gmra.mxu0 %v4414_v63  ;;  %1863 = vmatmul.bf16.gmra.mxu2 %v4478_v0 }
 0x2a4   : > { %v3345_v11 = vpack.c.bf16 %v3019_v8, %v3018_v5  ;;  %v2765_v12 = vmax.f32 %v2154_v9, 0.0  ;;  %2192 = vmatmul.bf16.gmra.mxu1 %v4414_v63  ;;  %2512 = vmatmul.bf16.gmra.mxu3 %v4478_v0 }
 0x2a6   : > { %3601 = vst [vmem:[%s4937_s23 + $0x5c8] sm:$0xff] %v3345_v11  ;;  %v3218_v13 = vpack.c.bf16 %v2765_v12, %v2764_v10  ;;  %v1824_v14 = vpop.f32.mrf.mxu2 }
 0x2a7   : > { %v1825_v15 = vadd.f32 %v1824_v14, %v4927_v1  ;;  %v2473_v16 = vpop.f32.mrf.mxu3 }
 0x2a8   : > { %3474 = vst [vmem:[%s4937_s23 + $0x1d0] sm:$0xff] %v3218_v13  ;;  %v2474_v17 = vadd.f32 %v2473_v16, %v4929_v2  ;;  %v1506_v18 = vpop.f32.mrf.mxu0 }
 0x2a9   : > { %v3020_v19 = vmax.f32 %v1825_v15, 0.0  ;;  %v1507_v20 = vadd.f32 %v1506_v18, %v4927_v1  ;;  %v2155_v21 = vpop.f32.mrf.mxu1 }
 0x2aa   : > { %v3021_v22 = vmax.f32 %v2474_v17, 0.0  ;;  %v2156_v23 = vadd.f32 %v2155_v21, %v4929_v2 }
 0x2ab   : > { %v2766_v24 = vmax.f32 %v1507_v20, 0.0 }
 0x2ac   : > { %v3346_v25 = vpack.c.bf16 %v3021_v22, %v3020_v19  ;;  %v2767_v26 = vmax.f32 %v2156_v23, 0.0 }
 0x2ae   : > { %3602 = vst [vmem:[%s4937_s23 + $0x5d0] sm:$0xff] %v3346_v25  ;;  %v3219_v27 = vpack.c.bf16 %v2767_v26, %v2766_v24  ;;  %v1826_v28 = vpop.f32.mrf.mxu2 }
 0x2af   : > { %v1827_v29 = vadd.f32 %v1826_v28, %v4927_v1  ;;  %v2475_v30 = vpop.f32.mrf.mxu3 }
 0x2b0   : > { %3475 = vst [vmem:[%s4937_s23 + $0x1d8] sm:$0xff] %v3219_v27  ;;  %v2476_v33 = vadd.f32 %v2475_v30, %v4929_v2  ;;  %v1509_v34 = vpop.f32.mrf.mxu0  ;;  %v4481_v30 = vld [vmem:[%s4901_s30 + $0x340] sm:$0xff] }
 0x2b1   : > { %v3022_v35 = vmax.f32 %v1827_v29, 0.0  ;;  %v1510_v36 = vadd.f32 %v1509_v34, %v4927_v1  ;;  %v2158_v37 = vpop.f32.mrf.mxu1  ;;  %v4417_v29 = vld [vmem:[%s4901_s30 + $0x140] sm:$0xff] }
 0x2b2   : > { %v3023_v38 = vmax.f32 %v2476_v33, 0.0  ;;  %v2159_v39 = vadd.f32 %v2158_v37, %v4929_v2 }
 0x2b3   : > { %v2768_v40 = vmax.f32 %v1510_v36, 0.0  ;;  %1548 = vmatmul.bf16.gmra.mxu0 %v4415_v31  ;;  %1868 = vmatmul.bf16.gmra.mxu2 %v4479_v32 }
 0x2b4   : > { %v3347_v41 = vpack.c.bf16 %v3023_v38, %v3022_v35  ;;  %v2769_v42 = vmax.f32 %v2159_v39, 0.0  ;;  %2197 = vmatmul.bf16.gmra.mxu1 %v4415_v31  ;;  %2517 = vmatmul.bf16.gmra.mxu3 %v4479_v32 }
 0x2b6   : > { %3603 = vst [vmem:[%s4937_s23 + $0x5d8] sm:$0xff] %v3347_v41  ;;  %v3220_v43 = vpack.c.bf16 %v2769_v42, %v2768_v40  ;;  %v1829_v44 = vpop.f32.mrf.mxu2 }
 0x2b7   : > { %v1830_v45 = vadd.f32 %v1829_v44, %v4927_v1  ;;  %v2478_v46 = vpop.f32.mrf.mxu3 }
 0x2b8   : > { %3476 = vst [vmem:[%s4937_s23 + $0x1e0] sm:$0xff] %v3220_v43  ;;  %v2479_v47 = vadd.f32 %v2478_v46, %v4929_v2  ;;  %v1511_v48 = vpop.f32.mrf.mxu0 }
 0x2b9   : > { %v3024_v49 = vmax.f32 %v1830_v45, 0.0  ;;  %v1512_v50 = vadd.f32 %v1511_v48, %v4927_v1  ;;  %v2160_v51 = vpop.f32.mrf.mxu1 }
 0x2ba   : > { %v3025_v52 = vmax.f32 %v2479_v47, 0.0  ;;  %v2161_v53 = vadd.f32 %v2160_v51, %v4929_v2 }
 0x2bb   : > { %v2770_v54 = vmax.f32 %v1512_v50, 0.0 }
 0x2bc   : > { %v3348_v55 = vpack.c.bf16 %v3025_v52, %v3024_v49  ;;  %v2771_v56 = vmax.f32 %v2161_v53, 0.0 }
 0x2be   : > { %3604 = vst [vmem:[%s4937_s23 + $0x5e0] sm:$0xff] %v3348_v55  ;;  %v3221_v57 = vpack.c.bf16 %v2771_v56, %v2770_v54  ;;  %v1831_v58 = vpop.f32.mrf.mxu2 }
 0x2bf   : > { %v1832_v59 = vadd.f32 %v1831_v58, %v4927_v1  ;;  %v2480_v60 = vpop.f32.mrf.mxu3 }
 0x2c0   : > { %3477 = vst [vmem:[%s4937_s23 + $0x1e8] sm:$0xff] %v3221_v57  ;;  %v2481_v63 = vadd.f32 %v2480_v60, %v4929_v2  ;;  %v1514_v0 = vpop.f32.mrf.mxu0  ;;  %v4482_v60 = vld [vmem:[%s4901_s30 + $0x348] sm:$0xff] }
 0x2c1   : > { %v3026_v3 = vmax.f32 %v1832_v59, 0.0  ;;  %v1515_v4 = vadd.f32 %v1514_v0, %v4927_v1  ;;  %v2163_v5 = vpop.f32.mrf.mxu1  ;;  %v4418_v59 = vld [vmem:[%s4901_s30 + $0x148] sm:$0xff] }
 0x2c2   : > { %v3027_v6 = vmax.f32 %v2481_v63, 0.0  ;;  %v2164_v7 = vadd.f32 %v2163_v5, %v4929_v2 }
 0x2c3   : > { %v2772_v8 = vmax.f32 %v1515_v4, 0.0  ;;  %1553 = vmatmul.bf16.gmra.mxu0 %v4416_v61  ;;  %1873 = vmatmul.bf16.gmra.mxu2 %v4480_v62 }
 0x2c4   : > { %v3349_v9 = vpack.c.bf16 %v3027_v6, %v3026_v3  ;;  %v2773_v10 = vmax.f32 %v2164_v7, 0.0  ;;  %2202 = vmatmul.bf16.gmra.mxu1 %v4416_v61  ;;  %2522 = vmatmul.bf16.gmra.mxu3 %v4480_v62 }
 0x2c6   : > { %3605 = vst [vmem:[%s4937_s23 + $0x5e8] sm:$0xff] %v3349_v9  ;;  %v3222_v11 = vpack.c.bf16 %v2773_v10, %v2772_v8  ;;  %v1834_v12 = vpop.f32.mrf.mxu2 }
 0x2c7   : > { %v1835_v13 = vadd.f32 %v1834_v12, %v4927_v1  ;;  %v2483_v14 = vpop.f32.mrf.mxu3 }
 0x2c8   : > { %3478 = vst [vmem:[%s4937_s23 + $0x1f0] sm:$0xff] %v3222_v11  ;;  %v2484_v15 = vadd.f32 %v2483_v14, %v4929_v2  ;;  %v1516_v16 = vpop.f32.mrf.mxu0 }
 0x2c9   : > { %v3028_v17 = vmax.f32 %v1835_v13, 0.0  ;;  %v1517_v18 = vadd.f32 %v1516_v16, %v4927_v1  ;;  %v2165_v19 = vpop.f32.mrf.mxu1 }
 0x2ca   : > { %v3029_v20 = vmax.f32 %v2484_v15, 0.0  ;;  %v2166_v21 = vadd.f32 %v2165_v19, %v4929_v2 }
 0x2cb   : > { %v2774_v22 = vmax.f32 %v1517_v18, 0.0 }
 0x2cc   : > { %v3350_v23 = vpack.c.bf16 %v3029_v20, %v3028_v17  ;;  %v2775_v24 = vmax.f32 %v2166_v21, 0.0 }
 0x2ce   : > { %3606 = vst [vmem:[%s4937_s23 + $0x5f0] sm:$0xff] %v3350_v23  ;;  %v3223_v25 = vpack.c.bf16 %v2775_v24, %v2774_v22  ;;  %v1836_v26 = vpop.f32.mrf.mxu2 }
 0x2cf   : > { %v1837_v27 = vadd.f32 %v1836_v26, %v4927_v1  ;;  %v2485_v28 = vpop.f32.mrf.mxu3 }
 0x2d0   : > { %3479 = vst [vmem:[%s4937_s23 + $0x1f8] sm:$0xff] %v3223_v25  ;;  %v2486_v31 = vadd.f32 %v2485_v28, %v4929_v2  ;;  %v1519_v32 = vpop.f32.mrf.mxu0  ;;  %v4483_v28 = vld [vmem:[%s4901_s30 + $0x350] sm:$0xff] }
 0x2d1   : > { %v3030_v33 = vmax.f32 %v1837_v27, 0.0  ;;  %v1520_v34 = vadd.f32 %v1519_v32, %v4927_v1  ;;  %v2168_v35 = vpop.f32.mrf.mxu1  ;;  %v4419_v27 = vld [vmem:[%s4901_s30 + $0x150] sm:$0xff] }
 0x2d2   : > { %v3031_v36 = vmax.f32 %v2486_v31, 0.0  ;;  %v2169_v37 = vadd.f32 %v2168_v35, %v4929_v2 }
 0x2d3   : > { %v2776_v38 = vmax.f32 %v1520_v34, 0.0  ;;  %1558 = vmatmul.bf16.gmra.mxu0 %v4417_v29  ;;  %1878 = vmatmul.bf16.gmra.mxu2 %v4481_v30 }
 0x2d4   : > { %v3351_v39 = vpack.c.bf16 %v3031_v36, %v3030_v33  ;;  %v2777_v40 = vmax.f32 %v2169_v37, 0.0  ;;  %2207 = vmatmul.bf16.gmra.mxu1 %v4417_v29  ;;  %2527 = vmatmul.bf16.gmra.mxu3 %v4481_v30 }
 0x2d6   : > { %3607 = vst [vmem:[%s4937_s23 + $0x5f8] sm:$0xff] %v3351_v39  ;;  %v3224_v41 = vpack.c.bf16 %v2777_v40, %v2776_v38  ;;  %v1839_v42 = vpop.f32.mrf.mxu2 }
 0x2d7   : > { %v1840_v43 = vadd.f32 %v1839_v42, %v4927_v1  ;;  %v2488_v44 = vpop.f32.mrf.mxu3 }
 0x2d8   : > { %3480 = vst [vmem:[%s4937_s23 + $0x200] sm:$0xff] %v3224_v41  ;;  %v2489_v45 = vadd.f32 %v2488_v44, %v4929_v2  ;;  %v1521_v46 = vpop.f32.mrf.mxu0 }
 0x2d9   : > { %v3032_v47 = vmax.f32 %v1840_v43, 0.0  ;;  %v1522_v48 = vadd.f32 %v1521_v46, %v4927_v1  ;;  %v2170_v49 = vpop.f32.mrf.mxu1 }
 0x2da   : > { %v3033_v50 = vmax.f32 %v2489_v45, 0.0  ;;  %v2171_v51 = vadd.f32 %v2170_v49, %v4929_v2 }
 0x2db   : > { %v2778_v52 = vmax.f32 %v1522_v48, 0.0 }
 0x2dc   : > { %v3352_v53 = vpack.c.bf16 %v3033_v50, %v3032_v47  ;;  %v2779_v54 = vmax.f32 %v2171_v51, 0.0 }
 0x2de   : > { %3608 = vst [vmem:[%s4937_s23 + $0x600] sm:$0xff] %v3352_v53  ;;  %v3225_v55 = vpack.c.bf16 %v2779_v54, %v2778_v52  ;;  %v1841_v56 = vpop.f32.mrf.mxu2 }
 0x2df   : > { %v1842_v57 = vadd.f32 %v1841_v56, %v4927_v1  ;;  %v2490_v58 = vpop.f32.mrf.mxu3 }
 0x2e0   : > { %3481 = vst [vmem:[%s4937_s23 + $0x208] sm:$0xff] %v3225_v55  ;;  %v2491_v61 = vadd.f32 %v2490_v58, %v4929_v2  ;;  %v1524_v62 = vpop.f32.mrf.mxu0  ;;  %v4484_v58 = vld [vmem:[%s4901_s30 + $0x358] sm:$0xff] }
 0x2e1   : > { %v3034_v63 = vmax.f32 %v1842_v57, 0.0  ;;  %v1525_v0 = vadd.f32 %v1524_v62, %v4927_v1  ;;  %v2173_v3 = vpop.f32.mrf.mxu1  ;;  %v4420_v57 = vld [vmem:[%s4901_s30 + $0x158] sm:$0xff] }
 0x2e2   : > { %v3035_v4 = vmax.f32 %v2491_v61, 0.0  ;;  %v2174_v5 = vadd.f32 %v2173_v3, %v4929_v2 }
 0x2e3   : > { %v2780_v6 = vmax.f32 %v1525_v0, 0.0  ;;  %1563 = vmatmul.bf16.gmra.mxu0 %v4418_v59  ;;  %1883 = vmatmul.bf16.gmra.mxu2 %v4482_v60 }
 0x2e4   : > { %v3353_v7 = vpack.c.bf16 %v3035_v4, %v3034_v63  ;;  %v2781_v8 = vmax.f32 %v2174_v5, 0.0  ;;  %2212 = vmatmul.bf16.gmra.mxu1 %v4418_v59  ;;  %2532 = vmatmul.bf16.gmra.mxu3 %v4482_v60 }
 0x2e6   : > { %3609 = vst [vmem:[%s4937_s23 + $0x608] sm:$0xff] %v3353_v7  ;;  %v3226_v9 = vpack.c.bf16 %v2781_v8, %v2780_v6  ;;  %v1844_v10 = vpop.f32.mrf.mxu2 }
 0x2e7   : > { %v1845_v11 = vadd.f32 %v1844_v10, %v4927_v1  ;;  %v2493_v12 = vpop.f32.mrf.mxu3 }
 0x2e8   : > { %3482 = vst [vmem:[%s4937_s23 + $0x210] sm:$0xff] %v3226_v9  ;;  %v2494_v13 = vadd.f32 %v2493_v12, %v4929_v2  ;;  %v1526_v14 = vpop.f32.mrf.mxu0 }
 0x2e9   : > { %v3036_v15 = vmax.f32 %v1845_v11, 0.0  ;;  %v1527_v16 = vadd.f32 %v1526_v14, %v4927_v1  ;;  %v2175_v17 = vpop.f32.mrf.mxu1 }
 0x2ea   : > { %v3037_v18 = vmax.f32 %v2494_v13, 0.0  ;;  %v2176_v19 = vadd.f32 %v2175_v17, %v4929_v2 }
 0x2eb   : > { %v2782_v20 = vmax.f32 %v1527_v16, 0.0 }
 0x2ec   : > { %v3354_v21 = vpack.c.bf16 %v3037_v18, %v3036_v15  ;;  %v2783_v22 = vmax.f32 %v2176_v19, 0.0 }
 0x2ee   : > { %3610 = vst [vmem:[%s4937_s23 + $0x610] sm:$0xff] %v3354_v21  ;;  %v3227_v23 = vpack.c.bf16 %v2783_v22, %v2782_v20  ;;  %v1846_v24 = vpop.f32.mrf.mxu2 }
 0x2ef   : > { %v1847_v25 = vadd.f32 %v1846_v24, %v4927_v1  ;;  %v2495_v26 = vpop.f32.mrf.mxu3 }
 0x2f0   : > { %3483 = vst [vmem:[%s4937_s23 + $0x218] sm:$0xff] %v3227_v23  ;;  %v2496_v29 = vadd.f32 %v2495_v26, %v4929_v2  ;;  %v1529_v30 = vpop.f32.mrf.mxu0  ;;  %v4485_v26 = vld [vmem:[%s4901_s30 + $0x360] sm:$0xff] }
 0x2f1   : > { %v3038_v31 = vmax.f32 %v1847_v25, 0.0  ;;  %v1530_v32 = vadd.f32 %v1529_v30, %v4927_v1  ;;  %v2178_v33 = vpop.f32.mrf.mxu1  ;;  %v4421_v25 = vld [vmem:[%s4901_s30 + $0x160] sm:$0xff] }
 0x2f2   : > { %v3039_v34 = vmax.f32 %v2496_v29, 0.0  ;;  %v2179_v35 = vadd.f32 %v2178_v33, %v4929_v2 }
 0x2f3   : > { %v2784_v36 = vmax.f32 %v1530_v32, 0.0  ;;  %1568 = vmatmul.bf16.gmra.mxu0 %v4419_v27  ;;  %1888 = vmatmul.bf16.gmra.mxu2 %v4483_v28 }
 0x2f4   : > { %v3355_v37 = vpack.c.bf16 %v3039_v34, %v3038_v31  ;;  %v2785_v38 = vmax.f32 %v2179_v35, 0.0  ;;  %2217 = vmatmul.bf16.gmra.mxu1 %v4419_v27  ;;  %2537 = vmatmul.bf16.gmra.mxu3 %v4483_v28 }
 0x2f6   : > { %3611 = vst [vmem:[%s4937_s23 + $0x618] sm:$0xff] %v3355_v37  ;;  %v3228_v39 = vpack.c.bf16 %v2785_v38, %v2784_v36  ;;  %v1849_v40 = vpop.f32.mrf.mxu2 }
 0x2f7   : > { %v1850_v41 = vadd.f32 %v1849_v40, %v4927_v1  ;;  %v2498_v42 = vpop.f32.mrf.mxu3 }
 0x2f8   : > { %3484 = vst [vmem:[%s4937_s23 + $0x220] sm:$0xff] %v3228_v39  ;;  %v2499_v43 = vadd.f32 %v2498_v42, %v4929_v2  ;;  %v1531_v44 = vpop.f32.mrf.mxu0 }
 0x2f9   : > { %v3040_v45 = vmax.f32 %v1850_v41, 0.0  ;;  %v1532_v46 = vadd.f32 %v1531_v44, %v4927_v1  ;;  %v2180_v47 = vpop.f32.mrf.mxu1 }
 0x2fa   : > { %v3041_v48 = vmax.f32 %v2499_v43, 0.0  ;;  %v2181_v49 = vadd.f32 %v2180_v47, %v4929_v2 }
 0x2fb   : > { %v2786_v50 = vmax.f32 %v1532_v46, 0.0 }
 0x2fc   : > { %v3356_v51 = vpack.c.bf16 %v3041_v48, %v3040_v45  ;;  %v2787_v52 = vmax.f32 %v2181_v49, 0.0 }
 0x2fe   : > { %3612 = vst [vmem:[%s4937_s23 + $0x620] sm:$0xff] %v3356_v51  ;;  %v3229_v53 = vpack.c.bf16 %v2787_v52, %v2786_v50  ;;  %v1851_v54 = vpop.f32.mrf.mxu2 }
 0x2ff   : > { %v1852_v55 = vadd.f32 %v1851_v54, %v4927_v1  ;;  %v2500_v56 = vpop.f32.mrf.mxu3 }
 0x300   : > { %3485 = vst [vmem:[%s4937_s23 + $0x228] sm:$0xff] %v3229_v53  ;;  %v2501_v59 = vadd.f32 %v2500_v56, %v4929_v2  ;;  %v1534_v60 = vpop.f32.mrf.mxu0  ;;  %v4486_v56 = vld [vmem:[%s4901_s30 + $0x368] sm:$0xff] }
 0x301   : > { %v3042_v61 = vmax.f32 %v1852_v55, 0.0  ;;  %v1535_v62 = vadd.f32 %v1534_v60, %v4927_v1  ;;  %v2183_v63 = vpop.f32.mrf.mxu1  ;;  %v4422_v55 = vld [vmem:[%s4901_s30 + $0x168] sm:$0xff] }
 0x302   : > { %v3043_v0 = vmax.f32 %v2501_v59, 0.0  ;;  %v2184_v3 = vadd.f32 %v2183_v63, %v4929_v2 }
 0x303   : > { %v2788_v4 = vmax.f32 %v1535_v62, 0.0  ;;  %1573 = vmatmul.bf16.gmra.mxu0 %v4420_v57  ;;  %1893 = vmatmul.bf16.gmra.mxu2 %v4484_v58 }
 0x304   : > { %v3357_v5 = vpack.c.bf16 %v3043_v0, %v3042_v61  ;;  %v2789_v6 = vmax.f32 %v2184_v3, 0.0  ;;  %2222 = vmatmul.bf16.gmra.mxu1 %v4420_v57  ;;  %2542 = vmatmul.bf16.gmra.mxu3 %v4484_v58 }
 0x306   : > { %3613 = vst [vmem:[%s4937_s23 + $0x628] sm:$0xff] %v3357_v5  ;;  %v3230_v7 = vpack.c.bf16 %v2789_v6, %v2788_v4  ;;  %v1854_v8 = vpop.f32.mrf.mxu2 }
 0x307   : > { %v1855_v9 = vadd.f32 %v1854_v8, %v4927_v1  ;;  %v2503_v10 = vpop.f32.mrf.mxu3 }
 0x308   : > { %3486 = vst [vmem:[%s4937_s23 + $0x230] sm:$0xff] %v3230_v7  ;;  %v2504_v11 = vadd.f32 %v2503_v10, %v4929_v2  ;;  %v1536_v12 = vpop.f32.mrf.mxu0 }
 0x309   : > { %v3044_v13 = vmax.f32 %v1855_v9, 0.0  ;;  %v1537_v14 = vadd.f32 %v1536_v12, %v4927_v1  ;;  %v2185_v15 = vpop.f32.mrf.mxu1 }
 0x30a   : > { %v3045_v16 = vmax.f32 %v2504_v11, 0.0  ;;  %v2186_v17 = vadd.f32 %v2185_v15, %v4929_v2 }
 0x30b   : > { %v2790_v18 = vmax.f32 %v1537_v14, 0.0 }
 0x30c   : > { %v3358_v19 = vpack.c.bf16 %v3045_v16, %v3044_v13  ;;  %v2791_v20 = vmax.f32 %v2186_v17, 0.0 }
 0x30e   : > { %3614 = vst [vmem:[%s4937_s23 + $0x630] sm:$0xff] %v3358_v19  ;;  %v3231_v21 = vpack.c.bf16 %v2791_v20, %v2790_v18  ;;  %v1856_v22 = vpop.f32.mrf.mxu2 }
 0x30f   : > { %v1857_v23 = vadd.f32 %v1856_v22, %v4927_v1  ;;  %v2505_v24 = vpop.f32.mrf.mxu3 }
 0x310   : > { %3487 = vst [vmem:[%s4937_s23 + $0x238] sm:$0xff] %v3231_v21  ;;  %v2506_v27 = vadd.f32 %v2505_v24, %v4929_v2  ;;  %v1539_v28 = vpop.f32.mrf.mxu0  ;;  %v4487_v24 = vld [vmem:[%s4901_s30 + $0x370] sm:$0xff] }
 0x311   : > { %v3046_v29 = vmax.f32 %v1857_v23, 0.0  ;;  %v1540_v30 = vadd.f32 %v1539_v28, %v4927_v1  ;;  %v2188_v31 = vpop.f32.mrf.mxu1  ;;  %v4423_v23 = vld [vmem:[%s4901_s30 + $0x170] sm:$0xff] }
 0x312   : > { %v3047_v32 = vmax.f32 %v2506_v27, 0.0  ;;  %v2189_v33 = vadd.f32 %v2188_v31, %v4929_v2 }
 0x313   : > { %v2792_v34 = vmax.f32 %v1540_v30, 0.0  ;;  %1578 = vmatmul.bf16.gmra.mxu0 %v4421_v25  ;;  %1898 = vmatmul.bf16.gmra.mxu2 %v4485_v26 }
 0x314   : > { %v3359_v35 = vpack.c.bf16 %v3047_v32, %v3046_v29  ;;  %v2793_v36 = vmax.f32 %v2189_v33, 0.0  ;;  %2227 = vmatmul.bf16.gmra.mxu1 %v4421_v25  ;;  %2547 = vmatmul.bf16.gmra.mxu3 %v4485_v26 }
 0x316   : > { %3615 = vst [vmem:[%s4937_s23 + $0x638] sm:$0xff] %v3359_v35  ;;  %v3232_v37 = vpack.c.bf16 %v2793_v36, %v2792_v34  ;;  %v1859_v38 = vpop.f32.mrf.mxu2 }
 0x317   : > { %v1860_v39 = vadd.f32 %v1859_v38, %v4927_v1  ;;  %v2508_v40 = vpop.f32.mrf.mxu3 }
 0x318   : > { %3488 = vst [vmem:[%s4937_s23 + $0x240] sm:$0xff] %v3232_v37  ;;  %v2509_v41 = vadd.f32 %v2508_v40, %v4929_v2  ;;  %v1541_v42 = vpop.f32.mrf.mxu0 }
 0x319   : > { %v3048_v43 = vmax.f32 %v1860_v39, 0.0  ;;  %v1542_v44 = vadd.f32 %v1541_v42, %v4927_v1  ;;  %v2190_v45 = vpop.f32.mrf.mxu1 }
 0x31a   : > { %v3049_v46 = vmax.f32 %v2509_v41, 0.0  ;;  %v2191_v47 = vadd.f32 %v2190_v45, %v4929_v2 }
 0x31b   : > { %v2794_v48 = vmax.f32 %v1542_v44, 0.0 }
 0x31c   : > { %v3360_v49 = vpack.c.bf16 %v3049_v46, %v3048_v43  ;;  %v2795_v50 = vmax.f32 %v2191_v47, 0.0 }
 0x31e   : > { %3616 = vst [vmem:[%s4937_s23 + $0x640] sm:$0xff] %v3360_v49  ;;  %v3233_v51 = vpack.c.bf16 %v2795_v50, %v2794_v48  ;;  %v1861_v52 = vpop.f32.mrf.mxu2 }
 0x31f   : > { %v1862_v53 = vadd.f32 %v1861_v52, %v4927_v1  ;;  %v2510_v54 = vpop.f32.mrf.mxu3 }
 0x320   : > { %3489 = vst [vmem:[%s4937_s23 + $0x248] sm:$0xff] %v3233_v51  ;;  %v2511_v57 = vadd.f32 %v2510_v54, %v4929_v2  ;;  %v1544_v58 = vpop.f32.mrf.mxu0  ;;  %v4488_v54 = vld [vmem:[%s4901_s30 + $0x378] sm:$0xff] }
 0x321   : > { %v3050_v59 = vmax.f32 %v1862_v53, 0.0  ;;  %v1545_v60 = vadd.f32 %v1544_v58, %v4927_v1  ;;  %v2193_v61 = vpop.f32.mrf.mxu1  ;;  %v4424_v53 = vld [vmem:[%s4901_s30 + $0x178] sm:$0xff] }
 0x322   : > { %v3051_v62 = vmax.f32 %v2511_v57, 0.0  ;;  %v2194_v63 = vadd.f32 %v2193_v61, %v4929_v2 }
 0x323   : > { %v2796_v0 = vmax.f32 %v1545_v60, 0.0  ;;  %1583 = vmatmul.bf16.gmra.mxu0 %v4422_v55  ;;  %1903 = vmatmul.bf16.gmra.mxu2 %v4486_v56 }
 0x324   : > { %v3361_v3 = vpack.c.bf16 %v3051_v62, %v3050_v59  ;;  %v2797_v4 = vmax.f32 %v2194_v63, 0.0  ;;  %2232 = vmatmul.bf16.gmra.mxu1 %v4422_v55  ;;  %2552 = vmatmul.bf16.gmra.mxu3 %v4486_v56 }
 0x326   : > { %3617 = vst [vmem:[%s4937_s23 + $0x648] sm:$0xff] %v3361_v3  ;;  %v3234_v5 = vpack.c.bf16 %v2797_v4, %v2796_v0  ;;  %v1864_v6 = vpop.f32.mrf.mxu2 }
 0x327   : > { %v1865_v7 = vadd.f32 %v1864_v6, %v4927_v1  ;;  %v2513_v8 = vpop.f32.mrf.mxu3 }
 0x328   : > { %3490 = vst [vmem:[%s4937_s23 + $0x250] sm:$0xff] %v3234_v5  ;;  %v2514_v9 = vadd.f32 %v2513_v8, %v4929_v2  ;;  %v1546_v10 = vpop.f32.mrf.mxu0 }
 0x329   : > { %v3052_v11 = vmax.f32 %v1865_v7, 0.0  ;;  %v1547_v12 = vadd.f32 %v1546_v10, %v4927_v1  ;;  %v2195_v13 = vpop.f32.mrf.mxu1 }
 0x32a   : > { %v3053_v14 = vmax.f32 %v2514_v9, 0.0  ;;  %v2196_v15 = vadd.f32 %v2195_v13, %v4929_v2 }
 0x32b   : > { %v2798_v16 = vmax.f32 %v1547_v12, 0.0 }
 0x32c   : > { %v3362_v17 = vpack.c.bf16 %v3053_v14, %v3052_v11  ;;  %v2799_v18 = vmax.f32 %v2196_v15, 0.0 }
 0x32e   : > { %3618 = vst [vmem:[%s4937_s23 + $0x650] sm:$0xff] %v3362_v17  ;;  %v3235_v19 = vpack.c.bf16 %v2799_v18, %v2798_v16  ;;  %v1866_v20 = vpop.f32.mrf.mxu2 }
 0x32f   : > { %v1867_v21 = vadd.f32 %v1866_v20, %v4927_v1  ;;  %v2515_v22 = vpop.f32.mrf.mxu3 }
 0x330   : > { %3491 = vst [vmem:[%s4937_s23 + $0x258] sm:$0xff] %v3235_v19  ;;  %v2516_v25 = vadd.f32 %v2515_v22, %v4929_v2  ;;  %v1549_v26 = vpop.f32.mrf.mxu0  ;;  %v4489_v22 = vld [vmem:[%s4901_s30 + $0x380] sm:$0xff] }
 0x331   : > { %v3054_v27 = vmax.f32 %v1867_v21, 0.0  ;;  %v1550_v28 = vadd.f32 %v1549_v26, %v4927_v1  ;;  %v2198_v29 = vpop.f32.mrf.mxu1  ;;  %v4425_v21 = vld [vmem:[%s4901_s30 + $0x180] sm:$0xff] }
 0x332   : > { %v3055_v30 = vmax.f32 %v2516_v25, 0.0  ;;  %v2199_v31 = vadd.f32 %v2198_v29, %v4929_v2 }
 0x333   : > { %v2800_v32 = vmax.f32 %v1550_v28, 0.0  ;;  %1588 = vmatmul.bf16.gmra.mxu0 %v4423_v23  ;;  %1908 = vmatmul.bf16.gmra.mxu2 %v4487_v24 }
 0x334   : > { %v3363_v33 = vpack.c.bf16 %v3055_v30, %v3054_v27  ;;  %v2801_v34 = vmax.f32 %v2199_v31, 0.0  ;;  %2237 = vmatmul.bf16.gmra.mxu1 %v4423_v23  ;;  %2557 = vmatmul.bf16.gmra.mxu3 %v4487_v24 }
 0x336   : > { %3619 = vst [vmem:[%s4937_s23 + $0x658] sm:$0xff] %v3363_v33  ;;  %v3236_v35 = vpack.c.bf16 %v2801_v34, %v2800_v32  ;;  %v1869_v36 = vpop.f32.mrf.mxu2 }
 0x337   : > { %v1870_v37 = vadd.f32 %v1869_v36, %v4927_v1  ;;  %v2518_v38 = vpop.f32.mrf.mxu3 }
 0x338   : > { %3492 = vst [vmem:[%s4937_s23 + $0x260] sm:$0xff] %v3236_v35  ;;  %v2519_v39 = vadd.f32 %v2518_v38, %v4929_v2  ;;  %v1551_v40 = vpop.f32.mrf.mxu0 }
 0x339   : > { %v3056_v41 = vmax.f32 %v1870_v37, 0.0  ;;  %v1552_v42 = vadd.f32 %v1551_v40, %v4927_v1  ;;  %v2200_v43 = vpop.f32.mrf.mxu1 }
 0x33a   : > { %v3057_v44 = vmax.f32 %v2519_v39, 0.0  ;;  %v2201_v45 = vadd.f32 %v2200_v43, %v4929_v2 }
 0x33b   : > { %v2802_v46 = vmax.f32 %v1552_v42, 0.0 }
 0x33c   : > { %v3364_v47 = vpack.c.bf16 %v3057_v44, %v3056_v41  ;;  %v2803_v48 = vmax.f32 %v2201_v45, 0.0 }
 0x33e   : > { %3620 = vst [vmem:[%s4937_s23 + $0x660] sm:$0xff] %v3364_v47  ;;  %v3237_v49 = vpack.c.bf16 %v2803_v48, %v2802_v46  ;;  %v1871_v50 = vpop.f32.mrf.mxu2 }
 0x33f   : > { %v1872_v51 = vadd.f32 %v1871_v50, %v4927_v1  ;;  %v2520_v52 = vpop.f32.mrf.mxu3 }
 0x340   : > { %3493 = vst [vmem:[%s4937_s23 + $0x268] sm:$0xff] %v3237_v49  ;;  %v2521_v55 = vadd.f32 %v2520_v52, %v4929_v2  ;;  %v1554_v56 = vpop.f32.mrf.mxu0  ;;  %v4490_v52 = vld [vmem:[%s4901_s30 + $0x388] sm:$0xff] }
 0x341   : > { %v3058_v57 = vmax.f32 %v1872_v51, 0.0  ;;  %v1555_v58 = vadd.f32 %v1554_v56, %v4927_v1  ;;  %v2203_v59 = vpop.f32.mrf.mxu1  ;;  %v4426_v51 = vld [vmem:[%s4901_s30 + $0x188] sm:$0xff] }
 0x342   : > { %v3059_v60 = vmax.f32 %v2521_v55, 0.0  ;;  %v2204_v61 = vadd.f32 %v2203_v59, %v4929_v2 }
 0x343   : > { %v2804_v62 = vmax.f32 %v1555_v58, 0.0  ;;  %1593 = vmatmul.bf16.gmra.mxu0 %v4424_v53  ;;  %1913 = vmatmul.bf16.gmra.mxu2 %v4488_v54 }
 0x344   : > { %v3365_v63 = vpack.c.bf16 %v3059_v60, %v3058_v57  ;;  %v2805_v0 = vmax.f32 %v2204_v61, 0.0  ;;  %2242 = vmatmul.bf16.gmra.mxu1 %v4424_v53  ;;  %2562 = vmatmul.bf16.gmra.mxu3 %v4488_v54 }
 0x346   : > { %3621 = vst [vmem:[%s4937_s23 + $0x668] sm:$0xff] %v3365_v63  ;;  %v3238_v3 = vpack.c.bf16 %v2805_v0, %v2804_v62  ;;  %v1874_v4 = vpop.f32.mrf.mxu2 }
 0x347   : > { %v1875_v5 = vadd.f32 %v1874_v4, %v4927_v1  ;;  %v2523_v6 = vpop.f32.mrf.mxu3 }
 0x348   : > { %3494 = vst [vmem:[%s4937_s23 + $0x270] sm:$0xff] %v3238_v3  ;;  %v2524_v7 = vadd.f32 %v2523_v6, %v4929_v2  ;;  %v1556_v8 = vpop.f32.mrf.mxu0 }
 0x349   : > { %v3060_v9 = vmax.f32 %v1875_v5, 0.0  ;;  %v1557_v10 = vadd.f32 %v1556_v8, %v4927_v1  ;;  %v2205_v11 = vpop.f32.mrf.mxu1 }
 0x34a   : > { %v3061_v12 = vmax.f32 %v2524_v7, 0.0  ;;  %v2206_v13 = vadd.f32 %v2205_v11, %v4929_v2 }
 0x34b   : > { %v2806_v14 = vmax.f32 %v1557_v10, 0.0 }
 0x34c   : > { %v3366_v15 = vpack.c.bf16 %v3061_v12, %v3060_v9  ;;  %v2807_v16 = vmax.f32 %v2206_v13, 0.0 }
 0x34e   : > { %3622 = vst [vmem:[%s4937_s23 + $0x670] sm:$0xff] %v3366_v15  ;;  %v3239_v17 = vpack.c.bf16 %v2807_v16, %v2806_v14  ;;  %v1876_v18 = vpop.f32.mrf.mxu2 }
 0x34f   : > { %v1877_v19 = vadd.f32 %v1876_v18, %v4927_v1  ;;  %v2525_v20 = vpop.f32.mrf.mxu3 }
 0x350   : > { %3495 = vst [vmem:[%s4937_s23 + $0x278] sm:$0xff] %v3239_v17  ;;  %v2526_v23 = vadd.f32 %v2525_v20, %v4929_v2  ;;  %v1559_v24 = vpop.f32.mrf.mxu0  ;;  %v4491_v20 = vld [vmem:[%s4901_s30 + $0x390] sm:$0xff] }
 0x351   : > { %v3062_v25 = vmax.f32 %v1877_v19, 0.0  ;;  %v1560_v26 = vadd.f32 %v1559_v24, %v4927_v1  ;;  %v2208_v27 = vpop.f32.mrf.mxu1  ;;  %v4427_v19 = vld [vmem:[%s4901_s30 + $0x190] sm:$0xff] }
 0x352   : > { %v3063_v28 = vmax.f32 %v2526_v23, 0.0  ;;  %v2209_v29 = vadd.f32 %v2208_v27, %v4929_v2 }
 0x353   : > { %v2808_v30 = vmax.f32 %v1560_v26, 0.0  ;;  %1598 = vmatmul.bf16.gmra.mxu0 %v4425_v21  ;;  %1918 = vmatmul.bf16.gmra.mxu2 %v4489_v22 }
 0x354   : > { %v3367_v31 = vpack.c.bf16 %v3063_v28, %v3062_v25  ;;  %v2809_v32 = vmax.f32 %v2209_v29, 0.0  ;;  %2247 = vmatmul.bf16.gmra.mxu1 %v4425_v21  ;;  %2567 = vmatmul.bf16.gmra.mxu3 %v4489_v22 }
 0x356   : > { %3623 = vst [vmem:[%s4937_s23 + $0x678] sm:$0xff] %v3367_v31  ;;  %v3240_v33 = vpack.c.bf16 %v2809_v32, %v2808_v30  ;;  %v1879_v34 = vpop.f32.mrf.mxu2 }
 0x357   : > { %v1880_v35 = vadd.f32 %v1879_v34, %v4927_v1  ;;  %v2528_v36 = vpop.f32.mrf.mxu3 }
 0x358   : > { %3496 = vst [vmem:[%s4937_s23 + $0x280] sm:$0xff] %v3240_v33  ;;  %v2529_v37 = vadd.f32 %v2528_v36, %v4929_v2  ;;  %v1561_v38 = vpop.f32.mrf.mxu0 }
 0x359   : > { %v3064_v39 = vmax.f32 %v1880_v35, 0.0  ;;  %v1562_v40 = vadd.f32 %v1561_v38, %v4927_v1  ;;  %v2210_v41 = vpop.f32.mrf.mxu1 }
 0x35a   : > { %v3065_v42 = vmax.f32 %v2529_v37, 0.0  ;;  %v2211_v43 = vadd.f32 %v2210_v41, %v4929_v2 }
 0x35b   : > { %v2810_v44 = vmax.f32 %v1562_v40, 0.0 }
 0x35c   : > { %v3368_v45 = vpack.c.bf16 %v3065_v42, %v3064_v39  ;;  %v2811_v46 = vmax.f32 %v2211_v43, 0.0 }
 0x35e   : > { %3624 = vst [vmem:[%s4937_s23 + $0x680] sm:$0xff] %v3368_v45  ;;  %v3241_v47 = vpack.c.bf16 %v2811_v46, %v2810_v44  ;;  %v1881_v48 = vpop.f32.mrf.mxu2 }
 0x35f   : > { %v1882_v49 = vadd.f32 %v1881_v48, %v4927_v1  ;;  %v2530_v50 = vpop.f32.mrf.mxu3 }
 0x360   : > { %3497 = vst [vmem:[%s4937_s23 + $0x288] sm:$0xff] %v3241_v47  ;;  %v2531_v53 = vadd.f32 %v2530_v50, %v4929_v2  ;;  %v1564_v54 = vpop.f32.mrf.mxu0  ;;  %v4492_v50 = vld [vmem:[%s4901_s30 + $0x398] sm:$0xff] }
 0x361   : > { %v3066_v55 = vmax.f32 %v1882_v49, 0.0  ;;  %v1565_v56 = vadd.f32 %v1564_v54, %v4927_v1  ;;  %v2213_v57 = vpop.f32.mrf.mxu1  ;;  %v4428_v49 = vld [vmem:[%s4901_s30 + $0x198] sm:$0xff] }
 0x362   : > { %v3067_v58 = vmax.f32 %v2531_v53, 0.0  ;;  %v2214_v59 = vadd.f32 %v2213_v57, %v4929_v2 }
 0x363   : > { %v2812_v60 = vmax.f32 %v1565_v56, 0.0  ;;  %1603 = vmatmul.bf16.gmra.mxu0 %v4426_v51  ;;  %1923 = vmatmul.bf16.gmra.mxu2 %v4490_v52 }
 0x364   : > { %v3369_v61 = vpack.c.bf16 %v3067_v58, %v3066_v55  ;;  %v2813_v62 = vmax.f32 %v2214_v59, 0.0  ;;  %2252 = vmatmul.bf16.gmra.mxu1 %v4426_v51  ;;  %2572 = vmatmul.bf16.gmra.mxu3 %v4490_v52 }
 0x366   : > { %3625 = vst [vmem:[%s4937_s23 + $0x688] sm:$0xff] %v3369_v61  ;;  %v3242_v63 = vpack.c.bf16 %v2813_v62, %v2812_v60  ;;  %v1884_v0 = vpop.f32.mrf.mxu2 }
 0x367   : > { %v1885_v3 = vadd.f32 %v1884_v0, %v4927_v1  ;;  %v2533_v4 = vpop.f32.mrf.mxu3 }
 0x368   : > { %3498 = vst [vmem:[%s4937_s23 + $0x290] sm:$0xff] %v3242_v63  ;;  %v2534_v5 = vadd.f32 %v2533_v4, %v4929_v2  ;;  %v1566_v6 = vpop.f32.mrf.mxu0 }
 0x369   : > { %v3068_v7 = vmax.f32 %v1885_v3, 0.0  ;;  %v1567_v8 = vadd.f32 %v1566_v6, %v4927_v1  ;;  %v2215_v9 = vpop.f32.mrf.mxu1 }
 0x36a   : > { %v3069_v10 = vmax.f32 %v2534_v5, 0.0  ;;  %v2216_v11 = vadd.f32 %v2215_v9, %v4929_v2 }
 0x36b   : > { %v2814_v12 = vmax.f32 %v1567_v8, 0.0 }
 0x36c   : > { %v3370_v13 = vpack.c.bf16 %v3069_v10, %v3068_v7  ;;  %v2815_v14 = vmax.f32 %v2216_v11, 0.0 }
 0x36e   : > { %3626 = vst [vmem:[%s4937_s23 + $0x690] sm:$0xff] %v3370_v13  ;;  %v3243_v15 = vpack.c.bf16 %v2815_v14, %v2814_v12  ;;  %v1886_v16 = vpop.f32.mrf.mxu2 }
 0x36f   : > { %v1887_v17 = vadd.f32 %v1886_v16, %v4927_v1  ;;  %v2535_v18 = vpop.f32.mrf.mxu3 }
 0x370   : > { %3499 = vst [vmem:[%s4937_s23 + $0x298] sm:$0xff] %v3243_v15  ;;  %v2536_v21 = vadd.f32 %v2535_v18, %v4929_v2  ;;  %v1569_v22 = vpop.f32.mrf.mxu0  ;;  %v4493_v18 = vld [vmem:[%s4901_s30 + $0x3a0] sm:$0xff] }
 0x371   : > { %v3070_v23 = vmax.f32 %v1887_v17, 0.0  ;;  %v1570_v24 = vadd.f32 %v1569_v22, %v4927_v1  ;;  %v2218_v25 = vpop.f32.mrf.mxu1  ;;  %v4429_v17 = vld [vmem:[%s4901_s30 + $0x1a0] sm:$0xff] }
 0x372   : > { %v3071_v26 = vmax.f32 %v2536_v21, 0.0  ;;  %v2219_v27 = vadd.f32 %v2218_v25, %v4929_v2 }
 0x373   : > { %v2816_v28 = vmax.f32 %v1570_v24, 0.0  ;;  %1608 = vmatmul.bf16.gmra.mxu0 %v4427_v19  ;;  %1928 = vmatmul.bf16.gmra.mxu2 %v4491_v20 }
 0x374   : > { %v3371_v29 = vpack.c.bf16 %v3071_v26, %v3070_v23  ;;  %v2817_v30 = vmax.f32 %v2219_v27, 0.0  ;;  %2257 = vmatmul.bf16.gmra.mxu1 %v4427_v19  ;;  %2577 = vmatmul.bf16.gmra.mxu3 %v4491_v20 }
 0x376   : > { %3627 = vst [vmem:[%s4937_s23 + $0x698] sm:$0xff] %v3371_v29  ;;  %v3244_v31 = vpack.c.bf16 %v2817_v30, %v2816_v28  ;;  %v1889_v32 = vpop.f32.mrf.mxu2 }
 0x377   : > { %v1890_v33 = vadd.f32 %v1889_v32, %v4927_v1  ;;  %v2538_v34 = vpop.f32.mrf.mxu3 }
 0x378   : > { %3500 = vst [vmem:[%s4937_s23 + $0x2a0] sm:$0xff] %v3244_v31  ;;  %v2539_v35 = vadd.f32 %v2538_v34, %v4929_v2  ;;  %v1571_v36 = vpop.f32.mrf.mxu0 }
 0x379   : > { %v3072_v37 = vmax.f32 %v1890_v33, 0.0  ;;  %v1572_v38 = vadd.f32 %v1571_v36, %v4927_v1  ;;  %v2220_v39 = vpop.f32.mrf.mxu1 }
 0x37a   : > { %v3073_v40 = vmax.f32 %v2539_v35, 0.0  ;;  %v2221_v41 = vadd.f32 %v2220_v39, %v4929_v2 }
 0x37b   : > { %v2818_v42 = vmax.f32 %v1572_v38, 0.0 }
 0x37c   : > { %v3372_v43 = vpack.c.bf16 %v3073_v40, %v3072_v37  ;;  %v2819_v44 = vmax.f32 %v2221_v41, 0.0 }
 0x37e   : > { %3628 = vst [vmem:[%s4937_s23 + $0x6a0] sm:$0xff] %v3372_v43  ;;  %v3245_v45 = vpack.c.bf16 %v2819_v44, %v2818_v42  ;;  %v1891_v46 = vpop.f32.mrf.mxu2 }
 0x37f   : > { %v1892_v47 = vadd.f32 %v1891_v46, %v4927_v1  ;;  %v2540_v48 = vpop.f32.mrf.mxu3 }
 0x380   : > { %3501 = vst [vmem:[%s4937_s23 + $0x2a8] sm:$0xff] %v3245_v45  ;;  %v2541_v51 = vadd.f32 %v2540_v48, %v4929_v2  ;;  %v1574_v52 = vpop.f32.mrf.mxu0  ;;  %v4494_v48 = vld [vmem:[%s4901_s30 + $0x3a8] sm:$0xff] }
 0x381   : > { %v3074_v53 = vmax.f32 %v1892_v47, 0.0  ;;  %v1575_v54 = vadd.f32 %v1574_v52, %v4927_v1  ;;  %v2223_v55 = vpop.f32.mrf.mxu1  ;;  %v4430_v47 = vld [vmem:[%s4901_s30 + $0x1a8] sm:$0xff] }
 0x382   : > { %v3075_v56 = vmax.f32 %v2541_v51, 0.0  ;;  %v2224_v57 = vadd.f32 %v2223_v55, %v4929_v2 }
 0x383   : > { %v2820_v58 = vmax.f32 %v1575_v54, 0.0  ;;  %1613 = vmatmul.bf16.gmra.mxu0 %v4428_v49  ;;  %1933 = vmatmul.bf16.gmra.mxu2 %v4492_v50 }
 0x384   : > { %v3373_v59 = vpack.c.bf16 %v3075_v56, %v3074_v53  ;;  %v2821_v60 = vmax.f32 %v2224_v57, 0.0  ;;  %2262 = vmatmul.bf16.gmra.mxu1 %v4428_v49  ;;  %2582 = vmatmul.bf16.gmra.mxu3 %v4492_v50 }
 0x386   : > { %3629 = vst [vmem:[%s4937_s23 + $0x6a8] sm:$0xff] %v3373_v59  ;;  %v3246_v61 = vpack.c.bf16 %v2821_v60, %v2820_v58  ;;  %v1894_v62 = vpop.f32.mrf.mxu2 }
 0x387   : > { %v1895_v63 = vadd.f32 %v1894_v62, %v4927_v1  ;;  %v2543_v0 = vpop.f32.mrf.mxu3 }
 0x388   : > { %3502 = vst [vmem:[%s4937_s23 + $0x2b0] sm:$0xff] %v3246_v61  ;;  %v2544_v3 = vadd.f32 %v2543_v0, %v4929_v2  ;;  %v1576_v4 = vpop.f32.mrf.mxu0 }
 0x389   : > { %v3076_v5 = vmax.f32 %v1895_v63, 0.0  ;;  %v1577_v6 = vadd.f32 %v1576_v4, %v4927_v1  ;;  %v2225_v7 = vpop.f32.mrf.mxu1 }
 0x38a   : > { %v3077_v8 = vmax.f32 %v2544_v3, 0.0  ;;  %v2226_v9 = vadd.f32 %v2225_v7, %v4929_v2 }
 0x38b   : > { %v2822_v10 = vmax.f32 %v1577_v6, 0.0 }
 0x38c   : > { %v3374_v11 = vpack.c.bf16 %v3077_v8, %v3076_v5  ;;  %v2823_v12 = vmax.f32 %v2226_v9, 0.0 }
 0x38e   : > { %3630 = vst [vmem:[%s4937_s23 + $0x6b0] sm:$0xff] %v3374_v11  ;;  %v3247_v13 = vpack.c.bf16 %v2823_v12, %v2822_v10  ;;  %v1896_v14 = vpop.f32.mrf.mxu2 }
 0x38f   : > { %v1897_v15 = vadd.f32 %v1896_v14, %v4927_v1  ;;  %v2545_v16 = vpop.f32.mrf.mxu3 }
 0x390   : > { %3503 = vst [vmem:[%s4937_s23 + $0x2b8] sm:$0xff] %v3247_v13  ;;  %v2546_v19 = vadd.f32 %v2545_v16, %v4929_v2  ;;  %v1579_v20 = vpop.f32.mrf.mxu0  ;;  %v4495_v16 = vld [vmem:[%s4901_s30 + $0x3b0] sm:$0xff] }
 0x391   : > { %v3078_v21 = vmax.f32 %v1897_v15, 0.0  ;;  %v1580_v22 = vadd.f32 %v1579_v20, %v4927_v1  ;;  %v2228_v23 = vpop.f32.mrf.mxu1  ;;  %v4431_v15 = vld [vmem:[%s4901_s30 + $0x1b0] sm:$0xff] }
 0x392   : > { %v3079_v24 = vmax.f32 %v2546_v19, 0.0  ;;  %v2229_v25 = vadd.f32 %v2228_v23, %v4929_v2 }
 0x393   : > { %v2824_v26 = vmax.f32 %v1580_v22, 0.0  ;;  %1618 = vmatmul.bf16.gmra.mxu0 %v4429_v17  ;;  %1938 = vmatmul.bf16.gmra.mxu2 %v4493_v18 }
 0x394   : > { %v3375_v27 = vpack.c.bf16 %v3079_v24, %v3078_v21  ;;  %v2825_v28 = vmax.f32 %v2229_v25, 0.0  ;;  %2267 = vmatmul.bf16.gmra.mxu1 %v4429_v17  ;;  %2587 = vmatmul.bf16.gmra.mxu3 %v4493_v18 }
 0x396   : > { %3631 = vst [vmem:[%s4937_s23 + $0x6b8] sm:$0xff] %v3375_v27  ;;  %v3248_v29 = vpack.c.bf16 %v2825_v28, %v2824_v26  ;;  %v1899_v30 = vpop.f32.mrf.mxu2 }
 0x397   : > { %v1900_v31 = vadd.f32 %v1899_v30, %v4927_v1  ;;  %v2548_v32 = vpop.f32.mrf.mxu3 }
 0x398   : > { %3504 = vst [vmem:[%s4937_s23 + $0x2c0] sm:$0xff] %v3248_v29  ;;  %v2549_v33 = vadd.f32 %v2548_v32, %v4929_v2  ;;  %v1581_v34 = vpop.f32.mrf.mxu0 }
 0x399   : > { %v3080_v35 = vmax.f32 %v1900_v31, 0.0  ;;  %v1582_v36 = vadd.f32 %v1581_v34, %v4927_v1  ;;  %v2230_v37 = vpop.f32.mrf.mxu1 }
 0x39a   : > { %v3081_v38 = vmax.f32 %v2549_v33, 0.0  ;;  %v2231_v39 = vadd.f32 %v2230_v37, %v4929_v2 }
 0x39b   : > { %v2826_v40 = vmax.f32 %v1582_v36, 0.0 }
 0x39c   : > { %v3376_v41 = vpack.c.bf16 %v3081_v38, %v3080_v35  ;;  %v2827_v42 = vmax.f32 %v2231_v39, 0.0 }
 0x39e   : > { %3632 = vst [vmem:[%s4937_s23 + $0x6c0] sm:$0xff] %v3376_v41  ;;  %v3249_v43 = vpack.c.bf16 %v2827_v42, %v2826_v40  ;;  %v1901_v44 = vpop.f32.mrf.mxu2 }
 0x39f   : > { %v1902_v45 = vadd.f32 %v1901_v44, %v4927_v1  ;;  %v2550_v46 = vpop.f32.mrf.mxu3 }
 0x3a0   : > { %3505 = vst [vmem:[%s4937_s23 + $0x2c8] sm:$0xff] %v3249_v43  ;;  %v2551_v49 = vadd.f32 %v2550_v46, %v4929_v2  ;;  %v1584_v50 = vpop.f32.mrf.mxu0  ;;  %v4496_v46 = vld [vmem:[%s4901_s30 + $0x3b8] sm:$0xff] }
 0x3a1   : > { %v3082_v51 = vmax.f32 %v1902_v45, 0.0  ;;  %v1585_v52 = vadd.f32 %v1584_v50, %v4927_v1  ;;  %v2233_v53 = vpop.f32.mrf.mxu1  ;;  %v4432_v45 = vld [vmem:[%s4901_s30 + $0x1b8] sm:$0xff] }
 0x3a2   : > { %v3083_v54 = vmax.f32 %v2551_v49, 0.0  ;;  %v2234_v55 = vadd.f32 %v2233_v53, %v4929_v2 }
 0x3a3   : > { %v2828_v56 = vmax.f32 %v1585_v52, 0.0  ;;  %1623 = vmatmul.bf16.gmra.mxu0 %v4430_v47  ;;  %1943 = vmatmul.bf16.gmra.mxu2 %v4494_v48 }
 0x3a4   : > { %v3377_v57 = vpack.c.bf16 %v3083_v54, %v3082_v51  ;;  %v2829_v58 = vmax.f32 %v2234_v55, 0.0  ;;  %2272 = vmatmul.bf16.gmra.mxu1 %v4430_v47  ;;  %2592 = vmatmul.bf16.gmra.mxu3 %v4494_v48 }
 0x3a6   : > { %3633 = vst [vmem:[%s4937_s23 + $0x6c8] sm:$0xff] %v3377_v57  ;;  %v3250_v59 = vpack.c.bf16 %v2829_v58, %v2828_v56  ;;  %v1904_v60 = vpop.f32.mrf.mxu2 }
 0x3a7   : > { %v1905_v61 = vadd.f32 %v1904_v60, %v4927_v1  ;;  %v2553_v62 = vpop.f32.mrf.mxu3 }
 0x3a8   : > { %3506 = vst [vmem:[%s4937_s23 + $0x2d0] sm:$0xff] %v3250_v59  ;;  %v2554_v63 = vadd.f32 %v2553_v62, %v4929_v2  ;;  %v1586_v0 = vpop.f32.mrf.mxu0 }
 0x3a9   : > { %v3084_v3 = vmax.f32 %v1905_v61, 0.0  ;;  %v1587_v4 = vadd.f32 %v1586_v0, %v4927_v1  ;;  %v2235_v5 = vpop.f32.mrf.mxu1 }
 0x3aa   : > { %v3085_v6 = vmax.f32 %v2554_v63, 0.0  ;;  %v2236_v7 = vadd.f32 %v2235_v5, %v4929_v2 }
 0x3ab   : > { %v2830_v8 = vmax.f32 %v1587_v4, 0.0 }
 0x3ac   : > { %v3378_v9 = vpack.c.bf16 %v3085_v6, %v3084_v3  ;;  %v2831_v10 = vmax.f32 %v2236_v7, 0.0 }
 0x3ae   : > { %3634 = vst [vmem:[%s4937_s23 + $0x6d0] sm:$0xff] %v3378_v9  ;;  %v3251_v11 = vpack.c.bf16 %v2831_v10, %v2830_v8  ;;  %v1906_v12 = vpop.f32.mrf.mxu2 }
 0x3af   : > { %v1907_v13 = vadd.f32 %v1906_v12, %v4927_v1  ;;  %v2555_v14 = vpop.f32.mrf.mxu3 }
 0x3b0   : > { %3507 = vst [vmem:[%s4937_s23 + $0x2d8] sm:$0xff] %v3251_v11  ;;  %v2556_v17 = vadd.f32 %v2555_v14, %v4929_v2  ;;  %v1589_v18 = vpop.f32.mrf.mxu0  ;;  %v4497_v14 = vld [vmem:[%s4901_s30 + $0x3c0] sm:$0xff] }
 0x3b1   : > { %v3086_v19 = vmax.f32 %v1907_v13, 0.0  ;;  %v1590_v20 = vadd.f32 %v1589_v18, %v4927_v1  ;;  %v2238_v21 = vpop.f32.mrf.mxu1  ;;  %v4433_v13 = vld [vmem:[%s4901_s30 + $0x1c0] sm:$0xff] }
 0x3b2   : > { %v3087_v22 = vmax.f32 %v2556_v17, 0.0  ;;  %v2239_v23 = vadd.f32 %v2238_v21, %v4929_v2 }
 0x3b3   : > { %v2832_v24 = vmax.f32 %v1590_v20, 0.0  ;;  %1628 = vmatmul.bf16.gmra.mxu0 %v4431_v15  ;;  %1948 = vmatmul.bf16.gmra.mxu2 %v4495_v16 }
 0x3b4   : > { %v3379_v25 = vpack.c.bf16 %v3087_v22, %v3086_v19  ;;  %v2833_v26 = vmax.f32 %v2239_v23, 0.0  ;;  %2277 = vmatmul.bf16.gmra.mxu1 %v4431_v15  ;;  %2597 = vmatmul.bf16.gmra.mxu3 %v4495_v16 }
 0x3b6   : > { %3635 = vst [vmem:[%s4937_s23 + $0x6d8] sm:$0xff] %v3379_v25  ;;  %v3252_v27 = vpack.c.bf16 %v2833_v26, %v2832_v24  ;;  %v1909_v28 = vpop.f32.mrf.mxu2 }
 0x3b7   : > { %v1910_v29 = vadd.f32 %v1909_v28, %v4927_v1  ;;  %v2558_v30 = vpop.f32.mrf.mxu3 }
 0x3b8   : > { %3508 = vst [vmem:[%s4937_s23 + $0x2e0] sm:$0xff] %v3252_v27  ;;  %v2559_v31 = vadd.f32 %v2558_v30, %v4929_v2  ;;  %v1591_v32 = vpop.f32.mrf.mxu0 }
 0x3b9   : > { %v3088_v33 = vmax.f32 %v1910_v29, 0.0  ;;  %v1592_v34 = vadd.f32 %v1591_v32, %v4927_v1  ;;  %v2240_v35 = vpop.f32.mrf.mxu1 }
 0x3ba   : > { %v3089_v36 = vmax.f32 %v2559_v31, 0.0  ;;  %v2241_v37 = vadd.f32 %v2240_v35, %v4929_v2 }
 0x3bb   : > { %v2834_v38 = vmax.f32 %v1592_v34, 0.0 }
 0x3bc   : > { %v3380_v39 = vpack.c.bf16 %v3089_v36, %v3088_v33  ;;  %v2835_v40 = vmax.f32 %v2241_v37, 0.0 }
 0x3be   : > { %3636 = vst [vmem:[%s4937_s23 + $0x6e0] sm:$0xff] %v3380_v39  ;;  %v3253_v41 = vpack.c.bf16 %v2835_v40, %v2834_v38  ;;  %v1911_v42 = vpop.f32.mrf.mxu2 }
 0x3bf   : > { %v1912_v43 = vadd.f32 %v1911_v42, %v4927_v1  ;;  %v2560_v44 = vpop.f32.mrf.mxu3 }
 0x3c0   : > { %3509 = vst [vmem:[%s4937_s23 + $0x2e8] sm:$0xff] %v3253_v41  ;;  %v2561_v47 = vadd.f32 %v2560_v44, %v4929_v2  ;;  %v1594_v48 = vpop.f32.mrf.mxu0  ;;  %v4498_v44 = vld [vmem:[%s4901_s30 + $0x3c8] sm:$0xff] }
 0x3c1   : > { %v3090_v49 = vmax.f32 %v1912_v43, 0.0  ;;  %v1595_v50 = vadd.f32 %v1594_v48, %v4927_v1  ;;  %v2243_v51 = vpop.f32.mrf.mxu1  ;;  %v4434_v43 = vld [vmem:[%s4901_s30 + $0x1c8] sm:$0xff] }
 0x3c2   : > { %v3091_v52 = vmax.f32 %v2561_v47, 0.0  ;;  %v2244_v53 = vadd.f32 %v2243_v51, %v4929_v2 }
 0x3c3   : > { %v2836_v54 = vmax.f32 %v1595_v50, 0.0  ;;  %1633 = vmatmul.bf16.gmra.mxu0 %v4432_v45  ;;  %1953 = vmatmul.bf16.gmra.mxu2 %v4496_v46 }
 0x3c4   : > { %v3381_v55 = vpack.c.bf16 %v3091_v52, %v3090_v49  ;;  %v2837_v56 = vmax.f32 %v2244_v53, 0.0  ;;  %2282 = vmatmul.bf16.gmra.mxu1 %v4432_v45  ;;  %2602 = vmatmul.bf16.gmra.mxu3 %v4496_v46 }
 0x3c6   : > { %3637 = vst [vmem:[%s4937_s23 + $0x6e8] sm:$0xff] %v3381_v55  ;;  %v3254_v57 = vpack.c.bf16 %v2837_v56, %v2836_v54  ;;  %v1914_v58 = vpop.f32.mrf.mxu2 }
 0x3c7   : > { %v1915_v59 = vadd.f32 %v1914_v58, %v4927_v1  ;;  %v2563_v60 = vpop.f32.mrf.mxu3 }
 0x3c8   : > { %3510 = vst [vmem:[%s4937_s23 + $0x2f0] sm:$0xff] %v3254_v57  ;;  %v2564_v61 = vadd.f32 %v2563_v60, %v4929_v2  ;;  %v1596_v62 = vpop.f32.mrf.mxu0 }
 0x3c9   : > { %v3092_v63 = vmax.f32 %v1915_v59, 0.0  ;;  %v1597_v0 = vadd.f32 %v1596_v62, %v4927_v1  ;;  %v2245_v3 = vpop.f32.mrf.mxu1 }
 0x3ca   : > { %v3093_v4 = vmax.f32 %v2564_v61, 0.0  ;;  %v2246_v5 = vadd.f32 %v2245_v3, %v4929_v2 }
 0x3cb   : > { %v2838_v6 = vmax.f32 %v1597_v0, 0.0 }
 0x3cc   : > { %v3382_v7 = vpack.c.bf16 %v3093_v4, %v3092_v63  ;;  %v2839_v8 = vmax.f32 %v2246_v5, 0.0 }
 0x3ce   : > { %3638 = vst [vmem:[%s4937_s23 + $0x6f0] sm:$0xff] %v3382_v7  ;;  %v3255_v9 = vpack.c.bf16 %v2839_v8, %v2838_v6  ;;  %v1916_v10 = vpop.f32.mrf.mxu2 }
 0x3cf   : > { %v1917_v11 = vadd.f32 %v1916_v10, %v4927_v1  ;;  %v2565_v12 = vpop.f32.mrf.mxu3 }
 0x3d0   : > { %3511 = vst [vmem:[%s4937_s23 + $0x2f8] sm:$0xff] %v3255_v9  ;;  %v2566_v15 = vadd.f32 %v2565_v12, %v4929_v2  ;;  %v1599_v16 = vpop.f32.mrf.mxu0  ;;  %v4499_v12 = vld [vmem:[%s4901_s30 + $0x3d0] sm:$0xff] }
 0x3d1   : > { %v3094_v17 = vmax.f32 %v1917_v11, 0.0  ;;  %v1600_v18 = vadd.f32 %v1599_v16, %v4927_v1  ;;  %v2248_v19 = vpop.f32.mrf.mxu1  ;;  %v4435_v11 = vld [vmem:[%s4901_s30 + $0x1d0] sm:$0xff] }
 0x3d2   : > { %v3095_v20 = vmax.f32 %v2566_v15, 0.0  ;;  %v2249_v21 = vadd.f32 %v2248_v19, %v4929_v2 }
 0x3d3   : > { %v2840_v22 = vmax.f32 %v1600_v18, 0.0  ;;  %1638 = vmatmul.bf16.gmra.mxu0 %v4433_v13  ;;  %1958 = vmatmul.bf16.gmra.mxu2 %v4497_v14 }
 0x3d4   : > { %v3383_v23 = vpack.c.bf16 %v3095_v20, %v3094_v17  ;;  %v2841_v24 = vmax.f32 %v2249_v21, 0.0  ;;  %2287 = vmatmul.bf16.gmra.mxu1 %v4433_v13  ;;  %2607 = vmatmul.bf16.gmra.mxu3 %v4497_v14 }
 0x3d6   : > { %3639 = vst [vmem:[%s4937_s23 + $0x6f8] sm:$0xff] %v3383_v23  ;;  %v3256_v25 = vpack.c.bf16 %v2841_v24, %v2840_v22  ;;  %v1919_v26 = vpop.f32.mrf.mxu2 }
 0x3d7   : > { %v1920_v27 = vadd.f32 %v1919_v26, %v4927_v1  ;;  %v2568_v28 = vpop.f32.mrf.mxu3 }
 0x3d8   : > { %3512 = vst [vmem:[%s4937_s23 + $0x300] sm:$0xff] %v3256_v25  ;;  %v2569_v29 = vadd.f32 %v2568_v28, %v4929_v2  ;;  %v1601_v30 = vpop.f32.mrf.mxu0 }
 0x3d9   : > { %v3096_v31 = vmax.f32 %v1920_v27, 0.0  ;;  %v1602_v32 = vadd.f32 %v1601_v30, %v4927_v1  ;;  %v2250_v33 = vpop.f32.mrf.mxu1 }
 0x3da   : > { %v3097_v34 = vmax.f32 %v2569_v29, 0.0  ;;  %v2251_v35 = vadd.f32 %v2250_v33, %v4929_v2 }
 0x3db   : > { %v2842_v36 = vmax.f32 %v1602_v32, 0.0 }
 0x3dc   : > { %v3384_v37 = vpack.c.bf16 %v3097_v34, %v3096_v31  ;;  %v2843_v38 = vmax.f32 %v2251_v35, 0.0 }
 0x3de   : > { %3640 = vst [vmem:[%s4937_s23 + $0x700] sm:$0xff] %v3384_v37  ;;  %v3257_v39 = vpack.c.bf16 %v2843_v38, %v2842_v36  ;;  %v1921_v40 = vpop.f32.mrf.mxu2 }
 0x3df   : > { %v1922_v41 = vadd.f32 %v1921_v40, %v4927_v1  ;;  %v2570_v42 = vpop.f32.mrf.mxu3 }
 0x3e0   : > { %3513 = vst [vmem:[%s4937_s23 + $0x308] sm:$0xff] %v3257_v39  ;;  %v2571_v45 = vadd.f32 %v2570_v42, %v4929_v2  ;;  %v1604_v46 = vpop.f32.mrf.mxu0  ;;  %v4500_v42 = vld [vmem:[%s4901_s30 + $0x3d8] sm:$0xff] }
 0x3e1   : > { %v3098_v47 = vmax.f32 %v1922_v41, 0.0  ;;  %v1605_v48 = vadd.f32 %v1604_v46, %v4927_v1  ;;  %v2253_v49 = vpop.f32.mrf.mxu1  ;;  %v4436_v41 = vld [vmem:[%s4901_s30 + $0x1d8] sm:$0xff] }
 0x3e2   : > { %v3099_v50 = vmax.f32 %v2571_v45, 0.0  ;;  %v2254_v51 = vadd.f32 %v2253_v49, %v4929_v2 }
 0x3e3   : > { %v2844_v52 = vmax.f32 %v1605_v48, 0.0  ;;  %1643 = vmatmul.bf16.gmra.mxu0 %v4434_v43  ;;  %1963 = vmatmul.bf16.gmra.mxu2 %v4498_v44 }
 0x3e4   : > { %v3385_v53 = vpack.c.bf16 %v3099_v50, %v3098_v47  ;;  %v2845_v54 = vmax.f32 %v2254_v51, 0.0  ;;  %2292 = vmatmul.bf16.gmra.mxu1 %v4434_v43  ;;  %2612 = vmatmul.bf16.gmra.mxu3 %v4498_v44 }
 0x3e6   : > { %3641 = vst [vmem:[%s4937_s23 + $0x708] sm:$0xff] %v3385_v53  ;;  %v3258_v55 = vpack.c.bf16 %v2845_v54, %v2844_v52  ;;  %v1924_v56 = vpop.f32.mrf.mxu2 }
 0x3e7   : > { %v1925_v57 = vadd.f32 %v1924_v56, %v4927_v1  ;;  %v2573_v58 = vpop.f32.mrf.mxu3 }
 0x3e8   : > { %3514 = vst [vmem:[%s4937_s23 + $0x310] sm:$0xff] %v3258_v55  ;;  %v2574_v59 = vadd.f32 %v2573_v58, %v4929_v2  ;;  %v1606_v60 = vpop.f32.mrf.mxu0 }
 0x3e9   : > { %v3100_v61 = vmax.f32 %v1925_v57, 0.0  ;;  %v1607_v62 = vadd.f32 %v1606_v60, %v4927_v1  ;;  %v2255_v63 = vpop.f32.mrf.mxu1 }
 0x3ea   : > { %v3101_v0 = vmax.f32 %v2574_v59, 0.0  ;;  %v2256_v3 = vadd.f32 %v2255_v63, %v4929_v2 }
 0x3eb   : > { %v2846_v4 = vmax.f32 %v1607_v62, 0.0 }
 0x3ec   : > { %v3386_v5 = vpack.c.bf16 %v3101_v0, %v3100_v61  ;;  %v2847_v6 = vmax.f32 %v2256_v3, 0.0 }
 0x3ee   : > { %3642 = vst [vmem:[%s4937_s23 + $0x710] sm:$0xff] %v3386_v5  ;;  %v3259_v7 = vpack.c.bf16 %v2847_v6, %v2846_v4  ;;  %v1926_v8 = vpop.f32.mrf.mxu2 }
 0x3ef   : > { %v1927_v9 = vadd.f32 %v1926_v8, %v4927_v1  ;;  %v2575_v10 = vpop.f32.mrf.mxu3 }
 0x3f0   : > { %3515 = vst [vmem:[%s4937_s23 + $0x318] sm:$0xff] %v3259_v7  ;;  %v2576_v13 = vadd.f32 %v2575_v10, %v4929_v2  ;;  %v1609_v14 = vpop.f32.mrf.mxu0  ;;  %v4501_v10 = vld [vmem:[%s4901_s30 + $0x3e0] sm:$0xff] }
 0x3f1   : > { %v3102_v15 = vmax.f32 %v1927_v9, 0.0  ;;  %v1610_v16 = vadd.f32 %v1609_v14, %v4927_v1  ;;  %v2258_v17 = vpop.f32.mrf.mxu1  ;;  %v4437_v9 = vld [vmem:[%s4901_s30 + $0x1e0] sm:$0xff] }
 0x3f2   : > { %v3103_v18 = vmax.f32 %v2576_v13, 0.0  ;;  %v2259_v19 = vadd.f32 %v2258_v17, %v4929_v2 }
 0x3f3   : > { %v2848_v20 = vmax.f32 %v1610_v16, 0.0  ;;  %1648 = vmatmul.bf16.gmra.mxu0 %v4435_v11  ;;  %1968 = vmatmul.bf16.gmra.mxu2 %v4499_v12 }
 0x3f4   : > { %v3387_v21 = vpack.c.bf16 %v3103_v18, %v3102_v15  ;;  %v2849_v22 = vmax.f32 %v2259_v19, 0.0  ;;  %2297 = vmatmul.bf16.gmra.mxu1 %v4435_v11  ;;  %2617 = vmatmul.bf16.gmra.mxu3 %v4499_v12 }
 0x3f6   : > { %3643 = vst [vmem:[%s4937_s23 + $0x718] sm:$0xff] %v3387_v21  ;;  %v3260_v23 = vpack.c.bf16 %v2849_v22, %v2848_v20  ;;  %v1929_v24 = vpop.f32.mrf.mxu2 }
 0x3f7   : > { %v1930_v25 = vadd.f32 %v1929_v24, %v4927_v1  ;;  %v2578_v26 = vpop.f32.mrf.mxu3 }
 0x3f8   : > { %3516 = vst [vmem:[%s4937_s23 + $0x320] sm:$0xff] %v3260_v23  ;;  %v2579_v27 = vadd.f32 %v2578_v26, %v4929_v2  ;;  %v1611_v28 = vpop.f32.mrf.mxu0 }
 0x3f9   : > { %v3104_v29 = vmax.f32 %v1930_v25, 0.0  ;;  %v1612_v30 = vadd.f32 %v1611_v28, %v4927_v1  ;;  %v2260_v31 = vpop.f32.mrf.mxu1 }
 0x3fa   : > { %v3105_v32 = vmax.f32 %v2579_v27, 0.0  ;;  %v2261_v33 = vadd.f32 %v2260_v31, %v4929_v2 }
 0x3fb   : > { %v2850_v34 = vmax.f32 %v1612_v30, 0.0 }
 0x3fc   : > { %v3388_v35 = vpack.c.bf16 %v3105_v32, %v3104_v29  ;;  %v2851_v36 = vmax.f32 %v2261_v33, 0.0 }
 0x3fe   : > { %3644 = vst [vmem:[%s4937_s23 + $0x720] sm:$0xff] %v3388_v35  ;;  %v3261_v37 = vpack.c.bf16 %v2851_v36, %v2850_v34  ;;  %v1931_v38 = vpop.f32.mrf.mxu2 }
 0x3ff   : > { %v1932_v39 = vadd.f32 %v1931_v38, %v4927_v1  ;;  %v2580_v40 = vpop.f32.mrf.mxu3 }
 0x400   : > { %3517 = vst [vmem:[%s4937_s23 + $0x328] sm:$0xff] %v3261_v37  ;;  %v2581_v43 = vadd.f32 %v2580_v40, %v4929_v2  ;;  %v1614_v44 = vpop.f32.mrf.mxu0  ;;  %v4502_v40 = vld [vmem:[%s4901_s30 + $0x3e8] sm:$0xff] }
 0x401   : > { %v3106_v45 = vmax.f32 %v1932_v39, 0.0  ;;  %v1615_v46 = vadd.f32 %v1614_v44, %v4927_v1  ;;  %v2263_v47 = vpop.f32.mrf.mxu1  ;;  %v4438_v39 = vld [vmem:[%s4901_s30 + $0x1e8] sm:$0xff] }
 0x402   : > { %v3107_v48 = vmax.f32 %v2581_v43, 0.0  ;;  %v2264_v49 = vadd.f32 %v2263_v47, %v4929_v2 }
 0x403   : > { %v2852_v50 = vmax.f32 %v1615_v46, 0.0  ;;  %1653 = vmatmul.bf16.gmra.mxu0 %v4436_v41  ;;  %1973 = vmatmul.bf16.gmra.mxu2 %v4500_v42 }
 0x404   : > { %v3389_v51 = vpack.c.bf16 %v3107_v48, %v3106_v45  ;;  %v2853_v52 = vmax.f32 %v2264_v49, 0.0  ;;  %2302 = vmatmul.bf16.gmra.mxu1 %v4436_v41  ;;  %2622 = vmatmul.bf16.gmra.mxu3 %v4500_v42 }
 0x406   : > { %3645 = vst [vmem:[%s4937_s23 + $0x728] sm:$0xff] %v3389_v51  ;;  %v3262_v53 = vpack.c.bf16 %v2853_v52, %v2852_v50  ;;  %v1934_v54 = vpop.f32.mrf.mxu2 }
 0x407   : > { %v1935_v55 = vadd.f32 %v1934_v54, %v4927_v1  ;;  %v2583_v56 = vpop.f32.mrf.mxu3 }
 0x408   : > { %3518 = vst [vmem:[%s4937_s23 + $0x330] sm:$0xff] %v3262_v53  ;;  %v2584_v57 = vadd.f32 %v2583_v56, %v4929_v2  ;;  %v1616_v58 = vpop.f32.mrf.mxu0 }
 0x409   : > { %v3108_v59 = vmax.f32 %v1935_v55, 0.0  ;;  %v1617_v60 = vadd.f32 %v1616_v58, %v4927_v1  ;;  %v2265_v61 = vpop.f32.mrf.mxu1 }
 0x40a   : > { %v3109_v62 = vmax.f32 %v2584_v57, 0.0  ;;  %v2266_v63 = vadd.f32 %v2265_v61, %v4929_v2 }
 0x40b   : > { %v2854_v0 = vmax.f32 %v1617_v60, 0.0 }
 0x40c   : > { %v3390_v3 = vpack.c.bf16 %v3109_v62, %v3108_v59  ;;  %v2855_v4 = vmax.f32 %v2266_v63, 0.0 }
 0x40e   : > { %3646 = vst [vmem:[%s4937_s23 + $0x730] sm:$0xff] %v3390_v3  ;;  %v3263_v5 = vpack.c.bf16 %v2855_v4, %v2854_v0  ;;  %v1936_v6 = vpop.f32.mrf.mxu2 }
 0x40f   : > { %v1937_v7 = vadd.f32 %v1936_v6, %v4927_v1  ;;  %v2585_v8 = vpop.f32.mrf.mxu3 }
 0x410   : > { %3519 = vst [vmem:[%s4937_s23 + $0x338] sm:$0xff] %v3263_v5  ;;  %v2586_v11 = vadd.f32 %v2585_v8, %v4929_v2  ;;  %v1619_v12 = vpop.f32.mrf.mxu0  ;;  %v4503_v8 = vld [vmem:[%s4901_s30 + $0x3f0] sm:$0xff] }
 0x411   : > { %v3110_v13 = vmax.f32 %v1937_v7, 0.0  ;;  %v1620_v14 = vadd.f32 %v1619_v12, %v4927_v1  ;;  %v2268_v15 = vpop.f32.mrf.mxu1  ;;  %v4439_v7 = vld [vmem:[%s4901_s30 + $0x1f0] sm:$0xff] }
 0x412   : > { %v3111_v16 = vmax.f32 %v2586_v11, 0.0  ;;  %v2269_v17 = vadd.f32 %v2268_v15, %v4929_v2 }
 0x413   : > { %v2856_v18 = vmax.f32 %v1620_v14, 0.0  ;;  %1658 = vmatmul.bf16.gmra.mxu0 %v4437_v9  ;;  %1978 = vmatmul.bf16.gmra.mxu2 %v4501_v10 }
 0x414   : > { %v3391_v19 = vpack.c.bf16 %v3111_v16, %v3110_v13  ;;  %v2857_v20 = vmax.f32 %v2269_v17, 0.0  ;;  %2307 = vmatmul.bf16.gmra.mxu1 %v4437_v9  ;;  %2627 = vmatmul.bf16.gmra.mxu3 %v4501_v10 }
 0x416   : > { %3647 = vst [vmem:[%s4937_s23 + $0x738] sm:$0xff] %v3391_v19  ;;  %v3264_v21 = vpack.c.bf16 %v2857_v20, %v2856_v18  ;;  %v1939_v22 = vpop.f32.mrf.mxu2 }
 0x417   : > { %v1940_v23 = vadd.f32 %v1939_v22, %v4927_v1  ;;  %v2588_v24 = vpop.f32.mrf.mxu3 }
 0x418   : > { %3520 = vst [vmem:[%s4937_s23 + $0x340] sm:$0xff] %v3264_v21  ;;  %v2589_v25 = vadd.f32 %v2588_v24, %v4929_v2  ;;  %v1621_v26 = vpop.f32.mrf.mxu0 }
 0x419   : > { %v3112_v27 = vmax.f32 %v1940_v23, 0.0  ;;  %v1622_v28 = vadd.f32 %v1621_v26, %v4927_v1  ;;  %v2270_v29 = vpop.f32.mrf.mxu1 }
 0x41a   : > { %v3113_v30 = vmax.f32 %v2589_v25, 0.0  ;;  %v2271_v31 = vadd.f32 %v2270_v29, %v4929_v2 }
 0x41b   : > { %v2858_v32 = vmax.f32 %v1622_v28, 0.0 }
 0x41c   : > { %v3392_v33 = vpack.c.bf16 %v3113_v30, %v3112_v27  ;;  %v2859_v34 = vmax.f32 %v2271_v31, 0.0 }
 0x41e   : > { %3648 = vst [vmem:[%s4937_s23 + $0x740] sm:$0xff] %v3392_v33  ;;  %v3265_v35 = vpack.c.bf16 %v2859_v34, %v2858_v32  ;;  %v1941_v36 = vpop.f32.mrf.mxu2 }
 0x41f   : > { %v1942_v37 = vadd.f32 %v1941_v36, %v4927_v1  ;;  %v2590_v38 = vpop.f32.mrf.mxu3 }
 0x420   : > { %3521 = vst [vmem:[%s4937_s23 + $0x348] sm:$0xff] %v3265_v35  ;;  %v2591_v41 = vadd.f32 %v2590_v38, %v4929_v2  ;;  %v1624_v42 = vpop.f32.mrf.mxu0  ;;  %v4504_v38 = vld [vmem:[%s4901_s30 + $0x3f8] sm:$0xff] }
 0x421   : > { %v3114_v43 = vmax.f32 %v1942_v37, 0.0  ;;  %v1625_v44 = vadd.f32 %v1624_v42, %v4927_v1  ;;  %v2273_v45 = vpop.f32.mrf.mxu1  ;;  %v4440_v37 = vld [vmem:[%s4901_s30 + $0x1f8] sm:$0xff] }
 0x422   : > { %v3115_v46 = vmax.f32 %v2591_v41, 0.0  ;;  %v2274_v47 = vadd.f32 %v2273_v45, %v4929_v2 }
 0x423   : > { %v2860_v48 = vmax.f32 %v1625_v44, 0.0  ;;  %1663 = vmatmul.bf16.gmra.mxu0 %v4438_v39  ;;  %1983 = vmatmul.bf16.gmra.mxu2 %v4502_v40 }
 0x424   : > { %v3393_v49 = vpack.c.bf16 %v3115_v46, %v3114_v43  ;;  %v2861_v50 = vmax.f32 %v2274_v47, 0.0  ;;  %2312 = vmatmul.bf16.gmra.mxu1 %v4438_v39  ;;  %2632 = vmatmul.bf16.gmra.mxu3 %v4502_v40 }
 0x426   : > { %3649 = vst [vmem:[%s4937_s23 + $0x748] sm:$0xff] %v3393_v49  ;;  %v3266_v51 = vpack.c.bf16 %v2861_v50, %v2860_v48  ;;  %v1944_v52 = vpop.f32.mrf.mxu2 }
 0x427   : > { %v1945_v53 = vadd.f32 %v1944_v52, %v4927_v1  ;;  %v2593_v54 = vpop.f32.mrf.mxu3 }
 0x428   : > { %3522 = vst [vmem:[%s4937_s23 + $0x350] sm:$0xff] %v3266_v51  ;;  %v2594_v55 = vadd.f32 %v2593_v54, %v4929_v2  ;;  %v1626_v56 = vpop.f32.mrf.mxu0 }
 0x429   : > { %v3116_v57 = vmax.f32 %v1945_v53, 0.0  ;;  %v1627_v58 = vadd.f32 %v1626_v56, %v4927_v1  ;;  %v2275_v59 = vpop.f32.mrf.mxu1 }
 0x42a   : > { %v3117_v60 = vmax.f32 %v2594_v55, 0.0  ;;  %v2276_v61 = vadd.f32 %v2275_v59, %v4929_v2 }
 0x42b   : > { %v2862_v62 = vmax.f32 %v1627_v58, 0.0 }
 0x42c   : > { %v3394_v63 = vpack.c.bf16 %v3117_v60, %v3116_v57  ;;  %v2863_v0 = vmax.f32 %v2276_v61, 0.0 }
 0x42e   : > { %3650 = vst [vmem:[%s4937_s23 + $0x750] sm:$0xff] %v3394_v63  ;;  %v3267_v3 = vpack.c.bf16 %v2863_v0, %v2862_v62  ;;  %v1946_v4 = vpop.f32.mrf.mxu2 }
 0x42f   : > { %v1947_v5 = vadd.f32 %v1946_v4, %v4927_v1  ;;  %v2595_v6 = vpop.f32.mrf.mxu3 }
 0x430   : > { %3523 = vst [vmem:[%s4937_s23 + $0x358] sm:$0xff] %v3267_v3  ;;  %v2596_v9 = vadd.f32 %v2595_v6, %v4929_v2  ;;  %v1629_v10 = vpop.f32.mrf.mxu0 }
 0x431   : > { %v3118_v11 = vmax.f32 %v1947_v5, 0.0  ;;  %v1630_v12 = vadd.f32 %v1629_v10, %v4927_v1  ;;  %v2278_v13 = vpop.f32.mrf.mxu1 }
 0x432   : > { %v3119_v14 = vmax.f32 %v2596_v9, 0.0  ;;  %v2279_v15 = vadd.f32 %v2278_v13, %v4929_v2 }
 0x433   : > { %v2864_v16 = vmax.f32 %v1630_v12, 0.0  ;;  %1668 = vmatmul.bf16.gmra.mxu0 %v4439_v7  ;;  %1988 = vmatmul.bf16.gmra.mxu2 %v4503_v8 }
 0x434   : > { %v3395_v17 = vpack.c.bf16 %v3119_v14, %v3118_v11  ;;  %v2865_v18 = vmax.f32 %v2279_v15, 0.0  ;;  %2317 = vmatmul.bf16.gmra.mxu1 %v4439_v7  ;;  %2637 = vmatmul.bf16.gmra.mxu3 %v4503_v8 }
 0x436   : > { %3651 = vst [vmem:[%s4937_s23 + $0x758] sm:$0xff] %v3395_v17  ;;  %v3268_v19 = vpack.c.bf16 %v2865_v18, %v2864_v16  ;;  %v1949_v20 = vpop.f32.mrf.mxu2 }
 0x437   : > { %v1950_v21 = vadd.f32 %v1949_v20, %v4927_v1  ;;  %v2598_v22 = vpop.f32.mrf.mxu3 }
 0x438   : > { %3524 = vst [vmem:[%s4937_s23 + $0x360] sm:$0xff] %v3268_v19  ;;  %v2599_v23 = vadd.f32 %v2598_v22, %v4929_v2  ;;  %v1631_v24 = vpop.f32.mrf.mxu0 }
 0x439   : > { %v3120_v25 = vmax.f32 %v1950_v21, 0.0  ;;  %v1632_v26 = vadd.f32 %v1631_v24, %v4927_v1  ;;  %v2280_v27 = vpop.f32.mrf.mxu1 }
 0x43a   : > { %v3121_v28 = vmax.f32 %v2599_v23, 0.0  ;;  %v2281_v29 = vadd.f32 %v2280_v27, %v4929_v2 }
 0x43b   : > { %v2866_v30 = vmax.f32 %v1632_v26, 0.0 }
 0x43c   : > { %v3396_v31 = vpack.c.bf16 %v3121_v28, %v3120_v25  ;;  %v2867_v32 = vmax.f32 %v2281_v29, 0.0 }
 0x43e   : > { %3652 = vst [vmem:[%s4937_s23 + $0x760] sm:$0xff] %v3396_v31  ;;  %v3269_v33 = vpack.c.bf16 %v2867_v32, %v2866_v30  ;;  %v1951_v34 = vpop.f32.mrf.mxu2 }
 0x43f   : > { %v1952_v35 = vadd.f32 %v1951_v34, %v4927_v1  ;;  %v2600_v36 = vpop.f32.mrf.mxu3 }
 0x440   : > { %3525 = vst [vmem:[%s4937_s23 + $0x368] sm:$0xff] %v3269_v33  ;;  %v2601_v39 = vadd.f32 %v2600_v36, %v4929_v2  ;;  %v1634_v40 = vpop.f32.mrf.mxu0 }
 0x441   : > { %v3122_v41 = vmax.f32 %v1952_v35, 0.0  ;;  %v1635_v42 = vadd.f32 %v1634_v40, %v4927_v1  ;;  %v2283_v43 = vpop.f32.mrf.mxu1 }
 0x442   : > { %v3123_v44 = vmax.f32 %v2601_v39, 0.0  ;;  %v2284_v45 = vadd.f32 %v2283_v43, %v4929_v2 }
 0x443   : > { %v2868_v46 = vmax.f32 %v1635_v42, 0.0  ;;  %1673 = vmatmul.bf16.gmra.mxu0 %v4440_v37  ;;  %1993 = vmatmul.bf16.gmra.mxu2 %v4504_v38 }
 0x444   : > { %v3397_v47 = vpack.c.bf16 %v3123_v44, %v3122_v41  ;;  %v2869_v48 = vmax.f32 %v2284_v45, 0.0  ;;  %2322 = vmatmul.bf16.gmra.mxu1 %v4440_v37  ;;  %2642 = vmatmul.bf16.gmra.mxu3 %v4504_v38 }
 0x446   : > { %3653 = vst [vmem:[%s4937_s23 + $0x768] sm:$0xff] %v3397_v47  ;;  %v3270_v49 = vpack.c.bf16 %v2869_v48, %v2868_v46  ;;  %v1954_v50 = vpop.f32.mrf.mxu2 }
 0x447   : > { %v1955_v51 = vadd.f32 %v1954_v50, %v4927_v1  ;;  %v2603_v52 = vpop.f32.mrf.mxu3 }
 0x448   : > { %3526 = vst [vmem:[%s4937_s23 + $0x370] sm:$0xff] %v3270_v49  ;;  %v2604_v53 = vadd.f32 %v2603_v52, %v4929_v2  ;;  %v1636_v54 = vpop.f32.mrf.mxu0 }
 0x449   : > { %v3124_v55 = vmax.f32 %v1955_v51, 0.0  ;;  %v1637_v56 = vadd.f32 %v1636_v54, %v4927_v1  ;;  %v2285_v57 = vpop.f32.mrf.mxu1 }
 0x44a   : > { %v3125_v58 = vmax.f32 %v2604_v53, 0.0  ;;  %v2286_v59 = vadd.f32 %v2285_v57, %v4929_v2 }
 0x44b   : > { %v2870_v60 = vmax.f32 %v1637_v56, 0.0 }
 0x44c   : > { %v3398_v61 = vpack.c.bf16 %v3125_v58, %v3124_v55  ;;  %v2871_v62 = vmax.f32 %v2286_v59, 0.0 }
 0x44e   : > { %3654 = vst [vmem:[%s4937_s23 + $0x770] sm:$0xff] %v3398_v61  ;;  %v3271_v63 = vpack.c.bf16 %v2871_v62, %v2870_v60  ;;  %v1956_v0 = vpop.f32.mrf.mxu2 }
 0x44f   : > { %v1957_v3 = vadd.f32 %v1956_v0, %v4927_v1  ;;  %v2605_v4 = vpop.f32.mrf.mxu3 }
 0x450   : > { %3527 = vst [vmem:[%s4937_s23 + $0x378] sm:$0xff] %v3271_v63  ;;  %v2606_v5 = vadd.f32 %v2605_v4, %v4929_v2  ;;  %v1639_v6 = vpop.f32.mrf.mxu0 }
 0x451   : > { %v3126_v7 = vmax.f32 %v1957_v3, 0.0  ;;  %v1640_v8 = vadd.f32 %v1639_v6, %v4927_v1  ;;  %v2288_v9 = vpop.f32.mrf.mxu1 }
 0x452   : > { %v3127_v10 = vmax.f32 %v2606_v5, 0.0  ;;  %v2289_v11 = vadd.f32 %v2288_v9, %v4929_v2 }
 0x453   : > { %v2872_v12 = vmax.f32 %v1640_v8, 0.0 }
 0x454   : > { %v3399_v13 = vpack.c.bf16 %v3127_v10, %v3126_v7  ;;  %v2873_v14 = vmax.f32 %v2289_v11, 0.0 }
 0x456   : > { %3655 = vst [vmem:[%s4937_s23 + $0x778] sm:$0xff] %v3399_v13  ;;  %v3272_v15 = vpack.c.bf16 %v2873_v14, %v2872_v12  ;;  %v1959_v16 = vpop.f32.mrf.mxu2 }
 0x457   : > { %v1960_v17 = vadd.f32 %v1959_v16, %v4927_v1  ;;  %v2608_v18 = vpop.f32.mrf.mxu3 }
 0x458   : > { %3528 = vst [vmem:[%s4937_s23 + $0x380] sm:$0xff] %v3272_v15  ;;  %v2609_v19 = vadd.f32 %v2608_v18, %v4929_v2  ;;  %v1641_v20 = vpop.f32.mrf.mxu0 }
 0x459   : > { %v3128_v21 = vmax.f32 %v1960_v17, 0.0  ;;  %v1642_v22 = vadd.f32 %v1641_v20, %v4927_v1  ;;  %v2290_v23 = vpop.f32.mrf.mxu1 }
 0x45a   : > { %v3129_v24 = vmax.f32 %v2609_v19, 0.0  ;;  %v2291_v25 = vadd.f32 %v2290_v23, %v4929_v2 }
 0x45b   : > { %v2874_v26 = vmax.f32 %v1642_v22, 0.0 }
 0x45c   : > { %v3400_v27 = vpack.c.bf16 %v3129_v24, %v3128_v21  ;;  %v2875_v28 = vmax.f32 %v2291_v25, 0.0 }
 0x45e   : > { %3656 = vst [vmem:[%s4937_s23 + $0x780] sm:$0xff] %v3400_v27  ;;  %v3273_v29 = vpack.c.bf16 %v2875_v28, %v2874_v26  ;;  %v1961_v30 = vpop.f32.mrf.mxu2 }
 0x45f   : > { %v1962_v31 = vadd.f32 %v1961_v30, %v4927_v1  ;;  %v2610_v32 = vpop.f32.mrf.mxu3 }
 0x460   : > { %3529 = vst [vmem:[%s4937_s23 + $0x388] sm:$0xff] %v3273_v29  ;;  %v2611_v33 = vadd.f32 %v2610_v32, %v4929_v2  ;;  %v1644_v34 = vpop.f32.mrf.mxu0 }
 0x461   : > { %v3130_v35 = vmax.f32 %v1962_v31, 0.0  ;;  %v1645_v36 = vadd.f32 %v1644_v34, %v4927_v1  ;;  %v2293_v37 = vpop.f32.mrf.mxu1 }
 0x462   : > { %v3131_v38 = vmax.f32 %v2611_v33, 0.0  ;;  %v2294_v39 = vadd.f32 %v2293_v37, %v4929_v2 }
 0x463   : > { %v2876_v40 = vmax.f32 %v1645_v36, 0.0 }
 0x464   : > { %v3401_v41 = vpack.c.bf16 %v3131_v38, %v3130_v35  ;;  %v2877_v42 = vmax.f32 %v2294_v39, 0.0 }
 0x466   : > { %3657 = vst [vmem:[%s4937_s23 + $0x788] sm:$0xff] %v3401_v41  ;;  %v3274_v43 = vpack.c.bf16 %v2877_v42, %v2876_v40  ;;  %v1964_v44 = vpop.f32.mrf.mxu2 }
 0x467   : > { %v1965_v45 = vadd.f32 %v1964_v44, %v4927_v1  ;;  %v2613_v46 = vpop.f32.mrf.mxu3 }
 0x468   : > { %3530 = vst [vmem:[%s4937_s23 + $0x390] sm:$0xff] %v3274_v43  ;;  %v2614_v47 = vadd.f32 %v2613_v46, %v4929_v2  ;;  %v1646_v48 = vpop.f32.mrf.mxu0 }
 0x469   : > { %v3132_v49 = vmax.f32 %v1965_v45, 0.0  ;;  %v1647_v50 = vadd.f32 %v1646_v48, %v4927_v1  ;;  %v2295_v51 = vpop.f32.mrf.mxu1 }
 0x46a   : > { %v3133_v52 = vmax.f32 %v2614_v47, 0.0  ;;  %v2296_v53 = vadd.f32 %v2295_v51, %v4929_v2 }
 0x46b   : > { %v2878_v54 = vmax.f32 %v1647_v50, 0.0 }
 0x46c   : > { %v3402_v55 = vpack.c.bf16 %v3133_v52, %v3132_v49  ;;  %v2879_v56 = vmax.f32 %v2296_v53, 0.0 }
 0x46e   : > { %3658 = vst [vmem:[%s4937_s23 + $0x790] sm:$0xff] %v3402_v55  ;;  %v3275_v57 = vpack.c.bf16 %v2879_v56, %v2878_v54  ;;  %v1966_v58 = vpop.f32.mrf.mxu2 }
 0x46f   : > { %v1967_v59 = vadd.f32 %v1966_v58, %v4927_v1  ;;  %v2615_v60 = vpop.f32.mrf.mxu3 }
 0x470   : > { %3531 = vst [vmem:[%s4937_s23 + $0x398] sm:$0xff] %v3275_v57  ;;  %v2616_v61 = vadd.f32 %v2615_v60, %v4929_v2  ;;  %v1649_v62 = vpop.f32.mrf.mxu0 }
 0x471   : > { %v3134_v63 = vmax.f32 %v1967_v59, 0.0  ;;  %v1650_v0 = vadd.f32 %v1649_v62, %v4927_v1  ;;  %v2298_v3 = vpop.f32.mrf.mxu1 }
 0x472   : > { %v3135_v4 = vmax.f32 %v2616_v61, 0.0  ;;  %v2299_v5 = vadd.f32 %v2298_v3, %v4929_v2 }
 0x473   : > { %v2880_v6 = vmax.f32 %v1650_v0, 0.0 }
 0x474   : > { %v3403_v7 = vpack.c.bf16 %v3135_v4, %v3134_v63  ;;  %v2881_v8 = vmax.f32 %v2299_v5, 0.0 }
 0x476   : > { %3659 = vst [vmem:[%s4937_s23 + $0x798] sm:$0xff] %v3403_v7  ;;  %v3276_v9 = vpack.c.bf16 %v2881_v8, %v2880_v6  ;;  %v1969_v10 = vpop.f32.mrf.mxu2 }
 0x477   : > { %v1970_v11 = vadd.f32 %v1969_v10, %v4927_v1  ;;  %v2618_v12 = vpop.f32.mrf.mxu3 }
 0x478   : > { %3532 = vst [vmem:[%s4937_s23 + $0x3a0] sm:$0xff] %v3276_v9  ;;  %v2619_v13 = vadd.f32 %v2618_v12, %v4929_v2  ;;  %v1651_v14 = vpop.f32.mrf.mxu0 }
 0x479   : > { %v3136_v15 = vmax.f32 %v1970_v11, 0.0  ;;  %v1652_v16 = vadd.f32 %v1651_v14, %v4927_v1  ;;  %v2300_v17 = vpop.f32.mrf.mxu1 }
 0x47a   : > { %v3137_v18 = vmax.f32 %v2619_v13, 0.0  ;;  %v2301_v19 = vadd.f32 %v2300_v17, %v4929_v2 }
 0x47b   : > { %v2882_v20 = vmax.f32 %v1652_v16, 0.0 }
 0x47c   : > { %v3404_v21 = vpack.c.bf16 %v3137_v18, %v3136_v15  ;;  %v2883_v22 = vmax.f32 %v2301_v19, 0.0 }
 0x47e   : > { %3660 = vst [vmem:[%s4937_s23 + $0x7a0] sm:$0xff] %v3404_v21  ;;  %v3277_v23 = vpack.c.bf16 %v2883_v22, %v2882_v20  ;;  %v1971_v24 = vpop.f32.mrf.mxu2 }
 0x47f   : > { %v1972_v25 = vadd.f32 %v1971_v24, %v4927_v1  ;;  %v2620_v26 = vpop.f32.mrf.mxu3 }
 0x480   : > { %3533 = vst [vmem:[%s4937_s23 + $0x3a8] sm:$0xff] %v3277_v23  ;;  %v2621_v27 = vadd.f32 %v2620_v26, %v4929_v2  ;;  %v1654_v28 = vpop.f32.mrf.mxu0 }
 0x481   : > { %v3138_v29 = vmax.f32 %v1972_v25, 0.0  ;;  %v1655_v30 = vadd.f32 %v1654_v28, %v4927_v1  ;;  %v2303_v31 = vpop.f32.mrf.mxu1 }
 0x482   : > { %v3139_v32 = vmax.f32 %v2621_v27, 0.0  ;;  %v2304_v33 = vadd.f32 %v2303_v31, %v4929_v2 }
 0x483   : > { %v2884_v34 = vmax.f32 %v1655_v30, 0.0 }
 0x484   : > { %v3405_v35 = vpack.c.bf16 %v3139_v32, %v3138_v29  ;;  %v2885_v36 = vmax.f32 %v2304_v33, 0.0 }
 0x486   : > { %3661 = vst [vmem:[%s4937_s23 + $0x7a8] sm:$0xff] %v3405_v35  ;;  %v3278_v37 = vpack.c.bf16 %v2885_v36, %v2884_v34  ;;  %v1974_v38 = vpop.f32.mrf.mxu2 }
 0x487   : > { %v1975_v39 = vadd.f32 %v1974_v38, %v4927_v1  ;;  %v2623_v40 = vpop.f32.mrf.mxu3 }
 0x488   : > { %3534 = vst [vmem:[%s4937_s23 + $0x3b0] sm:$0xff] %v3278_v37  ;;  %v2624_v41 = vadd.f32 %v2623_v40, %v4929_v2  ;;  %v1656_v42 = vpop.f32.mrf.mxu0 }
 0x489   : > { %v3140_v43 = vmax.f32 %v1975_v39, 0.0  ;;  %v1657_v44 = vadd.f32 %v1656_v42, %v4927_v1  ;;  %v2305_v45 = vpop.f32.mrf.mxu1 }
 0x48a   : > { %v3141_v46 = vmax.f32 %v2624_v41, 0.0  ;;  %v2306_v47 = vadd.f32 %v2305_v45, %v4929_v2 }
 0x48b   : > { %v2886_v48 = vmax.f32 %v1657_v44, 0.0 }
 0x48c   : > { %v3406_v49 = vpack.c.bf16 %v3141_v46, %v3140_v43  ;;  %v2887_v50 = vmax.f32 %v2306_v47, 0.0 }
 0x48e   : > { %3662 = vst [vmem:[%s4937_s23 + $0x7b0] sm:$0xff] %v3406_v49  ;;  %v3279_v51 = vpack.c.bf16 %v2887_v50, %v2886_v48  ;;  %v1976_v52 = vpop.f32.mrf.mxu2 }
 0x48f   : > { %v1977_v53 = vadd.f32 %v1976_v52, %v4927_v1  ;;  %v2625_v54 = vpop.f32.mrf.mxu3 }
 0x490   : > { %3535 = vst [vmem:[%s4937_s23 + $0x3b8] sm:$0xff] %v3279_v51  ;;  %v2626_v55 = vadd.f32 %v2625_v54, %v4929_v2  ;;  %v1659_v56 = vpop.f32.mrf.mxu0 }
 0x491   : > { %v3142_v57 = vmax.f32 %v1977_v53, 0.0  ;;  %v1660_v58 = vadd.f32 %v1659_v56, %v4927_v1  ;;  %v2308_v59 = vpop.f32.mrf.mxu1 }
 0x492   : > { %v3143_v60 = vmax.f32 %v2626_v55, 0.0  ;;  %v2309_v61 = vadd.f32 %v2308_v59, %v4929_v2 }
 0x493   : > { %v2888_v62 = vmax.f32 %v1660_v58, 0.0 }
 0x494   : > { %v3407_v63 = vpack.c.bf16 %v3143_v60, %v3142_v57  ;;  %v2889_v0 = vmax.f32 %v2309_v61, 0.0 }
 0x496   : > { %3663 = vst [vmem:[%s4937_s23 + $0x7b8] sm:$0xff] %v3407_v63  ;;  %v3280_v3 = vpack.c.bf16 %v2889_v0, %v2888_v62  ;;  %v1979_v4 = vpop.f32.mrf.mxu2 }
 0x497   : > { %v1980_v5 = vadd.f32 %v1979_v4, %v4927_v1  ;;  %v2628_v6 = vpop.f32.mrf.mxu3 }
 0x498   : > { %3536 = vst [vmem:[%s4937_s23 + $0x3c0] sm:$0xff] %v3280_v3  ;;  %v2629_v7 = vadd.f32 %v2628_v6, %v4929_v2  ;;  %v1661_v8 = vpop.f32.mrf.mxu0 }
 0x499   : > { %v3144_v9 = vmax.f32 %v1980_v5, 0.0  ;;  %v1662_v10 = vadd.f32 %v1661_v8, %v4927_v1  ;;  %v2310_v11 = vpop.f32.mrf.mxu1 }
 0x49a   : > { %v3145_v12 = vmax.f32 %v2629_v7, 0.0  ;;  %v2311_v13 = vadd.f32 %v2310_v11, %v4929_v2 }
 0x49b   : > { %v2890_v14 = vmax.f32 %v1662_v10, 0.0 }
 0x49c   : > { %v3408_v15 = vpack.c.bf16 %v3145_v12, %v3144_v9  ;;  %v2891_v16 = vmax.f32 %v2311_v13, 0.0 }
 0x49e   : > { %3664 = vst [vmem:[%s4937_s23 + $0x7c0] sm:$0xff] %v3408_v15  ;;  %v3281_v17 = vpack.c.bf16 %v2891_v16, %v2890_v14  ;;  %v1981_v18 = vpop.f32.mrf.mxu2 }
 0x49f   : > { %v1982_v19 = vadd.f32 %v1981_v18, %v4927_v1  ;;  %v2630_v20 = vpop.f32.mrf.mxu3 }
 0x4a0   : > { %3537 = vst [vmem:[%s4937_s23 + $0x3c8] sm:$0xff] %v3281_v17  ;;  %v2631_v21 = vadd.f32 %v2630_v20, %v4929_v2  ;;  %v1664_v22 = vpop.f32.mrf.mxu0 }
 0x4a1   : > { %v3146_v23 = vmax.f32 %v1982_v19, 0.0  ;;  %v1665_v24 = vadd.f32 %v1664_v22, %v4927_v1  ;;  %v2313_v25 = vpop.f32.mrf.mxu1 }
 0x4a2   : > { %v3147_v26 = vmax.f32 %v2631_v21, 0.0  ;;  %v2314_v27 = vadd.f32 %v2313_v25, %v4929_v2 }
 0x4a3   : > { %v2892_v28 = vmax.f32 %v1665_v24, 0.0 }
 0x4a4   : > { %v3409_v29 = vpack.c.bf16 %v3147_v26, %v3146_v23  ;;  %v2893_v30 = vmax.f32 %v2314_v27, 0.0 }
 0x4a6   : > { %3665 = vst [vmem:[%s4937_s23 + $0x7c8] sm:$0xff] %v3409_v29  ;;  %v3282_v31 = vpack.c.bf16 %v2893_v30, %v2892_v28  ;;  %v1984_v32 = vpop.f32.mrf.mxu2 }
 0x4a7   : > { %v1985_v33 = vadd.f32 %v1984_v32, %v4927_v1  ;;  %v2633_v34 = vpop.f32.mrf.mxu3 }
 0x4a8   : > { %3538 = vst [vmem:[%s4937_s23 + $0x3d0] sm:$0xff] %v3282_v31  ;;  %v2634_v35 = vadd.f32 %v2633_v34, %v4929_v2  ;;  %v1666_v36 = vpop.f32.mrf.mxu0 }
 0x4a9   : > { %v3148_v37 = vmax.f32 %v1985_v33, 0.0  ;;  %v1667_v38 = vadd.f32 %v1666_v36, %v4927_v1  ;;  %v2315_v39 = vpop.f32.mrf.mxu1 }
 0x4aa   : > { %v3149_v40 = vmax.f32 %v2634_v35, 0.0  ;;  %v2316_v41 = vadd.f32 %v2315_v39, %v4929_v2 }
 0x4ab   : > { %v2894_v42 = vmax.f32 %v1667_v38, 0.0 }
 0x4ac   : > { %v3410_v43 = vpack.c.bf16 %v3149_v40, %v3148_v37  ;;  %v2895_v44 = vmax.f32 %v2316_v41, 0.0 }
 0x4ae   : > { %3666 = vst [vmem:[%s4937_s23 + $0x7d0] sm:$0xff] %v3410_v43  ;;  %v3283_v45 = vpack.c.bf16 %v2895_v44, %v2894_v42  ;;  %v1986_v46 = vpop.f32.mrf.mxu2 }
 0x4af   : > { %v1987_v47 = vadd.f32 %v1986_v46, %v4927_v1  ;;  %v2635_v48 = vpop.f32.mrf.mxu3 }
 0x4b0   : > { %3539 = vst [vmem:[%s4937_s23 + $0x3d8] sm:$0xff] %v3283_v45  ;;  %v2636_v49 = vadd.f32 %v2635_v48, %v4929_v2  ;;  %v1669_v50 = vpop.f32.mrf.mxu0 }
 0x4b1   : > { %v3150_v51 = vmax.f32 %v1987_v47, 0.0  ;;  %v1670_v52 = vadd.f32 %v1669_v50, %v4927_v1  ;;  %v2318_v53 = vpop.f32.mrf.mxu1 }
 0x4b2   : > { %v3151_v54 = vmax.f32 %v2636_v49, 0.0  ;;  %v2319_v55 = vadd.f32 %v2318_v53, %v4929_v2 }
 0x4b3   : > { %v2896_v56 = vmax.f32 %v1670_v52, 0.0 }
 0x4b4   : > { %v3411_v57 = vpack.c.bf16 %v3151_v54, %v3150_v51  ;;  %v2897_v58 = vmax.f32 %v2319_v55, 0.0 }
 0x4b6   : > { %3667 = vst [vmem:[%s4937_s23 + $0x7d8] sm:$0xff] %v3411_v57  ;;  %v3284_v59 = vpack.c.bf16 %v2897_v58, %v2896_v56  ;;  %v1989_v60 = vpop.f32.mrf.mxu2 }
 0x4b7   : > { %v1990_v61 = vadd.f32 %v1989_v60, %v4927_v1  ;;  %v2638_v62 = vpop.f32.mrf.mxu3 }
 0x4b8   : > { %3540 = vst [vmem:[%s4937_s23 + $0x3e0] sm:$0xff] %v3284_v59  ;;  %v2639_v63 = vadd.f32 %v2638_v62, %v4929_v2  ;;  %v1671_v0 = vpop.f32.mrf.mxu0 }
 0x4b9   : > { %v3152_v3 = vmax.f32 %v1990_v61, 0.0  ;;  %v1672_v4 = vadd.f32 %v1671_v0, %v4927_v1  ;;  %v2320_v5 = vpop.f32.mrf.mxu1 }
 0x4ba   : > { %v3153_v6 = vmax.f32 %v2639_v63, 0.0  ;;  %v2321_v7 = vadd.f32 %v2320_v5, %v4929_v2 }
 0x4bb   : > { %v2898_v8 = vmax.f32 %v1672_v4, 0.0 }
 0x4bc   : > { %v3412_v9 = vpack.c.bf16 %v3153_v6, %v3152_v3  ;;  %v2899_v10 = vmax.f32 %v2321_v7, 0.0 }
 0x4be   : > { %3668 = vst [vmem:[%s4937_s23 + $0x7e0] sm:$0xff] %v3412_v9  ;;  %v3285_v11 = vpack.c.bf16 %v2899_v10, %v2898_v8  ;;  %v1991_v12 = vpop.f32.mrf.mxu2 }
 0x4bf   : > { %v1992_v13 = vadd.f32 %v1991_v12, %v4927_v1  ;;  %v2640_v14 = vpop.f32.mrf.mxu3 }
 0x4c0   : > { %3541 = vst [vmem:[%s4937_s23 + $0x3e8] sm:$0xff] %v3285_v11  ;;  %v2641_v15 = vadd.f32 %v2640_v14, %v4929_v2  ;;  %v1674_v16 = vpop.f32.mrf.mxu0 }
 0x4c1   : > { %v3154_v17 = vmax.f32 %v1992_v13, 0.0  ;;  %v1675_v18 = vadd.f32 %v1674_v16, %v4927_v1  ;;  %v2323_v19 = vpop.f32.mrf.mxu1 }
 0x4c2   : > { %v3155_v20 = vmax.f32 %v2641_v15, 0.0  ;;  %v2324_v21 = vadd.f32 %v2323_v19, %v4929_v2 }
 0x4c3   : > { %v2900_v22 = vmax.f32 %v1675_v18, 0.0 }
 0x4c4   : > { %v3413_v23 = vpack.c.bf16 %v3155_v20, %v3154_v17  ;;  %v2901_v24 = vmax.f32 %v2324_v21, 0.0 }
 0x4c6   : > { %3669 = vst [vmem:[%s4937_s23 + $0x7e8] sm:$0xff] %v3413_v23  ;;  %v3286_v25 = vpack.c.bf16 %v2901_v24, %v2900_v22  ;;  %v1994_v26 = vpop.f32.mrf.mxu2 }
 0x4c7   : > { %v1995_v27 = vadd.f32 %v1994_v26, %v4927_v1  ;;  %v2643_v28 = vpop.f32.mrf.mxu3 }
 0x4c8   : > { %3542 = vst [vmem:[%s4937_s23 + $0x3f0] sm:$0xff] %v3286_v25  ;;  %v2644_v29 = vadd.f32 %v2643_v28, %v4929_v2  ;;  %v1676_v30 = vpop.f32.mrf.mxu0 }
 0x4c9   : > { %v3156_v31 = vmax.f32 %v1995_v27, 0.0  ;;  %v1677_v32 = vadd.f32 %v1676_v30, %v4927_v1  ;;  %v2325_v33 = vpop.f32.mrf.mxu1 }
 0x4ca   : > { %v3157_v34 = vmax.f32 %v2644_v29, 0.0  ;;  %v2326_v35 = vadd.f32 %v2325_v33, %v4929_v2 }
 0x4cb   : > { %v2902_v36 = vmax.f32 %v1677_v32, 0.0 }
 0x4cc   : > { %v3414_v37 = vpack.c.bf16 %v3157_v34, %v3156_v31  ;;  %v2903_v38 = vmax.f32 %v2326_v35, 0.0 }
 0x4ce   : > { %3670 = vst [vmem:[%s4937_s23 + $0x7f0] sm:$0xff] %v3414_v37  ;;  %v3287_v39 = vpack.c.bf16 %v2903_v38, %v2902_v36  ;;  %v1996_v40 = vpop.f32.mrf.mxu2 }
 0x4cf   : > { %v1997_v41 = vadd.f32 %v1996_v40, %v4927_v1  ;;  %v2645_v42 = vpop.f32.mrf.mxu3 }
 0x4d0   : > { %3543 = vst [vmem:[%s4937_s23 + $0x3f8] sm:$0xff] %v3287_v39  ;;  %v2646_v43 = vadd.f32 %v2645_v42, %v4929_v2 }
 0x4d1   : > { %v3158_v44 = vmax.f32 %v1997_v41, 0.0 }
 0x4d2   : > { %v3159_v45 = vmax.f32 %v2646_v43, 0.0 }
 0x4d4   : > { %v3415_v46 = vpack.c.bf16 %v3159_v45, %v3158_v44 }
 0x4d6   : > { %3671 = vst [vmem:[%s4937_s23 + $0x7f8] sm:$0xff] %v3415_v46 }
 0x4d7   : > { %4729 = shalt.err (!%p4726_p10)
}
 0x4d8   : > { %s4780_s22 = smov 128   ;;  %s4781_s25 = smov 8  }
 0x4d9   : > { %4549 = dma.vmem_to_hbm [thread:$0]  (%p4867_p0), %s3687_s16, 32768, %s3689_s4, %s3673_s5, %s4780_s22, %s4780_s22, %s4781_s25  }
 0x4da PF: > { %p4571_p11 = scmp.ge.s32.totalorder %s4772_s15, 2  ;;  %s3703_s30 = sand.u32 1, %s4760_s12  }
 0x4db   : > { %s3704_s18 = scalar_lea.sflag [#allocation4], %s3703_s30 }
 0x4dc   : > { %p4563_p12 = pnand %p4571_p11, %p4837_p6 }
 0x4de   : > { %p4564_p13 = pneg %p4563_p12 }
 0x4e0   : > { %4755 = dma.done.wait (%p4564_p13), %s3704_s18, 32768  }
 0x4e1   : > { %4757 = vsyncadd (%p4564_p13), %s3704_s18, 4294934528  ;;  %p17_p3 = scmp.ge.s32.totalorder %s4857_s6, 6   ;;  %s5856_s12 = smov %s4764_s13 }
 0x4e2   : > { %s5857_s13 = smov %s4768_s14  ;;  %s5858_s14 = smov %s4873_s10 }
 0x4e3   : > { %s5859_s15 = smov %s4857_s6  ;;  %19 = sbr.rel (!%p17_p3) target bundleno = 6 (0x6), region = 85 }
 0x4e8   :  { %3710 = vsyncpa [#allocation3], 1 }
 0x4e9   :  { %3712 = vsyncpa [#allocation3 + $0x1], 1 }
 0x4ea   :  { %3713 = vsyncpa [#allocation6], 1 }
 0x4eb   :  { %3714 = vsyncpa [#allocation4], 1 }
 0x4ec   :  { %3716 = vsyncpa [#allocation4 + $0x1], 1 }

</bundles_post_ra>
